<compile_context>
chip_gen: v5e
topology: v5e:2x2
jax: 0.10.0
libtpu: 0.0.40
codegen_flags: <defaults>
</compile_context>

<pallas_src>
import functools

import jax
import jax.numpy as jnp
from jax.experimental import pallas as pl
from jax.experimental.pallas import tpu as pltpu

BN_EPS = 1e-5
CPAD = 128                      # lane-dense channel padding (unmasked vst)
VMEM_LIMIT = 32 * 1024 * 1024   # explicit scoped-VMEM limit, safe on v5e/v6e/v7x


def _full_spec(shape):
    return pl.BlockSpec(shape, lambda: (0,) * len(shape))


# ----------------------------------------------------------------------------
# Pallas kernels
# ----------------------------------------------------------------------------
def conv_bn_relu_pool_kernel(p_ref, w_ref, gamma_ref, beta_ref, o_ref, *, r):
    """Fused Conv2d (im2col matmul) + train-mode BN + ReLU + 2x2 MaxPool.

      p_ref     : (4*r, K)  bf16 patches, quadrant-major row order
      w_ref     : (K, 128)  bf16 conv weight, Cout zero-padded to 128 lanes
      gamma/beta: (1, 128)  f32 BN affine params (zero-padded lanes)
      o_ref     : (r, 128)  bf16 pooled activations, rows = (n, oh/2, ow/2)

    Exact two-pass batch statistics (mean then centered variance) — avoids the
    E[z^2]-mean^2 cancellation of the previous single-pass version.  The pool
    is an elementwise max of the four quadrant slabs; slab boundaries are
    multiples of r (a multiple of 8), so all slices are free sub-views.
    """
    z = jnp.dot(p_ref[...], w_ref[...], preferred_element_type=jnp.float32)  # (4r,128)
    mean = jnp.mean(z, axis=0, keepdims=True)                                # (1,128)
    var = jnp.mean((z - mean) ** 2, axis=0, keepdims=True)                   # biased var
    scale = gamma_ref[...] * jax.lax.rsqrt(var + BN_EPS)
    shift = beta_ref[...] - mean * scale
    y = jnp.maximum(z * scale + shift, 0.0)                                  # BN + ReLU
    m = jnp.maximum(jnp.maximum(y[0:r, :], y[r:2 * r, :]),
                    jnp.maximum(y[2 * r:3 * r, :], y[3 * r:4 * r, :]))
    o_ref[...] = m.astype(o_ref.dtype)


def head_kernel(h_ref, w1_ref, b1_ref, w2_ref, b2_ref, wd_ref, bd_ref, eps_ref,
                mu_ref, sigma_ref, logit_ref):
    """fc11|fc21 fused into one 1024x512 matmul, fc12|fc22 fused into one
    block-diagonal 512x256 matmul -> exp(0.5*) -> reparameterized sample
    -> d_likelihood.  Narrow outputs padded to 128 lanes."""
    t = jnp.dot(h_ref[...], w1_ref[...],
                preferred_element_type=jnp.float32) + b1_ref[...]            # (N,512)
    # ReLU only on the fc11 half (cols [0,256)); fc21 half stays linear.
    col = jax.lax.broadcasted_iota(jnp.int32, t.shape, 1)
    ab = jnp.where(col < 256, jnp.maximum(t, 0.0), t)
    u = jnp.dot(ab.astype(jnp.bfloat16), w2_ref[...],
                preferred_element_type=jnp.float32) + b2_ref[...]            # (N,256)
    mu = u[:, :CPAD]                      # fc12(relu(fc11(h)))
    c = jnp.maximum(u[:, CPAD:], 0.0)     # fc22 = Linear + ReLU
    sigma = jnp.exp(0.5 * c)
    zd_q = mu + sigma * eps_ref[...]      # Normal(mu, sigma).rsample()
    logit = jnp.dot(zd_q.astype(jnp.bfloat16), wd_ref[...],
                    preferred_element_type=jnp.float32) + bd_ref[...]
    mu_ref[...] = mu
    sigma_ref[...] = sigma
    logit_ref[...] = logit


# ----------------------------------------------------------------------------
# Wrappers
# ----------------------------------------------------------------------------
def conv_bn_relu_pool(patches, w_pad, gamma_pad, beta_pad):
    """patches: (4*R, K) bf16, quadrant-major rows.
    Returns pooled activations (R, 128) bf16, rows in (n, oh/2, ow/2) order."""
    m4 = patches.shape[0]
    r = m4 // 4
    return pl.pallas_call(
        functools.partial(conv_bn_relu_pool_kernel, r=r),
        out_shape=jax.ShapeDtypeStruct((r, CPAD), jnp.bfloat16),
        in_specs=[_full_spec(patches.shape), _full_spec(w_pad.shape),
                  _full_spec(gamma_pad.shape), _full_spec(beta_pad.shape)],
        out_specs=_full_spec((r, CPAD)),
        compiler_params=pltpu.CompilerParams(vmem_limit_bytes=VMEM_LIMIT),
    )(patches, w_pad, gamma_pad, beta_pad)


def head(h, w1, b1, w2, b2, wd, bd, eps):
    # TODO(synk): tile over N with a "parallel" grid axis if batch grows.
    n = h.shape[0]
    args = (h, w1, b1, w2, b2, wd, bd, eps)
    return pl.pallas_call(
        head_kernel,
        out_shape=(jax.ShapeDtypeStruct((n, CPAD), jnp.float32),) * 3,
        in_specs=[_full_spec(a.shape) for a in args],
        out_specs=(_full_spec((n, CPAD)),) * 3,
        compiler_params=pltpu.CompilerParams(vmem_limit_bytes=VMEM_LIMIT),
    )(*args)


# ----------------------------------------------------------------------------
# Glue (im2col / padding / params)
# ----------------------------------------------------------------------------
def im2col_pool_quadrant(x, k):
    """x: (N, H, W, Cin) -> (4*N*(OH/2)*(OW/2), Cin*k*k).

    Rows grouped by pool quadrant (dy, dx) outermost; within each quadrant the
    rows are ordered (n, oh/2, ow/2).  The fused kernel's max over the four
    contiguous slabs then implements MaxPool2d(2,2) and its output rows are
    already the pooled NHWC order.  Feature order is ci*k*k + kh*k + kw.
    """
    n, h, w, cin = x.shape
    oh, ow = h - k + 1, w - k + 1
    cols = []
    for kh in range(k):
        for kw in range(k):
            cols.append(x[:, kh:kh + oh, kw:kw + ow, :])     # (N, OH, OW, Cin)
    p = jnp.stack(cols, axis=-1)                             # (N, OH, OW, Cin, k*k)
    p = p.reshape(n, oh, ow, cin * k * k)
    p = p.reshape(n, oh // 2, 2, ow // 2, 2, cin * k * k)    # split pool windows
    p = jnp.transpose(p, (2, 4, 0, 1, 3, 5))                 # (dy, dx, n, oh2, ow2, K)
    return p.reshape(4 * n * (oh // 2) * (ow // 2), cin * k * k), (oh, ow)


def _pad_lanes(a, width=CPAD):
    return jnp.pad(a, ((0, 0), (0, width - a.shape[-1])))


def _pad_rows(a, target):
    return jnp.pad(a, ((0, target - a.shape[0]), (0, 0)))


def xavier_uniform(key, shape, fan_in, fan_out):
    bound = (6.0 / (fan_in + fan_out)) ** 0.5
    return jax.random.uniform(key, shape, jnp.float32, -bound, bound)


def init_params(key, zd_dim, d_dim):
    ks = jax.random.split(key, 8)
    p = {}
    # conv weights stored reshaped to (Cin*K*K, Cout); xavier fans match conv
    p["w_conv1"] = xavier_uniform(ks[0], (25, 32), fan_in=1 * 25, fan_out=32 * 25)
    p["w_conv2"] = xavier_uniform(ks[1], (800, 64), fan_in=32 * 25, fan_out=64 * 25)
    p["gamma1"] = jnp.ones((1, 32), jnp.float32)
    p["beta1"] = jnp.zeros((1, 32), jnp.float32)
    p["gamma2"] = jnp.ones((1, 64), jnp.float32)
    p["beta2"] = jnp.zeros((1, 64), jnp.float32)
    # fc layers stored as (in, out); xavier bound symmetric in fan_in/out
    p["w11"] = xavier_uniform(ks[2], (1024, 256), 1024, 256)
    p["b11"] = jnp.zeros((1, 256), jnp.float32)
    p["w12"] = xavier_uniform(ks[3], (256, zd_dim), 256, zd_dim)
    p["b12"] = jnp.zeros((1, zd_dim), jnp.float32)
    p["w21"] = xavier_uniform(ks[4], (1024, 256), 1024, 256)
    p["b21"] = jnp.zeros((1, 256), jnp.float32)
    p["w22"] = xavier_uniform(ks[5], (256, zd_dim), 256, zd_dim)
    p["b22"] = jnp.zeros((1, zd_dim), jnp.float32)
    # d_likelihood: PyTorch default Linear init U(-1/sqrt(in), 1/sqrt(in))
    bd_bound = 1.0 / (zd_dim ** 0.5)
    p["wd"] = jax.random.uniform(ks[6], (zd_dim, d_dim), jnp.float32, -bd_bound, bd_bound)
    p["bd"] = jax.random.uniform(ks[7], (1, d_dim), jnp.float32, -bd_bound, bd_bound)
    return p


@jax.jit
def qzd_forward(params, x_nchw, eps):
    """x_nchw: (N, 1, 28, 28) f32.  Returns (zd_mu, zd_sigma, logit_d)."""
    n = x_nchw.shape[0]
    zd_dim = params["w12"].shape[1]
    d_dim = params["wd"].shape[1]

    # ---- lane-dense padding / bf16 MXU operand casts -----------------------
    w1c = _pad_lanes(_pad_rows(params["w_conv1"], 32)).astype(jnp.bfloat16)  # (32,128)
    w2c = _pad_lanes(params["w_conv2"]).astype(jnp.bfloat16)                 # (800,128)
    g1, bt1 = _pad_lanes(params["gamma1"]), _pad_lanes(params["beta1"])
    g2, bt2 = _pad_lanes(params["gamma2"]), _pad_lanes(params["beta2"])

    # fc11 | fc21 side by side -> one (1024, 512) matmul
    w1 = jnp.concatenate([params["w11"], params["w21"]], axis=1).astype(jnp.bfloat16)
    b1 = jnp.concatenate([params["b11"], params["b21"]], axis=1)             # (1,512)
    # fc12 / fc22 block-diagonally -> one (512, 256) matmul
    w12p = _pad_lanes(params["w12"])                                         # (256,128)
    w22p = _pad_lanes(params["w22"])                                         # (256,128)
    zblk = jnp.zeros((256, CPAD), jnp.float32)
    w2 = jnp.concatenate([jnp.concatenate([w12p, zblk], axis=1),
                          jnp.concatenate([zblk, w22p], axis=1)],
                         axis=0).astype(jnp.bfloat16)                        # (512,256)
    b2 = jnp.concatenate([_pad_lanes(params["b12"]),
                          _pad_lanes(params["b22"])], axis=1)                # (1,256)
    wd = jnp.pad(params["wd"],
                 ((0, CPAD - zd_dim), (0, CPAD - d_dim))).astype(jnp.bfloat16)
    bd = _pad_lanes(params["bd"])
    eps_p = _pad_lanes(eps)                                                  # (N,128)

    x = jnp.transpose(x_nchw, (0, 2, 3, 1))                                  # NCHW->NHWC

    # ---- conv block 1: Conv2d(1,32,5)+BN+ReLU+MaxPool(2,2), one kernel ----
    p1, (oh1, ow1) = im2col_pool_quadrant(x.astype(jnp.bfloat16), 5)         # (4*N*144,25)
    p1 = _pad_lanes(p1, 32)                                                  # K 25->32
    pool1 = conv_bn_relu_pool(p1, w1c, g1, bt1)                              # (N*144,128) bf16
    h1 = pool1.reshape(n, oh1 // 2, ow1 // 2, CPAD)[..., :32]                # (N,12,12,32)

    # ---- conv block 2: Conv2d(32,64,5)+BN+ReLU+MaxPool(2,2), one kernel ----
    # TODO(synk): fuse conv2's im2col into the kernel (25 shifted matmuls on a
    #             resident h1 tile) to avoid the 25x patch expansion at large batch.
    p2, (oh2, ow2) = im2col_pool_quadrant(h1, 5)                             # (4*N*16,800)
    pool2 = conv_bn_relu_pool(p2, w2c, g2, bt2)                              # (N*16,128) bf16
    h2 = pool2.reshape(n, oh2 // 2, ow2 // 2, CPAD)[..., :64]                # (N,4,4,64)

    # flatten exactly like PyTorch h.view(-1, 1024) on NCHW
    h = jnp.transpose(h2, (0, 3, 1, 2)).reshape(n, 1024)                     # bf16

    mu_p, sigma_p, logit_p = head(h, w1, b1, w2, b2, wd, bd, eps_p)
    return mu_p[:, :zd_dim], sigma_p[:, :zd_dim], logit_p[:, :d_dim]


if __name__ == "__main__":
    ZD_DIM, D_DIM = 32, 8
    N = 2

    key = jax.random.PRNGKey(0)
    k_param, k_x, k_eps = jax.random.split(key, 3)

    params = init_params(k_param, ZD_DIM, D_DIM)
    # input must be (N, 1, 28, 28) so the encoder output flattens to 1024
    x = jax.random.normal(k_x, (N, 1, 28, 28), jnp.float32)
    # reparameterization noise for qzd.rsample()
    eps = jax.random.normal(k_eps, (N, ZD_DIM), jnp.float32)

    zd_mu, zd_sigma, logit_d = qzd_forward(params, x, eps)
    jax.block_until_ready((zd_mu, zd_sigma, logit_d))

    assert zd_mu.shape == (N, ZD_DIM)
    assert zd_sigma.shape == (N, ZD_DIM)
    assert logit_d.shape == (N, D_DIM)
    assert bool(jnp.all(zd_sigma > 0.0))
    assert bool(jnp.all(jnp.isfinite(zd_mu)))
    assert bool(jnp.all(jnp.isfinite(logit_d)))
    print("KERNEL_OK")
</pallas_src>

<mosaic_0001>
module attributes {stable_mosaic.version = 11 : i64} {
  func.func @conv_bn_relu_pool_kernel(%arg0: memref<1152x32xbf16, #tpu.memory_space<vmem>>, %arg1: memref<32x128xbf16, #tpu.memory_space<vmem>>, %arg2: memref<1x128xf32, #tpu.memory_space<vmem>>, %arg3: memref<1x128xf32, #tpu.memory_space<vmem>>, %arg4: memref<288x128xbf16, #tpu.memory_space<vmem>>) attributes {dimension_semantics = [], scalar_prefetch = 0 : i64, scratch_operands = 0 : i64, tpu.core_type = #tpu.core_type<tc>} {
    %c0 = arith.constant 0 : index
    %c0_0 = arith.constant 0 : index
    %0 = vector.load %arg0[%c0, %c0_0] : memref<1152x32xbf16, #tpu.memory_space<vmem>>, vector<1152x32xbf16>
    %c0_1 = arith.constant 0 : index
    %c0_2 = arith.constant 0 : index
    %1 = vector.load %arg1[%c0_1, %c0_2] : memref<32x128xbf16, #tpu.memory_space<vmem>>, vector<32x128xbf16>
    %cst = arith.constant dense<0.000000e+00> : vector<1152x128xf32>
    %2 = tpu.matmul %0, %1, %cst {dimension_numbers = #tpu.dot_dimension_numbers<[1], [0], [0], [1], [0, 0, 1, 1], [], []>} : vector<1152x32xbf16>, vector<32x128xbf16>, vector<1152x128xf32> -> vector<1152x128xf32>
    %cst_3 = arith.constant dense<0.000000e+00> : vector<128xf32>
    %3 = vector.multi_reduction <add>, %2, %cst_3 [0] : vector<1152x128xf32> to vector<128xf32>
    %4 = vector.shape_cast %3 : vector<128xf32> to vector<1x128xf32>
    %cst_4 = arith.constant 1.152000e+03 : f32
    %5 = vector.broadcast %cst_4 : f32 to vector<1x128xf32>
    %6 = arith.divf %4, %5 : vector<1x128xf32>
    %7 = vector.broadcast %6 : vector<1x128xf32> to vector<1152x128xf32>
    %8 = arith.subf %2, %7 : vector<1152x128xf32>
    %9 = arith.mulf %8, %8 : vector<1152x128xf32>
    %cst_5 = arith.constant dense<0.000000e+00> : vector<128xf32>
    %10 = vector.multi_reduction <add>, %9, %cst_5 [0] : vector<1152x128xf32> to vector<128xf32>
    %11 = vector.shape_cast %10 : vector<128xf32> to vector<1x128xf32>
    %cst_6 = arith.constant 1.152000e+03 : f32
    %12 = vector.broadcast %cst_6 : f32 to vector<1x128xf32>
    %13 = arith.divf %11, %12 : vector<1x128xf32>
    %c0_7 = arith.constant 0 : index
    %c0_8 = arith.constant 0 : index
    %14 = vector.load %arg2[%c0_7, %c0_8] : memref<1x128xf32, #tpu.memory_space<vmem>>, vector<1x128xf32>
    %cst_9 = arith.constant 9.99999974E-6 : f32
    %15 = vector.broadcast %cst_9 : f32 to vector<1x128xf32>
    %16 = arith.addf %13, %15 : vector<1x128xf32>
    %17 = math.rsqrt %16 : vector<1x128xf32>
    %18 = arith.mulf %14, %17 : vector<1x128xf32>
    %c0_10 = arith.constant 0 : index
    %c0_11 = arith.constant 0 : index
    %19 = vector.load %arg3[%c0_10, %c0_11] : memref<1x128xf32, #tpu.memory_space<vmem>>, vector<1x128xf32>
    %20 = arith.mulf %6, %18 : vector<1x128xf32>
    %21 = arith.subf %19, %20 : vector<1x128xf32>
    %22 = vector.broadcast %18 : vector<1x128xf32> to vector<1152x128xf32>
    %23 = arith.mulf %2, %22 : vector<1152x128xf32>
    %24 = vector.broadcast %21 : vector<1x128xf32> to vector<1152x128xf32>
    %25 = arith.addf %23, %24 : vector<1152x128xf32>
    %cst_12 = arith.constant 0.000000e+00 : f32
    %26 = vector.broadcast %cst_12 : f32 to vector<1152x128xf32>
    %27 = arith.maximumf %25, %26 : vector<1152x128xf32>
    %28 = vector.extract_strided_slice %27 {offsets = [0, 0], sizes = [288, 128], strides = [1, 1]} : vector<1152x128xf32> to vector<288x128xf32>
    %29 = vector.extract_strided_slice %27 {offsets = [288, 0], sizes = [288, 128], strides = [1, 1]} : vector<1152x128xf32> to vector<288x128xf32>
    %30 = arith.maximumf %28, %29 : vector<288x128xf32>
    %31 = vector.extract_strided_slice %27 {offsets = [576, 0], sizes = [288, 128], strides = [1, 1]} : vector<1152x128xf32> to vector<288x128xf32>
    %32 = vector.extract_strided_slice %27 {offsets = [864, 0], sizes = [288, 128], strides = [1, 1]} : vector<1152x128xf32> to vector<288x128xf32>
    %33 = arith.maximumf %31, %32 : vector<288x128xf32>
    %34 = arith.maximumf %30, %33 : vector<288x128xf32>
    %35 = arith.truncf %34 : vector<288x128xf32> to vector<288x128xbf16>
    %c0_13 = arith.constant 0 : index
    %c0_14 = arith.constant 0 : index
    %36 = vector.load %arg4[%c0_13, %c0_14] : memref<288x128xbf16, #tpu.memory_space<vmem>>, vector<288x128xbf16>
    tpu.vector_store %arg4[%c0_13, %c0_14], %35 {strides = array<i32>} : memref<288x128xbf16, #tpu.memory_space<vmem>>, vector<288x128xbf16>,
    return
  }
}

module attributes {stable_mosaic.version = 11 : i64} {
  func.func @conv_bn_relu_pool_kernel(%arg0: memref<128x800xbf16, #tpu.memory_space<vmem>>, %arg1: memref<800x128xbf16, #tpu.memory_space<vmem>>, %arg2: memref<1x128xf32, #tpu.memory_space<vmem>>, %arg3: memref<1x128xf32, #tpu.memory_space<vmem>>, %arg4: memref<32x128xbf16, #tpu.memory_space<vmem>>) attributes {dimension_semantics = [], scalar_prefetch = 0 : i64, scratch_operands = 0 : i64, tpu.core_type = #tpu.core_type<tc>} {
    %c0 = arith.constant 0 : index
    %c0_0 = arith.constant 0 : index
    %0 = vector.load %arg0[%c0, %c0_0] : memref<128x800xbf16, #tpu.memory_space<vmem>>, vector<128x800xbf16>
    %c0_1 = arith.constant 0 : index
    %c0_2 = arith.constant 0 : index
    %1 = vector.load %arg1[%c0_1, %c0_2] : memref<800x128xbf16, #tpu.memory_space<vmem>>, vector<800x128xbf16>
    %cst = arith.constant dense<0.000000e+00> : vector<128x128xf32>
    %2 = tpu.matmul %0, %1, %cst {dimension_numbers = #tpu.dot_dimension_numbers<[1], [0], [0], [1], [0, 0, 1, 1], [], []>} : vector<128x800xbf16>, vector<800x128xbf16>, vector<128x128xf32> -> vector<128x128xf32>
    %cst_3 = arith.constant dense<0.000000e+00> : vector<128xf32>
    %3 = vector.multi_reduction <add>, %2, %cst_3 [0] : vector<128x128xf32> to vector<128xf32>
    %4 = vector.shape_cast %3 : vector<128xf32> to vector<1x128xf32>
    %cst_4 = arith.constant 1.280000e+02 : f32
    %5 = vector.broadcast %cst_4 : f32 to vector<1x128xf32>
    %6 = arith.divf %4, %5 : vector<1x128xf32>
    %7 = vector.broadcast %6 : vector<1x128xf32> to vector<128x128xf32>
    %8 = arith.subf %2, %7 : vector<128x128xf32>
    %9 = arith.mulf %8, %8 : vector<128x128xf32>
    %cst_5 = arith.constant dense<0.000000e+00> : vector<128xf32>
    %10 = vector.multi_reduction <add>, %9, %cst_5 [0] : vector<128x128xf32> to vector<128xf32>
    %11 = vector.shape_cast %10 : vector<128xf32> to vector<1x128xf32>
    %cst_6 = arith.constant 1.280000e+02 : f32
    %12 = vector.broadcast %cst_6 : f32 to vector<1x128xf32>
    %13 = arith.divf %11, %12 : vector<1x128xf32>
    %c0_7 = arith.constant 0 : index
    %c0_8 = arith.constant 0 : index
    %14 = vector.load %arg2[%c0_7, %c0_8] : memref<1x128xf32, #tpu.memory_space<vmem>>, vector<1x128xf32>
    %cst_9 = arith.constant 9.99999974E-6 : f32
    %15 = vector.broadcast %cst_9 : f32 to vector<1x128xf32>
    %16 = arith.addf %13, %15 : vector<1x128xf32>
    %17 = math.rsqrt %16 : vector<1x128xf32>
    %18 = arith.mulf %14, %17 : vector<1x128xf32>
    %c0_10 = arith.constant 0 : index
    %c0_11 = arith.constant 0 : index
    %19 = vector.load %arg3[%c0_10, %c0_11] : memref<1x128xf32, #tpu.memory_space<vmem>>, vector<1x128xf32>
    %20 = arith.mulf %6, %18 : vector<1x128xf32>
    %21 = arith.subf %19, %20 : vector<1x128xf32>
    %22 = vector.broadcast %18 : vector<1x128xf32> to vector<128x128xf32>
    %23 = arith.mulf %2, %22 : vector<128x128xf32>
    %24 = vector.broadcast %21 : vector<1x128xf32> to vector<128x128xf32>
    %25 = arith.addf %23, %24 : vector<128x128xf32>
    %cst_12 = arith.constant 0.000000e+00 : f32
    %26 = vector.broadcast %cst_12 : f32 to vector<128x128xf32>
    %27 = arith.maximumf %25, %26 : vector<128x128xf32>
    %28 = vector.extract_strided_slice %27 {offsets = [0, 0], sizes = [32, 128], strides = [1, 1]} : vector<128x128xf32> to vector<32x128xf32>
    %29 = vector.extract_strided_slice %27 {offsets = [32, 0], sizes = [32, 128], strides = [1, 1]} : vector<128x128xf32> to vector<32x128xf32>
    %30 = arith.maximumf %28, %29 : vector<32x128xf32>
    %31 = vector.extract_strided_slice %27 {offsets = [64, 0], sizes = [32, 128], strides = [1, 1]} : vector<128x128xf32> to vector<32x128xf32>
    %32 = vector.extract_strided_slice %27 {offsets = [96, 0], sizes = [32, 128], strides = [1, 1]} : vector<128x128xf32> to vector<32x128xf32>
    %33 = arith.maximumf %31, %32 : vector<32x128xf32>
    %34 = arith.maximumf %30, %33 : vector<32x128xf32>
    %35 = arith.truncf %34 : vector<32x128xf32> to vector<32x128xbf16>
    %c0_13 = arith.constant 0 : index
    %c0_14 = arith.constant 0 : index
    %36 = vector.load %arg4[%c0_13, %c0_14] : memref<32x128xbf16, #tpu.memory_space<vmem>>, vector<32x128xbf16>
    tpu.vector_store %arg4[%c0_13, %c0_14], %35 {strides = array<i32>} : memref<32x128xbf16, #tpu.memory_space<vmem>>, vector<32x128xbf16>,
    return
  }
}

module attributes {stable_mosaic.version = 11 : i64} {
  func.func @head_kernel(%arg0: memref<2x1024xbf16, #tpu.memory_space<vmem>>, %arg1: memref<1024x512xbf16, #tpu.memory_space<vmem>>, %arg2: memref<1x512xf32, #tpu.memory_space<vmem>>, %arg3: memref<512x256xbf16, #tpu.memory_space<vmem>>, %arg4: memref<1x256xf32, #tpu.memory_space<vmem>>, %arg5: memref<128x128xbf16, #tpu.memory_space<vmem>>, %arg6: memref<1x128xf32, #tpu.memory_space<vmem>>, %arg7: memref<2x128xf32, #tpu.memory_space<vmem>>, %arg8: memref<2x128xf32, #tpu.memory_space<vmem>>, %arg9: memref<2x128xf32, #tpu.memory_space<vmem>>, %arg10: memref<2x128xf32, #tpu.memory_space<vmem>>) attributes {dimension_semantics = [], scalar_prefetch = 0 : i64, scratch_operands = 0 : i64, tpu.core_type = #tpu.core_type<tc>} {
    %c0 = arith.constant 0 : index
    %c0_0 = arith.constant 0 : index
    %0 = vector.load %arg0[%c0, %c0_0] : memref<2x1024xbf16, #tpu.memory_space<vmem>>, vector<2x1024xbf16>
    %c0_1 = arith.constant 0 : index
    %c0_2 = arith.constant 0 : index
    %1 = vector.load %arg1[%c0_1, %c0_2] : memref<1024x512xbf16, #tpu.memory_space<vmem>>, vector<1024x512xbf16>
    %cst = arith.constant dense<0.000000e+00> : vector<2x512xf32>
    %2 = tpu.matmul %0, %1, %cst {dimension_numbers = #tpu.dot_dimension_numbers<[1], [0], [0], [1], [0, 0, 1, 1], [], []>} : vector<2x1024xbf16>, vector<1024x512xbf16>, vector<2x512xf32> -> vector<2x512xf32>
    %c0_3 = arith.constant 0 : index
    %c0_4 = arith.constant 0 : index
    %3 = vector.load %arg2[%c0_3, %c0_4] : memref<1x512xf32, #tpu.memory_space<vmem>>, vector<1x512xf32>
    %4 = vector.broadcast %3 : vector<1x512xf32> to vector<2x512xf32>
    %5 = arith.addf %2, %4 : vector<2x512xf32>
    %6 = tpu.iota {dimensions = array<i32: 1>} : vector<2x512xi32>
    %c256_i32 = arith.constant 256 : i32
    %7 = vector.broadcast %c256_i32 : i32 to vector<2x512xi32>
    %8 = arith.cmpi slt, %6, %7 : vector<2x512xi32>
    %cst_5 = arith.constant 0.000000e+00 : f32
    %9 = vector.broadcast %cst_5 : f32 to vector<2x512xf32>
    %10 = arith.maximumf %5, %9 : vector<2x512xf32>
    %11 = arith.select %8, %10, %5 : vector<2x512xi1>, vector<2x512xf32>
    %12 = arith.truncf %11 : vector<2x512xf32> to vector<2x512xbf16>
    %c0_6 = arith.constant 0 : index
    %c0_7 = arith.constant 0 : index
    %13 = vector.load %arg3[%c0_6, %c0_7] : memref<512x256xbf16, #tpu.memory_space<vmem>>, vector<512x256xbf16>
    %cst_8 = arith.constant dense<0.000000e+00> : vector<2x256xf32>
    %14 = tpu.matmul %12, %13, %cst_8 {dimension_numbers = #tpu.dot_dimension_numbers<[1], [0], [0], [1], [0, 0, 1, 1], [], []>} : vector<2x512xbf16>, vector<512x256xbf16>, vector<2x256xf32> -> vector<2x256xf32>
    %c0_9 = arith.constant 0 : index
    %c0_10 = arith.constant 0 : index
    %15 = vector.load %arg4[%c0_9, %c0_10] : memref<1x256xf32, #tpu.memory_space<vmem>>, vector<1x256xf32>
    %16 = vector.broadcast %15 : vector<1x256xf32> to vector<2x256xf32>
    %17 = arith.addf %14, %16 : vector<2x256xf32>
    %18 = vector.extract_strided_slice %17 {offsets = [0, 0], sizes = [2, 128], strides = [1, 1]} : vector<2x256xf32> to vector<2x128xf32>
    %19 = vector.extract_strided_slice %17 {offsets = [0, 128], sizes = [2, 128], strides = [1, 1]} : vector<2x256xf32> to vector<2x128xf32>
    %cst_11 = arith.constant 0.000000e+00 : f32
    %20 = vector.broadcast %cst_11 : f32 to vector<2x128xf32>
    %21 = arith.maximumf %19, %20 : vector<2x128xf32>
    %cst_12 = arith.constant 5.000000e-01 : f32
    %22 = vector.broadcast %cst_12 : f32 to vector<2x128xf32>
    %23 = arith.mulf %22, %21 : vector<2x128xf32>
    %24 = math.exp %23 : vector<2x128xf32>
    %c0_13 = arith.constant 0 : index
    %c0_14 = arith.constant 0 : index
    %25 = vector.load %arg7[%c0_13, %c0_14] : memref<2x128xf32, #tpu.memory_space<vmem>>, vector<2x128xf32>
    %26 = arith.mulf %24, %25 : vector<2x128xf32>
    %27 = arith.addf %18, %26 : vector<2x128xf32>
    %28 = arith.truncf %27 : vector<2x128xf32> to vector<2x128xbf16>
    %c0_15 = arith.constant 0 : index
    %c0_16 = arith.constant 0 : index
    %29 = vector.load %arg5[%c0_15, %c0_16] : memref<128x128xbf16, #tpu.memory_space<vmem>>, vector<128x128xbf16>
    %cst_17 = arith.constant dense<0.000000e+00> : vector<2x128xf32>
    %30 = tpu.matmul %28, %29, %cst_17 {dimension_numbers = #tpu.dot_dimension_numbers<[1], [0], [0], [1], [0, 0, 1, 1], [], []>} : vector<2x128xbf16>, vector<128x128xbf16>, vector<2x128xf32> -> vector<2x128xf32>
    %c0_18 = arith.constant 0 : index
    %c0_19 = arith.constant 0 : index
    %31 = vector.load %arg6[%c0_18, %c0_19] : memref<1x128xf32, #tpu.memory_space<vmem>>, vector<1x128xf32>
    %32 = vector.broadcast %31 : vector<1x128xf32> to vector<2x128xf32>
    %33 = arith.addf %30, %32 : vector<2x128xf32>
    %c0_20 = arith.constant 0 : index
    %c0_21 = arith.constant 0 : index
    %34 = vector.load %arg8[%c0_20, %c0_21] : memref<2x128xf32, #tpu.memory_space<vmem>>, vector<2x128xf32>
    tpu.vector_store %arg8[%c0_20, %c0_21], %18 {strides = array<i32>} : memref<2x128xf32, #tpu.memory_space<vmem>>, vector<2x128xf32>,
    %c0_22 = arith.constant 0 : index
    %c0_23 = arith.constant 0 : index
    %35 = vector.load %arg9[%c0_22, %c0_23] : memref<2x128xf32, #tpu.memory_space<vmem>>, vector<2x128xf32>
    tpu.vector_store %arg9[%c0_22, %c0_23], %24 {strides = array<i32>} : memref<2x128xf32, #tpu.memory_space<vmem>>, vector<2x128xf32>,
    %c0_24 = arith.constant 0 : index
    %c0_25 = arith.constant 0 : index
    %36 = vector.load %arg10[%c0_24, %c0_25] : memref<2x128xf32, #tpu.memory_space<vmem>>, vector<2x128xf32>
    tpu.vector_store %arg10[%c0_24, %c0_25], %33 {strides = array<i32>} : memref<2x128xf32, #tpu.memory_space<vmem>>, vector<2x128xf32>,
    return
  }
}

</mosaic_0001>

<bundles_post_ra>
// kernel: qzd_forward.3
= control target key start
LH: loop header
LB: loop body
LE: loop exit
PB: predicated region body
PF: predicated region fallthrough
CT: control target
= control target key end

     0   :  { %vm538_vm0 = vcmask 261120   ;;  %s5750_s1 = inlined_call_operand.vmem [shape: bf16[32,128], index: 1, kind: input, shape index: {}]   ;;  %s5751_s0 = inlined_call_operand.vmem [shape: bf16[1152,32], index: 0, kind: input, shape index: {}]   ;;  %s5752_s2 = inlined_call_operand.vmem [shape: f32[1,128], index: 2, kind: input, shape index: {}]   ;;  %s5753_s3 = inlined_call_operand.vmem [shape: f32[1,128], index: 3, kind: input, shape index: {}]   ;;  %s5754_s4 = inlined_call_operand.vmem [shape: bf16[288,128], index: 4, kind: output, shape index: {}]  }
   0x1   :  { %v2798_v0 = vld [vmem:[%s5750_s1 + $0x8] sm:$0xff]  ;;  %v2797_v1 = vld [vmem:[%s5750_s1] sm:$0xff]  ;;  %v2727_v4 = vld [vmem:[%s5751_s0 + $0x10] sm:$0xff] }
   0x2   :  { %761 = vmatpush.bf16.msra.mxu0 %v2798_v0  ;;  %2906 = vmatpush.bf16.msra.mxu1 %v2798_v0  ;;  %v2725_v2 = vld [vmem:[%s5751_s0] sm:$0xff]  ;;  %v2726_v3 = vld [vmem:[%s5751_s0 + $0x8] sm:$0xff]  ;;  %v2743_v5 = vld [vmem:[%s5751_s0 + $0x90] sm:$0xff] }
   0x3   :  { %2907 = vmatpush.bf16.msra.mxu2 %v2798_v0  ;;  %2908 = vmatpush.bf16.msra.mxu3 %v2798_v0  ;;  %v2728_v6 = vld [vmem:[%s5751_s0 + $0x18] sm:$0xff]  ;;  %v2729_v8 = vld [vmem:[%s5751_s0 + $0x20] sm:$0xff]  ;;  %v2730_v10 = vld [vmem:[%s5751_s0 + $0x28] sm:$0xff] }
   0x4   :  { %v2744_v7 = vld [vmem:[%s5751_s0 + $0x98] sm:$0xff]  ;;  %v2745_v9 = vld [vmem:[%s5751_s0 + $0xa0] sm:$0xff]  ;;  %v2746_v11 = vld [vmem:[%s5751_s0 + $0xa8] sm:$0xff] }
   0x5   :  { %v2731_v12 = vld [vmem:[%s5751_s0 + $0x30] sm:$0xff]  ;;  %v2761_v14 = vld [vmem:[%s5751_s0 + $0x120] sm:$0xff]  ;;  %v2732_v15 = vld [vmem:[%s5751_s0 + $0x38] sm:$0xff] }
   0x6   :  { %762 = vmatpush.bf16.msra.mxu0 %v2797_v1  ;;  %2909 = vmatpush.bf16.msra.mxu1 %v2797_v1  ;;  %v2747_v13 = vld [vmem:[%s5751_s0 + $0xb0] sm:$0xff]  ;;  %v2748_v16 = vld [vmem:[%s5751_s0 + $0xb8] sm:$0xff]  ;;  %v2762_v17 = vld [vmem:[%s5751_s0 + $0x128] sm:$0xff] }
   0x7   :  { %2910 = vmatpush.bf16.msra.mxu2 %v2797_v1  ;;  %2911 = vmatpush.bf16.msra.mxu3 %v2797_v1  ;;  %v2733_v18 = vld [vmem:[%s5751_s0 + $0x40] sm:$0xff]  ;;  %v2763_v21 = vld [vmem:[%s5751_s0 + $0x130] sm:$0xff]  ;;  %v2734_v23 = vld [vmem:[%s5751_s0 + $0x48] sm:$0xff] }
   0x8   :  { %v2749_v20 = vld [vmem:[%s5751_s0 + $0xc0] sm:$0xff]  ;;  %v2750_v25 = vld [vmem:[%s5751_s0 + $0xc8] sm:$0xff]  ;;  %v2764_v26 = vld [vmem:[%s5751_s0 + $0x138] sm:$0xff] }
   0x9   :  { %2653 = vmatmul.msk.bf16.vlgmr.msra.gmra.mxu0 %vm538_vm0, %v2725_v2  ;;  %2671 = vmatmul.msk.bf16.vlgmr.msra.gmra.mxu1 %vm538_vm0, %v2743_v5  ;;  %v2735_v28 = vld [vmem:[%s5751_s0 + $0x50] sm:$0xff]  ;;  %v2765_v32 = vld [vmem:[%s5751_s0 + $0x140] sm:$0xff]  ;;  %v2736_v36 = vld [vmem:[%s5751_s0 + $0x58] sm:$0xff] }
   0xa   :  { %2689 = vmatmul.msk.bf16.vlgmr.msra.gmra.mxu2 %vm538_vm0, %v2761_v14  ;;  %v2751_v31 = vld [vmem:[%s5751_s0 + $0xd0] sm:$0xff]  ;;  %v2752_v39 = vld [vmem:[%s5751_s0 + $0xd8] sm:$0xff]  ;;  %v2766_v40 = vld [vmem:[%s5751_s0 + $0x148] sm:$0xff] }
   0xb   :  { %v2779_v35 = vld [vmem:[%s5751_s0 + $0x1b0] sm:$0xff]  ;;  %v2780_v43 = vld [vmem:[%s5751_s0 + $0x1b8] sm:$0xff]  ;;  %v2737_v44 = vld [vmem:[%s5751_s0 + $0x60] sm:$0xff] }
   0xc   :  { %2707 = vmatmul.msk.bf16.vlgmr.msra.gmra.mxu3 %vm538_vm0, %v2779_v35  ;;  %v2753_v47 = vld [vmem:[%s5751_s0 + $0xe0] sm:$0xff]  ;;  %v2767_v48 = vld [vmem:[%s5751_s0 + $0x150] sm:$0xff]  ;;  %v2738_v52 = vld [vmem:[%s5751_s0 + $0x68] sm:$0xff] }
   0xd   :  { %v2781_v51 = vld [vmem:[%s5751_s0 + $0x1c0] sm:$0xff]  ;;  %v2754_v55 = vld [vmem:[%s5751_s0 + $0xe8] sm:$0xff]  ;;  %v2768_v56 = vld [vmem:[%s5751_s0 + $0x158] sm:$0xff] }
   0xe   :  { %v2782_v59 = vld [vmem:[%s5751_s0 + $0x1c8] sm:$0xff]  ;;  %v2739_v60 = vld [vmem:[%s5751_s0 + $0x70] sm:$0xff]  ;;  %v2769_v0 = vld [vmem:[%s5751_s0 + $0x160] sm:$0xff] }
   0xf   :  { %v2755_v63 = vld [vmem:[%s5751_s0 + $0xf0] sm:$0xff]  ;;  %v2740_v5 = vld [vmem:[%s5751_s0 + $0x78] sm:$0xff] }
  0x10   :  { %v2784_v14 = vld [vmem:[%s5751_s0 + $0x1d8] sm:$0xff] }
  0x19   :  { %2654 = vmatmul.msk.bf16.gmra.mxu0 %vm538_vm0, %v2726_v3  ;;  %2672 = vmatmul.msk.bf16.gmra.mxu1 %vm538_vm0, %v2744_v7 }
  0x1a   :  { %2690 = vmatmul.msk.bf16.gmra.mxu2 %vm538_vm0, %v2762_v17 }
  0x1c   :  { %2708 = vmatmul.msk.bf16.gmra.mxu3 %vm538_vm0, %v2780_v43 }
  0x29   :  { %2655 = vmatmul.msk.bf16.gmra.mxu0 %vm538_vm0, %v2727_v4  ;;  %2673 = vmatmul.msk.bf16.gmra.mxu1 %vm538_vm0, %v2745_v9  ;;  %v2783_v4 = vld [vmem:[%s5751_s0 + $0x1d0] sm:$0xff]  ;;  %v2756_v9 = vld [vmem:[%s5751_s0 + $0xf8] sm:$0xff] }
  0x2a   :  { %2691 = vmatmul.msk.bf16.gmra.mxu2 %vm538_vm0, %v2763_v21  ;;  %v2771_v21 = vld [vmem:[%s5751_s0 + $0x170] sm:$0xff] }
  0x2c   :  { %2709 = vmatmul.msk.bf16.gmra.mxu3 %vm538_vm0, %v2781_v51 }
  0x39   :  { %2656 = vmatmul.msk.bf16.gmra.mxu0 %vm538_vm0, %v2728_v6  ;;  %2674 = vmatmul.msk.bf16.gmra.mxu1 %vm538_vm0, %v2746_v11 }
  0x3a   :  { %2692 = vmatmul.msk.bf16.gmra.mxu2 %vm538_vm0, %v2764_v26 }
  0x3c   :  { %2710 = vmatmul.msk.bf16.gmra.mxu3 %vm538_vm0, %v2782_v59 }
  0x49   :  { %2657 = vmatmul.msk.bf16.gmra.mxu0 %vm538_vm0, %v2729_v8  ;;  %2675 = vmatmul.msk.bf16.gmra.mxu1 %vm538_vm0, %v2747_v13 }
  0x4a   :  { %2693 = vmatmul.msk.bf16.gmra.mxu2 %vm538_vm0, %v2765_v32 }
  0x4c   :  { %2711 = vmatmul.msk.bf16.gmra.mxu3 %vm538_vm0, %v2783_v4 }
  0x59   :  { %2658 = vmatmul.msk.bf16.gmra.mxu0 %vm538_vm0, %v2730_v10  ;;  %2676 = vmatmul.msk.bf16.gmra.mxu1 %vm538_vm0, %v2748_v16  ;;  %v2770_v10 = vld [vmem:[%s5751_s0 + $0x168] sm:$0xff] }
  0x5a   :  { %2694 = vmatmul.msk.bf16.gmra.mxu2 %vm538_vm0, %v2766_v40  ;;  %v2772_v40 = vld [vmem:[%s5751_s0 + $0x178] sm:$0xff] }
  0x5c   :  { %2712 = vmatmul.msk.bf16.gmra.mxu3 %vm538_vm0, %v2784_v14  ;;  %v2774_v14 = vld [vmem:[%s5751_s0 + $0x188] sm:$0xff] }
  0x69   :  { %2659 = vmatmul.msk.bf16.gmra.mxu0 %vm538_vm0, %v2731_v12  ;;  %2677 = vmatmul.msk.bf16.gmra.mxu1 %vm538_vm0, %v2749_v20  ;;  %v2757_v20 = vld [vmem:[%s5751_s0 + $0x100] sm:$0xff] }
  0x6a   :  { %2695 = vmatmul.msk.bf16.gmra.mxu2 %vm538_vm0, %v2767_v48  ;;  %v2786_v48 = vld [vmem:[%s5751_s0 + $0x1e8] sm:$0xff] }
  0x79   :  { %2660 = vmatmul.msk.bf16.gmra.mxu0 %vm538_vm0, %v2732_v15  ;;  %2678 = vmatmul.msk.bf16.gmra.mxu1 %vm538_vm0, %v2750_v25  ;;  %v2741_v15 = vld [vmem:[%s5751_s0 + $0x80] sm:$0xff] }
  0x7a   :  { %2696 = vmatmul.msk.bf16.gmra.mxu2 %vm538_vm0, %v2768_v56  ;;  %v2773_v56 = vld [vmem:[%s5751_s0 + $0x180] sm:$0xff] }
  0x86   :  { %v3016_v19 = vpop.f32.mrf.mxu0  ;;  %v3050_v30 = vpop.f32.mrf.mxu1 }
  0x87   :  { %6125 = vst [vmem:[#allocation2_spill] sm:$0xff] %v3016_v19 }
  0x88   :  { %6130 = vst [vmem:[#allocation7_spill] sm:$0xff] %v3050_v30 }
  0x89   :  { %2661 = vmatmul.msk.bf16.gmra.mxu0 %vm538_vm0, %v2733_v18  ;;  %2679 = vmatmul.msk.bf16.gmra.mxu1 %vm538_vm0, %v2751_v31  ;;  %v2742_v31 = vld [vmem:[%s5751_s0 + $0x88] sm:$0xff] }
  0x8a   :  { %2697 = vmatmul.msk.bf16.gmra.mxu2 %vm538_vm0, %v2769_v0  ;;  %v2787_v0 = vld [vmem:[%s5751_s0 + $0x1f0] sm:$0xff] }
  0x8d   :  { %v3161_v3 = vpop.f32.mrf.mxu2 }
  0x8e   :  { %v3027_v22 = vpop.f32.mrf.mxu0  ;;  %v3063_v34 = vpop.f32.mrf.mxu1  ;;  %6147 = vst [vmem:[#allocation24_spill] sm:$0xff] %v3161_v3 }
  0x8f   :  { %6126 = vst [vmem:[#allocation3_spill] sm:$0xff] %v3027_v22 }
  0x90   :  { %6132 = vst [vmem:[#allocation9_spill] sm:$0xff] %v3063_v34 }
  0x95   :  { %v3174_v8 = vpop.f32.mrf.mxu2 }
  0x96   :  { %v3032_v24 = vpop.f32.mrf.mxu0  ;;  %v3074_v38 = vpop.f32.mrf.mxu1  ;;  %6150 = vst [vmem:[#allocation27_spill] sm:$0xff] %v3174_v8 }
  0x97   :  { %6127 = vst [vmem:[#allocation4_spill] sm:$0xff] %v3032_v24 }
  0x99   :  { %2662 = vmatmul.msk.bf16.gmra.mxu0 %vm538_vm0, %v2734_v23  ;;  %2680 = vmatmul.msk.bf16.gmra.mxu1 %vm538_vm0, %v2752_v39  ;;  %v2758_v39 = vld [vmem:[%s5751_s0 + $0x108] sm:$0xff] }
  0x9a   :  { %2698 = vmatmul.msk.bf16.gmra.mxu2 %vm538_vm0, %v2770_v10  ;;  %v2760_v10 = vld [vmem:[%s5751_s0 + $0x118] sm:$0xff] }
  0x9d   :  { %v3189_v13 = vpop.f32.mrf.mxu2 }
  0x9e   :  { %v3043_v27 = vpop.f32.mrf.mxu0  ;;  %v3087_v42 = vpop.f32.mrf.mxu1  ;;  %6153 = vst [vmem:[#allocation30_spill] sm:$0xff] %v3189_v13 }
  0x9f   :  { %6128 = vst [vmem:[#allocation5_spill] sm:$0xff] %v3043_v27 }
  0xa0   :  { %6135 = vst [vmem:[#allocation12_spill] sm:$0xff] %v3087_v42 }
  0xa5   :  { %v3202_v18 = vpop.f32.mrf.mxu2 }
  0xa6   :  { %v3048_v29 = vpop.f32.mrf.mxu0  ;;  %v3098_v46 = vpop.f32.mrf.mxu1  ;;  %6156 = vst [vmem:[#allocation33_spill] sm:$0xff] %v3202_v18 }
  0xa7   :  { %6129 = vst [vmem:[#allocation6_spill] sm:$0xff] %v3048_v29 }
  0xa8   :  { %6137 = vst [vmem:[#allocation14_spill] sm:$0xff] %v3098_v46 }
  0xa9   :  { %2663 = vmatmul.msk.bf16.gmra.mxu0 %vm538_vm0, %v2735_v28  ;;  %2681 = vmatmul.msk.bf16.gmra.mxu1 %vm538_vm0, %v2753_v47  ;;  %v2785_v28 = vld [vmem:[%s5751_s0 + $0x1e0] sm:$0xff] }
  0xaa   :  { %2699 = vmatmul.msk.bf16.gmra.mxu2 %vm538_vm0, %v2771_v21  ;;  %2713 = vmatmul.msk.bf16.gmra.mxu3 %vm538_vm0, %v2785_v28  ;;  %v2788_v28 = vld [vmem:[%s5751_s0 + $0x1f8] sm:$0xff] }
  0xad   :  { %v3217_v26 = vpop.f32.mrf.mxu2 }
  0xae   :  { %v3061_v33 = vpop.f32.mrf.mxu0  ;;  %v3111_v50 = vpop.f32.mrf.mxu1  ;;  %6159 = vst [vmem:[#allocation36_spill] sm:$0xff] %v3217_v26 }
  0xaf   :  { %6131 = vst [vmem:[#allocation8_spill] sm:$0xff] %v3061_v33 }
  0xb0   :  { %6139 = vst [vmem:[#allocation16_spill] sm:$0xff] %v3111_v50 }
  0xb6   :  { %v3072_v37 = vpop.f32.mrf.mxu0  ;;  %v3122_v54 = vpop.f32.mrf.mxu1 }
  0xb7   :  { %6133 = vst [vmem:[#allocation10_spill] sm:$0xff] %v3072_v37 }
  0xb9   :  { %2664 = vmatmul.msk.bf16.gmra.mxu0 %vm538_vm0, %v2736_v36  ;;  %2682 = vmatmul.msk.bf16.gmra.mxu1 %vm538_vm0, %v2754_v55  ;;  %v3230_v36 = vpop.f32.mrf.mxu2  ;;  %v2759_v55 = vld [vmem:[%s5751_s0 + $0x110] sm:$0xff] }
  0xba   :  { %6162 = vst [vmem:[#allocation39_spill] sm:$0xff] %v3230_v36  ;;  %2700 = vmatmul.msk.bf16.gmra.mxu2 %vm538_vm0, %v2772_v40  ;;  %2714 = vmatmul.msk.bf16.gmra.mxu3 %vm538_vm0, %v2786_v48  ;;  %v3301_v40 = vpop.f32.mrf.mxu3 }
  0xbb   :  { %6179 = vst [vmem:[#allocation56_spill] sm:$0xff] %v3301_v40 }
  0xbe   :  { %v3085_v41 = vpop.f32.mrf.mxu0  ;;  %v3135_v58 = vpop.f32.mrf.mxu1 }
  0xbf   :  { %6134 = vst [vmem:[#allocation11_spill] sm:$0xff] %v3085_v41 }
  0xc0   :  { %6142 = vst [vmem:[#allocation19_spill] sm:$0xff] %v3135_v58 }
  0xc1   :  { %v3245_v47 = vpop.f32.mrf.mxu2 }
  0xc2   :  { %6165 = vst [vmem:[#allocation42_spill] sm:$0xff] %v3245_v47 }
  0xc6   :  { %v3096_v45 = vpop.f32.mrf.mxu0  ;;  %v3146_v62 = vpop.f32.mrf.mxu1 }
  0xc7   :  { %6136 = vst [vmem:[#allocation13_spill] sm:$0xff] %v3096_v45 }
  0xc8   :  { %6144 = vst [vmem:[#allocation21_spill] sm:$0xff] %v3146_v62 }
  0xc9   :  { %2665 = vmatmul.msk.bf16.gmra.mxu0 %vm538_vm0, %v2737_v44  ;;  %2683 = vmatmul.msk.bf16.gmra.mxu1 %vm538_vm0, %v2755_v63 }
  0xca   :  { %2701 = vmatmul.msk.bf16.gmra.mxu2 %vm538_vm0, %v2773_v56  ;;  %2715 = vmatmul.msk.bf16.gmra.mxu3 %vm538_vm0, %v2787_v0 }
  0xce   :  { %v3109_v49 = vpop.f32.mrf.mxu0  ;;  %v3159_v2 = vpop.f32.mrf.mxu1 }
  0xcf   :  { %6138 = vst [vmem:[#allocation15_spill] sm:$0xff] %v3109_v49 }
  0xd0   :  { %6146 = vst [vmem:[#allocation23_spill] sm:$0xff] %v3159_v2 }
  0xd6   :  { %v3120_v53 = vpop.f32.mrf.mxu0  ;;  %v3172_v7 = vpop.f32.mrf.mxu1 }
  0xd7   :  { %6140 = vst [vmem:[#allocation17_spill] sm:$0xff] %v3120_v53 }
  0xd8   :  { %6149 = vst [vmem:[#allocation26_spill] sm:$0xff] %v3172_v7 }
  0xd9   :  { %2666 = vmatmul.msk.bf16.gmra.mxu0 %vm538_vm0, %v2738_v52  ;;  %2684 = vmatmul.msk.bf16.gmra.mxu1 %vm538_vm0, %v2756_v9  ;;  %v3253_v52 = vpop.f32.mrf.mxu2 }
  0xda   :  { %6167 = vst [vmem:[#allocation44_spill] sm:$0xff] %v3253_v52  ;;  %2702 = vmatmul.msk.bf16.gmra.mxu2 %vm538_vm0, %v2774_v14  ;;  %2716 = vmatmul.msk.bf16.gmra.mxu3 %vm538_vm0, %v2788_v28  ;;  %v3318_v28 = vpop.f32.mrf.mxu3  ;;  %v2790_v52 = vld [vmem:[%s5751_s0 + $0x208] sm:$0xff] }
  0xdb   :  { %6184 = vst [vmem:[#allocation61_spill] sm:$0xff] %v3318_v28 }
  0xde   :  { %v3133_v57 = vpop.f32.mrf.mxu0  ;;  %v3187_v12 = vpop.f32.mrf.mxu1 }
  0xdf   :  { %6141 = vst [vmem:[#allocation18_spill] sm:$0xff] %v3133_v57 }
  0xe0   :  { %6152 = vst [vmem:[#allocation29_spill] sm:$0xff] %v3187_v12 }
  0xe1   :  { %v3267_v63 = vpop.f32.mrf.mxu2 }
  0xe2   :  { %6170 = vst [vmem:[#allocation47_spill] sm:$0xff] %v3267_v63 }
  0xe6   :  { %v3144_v61 = vpop.f32.mrf.mxu0  ;;  %v3200_v17 = vpop.f32.mrf.mxu1 }
  0xe7   :  { %6143 = vst [vmem:[#allocation20_spill] sm:$0xff] %v3144_v61 }
  0xe8   :  { %6155 = vst [vmem:[#allocation32_spill] sm:$0xff] %v3200_v17 }
  0xe9   :  { %2667 = vmatmul.msk.bf16.gmra.mxu0 %vm538_vm0, %v2739_v60  ;;  %2685 = vmatmul.msk.bf16.gmra.mxu1 %vm538_vm0, %v2757_v20  ;;  %v3277_v9 = vpop.f32.mrf.mxu2 }
  0xea   :  { %6173 = vst [vmem:[#allocation50_spill] sm:$0xff] %v3277_v9  ;;  %v3332_v9 = vpop.f32.mrf.mxu3 }
  0xee   :  { %v3157_v1 = vpop.f32.mrf.mxu0  ;;  %v3215_v25 = vpop.f32.mrf.mxu1 }
  0xef   :  { %6145 = vst [vmem:[#allocation22_spill] sm:$0xff] %v3157_v1 }
  0xf0   :  { %6158 = vst [vmem:[#allocation35_spill] sm:$0xff] %v3215_v25 }
  0xf1   :  { %v3291_v21 = vpop.f32.mrf.mxu2 }
  0xf2   :  { %6176 = vst [vmem:[#allocation53_spill] sm:$0xff] %v3291_v21 }
  0xf6   :  { %v3170_v6 = vpop.f32.mrf.mxu0  ;;  %v3228_v35 = vpop.f32.mrf.mxu1 }
  0xf7   :  { %6148 = vst [vmem:[#allocation25_spill] sm:$0xff] %v3170_v6 }
  0xf8   :  { %6161 = vst [vmem:[#allocation38_spill] sm:$0xff] %v3228_v35 }
  0xf9   :  { %2668 = vmatmul.msk.bf16.gmra.mxu0 %vm538_vm0, %v2740_v5  ;;  %2686 = vmatmul.msk.bf16.gmra.mxu1 %vm538_vm0, %v2758_v39  ;;  %v3303_v48 = vpop.f32.mrf.mxu2 }
  0xfa   :  { %6180 = vst [vmem:[#allocation57_spill] sm:$0xff] %v3303_v48 }
  0xfe   :  { %v3185_v11 = vpop.f32.mrf.mxu0  ;;  %v3243_v44 = vpop.f32.mrf.mxu1 }
  0xff   :  { %6151 = vst [vmem:[#allocation28_spill] sm:$0xff] %v3185_v11 }
 0x100   :  { %6164 = vst [vmem:[#allocation41_spill] sm:$0xff] %v3243_v44 }
 0x101   :  { %v3311_v0 = vpop.f32.mrf.mxu2 }
 0x102   :  { %6182 = vst [vmem:[#allocation59_spill] sm:$0xff] %v3311_v0  ;;  %v1124_v0 = vadd.f32 %v3027_v22, %v3016_v19 }
 0x104   :  { %v1125_v28 = vadd.f32 %v1124_v0, %v3032_v24 }
 0x106   :  { %v3198_v16 = vpop.f32.mrf.mxu0  ;;  %v3261_v59 = vpop.f32.mrf.mxu1  ;;  %v1126_v63 = vadd.f32 %v1125_v28, %v3043_v27 }
 0x107   :  { %6154 = vst [vmem:[#allocation31_spill] sm:$0xff] %v3198_v16 }
 0x108   :  { %6168 = vst [vmem:[#allocation45_spill] sm:$0xff] %v3261_v59  ;;  %v1127_v47 = vadd.f32 %v1126_v63, %v3048_v29  ;;  %v2777_v63 = vld [vmem:[%s5751_s0 + $0x1a0] sm:$0xff]  ;;  %v2791_v29 = vld [vmem:[%s5751_s0 + $0x210] sm:$0xff] }
 0x109   :  { %2669 = vmatmul.msk.bf16.gmra.mxu0 %vm538_vm0, %v2741_v15  ;;  %2687 = vmatmul.msk.bf16.gmra.mxu1 %vm538_vm0, %v2759_v55  ;;  %v2775_v55 = vld [vmem:[%s5751_s0 + $0x190] sm:$0xff]  ;;  %v3323_v48 = vpop.f32.mrf.mxu2 }
 0x10a   :  { %2703 = vmatmul.msk.bf16.gmra.mxu2 %vm538_vm0, %v2775_v55  ;;  %6186 = vst [vmem:[#allocation63_spill] sm:$0xff] %v3323_v48  ;;  %v2776_v55 = vld [vmem:[%s5751_s0 + $0x198] sm:$0xff]  ;;  %v1128_v22 = vadd.f32 %v1127_v47, %v3061_v33 }
 0x10c   :  { %v1129_v0 = vadd.f32 %v1128_v22, %v3072_v37 }
 0x10e   :  { %v3213_v23 = vpop.f32.mrf.mxu0  ;;  %v3273_v4 = vpop.f32.mrf.mxu1  ;;  %v1130_v28 = vadd.f32 %v1129_v0, %v3085_v41 }
 0x10f   :  { %6157 = vst [vmem:[#allocation34_spill] sm:$0xff] %v3213_v23 }
 0x110   :  { %6171 = vst [vmem:[#allocation48_spill] sm:$0xff] %v3273_v4 }
 0x111   :  { %v3339_v48 = vpop.f32.mrf.mxu2 }
 0x112   :  { %6189 = vst [vmem:[#allocation66_spill] sm:$0xff] %v3339_v48 }
 0x116   :  { %v3226_v32 = vpop.f32.mrf.mxu0  ;;  %v3287_v15 = vpop.f32.mrf.mxu1 }
 0x117   :  { %6160 = vst [vmem:[#allocation37_spill] sm:$0xff] %v3226_v32 }
 0x118   :  { %6174 = vst [vmem:[#allocation51_spill] sm:$0xff] %v3287_v15 }
 0x119   :  { %2670 = vmatmul.msk.bf16.gmra.mxu0 %vm538_vm0, %v2742_v31  ;;  %2688 = vmatmul.msk.bf16.gmra.mxu1 %vm538_vm0, %v2760_v10  ;;  %v2789_v10 = vld [vmem:[%s5751_s0 + $0x200] sm:$0xff]  ;;  %v3355_v27 = vpop.f32.mrf.mxu2 }
 0x11a   :  { %2717 = vmatmul.msk.bf16.gmra.mxu3 %vm538_vm0, %v2789_v10  ;;  %2704 = vmatmul.msk.bf16.gmra.mxu2 %vm538_vm0, %v2776_v55  ;;  %v3350_v55 = vpop.f32.mrf.mxu3  ;;  %6193 = vst [vmem:[#allocation70_spill] sm:$0xff] %v3355_v27 }
 0x11b   :  { %6191 = vst [vmem:[#allocation68_spill] sm:$0xff] %v3350_v55 }
 0x11e   :  { %v3241_v43 = vpop.f32.mrf.mxu0  ;;  %v3299_v39 = vpop.f32.mrf.mxu1 }
 0x11f   :  { %6163 = vst [vmem:[#allocation40_spill] sm:$0xff] %v3241_v43 }
 0x120   :  { %6178 = vst [vmem:[#allocation55_spill] sm:$0xff] %v3299_v39 }
 0x121   :  { %v3374_v55 = vpop.f32.mrf.mxu2 }
 0x122   :  { %v3369_v41 = vpop.f32.mrf.mxu3  ;;  %6196 = vst [vmem:[#allocation73_spill] sm:$0xff] %v3374_v55 }
 0x126   :  { %v3251_v51 = vpop.f32.mrf.mxu0  ;;  %v3316_v14 = vpop.f32.mrf.mxu1 }
 0x127   :  { %6166 = vst [vmem:[#allocation43_spill] sm:$0xff] %v3251_v51 }
 0x128   :  { %6183 = vst [vmem:[#allocation60_spill] sm:$0xff] %v3316_v14 }
 0x12a   :  { %2718 = vmatmul.msk.bf16.gmra.mxu3 %vm538_vm0, %v2790_v52  ;;  %v1131_v52 = vadd.f32 %v1130_v28, %v3096_v45  ;;  %2705 = vmatmul.msk.bf16.gmra.mxu2 %vm538_vm0, %v2777_v63  ;;  %v3389_v45 = vpop.f32.mrf.mxu3 }
 0x12b   :  { %6199 = vst [vmem:[#allocation76_spill] sm:$0xff] %v3389_v45 }
 0x12c   :  { %v1132_v47 = vadd.f32 %v1131_v52, %v3109_v49 }
 0x12e   :  { %v3265_v60 = vpop.f32.mrf.mxu0  ;;  %v3328_v21 = vpop.f32.mrf.mxu1  ;;  %v1133_v22 = vadd.f32 %v1132_v47, %v3120_v53 }
 0x12f   :  { %6169 = vst [vmem:[#allocation46_spill] sm:$0xff] %v3265_v60 }
 0x130   :  { %6187 = vst [vmem:[#allocation64_spill] sm:$0xff] %v3328_v21  ;;  %v1134_v0 = vadd.f32 %v1133_v22, %v3133_v57  ;;  %v2778_v57 = vld [vmem:[%s5751_s0 + $0x1a8] sm:$0xff] }
 0x132   :  { %v1135_v28 = vadd.f32 %v1134_v0, %v3144_v61  ;;  %v3391_v0 = vpop.f32.mrf.mxu2 }
 0x133   :  { %6200 = vst [vmem:[#allocation77_spill] sm:$0xff] %v3391_v0 }
 0x134   :  { %v1136_v63 = vadd.f32 %v1135_v28, %v3157_v1  ;;  %v3406_v1 = vpop.f32.mrf.mxu3 }
 0x136   :  { %v3275_v5 = vpop.f32.mrf.mxu0  ;;  %v3347_v19 = vpop.f32.mrf.mxu1  ;;  %v1137_v52 = vadd.f32 %v1136_v63, %v3170_v6 }
 0x137   :  { %6172 = vst [vmem:[#allocation49_spill] sm:$0xff] %v3275_v5 }
 0x138   :  { %6190 = vst [vmem:[#allocation67_spill] sm:$0xff] %v3347_v19  ;;  %v1138_v22 = vadd.f32 %v1137_v52, %v3185_v11 }
 0x13a   :  { %2719 = vmatmul.msk.bf16.gmra.mxu3 %vm538_vm0, %v2791_v29  ;;  %v1139_v49 = vadd.f32 %v1138_v22, %v3198_v16  ;;  %2706 = vmatmul.msk.bf16.gmra.mxu2 %vm538_vm0, %v2778_v57  ;;  %v2792_v22 = vld [vmem:[%s5751_s0 + $0x218] sm:$0xff] }
 0x13c   :  { %v1140_v29 = vadd.f32 %v1139_v49, %v3213_v23  ;;  %v3409_v49 = vpop.f32.mrf.mxu2 }
 0x13e   :  { %v3289_v20 = vpop.f32.mrf.mxu0  ;;  %v3366_v33 = vpop.f32.mrf.mxu1  ;;  %v1141_v28 = vadd.f32 %v1140_v29, %v3226_v32 }
 0x13f   :  { %6175 = vst [vmem:[#allocation52_spill] sm:$0xff] %v3289_v20 }
 0x140   :  { %6195 = vst [vmem:[#allocation72_spill] sm:$0xff] %v3366_v33  ;;  %v1142_v52 = vadd.f32 %v1141_v28, %v3241_v43 }
 0x142   :  { %v1143_v11 = vadd.f32 %v1142_v52, %v3251_v51 }
 0x144   :  { %v1144_v6 = vadd.f32 %v1143_v11, %v3265_v60  ;;  %v3420_v60 = vpop.f32.mrf.mxu3 }
 0x146   :  { %v3297_v31 = vpop.f32.mrf.mxu0  ;;  %v3386_v53 = vpop.f32.mrf.mxu1  ;;  %v1145_v57 = vadd.f32 %v1144_v6, %v3275_v5 }
 0x147   :  { %6177 = vst [vmem:[#allocation54_spill] sm:$0xff] %v3297_v31 }
 0x148   :  { %6198 = vst [vmem:[#allocation75_spill] sm:$0xff] %v3386_v53  ;;  %v1146_v28 = vadd.f32 %v1145_v57, %v3289_v20  ;;  %v2793_v57 = vld [vmem:[%s5751_s0 + $0x220] sm:$0xff] }
 0x14a   :  { %2720 = vmatmul.msk.bf16.gmra.mxu3 %vm538_vm0, %v2792_v22  ;;  %v1147_v52 = vadd.f32 %v1146_v28, %v3297_v31  ;;  %v3424_v22 = vpop.f32.mrf.mxu2 }
 0x14b   :  { %6206 = vst [vmem:[#allocation83_spill] sm:$0xff] %v3424_v22 }
 0x14c   :  { %v3439_v31 = vpop.f32.mrf.mxu3 }
 0x14e   :  { %v3309_v56 = vpop.f32.mrf.mxu0  ;;  %v3403_v16 = vpop.f32.mrf.mxu1 }
 0x14f   :  { %6181 = vst [vmem:[#allocation58_spill] sm:$0xff] %v3309_v56  ;;  %v1148_v51 = vadd.f32 %v1147_v52, %v3309_v56 }
 0x150   :  { %6202 = vst [vmem:[#allocation79_spill] sm:$0xff] %v3403_v16 }
 0x156   :  { %v3321_v40 = vpop.f32.mrf.mxu0  ;;  %v3417_v43 = vpop.f32.mrf.mxu1 }
 0x157   :  { %6185 = vst [vmem:[#allocation62_spill] sm:$0xff] %v3321_v40  ;;  %v1149_v11 = vadd.f32 %v1148_v51, %v3321_v40 }
 0x158   :  { %6204 = vst [vmem:[#allocation81_spill] sm:$0xff] %v3417_v43 }
 0x15a   :  { %2721 = vmatmul.msk.bf16.gmra.mxu3 %vm538_vm0, %v2793_v57 }
 0x15e   :  { %v3336_v10 = vpop.f32.mrf.mxu0  ;;  %v3436_v40 = vpop.f32.mrf.mxu1 }
 0x15f   :  { %6188 = vst [vmem:[#allocation65_spill] sm:$0xff] %v3336_v10  ;;  %v1150_v6 = vadd.f32 %v1149_v11, %v3336_v10  ;;  %v3441_v11 = vpop.f32.mrf.mxu2 }
 0x160   :  { %6208 = vst [vmem:[#allocation85_spill] sm:$0xff] %v3436_v40 }
 0x161   :  { %6209 = vst [vmem:[#allocation86_spill] sm:$0xff] %v3441_v11 }
 0x166   :  { %v3352_v24 = vpop.f32.mrf.mxu0 }
 0x167   :  { %6192 = vst [vmem:[#allocation69_spill] sm:$0xff] %v3352_v24  ;;  %v1151_v5 = vadd.f32 %v1150_v6, %v3352_v24  ;;  %v3457_v10 = vpop.f32.mrf.mxu2 }
 0x168   :  { %6213 = vst [vmem:[#allocation90_spill] sm:$0xff] %v3457_v10 }
 0x16e   :  { %v3364_v37 = vpop.f32.mrf.mxu0 }
 0x16f   :  { %6194 = vst [vmem:[#allocation71_spill] sm:$0xff] %v3364_v37  ;;  %v1152_v28 = vadd.f32 %v1151_v5, %v3364_v37 }
 0x176   :  { %v3380_v47 = vpop.f32.mrf.mxu0 }
 0x177   :  { %6197 = vst [vmem:[#allocation74_spill] sm:$0xff] %v3380_v47  ;;  %v1153_v51 = vadd.f32 %v1152_v28, %v3380_v47  ;;  %v3449_v28 = vpop.f32.mrf.mxu1 }
 0x178   :  { %6211 = vst [vmem:[#allocation88_spill] sm:$0xff] %v3449_v28 }
 0x17e   :  { %v3396_v63 = vpop.f32.mrf.mxu0 }
 0x17f   :  { %6201 = vst [vmem:[#allocation78_spill] sm:$0xff] %v3396_v63  ;;  %v1154_v56 = vadd.f32 %v1153_v51, %v3396_v63  ;;  %v2794_v51 = vld [vmem:[%s5751_s0 + $0x228] sm:$0xff]  ;;  %v3455_v63 = vpop.f32.mrf.mxu3 }
 0x180   :  { %6212 = vst [vmem:[#allocation89_spill] sm:$0xff] %v3455_v63  ;;  %2722 = vmatmul.msk.bf16.gmra.mxu3 %vm538_vm0, %v2794_v51 }
 0x186   :  { %v3412_v29 = vpop.f32.mrf.mxu0 }
 0x187   :  { %6203 = vst [vmem:[#allocation80_spill] sm:$0xff] %v3412_v29  ;;  %v1155_v6 = vadd.f32 %v1154_v56, %v3412_v29 }
 0x18e   :  { %v3422_v32 = vpop.f32.mrf.mxu0 }
 0x18f   :  { %6205 = vst [vmem:[#allocation82_spill] sm:$0xff] %v3422_v32  ;;  %v1156_v24 = vadd.f32 %v1155_v6, %v3422_v32 }
 0x196   :  { %v3434_v52 = vpop.f32.mrf.mxu0 }
 0x197   :  { %6207 = vst [vmem:[#allocation84_spill] sm:$0xff] %v3434_v52  ;;  %v1157_v5 = vadd.f32 %v1156_v24, %v3434_v52  ;;  %v3469_v52 = vpop.f32.mrf.mxu2 }
 0x198   :  { %6216 = vst [vmem:[#allocation93_spill] sm:$0xff] %v3469_v52 }
 0x19e   :  { %v3446_v37 = vpop.f32.mrf.mxu0 }
 0x19f   :  { %6210 = vst [vmem:[#allocation87_spill] sm:$0xff] %v3446_v37  ;;  %v1158_v57 = vadd.f32 %v1157_v5, %v3446_v37  ;;  %v3464_v37 = vpop.f32.mrf.mxu1 }
 0x1a0   :  { %6214 = vst [vmem:[#allocation91_spill] sm:$0xff] %v3464_v37 }
 0x1a1   :  { %v1159_v47 = vadd.f32 %v1158_v57, %v3050_v30  ;;  %v3467_v30 = vpop.f32.mrf.mxu3 }
 0x1a2   :  { %6215 = vst [vmem:[#allocation92_spill] sm:$0xff] %v3467_v30 }
 0x1a3   :  { %v1160_v56 = vadd.f32 %v1159_v47, %v3063_v34 }
 0x1a5   :  { %v1161_v24 = vadd.f32 %v1160_v56, %v3074_v38  ;;  %v2795_v56 = vld [vmem:[%s5751_s0 + $0x230] sm:$0xff] }
 0x1a6   :  { %2723 = vmatmul.msk.bf16.gmra.mxu3 %vm538_vm0, %v2795_v56 }
 0x1a7   :  { %v1162_v6 = vadd.f32 %v1161_v24, %v3087_v42 }
 0x1a9   :  { %v1163_v5 = vadd.f32 %v1162_v6, %v3098_v46  ;;  %v3479_v6 = vpop.f32.mrf.mxu1  ;;  %v3484_v46 = vpop.f32.mrf.mxu2 }
 0x1aa   :  { %6217 = vst [vmem:[#allocation94_spill] sm:$0xff] %v3479_v6 }
 0x1ab   :  { %v1164_v57 = vadd.f32 %v1163_v5, %v3111_v50  ;;  %v3482_v50 = vpop.f32.mrf.mxu3  ;;  %6219 = vst [vmem:[#allocation96_spill] sm:$0xff] %v3484_v46 }
 0x1ac   :  { %6218 = vst [vmem:[#allocation95_spill] sm:$0xff] %v3482_v50 }
 0x1ad   :  { %v1165_v32 = vadd.f32 %v1164_v57, %v3122_v54 }
 0x1af   :  { %v1166_v47 = vadd.f32 %v1165_v32, %v3135_v58 }
 0x1b1   :  { %v1167_v51 = vadd.f32 %v1166_v47, %v3146_v62  ;;  %v3490_v58 = vpop.f32.mrf.mxu1 }
 0x1b2   :  { %6220 = vst [vmem:[#allocation97_spill] sm:$0xff] %v3490_v58 }
 0x1b3   :  { %v1168_v24 = vadd.f32 %v1167_v51, %v3159_v2  ;;  %v3493_v56 = vpop.f32.mrf.mxu3  ;;  %v3495_v2 = vpop.f32.mrf.mxu2 }
 0x1b4   :  { %6221 = vst [vmem:[#allocation98_spill] sm:$0xff] %v3493_v56 }
 0x1b5   :  { %v1169_v5 = vadd.f32 %v1168_v24, %v3172_v7  ;;  %6222 = vst [vmem:[#allocation99_spill] sm:$0xff] %v3495_v2 }
 0x1b7   :  { %v1170_v32 = vadd.f32 %v1169_v5, %v3187_v12  ;;  %v2796_v5 = vld [vmem:[%s5751_s0 + $0x238] sm:$0xff] }
 0x1b8   :  { %2724 = vmatmul.msk.bf16.gmra.mxu3 %vm538_vm0, %v2796_v5 }
 0x1b9   :  { %v1171_v57 = vadd.f32 %v1170_v32, %v3200_v17 }
 0x1bb   :  { %v1172_v47 = vadd.f32 %v1171_v57, %v3215_v25  ;;  %v3510_v25 = vpop.f32.mrf.mxu2 }
 0x1bc   :  { %6225 = vst [vmem:[#allocation102_spill] sm:$0xff] %v3510_v25 }
 0x1bd   :  { %v1173_v62 = vadd.f32 %v1172_v47, %v3228_v35  ;;  %v3505_v35 = vpop.f32.mrf.mxu1 }
 0x1be   :  { %6223 = vst [vmem:[#allocation100_spill] sm:$0xff] %v3505_v35 }
 0x1bf   :  { %v1174_v51 = vadd.f32 %v1173_v62, %v3243_v44  ;;  %v3508_v44 = vpop.f32.mrf.mxu3 }
 0x1c0   :  { %6224 = vst [vmem:[#allocation101_spill] sm:$0xff] %v3508_v44 }
 0x1c1   :  { %v1175_v24 = vadd.f32 %v1174_v51, %v3261_v59 }
 0x1c3   :  { %v1176_v32 = vadd.f32 %v1175_v24, %v3273_v4 }
 0x1c5   :  { %v1177_v57 = vadd.f32 %v1176_v32, %v3287_v15  ;;  %v3516_v4 = vpop.f32.mrf.mxu1 }
 0x1c6   :  { %6226 = vst [vmem:[#allocation103_spill] sm:$0xff] %v3516_v4 }
 0x1c7   :  { %v1178_v47 = vadd.f32 %v1177_v57, %v3299_v39  ;;  %v3519_v57 = vpop.f32.mrf.mxu3  ;;  %v3521_v39 = vpop.f32.mrf.mxu2 }
 0x1c8   :  { %6227 = vst [vmem:[#allocation104_spill] sm:$0xff] %v3519_v57 }
 0x1c9   :  { %v1179_v62 = vadd.f32 %v1178_v47, %v3316_v14  ;;  %6228 = vst [vmem:[#allocation105_spill] sm:$0xff] %v3521_v39 }
 0x1cb   :  { %v1180_v51 = vadd.f32 %v1179_v62, %v3328_v21 }
 0x1cd   :  { %v1181_v59 = vadd.f32 %v1180_v51, %v3347_v19  ;;  %v3527_v19 = vpop.f32.mrf.mxu1 }
 0x1ce   :  { %6229 = vst [vmem:[#allocation106_spill] sm:$0xff] %v3527_v19 }
 0x1cf   :  { %v1182_v24 = vadd.f32 %v1181_v59, %v3366_v33  ;;  %v6246_v33 = vld [vmem:[#allocation63_spill] sm:$0xff] }
 0x1d1   :  { %v1183_v5 = vadd.f32 %v1182_v24, %v3386_v53  ;;  %v3530_v24 = vpop.f32.mrf.mxu3  ;;  %v3532_v53 = vpop.f32.mrf.mxu2 }
 0x1d2   :  { %6230 = vst [vmem:[#allocation107_spill] sm:$0xff] %v3530_v24 }
 0x1d3   :  { %v1184_v32 = vadd.f32 %v1183_v5, %v3403_v16  ;;  %6231 = vst [vmem:[#allocation108_spill] sm:$0xff] %v3532_v53 }
 0x1d5   :  { %v1185_v47 = vadd.f32 %v1184_v32, %v3417_v43 }
 0x1d7   :  { %v1186_v14 = vadd.f32 %v1185_v47, %v3436_v40  ;;  %v3538_v40 = vpop.f32.mrf.mxu1 }
 0x1d8   :  { %6232 = vst [vmem:[#allocation109_spill] sm:$0xff] %v3538_v40 }
 0x1d9   :  { %v1187_v62 = vadd.f32 %v1186_v14, %v3449_v28  ;;  %v6239_v28 = vld [vmem:[#allocation47_spill] sm:$0xff] }
 0x1db   :  { %v1188_v51 = vadd.f32 %v1187_v62, %v3464_v37  ;;  %v3541_v62 = vpop.f32.mrf.mxu3  ;;  %v3543_v37 = vpop.f32.mrf.mxu2 }
 0x1dc   :  { %6233 = vst [vmem:[#allocation110_spill] sm:$0xff] %v3541_v62 }
 0x1dd   :  { %v1189_v59 = vadd.f32 %v1188_v51, %v3479_v6  ;;  %6234 = vst [vmem:[#allocation111_spill] sm:$0xff] %v3543_v37 }
 0x1df   :  { %v1190_v5 = vadd.f32 %v1189_v59, %v3490_v58 }
 0x1e1   :  { %v1191_v16 = vadd.f32 %v1190_v5, %v3505_v35  ;;  %v6238_v35 = vld [vmem:[#allocation44_spill] sm:$0xff] }
 0x1e3   :  { %v1192_v32 = vadd.f32 %v1191_v16, %v3516_v4  ;;  %v3550_v4 = vpop.f32.mrf.mxu3 }
 0x1e4   :  { %6235 = vst [vmem:[#allocation112_spill] sm:$0xff] %v3550_v4 }
 0x1e5   :  { %v1193_v47 = vadd.f32 %v1192_v32, %v3527_v19  ;;  %v3552_v32 = vpop.f32.mrf.mxu2 }
 0x1e6   :  { %6236 = vst [vmem:[#allocation113_spill] sm:$0xff] %v3552_v32 }
 0x1e7   :  { %v1194_v14 = vadd.f32 %v1193_v47, %v3538_v40  ;;  %v6237_v40 = vld [vmem:[#allocation42_spill] sm:$0xff] }
 0x1e9   :  { %v1195_v51 = vadd.f32 %v1194_v14, %v3161_v3  ;;  %v6240_v3 = vld [vmem:[#allocation50_spill] sm:$0xff] }
 0x1eb   :  { %v1196_v6 = vadd.f32 %v1195_v51, %v3174_v8  ;;  %v3559_v8 = vpop.f32.mrf.mxu3 }
 0x1ec   :  { %6241 = vst [vmem:[#allocation47_spill] sm:$0xff] %v3559_v8 }
 0x1ed   :  { %v1197_v59 = vadd.f32 %v1196_v6, %v3189_v13  ;;  %v3561_v6 = vpop.f32.mrf.mxu2  ;;  %v6245_v13 = vld [vmem:[#allocation59_spill] sm:$0xff] }
 0x1ee   :  { %6242 = vst [vmem:[#allocation114_spill] sm:$0xff] %v3561_v6 }
 0x1ef   :  { %v1198_v5 = vadd.f32 %v1197_v59, %v3202_v18  ;;  %v6243_v59 = vld [vmem:[#allocation53_spill] sm:$0xff] }
 0x1f1   :  { %v1199_v16 = vadd.f32 %v1198_v5, %v3217_v26  ;;  %v6244_v26 = vld [vmem:[#allocation57_spill] sm:$0xff] }
 0x1f3   :  { %v1200_v47 = vadd.f32 %v1199_v16, %v3230_v36 }
 0x1f5   :  { %v1201_v19 = vadd.f32 %v1200_v47, %v6237_v40  ;;  %v3568_v40 = vpop.f32.mrf.mxu3 }
 0x1f6   :  { %6247 = vst [vmem:[#allocation63_spill] sm:$0xff] %v3568_v40 }
 0x1f7   :  { %v1202_v58 = vadd.f32 %v1201_v19, %v6238_v35  ;;  %v3570_v19 = vpop.f32.mrf.mxu2 }
 0x1f8   :  { %6248 = vst [vmem:[#allocation115_spill] sm:$0xff] %v3570_v19 }
 0x1f9   :  { %v1203_v14 = vadd.f32 %v1202_v58, %v6239_v28 }
 0x1fb   :  { %v1204_v51 = vadd.f32 %v1203_v14, %v6240_v3 }
 0x1fd   :  { %v1205_v5 = vadd.f32 %v1204_v51, %v6243_v59 }
 0x1ff   :  { %v1206_v18 = vadd.f32 %v1205_v5, %v6244_v26  ;;  %v3577_v26 = vpop.f32.mrf.mxu3 }
 0x200   :  { %6249 = vst [vmem:[#allocation116_spill] sm:$0xff] %v3577_v26 }
 0x201   :  { %v1207_v43 = vadd.f32 %v1206_v18, %v6245_v13  ;;  %v3579_v18 = vpop.f32.mrf.mxu2 }
 0x203   :  { %v1208_v16 = vadd.f32 %v1207_v43, %v6246_v33 }
 0x205   :  { %v1209_v47 = vadd.f32 %v1208_v16, %v3339_v48 }
 0x207   :  { %v1210_v58 = vadd.f32 %v1209_v47, %v3355_v27 }
 0x209   :  { %v1211_v14 = vadd.f32 %v1210_v58, %v3374_v55  ;;  %v3586_v55 = vpop.f32.mrf.mxu3 }
 0x20a   :  { %6250 = vst [vmem:[#allocation117_spill] sm:$0xff] %v3586_v55 }
 0x20b   :  { %v1212_v3 = vadd.f32 %v1211_v14, %v3391_v0  ;;  %v3588_v14 = vpop.f32.mrf.mxu2 }
 0x20d   :  { %v1213_v51 = vadd.f32 %v1212_v3, %v3409_v49 }
 0x20f   :  { %v1214_v5 = vadd.f32 %v1213_v51, %v3424_v22 }
 0x211   :  { %v1215_v43 = vadd.f32 %v1214_v5, %v3441_v11 }
 0x213   :  { %v1216_v16 = vadd.f32 %v1215_v43, %v3457_v10  ;;  %v3595_v10 = vpop.f32.mrf.mxu3 }
 0x214   :  { %6251 = vst [vmem:[#allocation118_spill] sm:$0xff] %v3595_v10 }
 0x215   :  { %v1217_v48 = vadd.f32 %v1216_v16, %v3469_v52  ;;  %v3597_v16 = vpop.f32.mrf.mxu2 }
 0x216   :  { %6252 = vst [vmem:[#allocation119_spill] sm:$0xff] %v3597_v16 }
 0x217   :  { %v1218_v47 = vadd.f32 %v1217_v48, %v3484_v46 }
 0x219   :  { %v1219_v58 = vadd.f32 %v1218_v47, %v3495_v2 }
 0x21b   :  { %v1220_v3 = vadd.f32 %v1219_v58, %v3510_v25 }
 0x21d   :  { %v1221_v51 = vadd.f32 %v1220_v3, %v3521_v39  ;;  %v3604_v39 = vpop.f32.mrf.mxu3 }
 0x21e   :  { %6253 = vst [vmem:[#allocation120_spill] sm:$0xff] %v3604_v39 }
 0x21f   :  { %v1222_v22 = vadd.f32 %v1221_v51, %v3532_v53  ;;  %v3606_v51 = vpop.f32.mrf.mxu2 }
 0x220   :  { %6254 = vst [vmem:[#allocation121_spill] sm:$0xff] %v3606_v51 }
 0x221   :  { %v1223_v5 = vadd.f32 %v1222_v22, %v3543_v37  ;;  %v6256_v37 = vld [vmem:[#allocation61_spill] sm:$0xff] }
 0x223   :  { %v1224_v43 = vadd.f32 %v1223_v5, %v3552_v32  ;;  %v6255_v5 = vld [vmem:[#allocation56_spill] sm:$0xff] }
 0x225   :  { %v1225_v48 = vadd.f32 %v1224_v43, %v3561_v6  ;;  %v6257_v6 = vld [vmem:[#allocation68_spill] sm:$0xff] }
 0x227   :  { %v1226_v47 = vadd.f32 %v1225_v48, %v3570_v19  ;;  %v3613_v19 = vpop.f32.mrf.mxu3 }
 0x228   :  { %6258 = vst [vmem:[#allocation56_spill] sm:$0xff] %v3613_v19 }
 0x229   :  { %v1227_v2 = vadd.f32 %v1226_v47, %v3579_v18 }
 0x22b   :  { %v1228_v58 = vadd.f32 %v1227_v2, %v3588_v14 }
 0x22d   :  { %v1229_v3 = vadd.f32 %v1228_v58, %v3597_v16 }
 0x22f   :  { %v1230_v22 = vadd.f32 %v1229_v3, %v3606_v51  ;;  %v3620_v51 = vpop.f32.mrf.mxu3 }
 0x230   :  { %6259 = vst [vmem:[#allocation61_spill] sm:$0xff] %v3620_v51 }
 0x231   :  { %v1231_v32 = vadd.f32 %v1230_v22, %v6255_v5 }
 0x233   :  { %v1232_v53 = vadd.f32 %v1231_v32, %v6256_v37 }
 0x235   :  { %v1233_v43 = vadd.f32 %v1232_v53, %v3332_v9 }
 0x237   :  { %v1234_v48 = vadd.f32 %v1233_v43, %v6257_v6  ;;  %v3626_v6 = vpop.f32.mrf.mxu3 }
 0x238   :  { %6260 = vst [vmem:[#allocation122_spill] sm:$0xff] %v3626_v6 }
 0x239   :  { %v1235_v2 = vadd.f32 %v1234_v48, %v3369_v41 }
 0x23b   :  { %v1236_v47 = vadd.f32 %v1235_v2, %v3389_v45 }
 0x23d   :  { %v1237_v58 = vadd.f32 %v1236_v47, %v3406_v1 }
 0x23f   :  { %v1238_v16 = vadd.f32 %v1237_v58, %v3420_v60  ;;  %v3630_v47 = vpop.f32.mrf.mxu3 }
 0x240   :  { %6261 = vst [vmem:[#allocation123_spill] sm:$0xff] %v3630_v47 }
 0x241   :  { %v1239_v3 = vadd.f32 %v1238_v16, %v3439_v31 }
 0x243   :  { %v1240_v32 = vadd.f32 %v1239_v3, %v3455_v63 }
 0x245   :  { %v1241_v53 = vadd.f32 %v1240_v32, %v3467_v30 }
 0x247   :  { %v1242_v22 = vadd.f32 %v1241_v53, %v3482_v50  ;;  %v3635_v63 = vpop.f32.mrf.mxu3 }
 0x248   :  { %6262 = vst [vmem:[#allocation124_spill] sm:$0xff] %v3635_v63 }
 0x249   :  { %v1243_v43 = vadd.f32 %v1242_v22, %v3493_v56 }
 0x24b   :  { %v1244_v48 = vadd.f32 %v1243_v43, %v3508_v44 }
 0x24d   :  { %v1245_v2 = vadd.f32 %v1244_v48, %v3519_v57 }
 0x24f   :  { %v1246_v16 = vadd.f32 %v1245_v2, %v3530_v24  ;;  %v3639_v22 = vpop.f32.mrf.mxu3 }
 0x250   :  { %6263 = vst [vmem:[#allocation125_spill] sm:$0xff] %v3639_v22 }
 0x251   :  { %v1247_v58 = vadd.f32 %v1246_v16, %v3541_v62 }
 0x253   :  { %v1248_v3 = vadd.f32 %v1247_v58, %v3550_v4 }
 0x255   :  { %v1249_v32 = vadd.f32 %v1248_v3, %v3559_v8 }
 0x257   :  { %v1250_v53 = vadd.f32 %v1249_v32, %v3568_v40  ;;  %v3644_v44 = vpop.f32.mrf.mxu3 }
 0x258   :  { %6264 = vst [vmem:[#allocation126_spill] sm:$0xff] %v3644_v44 }
 0x259   :  { %v1251_v43 = vadd.f32 %v1250_v53, %v3577_v26  ;;  %v6279_v26 = vld [vmem:[#allocation13_spill] sm:$0xff] }
 0x25b   :  { %v1252_v48 = vadd.f32 %v1251_v43, %v3586_v55 }
 0x25d   :  { %v1253_v57 = vadd.f32 %v1252_v48, %v3595_v10 }
 0x25f   :  { %v1254_v2 = vadd.f32 %v1253_v57, %v3604_v39  ;;  %v3648_v58 = vpop.f32.mrf.mxu3 }
 0x260   :  { %6265 = vst [vmem:[#allocation127_spill] sm:$0xff] %v3648_v58 }
 0x261   :  { %v1255_v16 = vadd.f32 %v1254_v2, %v3613_v19 }
 0x263   :  { %v1256_v3 = vadd.f32 %v1255_v16, %v3620_v51 }
 0x265   :  { %v1257_v32 = vadd.f32 %v1256_v3, %v3626_v6 }
 0x267   :  { %v1258_v40 = vadd.f32 %v1257_v32, %v3630_v47  ;;  %v3653_v8 = vpop.f32.mrf.mxu3 }
 0x268   :  { %6266 = vst [vmem:[#allocation128_spill] sm:$0xff] %v3653_v8 }
 0x269   :  { %v1259_v53 = vadd.f32 %v1258_v40, %v3635_v63  ;;  %v2917_v63 = vmov 1152.0  }
 0x26a   :  { %2913 = vrcp.f32 %v2917_v63 }
 0x26b   :  { %v1260_v43 = vadd.f32 %v1259_v53, %v3639_v22 }
 0x26d   :  { %v1261_v57 = vadd.f32 %v1260_v43, %v3644_v44 }
 0x26f   :  { %v3657_v48 = vpop.f32.mrf.mxu3  ;;  %v1262_v2 = vadd.f32 %v1261_v57, %v3648_v58 }
 0x270   :  { %6267 = vst [vmem:[#allocation129_spill] sm:$0xff] %v3657_v48  ;;  %v2914_v22 = vpop.eup %2913 }
 0x271   :  { %v1263_v19 = vadd.f32 %v1262_v2, %v3653_v8  ;;  %v1274_v43 = vmul.f32 1152.0, %v2914_v22  ;;  %vm1278_vm1 = vweird.f32 %v2914_v22 }
 0x273   :  { %v1264_v16 = vadd.f32 %v1263_v19, %v3657_v48  ;;  %v1275_v57 = vsub.f32 1.0, %v1274_v43 }
 0x275   :  { %v1276_v2 = vmul.f32 %v2914_v22, %v1275_v57  ;;  %v6274_v57 = vld [vmem:[#allocation5_spill] sm:$0xff] }
 0x277   :  { %v3662_v39 = vpop.f32.mrf.mxu3  ;;  %v1277_v6 = vadd.f32 %v2914_v22, %v1276_v2 }
 0x278   :  { %6268 = vst [vmem:[#allocation130_spill] sm:$0xff] %v3662_v39  ;;  %v1265_v3 = vadd.f32 %v1264_v16, %v3662_v39 }
 0x279   :  { %v3669_v48 = vsel %vm1278_vm1, %v2914_v22, %v1277_v6 }
 0x27a   :  { %6270 = vst [vmem:[#allocation132_spill] sm:$0xff] %v3669_v48 }
 0x27f   :  { %v3666_v32 = vpop.f32.mrf.mxu3 }
 0x280   :  { %6269 = vst [vmem:[#allocation131_spill] sm:$0xff] %v3666_v32  ;;  %v1266_v40 = vadd.f32 %v1265_v3, %v3666_v32  ;;  %v6271_v3 = vld [vmem:[#allocation2_spill] sm:$0xff]  ;;  %v6272_v32 = vld [vmem:[#allocation3_spill] sm:$0xff] }
 0x282   :  { %v1267_v53 = vrot.slane %v1266_v40, 4 }
 0x284   :  { %v1268_v47 = vadd.f32 %v1267_v53, %v1266_v40  ;;  %v6273_v53 = vld [vmem:[#allocation4_spill] sm:$0xff] }
 0x286   :  { %v1269_v44 = vrot.slane %v1268_v47, 2 }
 0x288   :  { %v1270_v58 = vadd.f32 %v1269_v44, %v1268_v47 }
 0x28a   :  { %v1271_v8 = vrot.slane %v1270_v58, 1 }
 0x28c   :  { %v1272_v19 = vadd.f32 %v1271_v8, %v1270_v58  ;;  %v6275_v8 = vld [vmem:[#allocation6_spill] sm:$0xff] }
 0x28e   :  { %v3672_v16 = vmul.f32 %v3669_v48, %v1272_v19  ;;  %v6276_v19 = vld [vmem:[#allocation8_spill] sm:$0xff] }
 0x290   :  { %v1281_v63 = vsub.f32 %v6271_v3, %v3672_v16  ;;  %v1282_v40 = vsub.f32 %v6272_v32, %v3672_v16  ;;  %v1283_v43 = vsub.f32 %v6273_v53, %v3672_v16  ;;  %v1284_v2 = vsub.f32 %v6274_v57, %v3672_v16  ;;  %v6277_v32 = vld [vmem:[#allocation10_spill] sm:$0xff] }
 0x291   :  { %v1285_v6 = vsub.f32 %v6275_v8, %v3672_v16  ;;  %v1286_v48 = vsub.f32 %v6276_v19, %v3672_v16  ;;  %v1287_v51 = vsub.f32 %v6277_v32, %v3672_v16  ;;  %v1289_v8 = vsub.f32 %v6279_v26, %v3672_v16 }
 0x292   :  { %v1425_v44 = vmul.f32 %v1281_v63, %v1281_v63  ;;  %v1426_v47 = vmul.f32 %v1282_v40, %v1282_v40  ;;  %v1427_v22 = vmul.f32 %v1283_v43, %v1283_v43  ;;  %v1428_v3 = vmul.f32 %v1284_v2, %v1284_v2  ;;  %v6278_v63 = vld [vmem:[#allocation11_spill] sm:$0xff] }
 0x293   :  { %v1429_v10 = vmul.f32 %v1285_v6, %v1285_v6  ;;  %v1288_v40 = vsub.f32 %v6278_v63, %v3672_v16  ;;  %v1430_v55 = vmul.f32 %v1286_v48, %v1286_v48  ;;  %v1431_v43 = vmul.f32 %v1287_v51, %v1287_v51 }
 0x294   :  { %v1569_v58 = vadd.f32 %v1426_v47, %v1425_v44  ;;  %v6280_v47 = vld [vmem:[#allocation15_spill] sm:$0xff]  ;;  %v1433_v6 = vmul.f32 %v1289_v8, %v1289_v8 }
 0x295   :  { %v1290_v19 = vsub.f32 %v6280_v47, %v3672_v16  ;;  %v1432_v2 = vmul.f32 %v1288_v40, %v1288_v40 }
 0x296   :  { %v1570_v39 = vadd.f32 %v1569_v58, %v1427_v22  ;;  %v6281_v58 = vld [vmem:[#allocation17_spill] sm:$0xff] }
 0x297   :  { %v1291_v32 = vsub.f32 %v6281_v58, %v3672_v16  ;;  %v1434_v48 = vmul.f32 %v1290_v19, %v1290_v19 }
 0x298   :  { %v1571_v53 = vadd.f32 %v1570_v39, %v1428_v3  ;;  %v6282_v3 = vld [vmem:[#allocation18_spill] sm:$0xff] }
 0x299   :  { %v1292_v63 = vsub.f32 %v6282_v3, %v3672_v16  ;;  %v1435_v51 = vmul.f32 %v1291_v32, %v1291_v32 }
 0x29a   :  { %v1572_v57 = vadd.f32 %v1571_v53, %v1429_v10  ;;  %v1293_v53 = vsub.f32 %v3144_v61, %v3672_v16 }
 0x29b   :  { %v1436_v40 = vmul.f32 %v1292_v63, %v1292_v63 }
 0x29c   :  { %v1573_v44 = vadd.f32 %v1572_v57, %v1430_v55  ;;  %v6283_v57 = vld [vmem:[#allocation22_spill] sm:$0xff]  ;;  %v1437_v8 = vmul.f32 %v1293_v53, %v1293_v53 }
 0x29d   :  { %v1294_v47 = vsub.f32 %v6283_v57, %v3672_v16 }
 0x29e   :  { %v1574_v22 = vadd.f32 %v1573_v44, %v1431_v43  ;;  %v6284_v44 = vld [vmem:[#allocation25_spill] sm:$0xff] }
 0x29f   :  { %v1295_v58 = vsub.f32 %v6284_v44, %v3672_v16  ;;  %v1438_v19 = vmul.f32 %v1294_v47, %v1294_v47 }
 0x2a0   :  { %v1575_v39 = vadd.f32 %v1574_v22, %v1432_v2  ;;  %v6285_v22 = vld [vmem:[#allocation28_spill] sm:$0xff] }
 0x2a1   :  { %v1296_v3 = vsub.f32 %v6285_v22, %v3672_v16  ;;  %v1439_v32 = vmul.f32 %v1295_v58, %v1295_v58 }
 0x2a2   :  { %v1576_v10 = vadd.f32 %v1575_v39, %v1433_v6  ;;  %v6286_v39 = vld [vmem:[#allocation31_spill] sm:$0xff] }
 0x2a3   :  { %v1297_v61 = vsub.f32 %v6286_v39, %v3672_v16  ;;  %v1440_v63 = vmul.f32 %v1296_v3, %v1296_v3 }
 0x2a4   :  { %v1577_v55 = vadd.f32 %v1576_v10, %v1434_v48  ;;  %v1298_v10 = vsub.f32 %v3213_v23, %v3672_v16 }
 0x2a5   :  { %v1441_v53 = vmul.f32 %v1297_v61, %v1297_v61 }
 0x2a6   :  { %v1578_v43 = vadd.f32 %v1577_v55, %v1435_v51  ;;  %v6287_v55 = vld [vmem:[#allocation37_spill] sm:$0xff]  ;;  %v1442_v47 = vmul.f32 %v1298_v10, %v1298_v10 }
 0x2a7   :  { %v1299_v44 = vsub.f32 %v6287_v55, %v3672_v16 }
 0x2a8   :  { %v1579_v2 = vadd.f32 %v1578_v43, %v1436_v40  ;;  %v6288_v43 = vld [vmem:[#allocation40_spill] sm:$0xff] }
 0x2a9   :  { %v1300_v22 = vsub.f32 %v6288_v43, %v3672_v16  ;;  %v1443_v58 = vmul.f32 %v1299_v44, %v1299_v44 }
 0x2aa   :  { %v1580_v6 = vadd.f32 %v1579_v2, %v1437_v8  ;;  %v6289_v2 = vld [vmem:[#allocation43_spill] sm:$0xff] }
 0x2ab   :  { %v1301_v39 = vsub.f32 %v6289_v2, %v3672_v16  ;;  %v1444_v3 = vmul.f32 %v1300_v22, %v1300_v22 }
 0x2ac   :  { %v1581_v48 = vadd.f32 %v1580_v6, %v1438_v19  ;;  %v6290_v6 = vld [vmem:[#allocation46_spill] sm:$0xff] }
 0x2ad   :  { %v1302_v23 = vsub.f32 %v6290_v6, %v3672_v16  ;;  %v1445_v61 = vmul.f32 %v1301_v39, %v1301_v39 }
 0x2ae   :  { %v1582_v51 = vadd.f32 %v1581_v48, %v1439_v32  ;;  %v6291_v48 = vld [vmem:[#allocation49_spill] sm:$0xff] }
 0x2af   :  { %v1303_v55 = vsub.f32 %v6291_v48, %v3672_v16  ;;  %v1446_v10 = vmul.f32 %v1302_v23, %v1302_v23 }
 0x2b0   :  { %v1583_v40 = vadd.f32 %v1582_v51, %v1440_v63  ;;  %v1304_v51 = vsub.f32 %v3289_v20, %v3672_v16 }
 0x2b1   :  { %v1447_v44 = vmul.f32 %v1303_v55, %v1303_v55 }
 0x2b2   :  { %v1584_v8 = vadd.f32 %v1583_v40, %v1441_v53  ;;  %v6292_v40 = vld [vmem:[#allocation54_spill] sm:$0xff]  ;;  %v1448_v22 = vmul.f32 %v1304_v51, %v1304_v51 }
 0x2b3   :  { %v1305_v2 = vsub.f32 %v6292_v40, %v3672_v16 }
 0x2b4   :  { %v1585_v19 = vadd.f32 %v1584_v8, %v1442_v47  ;;  %v6293_v8 = vld [vmem:[#allocation58_spill] sm:$0xff] }
 0x2b5   :  { %v1306_v6 = vsub.f32 %v6293_v8, %v3672_v16  ;;  %v1449_v39 = vmul.f32 %v1305_v2, %v1305_v2 }
 0x2b6   :  { %v1586_v32 = vadd.f32 %v1585_v19, %v1443_v58  ;;  %v6294_v19 = vld [vmem:[#allocation62_spill] sm:$0xff] }
 0x2b7   :  { %v1307_v48 = vsub.f32 %v6294_v19, %v3672_v16  ;;  %v1450_v23 = vmul.f32 %v1306_v6, %v1306_v6 }
 0x2b8   :  { %v1587_v63 = vadd.f32 %v1586_v32, %v1444_v3  ;;  %v6295_v32 = vld [vmem:[#allocation65_spill] sm:$0xff] }
 0x2b9   :  { %v1308_v20 = vsub.f32 %v6295_v32, %v3672_v16  ;;  %v1451_v55 = vmul.f32 %v1307_v48, %v1307_v48 }
 0x2ba   :  { %v1588_v53 = vadd.f32 %v1587_v63, %v1445_v61  ;;  %v6296_v63 = vld [vmem:[#allocation69_spill] sm:$0xff] }
 0x2bb   :  { %v1309_v40 = vsub.f32 %v6296_v63, %v3672_v16  ;;  %v1452_v51 = vmul.f32 %v1308_v20, %v1308_v20 }
 0x2bc   :  { %v1589_v47 = vadd.f32 %v1588_v53, %v1446_v10  ;;  %v6297_v53 = vld [vmem:[#allocation71_spill] sm:$0xff] }
 0x2bd   :  { %v1310_v8 = vsub.f32 %v6297_v53, %v3672_v16  ;;  %v1453_v2 = vmul.f32 %v1309_v40, %v1309_v40 }
 0x2be   :  { %v1590_v58 = vadd.f32 %v1589_v47, %v1447_v44  ;;  %v6298_v47 = vld [vmem:[#allocation74_spill] sm:$0xff] }
 0x2bf   :  { %v1311_v19 = vsub.f32 %v6298_v47, %v3672_v16  ;;  %v1454_v6 = vmul.f32 %v1310_v8, %v1310_v8 }
 0x2c0   :  { %v1591_v3 = vadd.f32 %v1590_v58, %v1448_v22  ;;  %v6299_v58 = vld [vmem:[#allocation78_spill] sm:$0xff] }
 0x2c1   :  { %v1312_v32 = vsub.f32 %v6299_v58, %v3672_v16  ;;  %v1455_v48 = vmul.f32 %v1311_v19, %v1311_v19 }
 0x2c2   :  { %v1592_v61 = vadd.f32 %v1591_v3, %v1449_v39  ;;  %v1313_v3 = vsub.f32 %v3412_v29, %v3672_v16 }
 0x2c3   :  { %v1456_v20 = vmul.f32 %v1312_v32, %v1312_v32 }
 0x2c4   :  { %v1593_v10 = vadd.f32 %v1592_v61, %v1450_v23  ;;  %v6300_v61 = vld [vmem:[#allocation82_spill] sm:$0xff]  ;;  %v1457_v40 = vmul.f32 %v1313_v3, %v1313_v3 }
 0x2c5   :  { %v1314_v53 = vsub.f32 %v6300_v61, %v3672_v16 }
 0x2c6   :  { %v1594_v44 = vadd.f32 %v1593_v10, %v1451_v55  ;;  %v6301_v10 = vld [vmem:[#allocation84_spill] sm:$0xff] }
 0x2c7   :  { %v1315_v47 = vsub.f32 %v6301_v10, %v3672_v16  ;;  %v1458_v8 = vmul.f32 %v1314_v53, %v1314_v53 }
 0x2c8   :  { %v1595_v22 = vadd.f32 %v1594_v44, %v1452_v51  ;;  %v6302_v44 = vld [vmem:[#allocation87_spill] sm:$0xff] }
 0x2c9   :  { %v1316_v58 = vsub.f32 %v6302_v44, %v3672_v16  ;;  %v1459_v19 = vmul.f32 %v1315_v47, %v1315_v47 }
 0x2ca   :  { %v1596_v39 = vadd.f32 %v1595_v22, %v1453_v2  ;;  %v6303_v22 = vld [vmem:[#allocation7_spill] sm:$0xff] }
 0x2cb   :  { %v1317_v29 = vsub.f32 %v6303_v22, %v3672_v16  ;;  %v1460_v32 = vmul.f32 %v1316_v58, %v1316_v58 }
 0x2cc   :  { %v1597_v23 = vadd.f32 %v1596_v39, %v1454_v6  ;;  %v1318_v39 = vsub.f32 %v3063_v34, %v3672_v16 }
 0x2cd   :  { %v1461_v3 = vmul.f32 %v1317_v29, %v1317_v29 }
 0x2ce   :  { %v1598_v55 = vadd.f32 %v1597_v23, %v1455_v48  ;;  %v1319_v23 = vsub.f32 %v3074_v38, %v3672_v16  ;;  %v1462_v53 = vmul.f32 %v1318_v39, %v1318_v39 }
 0x2d0   :  { %v1599_v51 = vadd.f32 %v1598_v55, %v1456_v20  ;;  %v1320_v55 = vsub.f32 %v3087_v42, %v3672_v16  ;;  %v1463_v47 = vmul.f32 %v1319_v23, %v1319_v23 }
 0x2d2   :  { %v1600_v2 = vadd.f32 %v1599_v51, %v1457_v40  ;;  %v6304_v51 = vld [vmem:[#allocation14_spill] sm:$0xff]  ;;  %v1464_v58 = vmul.f32 %v1320_v55, %v1320_v55 }
 0x2d3   :  { %v1321_v22 = vsub.f32 %v6304_v51, %v3672_v16 }
 0x2d4   :  { %v1601_v6 = vadd.f32 %v1600_v2, %v1458_v8  ;;  %v6305_v2 = vld [vmem:[#allocation16_spill] sm:$0xff] }
 0x2d5   :  { %v1322_v34 = vsub.f32 %v6305_v2, %v3672_v16  ;;  %v1465_v29 = vmul.f32 %v1321_v22, %v1321_v22 }
 0x2d6   :  { %v1602_v48 = vadd.f32 %v1601_v6, %v1459_v19  ;;  %v1323_v6 = vsub.f32 %v3122_v54, %v3672_v16 }
 0x2d7   :  { %v1466_v39 = vmul.f32 %v1322_v34, %v1322_v34 }
 0x2d8   :  { %v1603_v20 = vadd.f32 %v1602_v48, %v1460_v32  ;;  %v6306_v48 = vld [vmem:[#allocation19_spill] sm:$0xff]  ;;  %v1467_v23 = vmul.f32 %v1323_v6, %v1323_v6 }
 0x2d9   :  { %v1324_v42 = vsub.f32 %v6306_v48, %v3672_v16 }
 0x2da   :  { %v1604_v40 = vadd.f32 %v1603_v20, %v1461_v3  ;;  %v6307_v20 = vld [vmem:[#allocation21_spill] sm:$0xff] }
 0x2db   :  { %v1325_v51 = vsub.f32 %v6307_v20, %v3672_v16  ;;  %v1468_v55 = vmul.f32 %v1324_v42, %v1324_v42 }
 0x2dc   :  { %v1605_v8 = vadd.f32 %v1604_v40, %v1462_v53  ;;  %v6308_v40 = vld [vmem:[#allocation23_spill] sm:$0xff] }
 0x2dd   :  { %v1326_v2 = vsub.f32 %v6308_v40, %v3672_v16  ;;  %v1469_v22 = vmul.f32 %v1325_v51, %v1325_v51 }
 0x2de   :  { %v1606_v19 = vadd.f32 %v1605_v8, %v1463_v47  ;;  %v1327_v8 = vsub.f32 %v3172_v7, %v3672_v16 }
 0x2df   :  { %v1470_v34 = vmul.f32 %v1326_v2, %v1326_v2 }
 0x2e0   :  { %v1607_v32 = vadd.f32 %v1606_v19, %v1464_v58  ;;  %v1328_v19 = vsub.f32 %v3187_v12, %v3672_v16  ;;  %v1471_v6 = vmul.f32 %v1327_v8, %v1327_v8 }
 0x2e2   :  { %v1608_v3 = vadd.f32 %v1607_v32, %v1465_v29  ;;  %v1329_v32 = vsub.f32 %v3200_v17, %v3672_v16  ;;  %v1472_v42 = vmul.f32 %v1328_v19, %v1328_v19 }
 0x2e4   :  { %v1609_v53 = vadd.f32 %v1608_v3, %v1466_v39  ;;  %v6309_v3 = vld [vmem:[#allocation35_spill] sm:$0xff]  ;;  %v1473_v51 = vmul.f32 %v1329_v32, %v1329_v32 }
 0x2e5   :  { %v1330_v40 = vsub.f32 %v6309_v3, %v3672_v16 }
 0x2e6   :  { %v1610_v47 = vadd.f32 %v1609_v53, %v1467_v23  ;;  %v6310_v53 = vld [vmem:[#allocation38_spill] sm:$0xff] }
 0x2e7   :  { %v1331_v7 = vsub.f32 %v6310_v53, %v3672_v16  ;;  %v1474_v2 = vmul.f32 %v1330_v40, %v1330_v40 }
 0x2e8   :  { %v1611_v58 = vadd.f32 %v1610_v47, %v1468_v55  ;;  %v6311_v47 = vld [vmem:[#allocation41_spill] sm:$0xff] }
 0x2e9   :  { %v1332_v12 = vsub.f32 %v6311_v47, %v3672_v16  ;;  %v1475_v8 = vmul.f32 %v1331_v7, %v1331_v7 }
 0x2ea   :  { %v1612_v29 = vadd.f32 %v1611_v58, %v1469_v22  ;;  %v6312_v58 = vld [vmem:[#allocation45_spill] sm:$0xff] }
 0x2eb   :  { %v1333_v17 = vsub.f32 %v6312_v58, %v3672_v16  ;;  %v1476_v19 = vmul.f32 %v1332_v12, %v1332_v12 }
 0x2ec   :  { %v1613_v39 = vadd.f32 %v1612_v29, %v1470_v34  ;;  %v6313_v29 = vld [vmem:[#allocation48_spill] sm:$0xff] }
 0x2ed   :  { %v1334_v3 = vsub.f32 %v6313_v29, %v3672_v16  ;;  %v1477_v32 = vmul.f32 %v1333_v17, %v1333_v17 }
 0x2ee   :  { %v1614_v23 = vadd.f32 %v1613_v39, %v1471_v6  ;;  %v1335_v39 = vsub.f32 %v3287_v15, %v3672_v16 }
 0x2ef   :  { %v1478_v40 = vmul.f32 %v1334_v3, %v1334_v3 }
 0x2f0   :  { %v1615_v55 = vadd.f32 %v1614_v23, %v1472_v42  ;;  %v6314_v23 = vld [vmem:[#allocation55_spill] sm:$0xff]  ;;  %v1479_v7 = vmul.f32 %v1335_v39, %v1335_v39 }
 0x2f1   :  { %v1336_v47 = vsub.f32 %v6314_v23, %v3672_v16 }
 0x2f2   :  { %v1616_v22 = vadd.f32 %v1615_v55, %v1473_v51  ;;  %v6315_v55 = vld [vmem:[#allocation60_spill] sm:$0xff] }
 0x2f3   :  { %v1337_v58 = vsub.f32 %v6315_v55, %v3672_v16  ;;  %v1480_v12 = vmul.f32 %v1336_v47, %v1336_v47 }
 0x2f4   :  { %v1617_v34 = vadd.f32 %v1616_v22, %v1474_v2  ;;  %v1338_v22 = vsub.f32 %v3328_v21, %v3672_v16 }
 0x2f5   :  { %v1481_v17 = vmul.f32 %v1337_v58, %v1337_v58 }
 0x2f6   :  { %v1618_v6 = vadd.f32 %v1617_v34, %v1475_v8  ;;  %v6316_v34 = vld [vmem:[#allocation67_spill] sm:$0xff]  ;;  %v1482_v3 = vmul.f32 %v1338_v22, %v1338_v22 }
 0x2f7   :  { %v1339_v15 = vsub.f32 %v6316_v34, %v3672_v16 }
 0x2f8   :  { %v1619_v42 = vadd.f32 %v1618_v6, %v1476_v19  ;;  %v6317_v6 = vld [vmem:[#allocation72_spill] sm:$0xff] }
 0x2f9   :  { %v1340_v23 = vsub.f32 %v6317_v6, %v3672_v16  ;;  %v1483_v39 = vmul.f32 %v1339_v15, %v1339_v15 }
 0x2fa   :  { %v1620_v51 = vadd.f32 %v1619_v42, %v1477_v32  ;;  %v6318_v42 = vld [vmem:[#allocation75_spill] sm:$0xff] }
 0x2fb   :  { %v1341_v55 = vsub.f32 %v6318_v42, %v3672_v16  ;;  %v1484_v47 = vmul.f32 %v1340_v23, %v1340_v23 }
 0x2fc   :  { %v1621_v2 = vadd.f32 %v1620_v51, %v1478_v40  ;;  %v6319_v51 = vld [vmem:[#allocation79_spill] sm:$0xff] }
 0x2fd   :  { %v1342_v21 = vsub.f32 %v6319_v51, %v3672_v16  ;;  %v1485_v58 = vmul.f32 %v1341_v55, %v1341_v55 }
 0x2fe   :  { %v1622_v8 = vadd.f32 %v1621_v2, %v1479_v7  ;;  %v6320_v2 = vld [vmem:[#allocation81_spill] sm:$0xff] }
 0x2ff   :  { %v1343_v34 = vsub.f32 %v6320_v2, %v3672_v16  ;;  %v1486_v22 = vmul.f32 %v1342_v21, %v1342_v21 }
 0x300   :  { %v1623_v19 = vadd.f32 %v1622_v8, %v1480_v12  ;;  %v6321_v8 = vld [vmem:[#allocation85_spill] sm:$0xff] }
 0x301   :  { %v1344_v6 = vsub.f32 %v6321_v8, %v3672_v16  ;;  %v1487_v15 = vmul.f32 %v1343_v34, %v1343_v34 }
 0x302   :  { %v1624_v32 = vadd.f32 %v1623_v19, %v1481_v17  ;;  %v6322_v19 = vld [vmem:[#allocation88_spill] sm:$0xff] }
 0x303   :  { %v1345_v42 = vsub.f32 %v6322_v19, %v3672_v16  ;;  %v1488_v23 = vmul.f32 %v1344_v6, %v1344_v6 }
 0x304   :  { %v1625_v40 = vadd.f32 %v1624_v32, %v1482_v3  ;;  %v6323_v32 = vld [vmem:[#allocation91_spill] sm:$0xff] }
 0x305   :  { %v1346_v51 = vsub.f32 %v6323_v32, %v3672_v16  ;;  %v1489_v55 = vmul.f32 %v1345_v42, %v1345_v42 }
 0x306   :  { %v1626_v7 = vadd.f32 %v1625_v40, %v1483_v39  ;;  %v6324_v40 = vld [vmem:[#allocation94_spill] sm:$0xff] }
 0x307   :  { %v1347_v2 = vsub.f32 %v6324_v40, %v3672_v16  ;;  %v1490_v21 = vmul.f32 %v1346_v51, %v1346_v51 }
 0x308   :  { %v1627_v12 = vadd.f32 %v1626_v7, %v1484_v47  ;;  %v6325_v7 = vld [vmem:[#allocation97_spill] sm:$0xff] }
 0x309   :  { %v1348_v8 = vsub.f32 %v6325_v7, %v3672_v16  ;;  %v1491_v34 = vmul.f32 %v1347_v2, %v1347_v2 }
 0x30a   :  { %v1628_v17 = vadd.f32 %v1627_v12, %v1485_v58  ;;  %v6326_v12 = vld [vmem:[#allocation100_spill] sm:$0xff] }
 0x30b   :  { %v1349_v19 = vsub.f32 %v6326_v12, %v3672_v16  ;;  %v1492_v6 = vmul.f32 %v1348_v8, %v1348_v8 }
 0x30c   :  { %v1629_v3 = vadd.f32 %v1628_v17, %v1486_v22  ;;  %v6327_v17 = vld [vmem:[#allocation103_spill] sm:$0xff] }
 0x30d   :  { %v1350_v32 = vsub.f32 %v6327_v17, %v3672_v16  ;;  %v1493_v42 = vmul.f32 %v1349_v19, %v1349_v19 }
 0x30e   :  { %v1630_v39 = vadd.f32 %v1629_v3, %v1487_v15  ;;  %v6328_v3 = vld [vmem:[#allocation106_spill] sm:$0xff] }
 0x30f   :  { %v1351_v40 = vsub.f32 %v6328_v3, %v3672_v16  ;;  %v1494_v51 = vmul.f32 %v1350_v32, %v1350_v32 }
 0x310   :  { %v1631_v47 = vadd.f32 %v1630_v39, %v1488_v23  ;;  %v6329_v39 = vld [vmem:[#allocation109_spill] sm:$0xff] }
 0x311   :  { %v1352_v7 = vsub.f32 %v6329_v39, %v3672_v16  ;;  %v1495_v2 = vmul.f32 %v1351_v40, %v1351_v40 }
 0x312   :  { %v1632_v58 = vadd.f32 %v1631_v47, %v1489_v55  ;;  %v6330_v47 = vld [vmem:[#allocation24_spill] sm:$0xff] }
 0x313   :  { %v1353_v12 = vsub.f32 %v6330_v47, %v3672_v16  ;;  %v1496_v8 = vmul.f32 %v1352_v7, %v1352_v7 }
 0x314   :  { %v1633_v22 = vadd.f32 %v1632_v58, %v1490_v21  ;;  %v6331_v58 = vld [vmem:[#allocation27_spill] sm:$0xff] }
 0x315   :  { %v1354_v17 = vsub.f32 %v6331_v58, %v3672_v16  ;;  %v1497_v19 = vmul.f32 %v1353_v12, %v1353_v12 }
 0x316   :  { %v1634_v15 = vadd.f32 %v1633_v22, %v1491_v34  ;;  %v6332_v22 = vld [vmem:[#allocation30_spill] sm:$0xff] }
 0x317   :  { %v1355_v3 = vsub.f32 %v6332_v22, %v3672_v16  ;;  %v1498_v32 = vmul.f32 %v1354_v17, %v1354_v17 }
 0x318   :  { %v1635_v23 = vadd.f32 %v1634_v15, %v1492_v6  ;;  %v6333_v15 = vld [vmem:[#allocation33_spill] sm:$0xff] }
 0x319   :  { %v1356_v39 = vsub.f32 %v6333_v15, %v3672_v16  ;;  %v1499_v40 = vmul.f32 %v1355_v3, %v1355_v3 }
 0x31a   :  { %v1636_v55 = vadd.f32 %v1635_v23, %v1493_v42  ;;  %v6334_v23 = vld [vmem:[#allocation36_spill] sm:$0xff] }
 0x31b   :  { %v1357_v47 = vsub.f32 %v6334_v23, %v3672_v16  ;;  %v1500_v7 = vmul.f32 %v1356_v39, %v1356_v39 }
 0x31c   :  { %v1637_v21 = vadd.f32 %v1636_v55, %v1494_v51  ;;  %v1358_v55 = vsub.f32 %v3230_v36, %v3672_v16 }
 0x31d   :  { %v1501_v12 = vmul.f32 %v1357_v47, %v1357_v47 }
 0x31e   :  { %v1638_v34 = vadd.f32 %v1637_v21, %v1495_v2  ;;  %v6335_v21 = vld [vmem:[#allocation42_spill] sm:$0xff]  ;;  %v1502_v17 = vmul.f32 %v1358_v55, %v1358_v55 }
 0x31f   :  { %v1359_v22 = vsub.f32 %v6335_v21, %v3672_v16 }
 0x320   :  { %v1639_v6 = vadd.f32 %v1638_v34, %v1496_v8  ;;  %v1360_v34 = vsub.f32 %v6238_v35, %v3672_v16 }
 0x321   :  { %v1503_v3 = vmul.f32 %v1359_v22, %v1359_v22 }
 0x322   :  { %v1640_v42 = vadd.f32 %v1639_v6, %v1497_v19  ;;  %v1361_v6 = vsub.f32 %v6239_v28, %v3672_v16  ;;  %v1504_v39 = vmul.f32 %v1360_v34, %v1360_v34 }
 0x324   :  { %v1641_v51 = vadd.f32 %v1640_v42, %v1498_v32  ;;  %v6336_v42 = vld [vmem:[#allocation50_spill] sm:$0xff]  ;;  %v1505_v47 = vmul.f32 %v1361_v6, %v1361_v6 }
 0x325   :  { %v1362_v36 = vsub.f32 %v6336_v42, %v3672_v16 }
 0x326   :  { %v1642_v2 = vadd.f32 %v1641_v51, %v1499_v40  ;;  %v1363_v51 = vsub.f32 %v6243_v59, %v3672_v16 }
 0x327   :  { %v1506_v55 = vmul.f32 %v1362_v36, %v1362_v36 }
 0x328   :  { %v1643_v8 = vadd.f32 %v1642_v2, %v1500_v7  ;;  %v6337_v2 = vld [vmem:[#allocation57_spill] sm:$0xff]  ;;  %v1507_v22 = vmul.f32 %v1363_v51, %v1363_v51 }
 0x329   :  { %v1364_v35 = vsub.f32 %v6337_v2, %v3672_v16 }
 0x32a   :  { %v1644_v19 = vadd.f32 %v1643_v8, %v1501_v12  ;;  %v1365_v8 = vsub.f32 %v6245_v13, %v3672_v16 }
 0x32b   :  { %v1508_v34 = vmul.f32 %v1364_v35, %v1364_v35 }
 0x32c   :  { %v1645_v32 = vadd.f32 %v1644_v19, %v1502_v17  ;;  %v1366_v19 = vsub.f32 %v6246_v33, %v3672_v16  ;;  %v1509_v6 = vmul.f32 %v1365_v8, %v1365_v8 }
 0x32e   :  { %v1646_v40 = vadd.f32 %v1645_v32, %v1503_v3  ;;  %v6338_v32 = vld [vmem:[#allocation66_spill] sm:$0xff]  ;;  %v1510_v36 = vmul.f32 %v1366_v19, %v1366_v19 }
 0x32f   :  { %v1367_v59 = vsub.f32 %v6338_v32, %v3672_v16 }
 0x330   :  { %v1647_v7 = vadd.f32 %v1646_v40, %v1504_v39  ;;  %v1368_v40 = vsub.f32 %v3355_v27, %v3672_v16 }
 0x331   :  { %v1511_v51 = vmul.f32 %v1367_v59, %v1367_v59 }
 0x332   :  { %v1648_v12 = vadd.f32 %v1647_v7, %v1505_v47  ;;  %v6339_v7 = vld [vmem:[#allocation73_spill] sm:$0xff]  ;;  %v1512_v35 = vmul.f32 %v1368_v40, %v1368_v40 }
 0x333   :  { %v1369_v13 = vsub.f32 %v6339_v7, %v3672_v16 }
 0x334   :  { %v1649_v17 = vadd.f32 %v1648_v12, %v1506_v55  ;;  %v1370_v12 = vsub.f32 %v3391_v0, %v3672_v16 }
 0x335   :  { %v1513_v8 = vmul.f32 %v1369_v13, %v1369_v13 }
 0x336   :  { %v1650_v3 = vadd.f32 %v1649_v17, %v1507_v22  ;;  %v1371_v17 = vsub.f32 %v3409_v49, %v3672_v16  ;;  %v1514_v19 = vmul.f32 %v1370_v12, %v1370_v12 }
 0x338   :  { %v1651_v39 = vadd.f32 %v1650_v3, %v1508_v34  ;;  %v6340_v3 = vld [vmem:[#allocation83_spill] sm:$0xff]  ;;  %v1515_v59 = vmul.f32 %v1371_v17, %v1371_v17 }
 0x339   :  { %v1372_v27 = vsub.f32 %v6340_v3, %v3672_v16 }
 0x33a   :  { %v1652_v47 = vadd.f32 %v1651_v39, %v1509_v6  ;;  %v1373_v39 = vsub.f32 %v3441_v11, %v3672_v16 }
 0x33b   :  { %v1516_v40 = vmul.f32 %v1372_v27, %v1372_v27 }
 0x33c   :  { %v1653_v55 = vadd.f32 %v1652_v47, %v1510_v36  ;;  %v6341_v47 = vld [vmem:[#allocation90_spill] sm:$0xff]  ;;  %v1517_v13 = vmul.f32 %v1373_v39, %v1373_v39 }
 0x33d   :  { %v1374_v0 = vsub.f32 %v6341_v47, %v3672_v16 }
 0x33e   :  { %v1654_v22 = vadd.f32 %v1653_v55, %v1511_v51  ;;  %v1375_v55 = vsub.f32 %v3469_v52, %v3672_v16 }
 0x33f   :  { %v1518_v12 = vmul.f32 %v1374_v0, %v1374_v0 }
 0x340   :  { %v1655_v34 = vadd.f32 %v1654_v22, %v1512_v35  ;;  %v1376_v22 = vsub.f32 %v3484_v46, %v3672_v16  ;;  %v1519_v17 = vmul.f32 %v1375_v55, %v1375_v55 }
 0x342   :  { %v1656_v6 = vadd.f32 %v1655_v34, %v1513_v8  ;;  %v6342_v34 = vld [vmem:[#allocation99_spill] sm:$0xff]  ;;  %v1520_v27 = vmul.f32 %v1376_v22, %v1376_v22 }
 0x343   :  { %v1377_v11 = vsub.f32 %v6342_v34, %v3672_v16 }
 0x344   :  { %v1657_v36 = vadd.f32 %v1656_v6, %v1514_v19  ;;  %v1378_v6 = vsub.f32 %v3510_v25, %v3672_v16 }
 0x345   :  { %v1521_v39 = vmul.f32 %v1377_v11, %v1377_v11 }
 0x346   :  { %v1658_v51 = vadd.f32 %v1657_v36, %v1515_v59  ;;  %v6343_v36 = vld [vmem:[#allocation105_spill] sm:$0xff]  ;;  %v1522_v0 = vmul.f32 %v1378_v6, %v1378_v6 }
 0x347   :  { %v1379_v52 = vsub.f32 %v6343_v36, %v3672_v16 }
 0x348   :  { %v1659_v35 = vadd.f32 %v1658_v51, %v1516_v40  ;;  %v6344_v51 = vld [vmem:[#allocation108_spill] sm:$0xff] }
 0x349   :  { %v1380_v46 = vsub.f32 %v6344_v51, %v3672_v16  ;;  %v1523_v55 = vmul.f32 %v1379_v52, %v1379_v52 }
 0x34a   :  { %v1660_v8 = vadd.f32 %v1659_v35, %v1517_v13  ;;  %v6345_v35 = vld [vmem:[#allocation111_spill] sm:$0xff] }
 0x34b   :  { %v1381_v34 = vsub.f32 %v6345_v35, %v3672_v16  ;;  %v1524_v22 = vmul.f32 %v1380_v46, %v1380_v46 }
 0x34c   :  { %v1661_v19 = vadd.f32 %v1660_v8, %v1518_v12  ;;  %v6346_v8 = vld [vmem:[#allocation113_spill] sm:$0xff] }
 0x34d   :  { %v1382_v25 = vsub.f32 %v6346_v8, %v3672_v16  ;;  %v1525_v11 = vmul.f32 %v1381_v34, %v1381_v34 }
 0x34e   :  { %v1662_v59 = vadd.f32 %v1661_v19, %v1519_v17  ;;  %v6347_v19 = vld [vmem:[#allocation114_spill] sm:$0xff] }
 0x34f   :  { %v1383_v36 = vsub.f32 %v6347_v19, %v3672_v16  ;;  %v1526_v6 = vmul.f32 %v1382_v25, %v1382_v25 }
 0x350   :  { %v1663_v40 = vadd.f32 %v1662_v59, %v1520_v27  ;;  %v6348_v59 = vld [vmem:[#allocation115_spill] sm:$0xff] }
 0x351   :  { %v1384_v51 = vsub.f32 %v6348_v59, %v3672_v16  ;;  %v1527_v52 = vmul.f32 %v1383_v36, %v1383_v36 }
 0x352   :  { %v1664_v13 = vadd.f32 %v1663_v40, %v1521_v39  ;;  %v1385_v40 = vsub.f32 %v3579_v18, %v3672_v16 }
 0x353   :  { %v1528_v46 = vmul.f32 %v1384_v51, %v1384_v51 }
 0x354   :  { %v1665_v12 = vadd.f32 %v1664_v13, %v1522_v0  ;;  %v1386_v13 = vsub.f32 %v3588_v14, %v3672_v16  ;;  %v1529_v34 = vmul.f32 %v1385_v40, %v1385_v40 }
 0x356   :  { %v1666_v17 = vadd.f32 %v1665_v12, %v1523_v55  ;;  %v6349_v12 = vld [vmem:[#allocation119_spill] sm:$0xff]  ;;  %v1530_v25 = vmul.f32 %v1386_v13, %v1386_v13 }
 0x357   :  { %v1387_v19 = vsub.f32 %v6349_v12, %v3672_v16 }
 0x358   :  { %v1667_v27 = vadd.f32 %v1666_v17, %v1524_v22  ;;  %v6350_v17 = vld [vmem:[#allocation121_spill] sm:$0xff] }
 0x359   :  { %v1388_v59 = vsub.f32 %v6350_v17, %v3672_v16  ;;  %v1531_v36 = vmul.f32 %v1387_v19, %v1387_v19 }
 0x35a   :  { %v1668_v39 = vadd.f32 %v1667_v27, %v1525_v11  ;;  %v1389_v27 = vsub.f32 %v6255_v5, %v3672_v16 }
 0x35b   :  { %v1532_v51 = vmul.f32 %v1388_v59, %v1388_v59 }
 0x35c   :  { %v1669_v0 = vadd.f32 %v1668_v39, %v1526_v6  ;;  %v1390_v39 = vsub.f32 %v6256_v37, %v3672_v16  ;;  %v1533_v40 = vmul.f32 %v1389_v27, %v1389_v27 }
 0x35e   :  { %v1670_v55 = vadd.f32 %v1669_v0, %v1527_v52  ;;  %v1391_v0 = vsub.f32 %v3332_v9, %v3672_v16  ;;  %v1534_v13 = vmul.f32 %v1390_v39, %v1390_v39 }
 0x360   :  { %v1671_v22 = vadd.f32 %v1670_v55, %v1528_v46  ;;  %v6351_v55 = vld [vmem:[#allocation68_spill] sm:$0xff]  ;;  %v1535_v19 = vmul.f32 %v1391_v0, %v1391_v0 }
 0x361   :  { %v1392_v17 = vsub.f32 %v6351_v55, %v3672_v16 }
 0x362   :  { %v1672_v11 = vadd.f32 %v1671_v22, %v1529_v34  ;;  %v1393_v22 = vsub.f32 %v3369_v41, %v3672_v16 }
 0x363   :  { %v1536_v59 = vmul.f32 %v1392_v17, %v1392_v17 }
 0x364   :  { %v1673_v6 = vadd.f32 %v1672_v11, %v1530_v25  ;;  %v1394_v11 = vsub.f32 %v3389_v45, %v3672_v16  ;;  %v1537_v27 = vmul.f32 %v1393_v22, %v1393_v22 }
 0x366   :  { %v1674_v52 = vadd.f32 %v1673_v6, %v1531_v36  ;;  %v1395_v6 = vsub.f32 %v3406_v1, %v3672_v16  ;;  %v1538_v39 = vmul.f32 %v1394_v11, %v1394_v11 }
 0x368   :  { %v1675_v46 = vadd.f32 %v1674_v52, %v1532_v51  ;;  %v1396_v52 = vsub.f32 %v3420_v60, %v3672_v16  ;;  %v1539_v0 = vmul.f32 %v1395_v6, %v1395_v6 }
 0x36a   :  { %v1676_v34 = vadd.f32 %v1675_v46, %v1533_v40  ;;  %v1397_v46 = vsub.f32 %v3439_v31, %v3672_v16  ;;  %v1540_v17 = vmul.f32 %v1396_v52, %v1396_v52 }
 0x36c   :  { %v1677_v25 = vadd.f32 %v1676_v34, %v1534_v13  ;;  %v6352_v34 = vld [vmem:[#allocation89_spill] sm:$0xff]  ;;  %v1541_v22 = vmul.f32 %v1397_v46, %v1397_v46 }
 0x36d   :  { %v1398_v45 = vsub.f32 %v6352_v34, %v3672_v16 }
 0x36e   :  { %v1678_v36 = vadd.f32 %v1677_v25, %v1535_v19  ;;  %v1399_v25 = vsub.f32 %v3467_v30, %v3672_v16 }
 0x36f   :  { %v1542_v11 = vmul.f32 %v1398_v45, %v1398_v45 }
 0x370   :  { %v1679_v51 = vadd.f32 %v1678_v36, %v1536_v59  ;;  %v1400_v36 = vsub.f32 %v3482_v50, %v3672_v16  ;;  %v1543_v6 = vmul.f32 %v1399_v25, %v1399_v25  ;;  %v6373_v50 = vld [vmem:[#allocation132_spill] sm:$0xff] }
 0x372   :  { %v1680_v40 = vadd.f32 %v1679_v51, %v1537_v27  ;;  %v1401_v51 = vsub.f32 %v3493_v56, %v3672_v16  ;;  %v1544_v52 = vmul.f32 %v1400_v36, %v1400_v36 }
 0x374   :  { %v1681_v13 = vadd.f32 %v1680_v40, %v1538_v39  ;;  %v6353_v40 = vld [vmem:[#allocation101_spill] sm:$0xff]  ;;  %v1545_v46 = vmul.f32 %v1401_v51, %v1401_v51 }
 0x375   :  { %v1402_v34 = vsub.f32 %v6353_v40, %v3672_v16 }
 0x376   :  { %v1682_v19 = vadd.f32 %v1681_v13, %v1539_v0  ;;  %v6354_v13 = vld [vmem:[#allocation104_spill] sm:$0xff] }
 0x377   :  { %v1403_v30 = vsub.f32 %v6354_v13, %v3672_v16  ;;  %v1546_v45 = vmul.f32 %v1402_v34, %v1402_v34 }
 0x378   :  { %v1683_v59 = vadd.f32 %v1682_v19, %v1540_v17  ;;  %v1404_v19 = vsub.f32 %v3530_v24, %v3672_v16 }
 0x379   :  { %v1547_v25 = vmul.f32 %v1403_v30, %v1403_v30 }
 0x37a   :  { %v1684_v27 = vadd.f32 %v1683_v59, %v1541_v22  ;;  %v1405_v59 = vsub.f32 %v3541_v62, %v3672_v16  ;;  %v1548_v36 = vmul.f32 %v1404_v19, %v1404_v19 }
 0x37c   :  { %v1685_v39 = vadd.f32 %v1684_v27, %v1542_v11  ;;  %v1406_v27 = vsub.f32 %v3550_v4, %v3672_v16  ;;  %v1549_v51 = vmul.f32 %v1405_v59, %v1405_v59 }
 0x37e   :  { %v1686_v0 = vadd.f32 %v1685_v39, %v1543_v6  ;;  %v6355_v39 = vld [vmem:[#allocation47_spill] sm:$0xff]  ;;  %v1550_v34 = vmul.f32 %v1406_v27, %v1406_v27 }
 0x37f   :  { %v1407_v13 = vsub.f32 %v6355_v39, %v3672_v16 }
 0x380   :  { %v1687_v17 = vadd.f32 %v1686_v0, %v1544_v52  ;;  %v6356_v0 = vld [vmem:[#allocation63_spill] sm:$0xff] }
 0x381   :  { %v1408_v24 = vsub.f32 %v6356_v0, %v3672_v16  ;;  %v1551_v30 = vmul.f32 %v1407_v13, %v1407_v13 }
 0x382   :  { %v1688_v22 = vadd.f32 %v1687_v17, %v1545_v46  ;;  %v6357_v17 = vld [vmem:[#allocation116_spill] sm:$0xff] }
 0x383   :  { %v1409_v62 = vsub.f32 %v6357_v17, %v3672_v16  ;;  %v1552_v19 = vmul.f32 %v1408_v24, %v1408_v24 }
 0x384   :  { %v1689_v11 = vadd.f32 %v1688_v22, %v1546_v45  ;;  %v6358_v22 = vld [vmem:[#allocation117_spill] sm:$0xff] }
 0x385   :  { %v1410_v4 = vsub.f32 %v6358_v22, %v3672_v16  ;;  %v1553_v59 = vmul.f32 %v1409_v62, %v1409_v62 }
 0x386   :  { %v1690_v6 = vadd.f32 %v1689_v11, %v1547_v25  ;;  %v6359_v11 = vld [vmem:[#allocation118_spill] sm:$0xff] }
 0x387   :  { %v1411_v39 = vsub.f32 %v6359_v11, %v3672_v16  ;;  %v1554_v27 = vmul.f32 %v1410_v4, %v1410_v4 }
 0x388   :  { %v1691_v52 = vadd.f32 %v1690_v6, %v1548_v36  ;;  %v6360_v6 = vld [vmem:[#allocation120_spill] sm:$0xff] }
 0x389   :  { %v1412_v0 = vsub.f32 %v6360_v6, %v3672_v16  ;;  %v1555_v13 = vmul.f32 %v1411_v39, %v1411_v39 }
 0x38a   :  { %v1692_v46 = vadd.f32 %v1691_v52, %v1549_v51  ;;  %v6361_v52 = vld [vmem:[#allocation56_spill] sm:$0xff] }
 0x38b   :  { %v1413_v17 = vsub.f32 %v6361_v52, %v3672_v16  ;;  %v1556_v24 = vmul.f32 %v1412_v0, %v1412_v0 }
 0x38c   :  { %v1693_v45 = vadd.f32 %v1692_v46, %v1550_v34  ;;  %v6362_v46 = vld [vmem:[#allocation61_spill] sm:$0xff] }
 0x38d   :  { %v1414_v22 = vsub.f32 %v6362_v46, %v3672_v16  ;;  %v1557_v62 = vmul.f32 %v1413_v17, %v1413_v17 }
 0x38e   :  { %v1694_v25 = vadd.f32 %v1693_v45, %v1551_v30  ;;  %v6363_v45 = vld [vmem:[#allocation122_spill] sm:$0xff] }
 0x38f   :  { %v1415_v11 = vsub.f32 %v6363_v45, %v3672_v16  ;;  %v1558_v4 = vmul.f32 %v1414_v22, %v1414_v22 }
 0x390   :  { %v1695_v36 = vadd.f32 %v1694_v25, %v1552_v19  ;;  %v6364_v25 = vld [vmem:[#allocation123_spill] sm:$0xff] }
 0x391   :  { %v1416_v6 = vsub.f32 %v6364_v25, %v3672_v16  ;;  %v1559_v39 = vmul.f32 %v1415_v11, %v1415_v11 }
 0x392   :  { %v1696_v51 = vadd.f32 %v1695_v36, %v1553_v59  ;;  %v6365_v36 = vld [vmem:[#allocation124_spill] sm:$0xff] }
 0x393   :  { %v1417_v52 = vsub.f32 %v6365_v36, %v3672_v16  ;;  %v1560_v0 = vmul.f32 %v1416_v6, %v1416_v6 }
 0x394   :  { %v1697_v34 = vadd.f32 %v1696_v51, %v1554_v27  ;;  %v6366_v51 = vld [vmem:[#allocation125_spill] sm:$0xff] }
 0x395   :  { %v1418_v46 = vsub.f32 %v6366_v51, %v3672_v16  ;;  %v1561_v17 = vmul.f32 %v1417_v52, %v1417_v52 }
 0x396   :  { %v1698_v30 = vadd.f32 %v1697_v34, %v1555_v13  ;;  %v6367_v34 = vld [vmem:[#allocation126_spill] sm:$0xff] }
 0x397   :  { %v1419_v45 = vsub.f32 %v6367_v34, %v3672_v16  ;;  %v1562_v22 = vmul.f32 %v1418_v46, %v1418_v46 }
 0x398   :  { %v1699_v19 = vadd.f32 %v1698_v30, %v1556_v24  ;;  %v6368_v30 = vld [vmem:[#allocation127_spill] sm:$0xff] }
 0x399   :  { %v1420_v25 = vsub.f32 %v6368_v30, %v3672_v16  ;;  %v1563_v11 = vmul.f32 %v1419_v45, %v1419_v45 }
 0x39a   :  { %v1700_v59 = vadd.f32 %v1699_v19, %v1557_v62  ;;  %v6369_v19 = vld [vmem:[#allocation128_spill] sm:$0xff] }
 0x39b   :  { %v1421_v36 = vsub.f32 %v6369_v19, %v3672_v16  ;;  %v1564_v6 = vmul.f32 %v1420_v25, %v1420_v25 }
 0x39c   :  { %v1701_v27 = vadd.f32 %v1700_v59, %v1558_v4  ;;  %v6370_v59 = vld [vmem:[#allocation129_spill] sm:$0xff] }
 0x39d   :  { %v1422_v51 = vsub.f32 %v6370_v59, %v3672_v16  ;;  %v1565_v52 = vmul.f32 %v1421_v36, %v1421_v36 }
 0x39e   :  { %v1702_v13 = vadd.f32 %v1701_v27, %v1559_v39  ;;  %v6371_v27 = vld [vmem:[#allocation130_spill] sm:$0xff] }
 0x39f   :  { %v1423_v34 = vsub.f32 %v6371_v27, %v3672_v16  ;;  %v1566_v46 = vmul.f32 %v1422_v51, %v1422_v51 }
 0x3a0   :  { %v1703_v24 = vadd.f32 %v1702_v13, %v1560_v0  ;;  %v6372_v13 = vld [vmem:[#allocation131_spill] sm:$0xff] }
 0x3a1   :  { %v1424_v30 = vsub.f32 %v6372_v13, %v3672_v16 }
 0x3a2   :  { %v1704_v62 = vadd.f32 %v1703_v24, %v1561_v17  ;;  %v1567_v24 = vmul.f32 %v1423_v34, %v1423_v34 }
 0x3a3   :  { %v1568_v19 = vmul.f32 %v1424_v30, %v1424_v30 }
 0x3a4   :  { %v1705_v4 = vadd.f32 %v1704_v62, %v1562_v22 }
 0x3a6   :  { %v1706_v39 = vadd.f32 %v1705_v4, %v1563_v11 }
 0x3a8   :  { %v1707_v0 = vadd.f32 %v1706_v39, %v1564_v6 }
 0x3aa   :  { %v1708_v17 = vadd.f32 %v1707_v0, %v1565_v52  ;;  %v6374_v0 = vld [vmem:[#allocation2_spill] sm:$0xff] }
 0x3ac   :  { %v1709_v40 = vadd.f32 %v1708_v17, %v1566_v46  ;;  %v6375_v46 = vld [vmem:[#allocation3_spill] sm:$0xff] }
 0x3ae   :  { %v1710_v45 = vadd.f32 %v1709_v40, %v1567_v24  ;;  %v1719_v40 = vld [vmem:[%s5752_s2] sm:$0x1] }
 0x3b0   :  { %v1711_v22 = vadd.f32 %v1710_v45, %v1568_v19  ;;  %v6377_v45 = vld [vmem:[#allocation5_spill] sm:$0xff] }
 0x3b2   :  { %v1712_v62 = vrot.slane %v1711_v22, 4 }
 0x3b4   :  { %v1713_v56 = vadd.f32 %v1712_v62, %v1711_v22  ;;  %v6378_v62 = vld [vmem:[#allocation6_spill] sm:$0xff] }
 0x3b6   :  { %v1714_v59 = vrot.slane %v1713_v56, 2 }
 0x3b8   :  { %v1715_v25 = vadd.f32 %v1714_v59, %v1713_v56  ;;  %v3974_v59 = vld [vmem:[%s5753_s3] sm:$0x1] }
 0x3ba   :  { %v1716_v11 = vrot.slane %v1715_v25, 1 }
 0x3bc   :  { %v1717_v4 = vadd.f32 %v1716_v11, %v1715_v25  ;;  %v6379_v11 = vld [vmem:[#allocation8_spill] sm:$0xff] }
 0x3be   :  { %v1718_v27 = vmul.f32 %v1717_v4, %v6373_v50 }
 0x3c0   :  { %v1720_v36 = vadd.f32 1e-05, %v1718_v27  ;;  %v6394_v27 = vld [vmem:[#allocation37_spill] sm:$0xff] }
 0x3c2   :  { %2915 = vrsqrt.f32 %v1720_v36  ;;  %vm1727_vm3 = vweird.f32 %v1720_v36 }
 0x3c8   :  { %v2916_v6 = vpop.eup %2915 }
 0x3c9   :  { %v1722_v39 = vmul.f32 %v2916_v6, %v1720_v36  ;;  %vm1728_vm2 = vweird.f32 %v2916_v6  ;;  %v6380_v36 = vld [vmem:[#allocation10_spill] sm:$0xff] }
 0x3ca   :  { %vm1729_vm4 = vmor %vm1727_vm3, %vm1728_vm2 }
 0x3cb   :  { %v1723_v13 = vmul.f32 %v2916_v6, %v1722_v39  ;;  %v6381_v39 = vld [vmem:[#allocation11_spill] sm:$0xff] }
 0x3cd   :  { %v1724_v51 = vmul.f32 0.5, %v1723_v13 }
 0x3cf   :  { %v1725_v52 = vsub.f32 1.5, %v1724_v51 }
 0x3d1   :  { %v1726_v34 = vmul.f32 %v2916_v6, %v1725_v52 }
 0x3d3   :  { %v1730_v56 = vsel %vm1729_vm4, %v2916_v6, %v1726_v34  ;;  %v6382_v34 = vld [vmem:[#allocation15_spill] sm:$0xff] }
 0x3d4   :  { %v1731_v30 = vmul.f32 %v1730_v56, %v1719_v40  ;;  %v6383_v56 = vld [vmem:[#allocation17_spill] sm:$0xff] }
 0x3d6   :  { %v3967_v19 = vmul.f32 %v1731_v30, %v3672_v16  ;;  %v3969_v50 = vperm.slane %v1731_v30, 0  ;;  %v6376_v16 = vld [vmem:[#allocation4_spill] sm:$0xff] }
 0x3d8   :  { %v3980_v13 = vmul.f32 %v3969_v50, %v6374_v0  ;;  %v3984_v17 = vmul.f32 %v3969_v50, %v6375_v46  ;;  %v3988_v24 = vmul.f32 %v3969_v50, %v6376_v16  ;;  %v3992_v22 = vmul.f32 %v3969_v50, %v6377_v45  ;;  %v6384_v0 = vld [vmem:[#allocation18_spill] sm:$0xff]  ;;  %v6385_v16 = vld [vmem:[#allocation20_spill] sm:$0xff] }
 0x3d9   :  { %v3996_v25 = vmul.f32 %v3969_v50, %v6378_v62  ;;  %v4000_v4 = vmul.f32 %v3969_v50, %v6379_v11  ;;  %v4004_v6 = vmul.f32 %v3969_v50, %v6380_v36  ;;  %v4008_v51 = vmul.f32 %v3969_v50, %v6381_v39  ;;  %v6386_v62 = vld [vmem:[#allocation25_spill] sm:$0xff]  ;;  %v6388_v36 = vld [vmem:[#allocation28_spill] sm:$0xff] }
 0x3da   :  { %v4012_v52 = vmul.f32 %v3969_v50, %v6279_v26  ;;  %v4016_v40 = vmul.f32 %v3969_v50, %v6382_v34  ;;  %v4020_v30 = vmul.f32 %v3969_v50, %v6383_v56  ;;  %v4024_v46 = vmul.f32 %v3969_v50, %v6384_v0  ;;  %v6390_v34 = vld [vmem:[#allocation31_spill] sm:$0xff]  ;;  %v6392_v0 = vld [vmem:[#allocation34_spill] sm:$0xff] }
 0x3db   :  { %v4028_v45 = vmul.f32 %v3969_v50, %v6385_v16  ;;  %v4032_v26 = vmul.f32 %v3969_v50, %v6283_v57  ;;  %v4036_v11 = vmul.f32 %v3969_v50, %v6386_v62  ;;  %v4040_v39 = vmul.f32 %v3969_v50, %v6388_v36 }
 0x3dc   :  { %v4044_v56 = vmul.f32 %v3969_v50, %v6390_v34  ;;  %v4048_v16 = vmul.f32 %v3969_v50, %v6392_v0  ;;  %v4052_v57 = vmul.f32 %v3969_v50, %v6394_v27  ;;  %v4056_v62 = vmul.f32 %v3969_v50, %v6288_v43 }
 0x3dd   :  { %6387 = vst [vmem:[#allocation13_spill] sm:$0xff] %v4036_v11  ;;  %v6397_v11 = vld [vmem:[#allocation43_spill] sm:$0xff] }
 0x3de   :  { %6389 = vst [vmem:[#allocation22_spill] sm:$0xff] %v4040_v39  ;;  %v4060_v36 = vmul.f32 %v3969_v50, %v6397_v11  ;;  %v6399_v39 = vld [vmem:[#allocation46_spill] sm:$0xff] }
 0x3df   :  { %6391 = vst [vmem:[#allocation40_spill] sm:$0xff] %v4044_v56  ;;  %v4064_v34 = vmul.f32 %v3969_v50, %v6399_v39  ;;  %v6401_v56 = vld [vmem:[#allocation49_spill] sm:$0xff] }
 0x3e0   :  { %6393 = vst [vmem:[#allocation69_spill] sm:$0xff] %v4048_v16  ;;  %v4068_v0 = vmul.f32 %v3969_v50, %v6401_v56  ;;  %v6402_v16 = vld [vmem:[#allocation52_spill] sm:$0xff] }
 0x3e1   :  { %6395 = vst [vmem:[#allocation82_spill] sm:$0xff] %v4052_v57  ;;  %v4072_v27 = vmul.f32 %v3969_v50, %v6402_v16  ;;  %v6404_v57 = vld [vmem:[#allocation54_spill] sm:$0xff]  ;;  %v4092_v16 = vmul.f32 %v3969_v50, %v6296_v63  ;;  %v4112_v63 = vmul.f32 %v3969_v50, %v6300_v61  ;;  %v4132_v61 = vmul.f32 %v3969_v50, %v3074_v38 }
 0x3e2   :  { %6396 = vst [vmem:[#allocation84_spill] sm:$0xff] %v4056_v62  ;;  %v4076_v43 = vmul.f32 %v3969_v50, %v6404_v57  ;;  %v6406_v62 = vld [vmem:[#allocation58_spill] sm:$0xff]  ;;  %v4152_v38 = vmul.f32 %v3969_v50, %v6306_v48 }
 0x3e3   :  { %6398 = vst [vmem:[#allocation87_spill] sm:$0xff] %v4060_v36  ;;  %v4080_v11 = vmul.f32 %v3969_v50, %v6406_v62  ;;  %v6408_v36 = vld [vmem:[#allocation62_spill] sm:$0xff] }
 0x3e4   :  { %6400 = vst [vmem:[#allocation19_spill] sm:$0xff] %v4064_v34  ;;  %v4084_v39 = vmul.f32 %v3969_v50, %v6408_v36  ;;  %v6410_v34 = vld [vmem:[#allocation65_spill] sm:$0xff] }
 0x3e5   :  { %6403 = vst [vmem:[#allocation21_spill] sm:$0xff] %v4072_v27  ;;  %v4088_v56 = vmul.f32 %v3969_v50, %v6410_v34  ;;  %v6411_v27 = vld [vmem:[#allocation71_spill] sm:$0xff] }
 0x3e6   :  { %6405 = vst [vmem:[#allocation38_spill] sm:$0xff] %v4076_v43  ;;  %v4096_v57 = vmul.f32 %v3969_v50, %v6411_v27  ;;  %v6412_v43 = vld [vmem:[#allocation74_spill] sm:$0xff]  ;;  %v4116_v27 = vmul.f32 %v3969_v50, %v6301_v10 }
 0x3e7   :  { %6407 = vst [vmem:[#allocation48_spill] sm:$0xff] %v4080_v11  ;;  %v4100_v62 = vmul.f32 %v3969_v50, %v6412_v43  ;;  %v6414_v11 = vld [vmem:[#allocation78_spill] sm:$0xff]  ;;  %v4120_v43 = vmul.f32 %v3969_v50, %v6302_v44 }
 0x3e8   :  { %6409 = vst [vmem:[#allocation27_spill] sm:$0xff] %v4084_v39  ;;  %v4104_v36 = vmul.f32 %v3969_v50, %v6414_v11  ;;  %v6416_v39 = vld [vmem:[#allocation80_spill] sm:$0xff] }
 0x3e9   :  { %6413 = vst [vmem:[#allocation33_spill] sm:$0xff] %v4100_v62  ;;  %v4108_v34 = vmul.f32 %v3969_v50, %v6416_v39  ;;  %v6420_v62 = vld [vmem:[#allocation7_spill] sm:$0xff] }
 0x3ea   :  { %6415 = vst [vmem:[#allocation36_spill] sm:$0xff] %v4104_v36  ;;  %v4124_v11 = vmul.f32 %v3969_v50, %v6420_v62  ;;  %v6421_v36 = vld [vmem:[#allocation9_spill] sm:$0xff] }
 0x3eb   :  { %6417 = vst [vmem:[#allocation42_spill] sm:$0xff] %v4112_v63  ;;  %v4128_v39 = vmul.f32 %v3969_v50, %v6421_v36  ;;  %v6422_v63 = vld [vmem:[#allocation12_spill] sm:$0xff]  ;;  %v4148_v36 = vmul.f32 %v3969_v50, %v3122_v54 }
 0x3ec   :  { %6418 = vst [vmem:[#allocation50_spill] sm:$0xff] %v4116_v27  ;;  %v4136_v10 = vmul.f32 %v3969_v50, %v6422_v63  ;;  %v6424_v27 = vld [vmem:[#allocation14_spill] sm:$0xff]  ;;  %v4156_v63 = vmul.f32 %v3969_v50, %v6307_v20 }
 0x3ed   :  { %6419 = vst [vmem:[#allocation57_spill] sm:$0xff] %v4120_v43  ;;  %v4140_v44 = vmul.f32 %v3969_v50, %v6424_v27  ;;  %v6426_v43 = vld [vmem:[#allocation16_spill] sm:$0xff] }
 0x3ee   :  { %6423 = vst [vmem:[#allocation66_spill] sm:$0xff] %v4136_v10  ;;  %v4144_v62 = vmul.f32 %v3969_v50, %v6426_v43  ;;  %v6430_v10 = vld [vmem:[#allocation23_spill] sm:$0xff] }
 0x3ef   :  { %6425 = vst [vmem:[#allocation73_spill] sm:$0xff] %v4140_v44  ;;  %v4160_v27 = vmul.f32 %v3969_v50, %v6430_v10  ;;  %v6432_v44 = vld [vmem:[#allocation26_spill] sm:$0xff]  ;;  %v4180_v10 = vmul.f32 %v3969_v50, %v6310_v53 }
 0x3f0   :  { %6427 = vst [vmem:[#allocation83_spill] sm:$0xff] %v4144_v62  ;;  %v4164_v43 = vmul.f32 %v3969_v50, %v6432_v44  ;;  %v6434_v62 = vld [vmem:[#allocation29_spill] sm:$0xff] }
 0x3f1   :  { %6428 = vst [vmem:[#allocation90_spill] sm:$0xff] %v4148_v36  ;;  %v4168_v54 = vmul.f32 %v3969_v50, %v6434_v62  ;;  %v6435_v36 = vld [vmem:[#allocation32_spill] sm:$0xff] }
 0x3f2   :  { %6429 = vst [vmem:[#allocation111_spill] sm:$0xff] %v4152_v38  ;;  %v4172_v48 = vmul.f32 %v3969_v50, %v6435_v36  ;;  %v6437_v38 = vld [vmem:[#allocation35_spill] sm:$0xff]  ;;  %v4192_v36 = vmul.f32 %v3969_v50, %v6313_v29 }
 0x3f3   :  { %6431 = vst [vmem:[#allocation113_spill] sm:$0xff] %v4160_v27  ;;  %v4176_v20 = vmul.f32 %v3969_v50, %v6437_v38  ;;  %v6440_v27 = vld [vmem:[#allocation41_spill] sm:$0xff] }
 0x3f4   :  { %6433 = vst [vmem:[#allocation119_spill] sm:$0xff] %v4164_v43  ;;  %v4184_v44 = vmul.f32 %v3969_v50, %v6440_v27  ;;  %v6442_v43 = vld [vmem:[#allocation45_spill] sm:$0xff] }
 0x3f5   :  { %6436 = vst [vmem:[#allocation68_spill] sm:$0xff] %v4172_v48  ;;  %v4188_v62 = vmul.f32 %v3969_v50, %v6442_v43  ;;  %v6445_v48 = vld [vmem:[#allocation51_spill] sm:$0xff] }
 0x3f6   :  { %6438 = vst [vmem:[#allocation132_spill] sm:$0xff] %v4176_v20  ;;  %v4196_v38 = vmul.f32 %v3969_v50, %v6445_v48  ;;  %v6447_v20 = vld [vmem:[#allocation55_spill] sm:$0xff] }
 0x3f7   :  { %6439 = vst [vmem:[#allocation2_spill] sm:$0xff] %v4180_v10  ;;  %v4200_v53 = vmul.f32 %v3969_v50, %v6447_v20  ;;  %v6449_v10 = vld [vmem:[#allocation60_spill] sm:$0xff] }
 0x3f8   :  { %6441 = vst [vmem:[#allocation3_spill] sm:$0xff] %v4184_v44  ;;  %v4204_v27 = vmul.f32 %v3969_v50, %v6449_v10  ;;  %v6451_v44 = vld [vmem:[#allocation64_spill] sm:$0xff] }
 0x3f9   :  { %6443 = vst [vmem:[#allocation4_spill] sm:$0xff] %v4188_v62  ;;  %v4208_v43 = vmul.f32 %v3969_v50, %v6451_v44  ;;  %v6453_v62 = vld [vmem:[#allocation67_spill] sm:$0xff] }
 0x3fa   :  { %6444 = vst [vmem:[#allocation5_spill] sm:$0xff] %v4192_v36  ;;  %v4212_v29 = vmul.f32 %v3969_v50, %v6453_v62  ;;  %v6455_v36 = vld [vmem:[#allocation72_spill] sm:$0xff] }
 0x3fb   :  { %6446 = vst [vmem:[#allocation6_spill] sm:$0xff] %v4196_v38  ;;  %v4216_v48 = vmul.f32 %v3969_v50, %v6455_v36  ;;  %v6457_v38 = vld [vmem:[#allocation75_spill] sm:$0xff] }
 0x3fc   :  { %6448 = vst [vmem:[#allocation8_spill] sm:$0xff] %v4200_v53  ;;  %v4220_v20 = vmul.f32 %v3969_v50, %v6457_v38  ;;  %v6459_v53 = vld [vmem:[#allocation79_spill] sm:$0xff] }
 0x3fd   :  { %6450 = vst [vmem:[#allocation10_spill] sm:$0xff] %v4204_v27  ;;  %v4224_v10 = vmul.f32 %v3969_v50, %v6459_v53  ;;  %v6461_v27 = vld [vmem:[#allocation81_spill] sm:$0xff] }
 0x3fe   :  { %6452 = vst [vmem:[#allocation11_spill] sm:$0xff] %v4208_v43  ;;  %v4228_v44 = vmul.f32 %v3969_v50, %v6461_v27  ;;  %v6463_v43 = vld [vmem:[#allocation85_spill] sm:$0xff] }
 0x3ff   :  { %6454 = vst [vmem:[#allocation15_spill] sm:$0xff] %v4212_v29  ;;  %v4232_v62 = vmul.f32 %v3969_v50, %v6463_v43  ;;  %v6465_v29 = vld [vmem:[#allocation88_spill] sm:$0xff] }
 0x400   :  { %6456 = vst [vmem:[#allocation17_spill] sm:$0xff] %v4216_v48  ;;  %v4236_v36 = vmul.f32 %v3969_v50, %v6465_v29  ;;  %v6467_v48 = vld [vmem:[#allocation91_spill] sm:$0xff] }
 0x401   :  { %6458 = vst [vmem:[#allocation18_spill] sm:$0xff] %v4220_v20  ;;  %v4240_v38 = vmul.f32 %v3969_v50, %v6467_v48  ;;  %v6469_v20 = vld [vmem:[#allocation94_spill] sm:$0xff] }
 0x402   :  { %6460 = vst [vmem:[#allocation20_spill] sm:$0xff] %v4224_v10  ;;  %v4244_v53 = vmul.f32 %v3969_v50, %v6469_v20  ;;  %v6471_v10 = vld [vmem:[#allocation97_spill] sm:$0xff] }
 0x403   :  { %6462 = vst [vmem:[#allocation25_spill] sm:$0xff] %v4228_v44  ;;  %v4248_v27 = vmul.f32 %v3969_v50, %v6471_v10  ;;  %v6472_v44 = vld [vmem:[#allocation100_spill] sm:$0xff] }
 0x404   :  { %6464 = vst [vmem:[#allocation28_spill] sm:$0xff] %v4232_v62  ;;  %v4252_v43 = vmul.f32 %v3969_v50, %v6472_v44  ;;  %v6474_v62 = vld [vmem:[#allocation103_spill] sm:$0xff]  ;;  %v4272_v44 = vmul.f32 %v3969_v50, %v6331_v58  ;;  %v4292_v58 = vmul.f32 %v3969_v50, %v6335_v21  ;;  %v4312_v21 = vmul.f32 %v3969_v50, %v6337_v2 }
 0x405   :  { %6466 = vst [vmem:[#allocation31_spill] sm:$0xff] %v4236_v36  ;;  %v4256_v29 = vmul.f32 %v3969_v50, %v6474_v62  ;;  %v6475_v36 = vld [vmem:[#allocation106_spill] sm:$0xff]  ;;  %v4332_v2 = vmul.f32 %v3969_v50, %v6339_v7  ;;  %v4352_v7 = vmul.f32 %v3969_v50, %v6341_v47 }
 0x406   :  { %6468 = vst [vmem:[#allocation34_spill] sm:$0xff] %v4240_v38  ;;  %v4260_v48 = vmul.f32 %v3969_v50, %v6475_v36  ;;  %v6476_v38 = vld [vmem:[#allocation109_spill] sm:$0xff]  ;;  %v4280_v36 = vmul.f32 %v3969_v50, %v6333_v15  ;;  %v4300_v15 = vmul.f32 %v3969_v50, %v6239_v28  ;;  %v4320_v28 = vmul.f32 %v3969_v50, %v6246_v33 }
 0x407   :  { %6470 = vst [vmem:[#allocation37_spill] sm:$0xff] %v4244_v53  ;;  %v4264_v20 = vmul.f32 %v3969_v50, %v6476_v38  ;;  %v6478_v53 = vld [vmem:[#allocation24_spill] sm:$0xff]  ;;  %v4284_v38 = vmul.f32 %v3969_v50, %v6334_v23  ;;  %v4304_v23 = vmul.f32 %v3969_v50, %v6336_v42  ;;  %v4324_v42 = vmul.f32 %v3969_v50, %v6338_v32 }
 0x408   :  { %6473 = vst [vmem:[#allocation43_spill] sm:$0xff] %v4252_v43  ;;  %v4268_v10 = vmul.f32 %v3969_v50, %v6478_v53  ;;  %v6480_v43 = vld [vmem:[#allocation30_spill] sm:$0xff]  ;;  %v4340_v33 = vmul.f32 %v3969_v50, %v3409_v49  ;;  %v4344_v32 = vmul.f32 %v3969_v50, %v6340_v3 }
 0x409   :  { %6477 = vst [vmem:[#allocation46_spill] sm:$0xff] %v4264_v20  ;;  %v4276_v62 = vmul.f32 %v3969_v50, %v6480_v43  ;;  %v6482_v20 = vld [vmem:[#allocation39_spill] sm:$0xff] }
 0x40a   :  { %6479 = vst [vmem:[#allocation49_spill] sm:$0xff] %v4272_v44  ;;  %v4288_v53 = vmul.f32 %v3969_v50, %v6482_v20  ;;  %v6484_v44 = vld [vmem:[#allocation44_spill] sm:$0xff] }
 0x40b   :  { %6481 = vst [vmem:[#allocation52_spill] sm:$0xff] %v4284_v38  ;;  %v4296_v43 = vmul.f32 %v3969_v50, %v6484_v44  ;;  %v6486_v38 = vld [vmem:[#allocation53_spill] sm:$0xff] }
 0x40c   :  { %6483 = vst [vmem:[#allocation54_spill] sm:$0xff] %v4292_v58  ;;  %v4308_v20 = vmul.f32 %v3969_v50, %v6486_v38  ;;  %v6488_v58 = vld [vmem:[#allocation59_spill] sm:$0xff] }
 0x40d   :  { %6485 = vst [vmem:[#allocation58_spill] sm:$0xff] %v4304_v23  ;;  %v4316_v44 = vmul.f32 %v3969_v50, %v6488_v58  ;;  %v6490_v23 = vld [vmem:[#allocation70_spill] sm:$0xff] }
 0x40e   :  { %6487 = vst [vmem:[#allocation62_spill] sm:$0xff] %v4312_v21  ;;  %v4328_v38 = vmul.f32 %v3969_v50, %v6490_v23  ;;  %v6492_v21 = vld [vmem:[#allocation77_spill] sm:$0xff] }
 0x40f   :  { %6489 = vst [vmem:[#allocation65_spill] sm:$0xff] %v4324_v42  ;;  %v4336_v58 = vmul.f32 %v3969_v50, %v6492_v21  ;;  %v6496_v42 = vld [vmem:[#allocation86_spill] sm:$0xff] }
 0x410   :  { %6491 = vst [vmem:[#allocation71_spill] sm:$0xff] %v4332_v2  ;;  %v4348_v23 = vmul.f32 %v3969_v50, %v6496_v42  ;;  %v6499_v2 = vld [vmem:[#allocation93_spill] sm:$0xff] }
 0x411   :  { %6493 = vst [vmem:[#allocation74_spill] sm:$0xff] %v4336_v58  ;;  %v4356_v21 = vmul.f32 %v3969_v50, %v6499_v2  ;;  %v6500_v58 = vld [vmem:[#allocation96_spill] sm:$0xff] }
 0x412   :  { %6494 = vst [vmem:[#allocation78_spill] sm:$0xff] %v4340_v33  ;;  %v4360_v49 = vmul.f32 %v3969_v50, %v6500_v58  ;;  %v6501_v33 = vld [vmem:[#allocation99_spill] sm:$0xff]  ;;  %v4380_v58 = vmul.f32 %v3969_v50, %v6345_v35  ;;  %v4400_v35 = vmul.f32 %v3969_v50, %v3588_v14  ;;  %v4420_v14 = vmul.f32 %v3969_v50, %v3332_v9 }
 0x413   :  { %6495 = vst [vmem:[#allocation80_spill] sm:$0xff] %v4344_v32  ;;  %v4364_v3 = vmul.f32 %v3969_v50, %v6501_v33  ;;  %v6503_v32 = vld [vmem:[#allocation102_spill] sm:$0xff]  ;;  %v4384_v33 = vmul.f32 %v3969_v50, %v6346_v8  ;;  %v4404_v8 = vmul.f32 %v3969_v50, %v6349_v12  ;;  %v4424_v12 = vmul.f32 %v3969_v50, %v6351_v55 }
 0x414   :  { %6497 = vst [vmem:[#allocation7_spill] sm:$0xff] %v4348_v23  ;;  %v4368_v42 = vmul.f32 %v3969_v50, %v6503_v32  ;;  %v6505_v23 = vld [vmem:[#allocation105_spill] sm:$0xff]  ;;  %v4440_v9 = vmul.f32 %v3969_v50, %v3420_v60  ;;  %v4444_v55 = vmul.f32 %v3969_v50, %v3439_v31 }
 0x415   :  { %6498 = vst [vmem:[#allocation9_spill] sm:$0xff] %v4352_v7  ;;  %v4372_v47 = vmul.f32 %v3969_v50, %v6505_v23  ;;  %v6506_v7 = vld [vmem:[#allocation108_spill] sm:$0xff] }
 0x416   :  { %6502 = vst [vmem:[#allocation12_spill] sm:$0xff] %v4364_v3  ;;  %v4376_v2 = vmul.f32 %v3969_v50, %v6506_v7  ;;  %v6508_v3 = vld [vmem:[#allocation114_spill] sm:$0xff]  ;;  %v4396_v7 = vmul.f32 %v3969_v50, %v3579_v18  ;;  %v4416_v18 = vmul.f32 %v3969_v50, %v6256_v37  ;;  %v4436_v37 = vmul.f32 %v3969_v50, %v3406_v1 }
 0x417   :  { %6504 = vst [vmem:[#allocation14_spill] sm:$0xff] %v4368_v42  ;;  %v4388_v32 = vmul.f32 %v3969_v50, %v6508_v3  ;;  %v6509_v42 = vld [vmem:[#allocation115_spill] sm:$0xff] }
 0x418   :  { %6507 = vst [vmem:[#allocation16_spill] sm:$0xff] %v4384_v33  ;;  %v4392_v23 = vmul.f32 %v3969_v50, %v6509_v42  ;;  %v6510_v33 = vld [vmem:[#allocation121_spill] sm:$0xff]  ;;  %v4412_v42 = vmul.f32 %v3969_v50, %v6255_v5 }
 0x419   :  { %v4408_v3 = vmul.f32 %v3969_v50, %v6510_v33  ;;  %6512 = vst [vmem:[#allocation26_spill] sm:$0xff] %v4424_v12  ;;  %v4428_v33 = vmul.f32 %v3969_v50, %v3369_v41  ;;  %v6519_v12 = vld [vmem:[#allocation89_spill] sm:$0xff] }
 0x41a   :  { %6516 = vst [vmem:[#allocation35_spill] sm:$0xff] %v4436_v37  ;;  %v4448_v41 = vmul.f32 %v3969_v50, %v6519_v12  ;;  %v6525_v37 = vld [vmem:[#allocation98_spill] sm:$0xff] }
 0x41b   :  { %6511 = vst [vmem:[#allocation23_spill] sm:$0xff] %v4408_v3  ;;  %v6514_v3 = vld [vmem:[#allocation76_spill] sm:$0xff]  ;;  %v4460_v60 = vmul.f32 %v3969_v50, %v6525_v37 }
 0x41c   :  { %6513 = vst [vmem:[#allocation29_spill] sm:$0xff] %v4428_v33  ;;  %v4432_v5 = vmul.f32 %v3969_v50, %v6514_v3  ;;  %v6521_v33 = vld [vmem:[#allocation92_spill] sm:$0xff] }
 0x41d   :  { %6517 = vst [vmem:[#allocation41_spill] sm:$0xff] %v4440_v9  ;;  %v4452_v3 = vmul.f32 %v3969_v50, %v6521_v33  ;;  %v6527_v9 = vld [vmem:[#allocation101_spill] sm:$0xff] }
 0x41e   :  { %6515 = vst [vmem:[#allocation32_spill] sm:$0xff] %v4432_v5  ;;  %v6523_v5 = vld [vmem:[#allocation95_spill] sm:$0xff]  ;;  %v4464_v31 = vmul.f32 %v3969_v50, %v6527_v9 }
 0x41f   :  { %6518 = vst [vmem:[#allocation45_spill] sm:$0xff] %v4444_v55  ;;  %v4456_v1 = vmul.f32 %v3969_v50, %v6523_v5  ;;  %v6529_v55 = vld [vmem:[#allocation104_spill] sm:$0xff] }
 0x420   :  { %6520 = vst [vmem:[#allocation51_spill] sm:$0xff] %v4448_v41  ;;  %v4468_v12 = vmul.f32 %v3969_v50, %v6529_v55  ;;  %v6531_v41 = vld [vmem:[#allocation107_spill] sm:$0xff] }
 0x421   :  { %6522 = vst [vmem:[#allocation55_spill] sm:$0xff] %v4452_v3  ;;  %v4472_v33 = vmul.f32 %v3969_v50, %v6531_v41  ;;  %v6533_v3 = vld [vmem:[#allocation110_spill] sm:$0xff] }
 0x422   :  { %6524 = vst [vmem:[#allocation60_spill] sm:$0xff] %v4456_v1  ;;  %v4476_v5 = vmul.f32 %v3969_v50, %v6533_v3  ;;  %v6535_v1 = vld [vmem:[#allocation112_spill] sm:$0xff] }
 0x423   :  { %6526 = vst [vmem:[#allocation64_spill] sm:$0xff] %v4460_v60  ;;  %v4480_v37 = vmul.f32 %v3969_v50, %v6535_v1  ;;  %v6537_v60 = vld [vmem:[#allocation47_spill] sm:$0xff]  ;;  %v6545_v1 = vsub.f32 %v3974_v59, %v3967_v19 }
 0x424   :  { %6528 = vst [vmem:[#allocation67_spill] sm:$0xff] %v4464_v31  ;;  %v4484_v9 = vmul.f32 %v3969_v50, %v6537_v60  ;;  %v6539_v31 = vld [vmem:[#allocation63_spill] sm:$0xff] }
 0x425   :  { %6530 = vst [vmem:[#allocation72_spill] sm:$0xff] %v4468_v12  ;;  %v4488_v55 = vmul.f32 %v3969_v50, %v6539_v31  ;;  %v6541_v12 = vld [vmem:[#allocation116_spill] sm:$0xff]  ;;  %v6555_v59 = vld [vmem:[#allocation123_spill] sm:$0xff] }
 0x426   :  { %6532 = vst [vmem:[#allocation75_spill] sm:$0xff] %v4472_v33  ;;  %v4492_v41 = vmul.f32 %v3969_v50, %v6541_v12  ;;  %v6543_v33 = vld [vmem:[#allocation117_spill] sm:$0xff] }
 0x427   :  { %6534 = vst [vmem:[#allocation79_spill] sm:$0xff] %v4476_v5  ;;  %v4496_v3 = vmul.f32 %v3969_v50, %v6543_v33  ;;  %v6546_v5 = vld [vmem:[#allocation118_spill] sm:$0xff] }
 0x428   :  { %6536 = vst [vmem:[#allocation81_spill] sm:$0xff] %v4480_v37  ;;  %v4501_v37 = vperm.slane %v6545_v1, 0  ;;  %v4505_v60 = vmul.f32 %v3969_v50, %v6546_v5  ;;  %v4525_v5 = vmul.f32 %v3969_v50, %v6555_v59  ;;  %v6557_v1 = vld [vmem:[#allocation124_spill] sm:$0xff] }
 0x429   :  { %6538 = vst [vmem:[#allocation85_spill] sm:$0xff] %v4484_v9  ;;  %v6547_v9 = vld [vmem:[#allocation120_spill] sm:$0xff] }
 0x42a   :  { %6540 = vst [vmem:[#allocation88_spill] sm:$0xff] %v4488_v55  ;;  %v4509_v31 = vmul.f32 %v3969_v50, %v6547_v9  ;;  %v6549_v55 = vld [vmem:[#allocation56_spill] sm:$0xff]  ;;  %v4529_v9 = vmul.f32 %v3969_v50, %v6557_v1 }
 0x42b   :  { %6542 = vst [vmem:[#allocation91_spill] sm:$0xff] %v4492_v41  ;;  %v4513_v12 = vmul.f32 %v3969_v50, %v6549_v55  ;;  %v6551_v41 = vld [vmem:[#allocation61_spill] sm:$0xff] }
 0x42c   :  { %6544 = vst [vmem:[#allocation94_spill] sm:$0xff] %v4496_v3  ;;  %v4517_v33 = vmul.f32 %v3969_v50, %v6551_v41  ;;  %v6553_v3 = vld [vmem:[#allocation122_spill] sm:$0xff] }
 0x42d   :  { %6548 = vst [vmem:[#allocation97_spill] sm:$0xff] %v4509_v31  ;;  %v4521_v19 = vmul.f32 %v3969_v50, %v6553_v3  ;;  %v6559_v31 = vld [vmem:[#allocation125_spill] sm:$0xff] }
 0x42e   :  { %6550 = vst [vmem:[#allocation100_spill] sm:$0xff] %v4513_v12  ;;  %v4533_v55 = vmul.f32 %v3969_v50, %v6559_v31  ;;  %v6561_v12 = vld [vmem:[#allocation126_spill] sm:$0xff] }
 0x42f   :  { %6552 = vst [vmem:[#allocation103_spill] sm:$0xff] %v4517_v33  ;;  %v4537_v41 = vmul.f32 %v3969_v50, %v6561_v12  ;;  %v6562_v33 = vld [vmem:[#allocation127_spill] sm:$0xff] }
 0x430   :  { %6554 = vst [vmem:[#allocation106_spill] sm:$0xff] %v4521_v19  ;;  %v4541_v3 = vmul.f32 %v3969_v50, %v6562_v33  ;;  %v6563_v19 = vld [vmem:[#allocation128_spill] sm:$0xff]  ;;  %v4561_v33 = vadd.f32 %v4501_v37, %v3980_v13  ;;  %v4581_v13 = vadd.f32 %v4501_v37, %v4000_v4  ;;  %v4601_v4 = vadd.f32 %v4501_v37, %v4020_v30 }
 0x431   :  { %6556 = vst [vmem:[#allocation109_spill] sm:$0xff] %v4525_v5  ;;  %v4545_v59 = vmul.f32 %v3969_v50, %v6563_v19  ;;  %v6564_v5 = vld [vmem:[#allocation129_spill] sm:$0xff]  ;;  %v4565_v19 = vadd.f32 %v4501_v37, %v3984_v17  ;;  %v4585_v17 = vadd.f32 %v4501_v37, %v4004_v6  ;;  %v4605_v6 = vadd.f32 %v4501_v37, %v4024_v46 }
 0x432   :  { %6558 = vst [vmem:[#allocation24_spill] sm:$0xff] %v4529_v9  ;;  %v4549_v1 = vmul.f32 %v3969_v50, %v6564_v5  ;;  %v6565_v9 = vld [vmem:[#allocation130_spill] sm:$0xff]  ;;  %v4569_v5 = vadd.f32 %v4501_v37, %v3988_v24  ;;  %v4589_v24 = vadd.f32 %v4501_v37, %v4008_v51  ;;  %v4609_v51 = vadd.f32 %v4501_v37, %v4028_v45 }
 0x433   :  { %6560 = vst [vmem:[#allocation30_spill] sm:$0xff] %v4533_v55  ;;  %v4553_v31 = vmul.f32 %v3969_v50, %v6565_v9  ;;  %v6566_v55 = vld [vmem:[#allocation131_spill] sm:$0xff]  ;;  %v4573_v9 = vadd.f32 %v4501_v37, %v3992_v22  ;;  %v4593_v22 = vadd.f32 %v4501_v37, %v4012_v52  ;;  %v4613_v52 = vadd.f32 %v4501_v37, %v4032_v26 }
 0x434   :  { %v4557_v12 = vmul.f32 %v3969_v50, %v6566_v55  ;;  %6567 = vst [vmem:[#allocation39_spill] sm:$0xff] %v4561_v33  ;;  %v4577_v50 = vadd.f32 %v4501_v37, %v3996_v25  ;;  %v4597_v25 = vadd.f32 %v4501_v37, %v4016_v40  ;;  %v6580_v55 = vld [vmem:[#allocation13_spill] sm:$0xff] }
 0x435   :  { %6568 = vst [vmem:[#allocation44_spill] sm:$0xff] %v4565_v19  ;;  %v4617_v40 = vadd.f32 %v4501_v37, %v6580_v55 }
 0x436   :  { %6569 = vst [vmem:[#allocation53_spill] sm:$0xff] %v4569_v5 }
 0x437   :  { %6570 = vst [vmem:[#allocation59_spill] sm:$0xff] %v4573_v9 }
 0x438   :  { %6571 = vst [vmem:[#allocation70_spill] sm:$0xff] %v4577_v50 }
 0x439   :  { %6572 = vst [vmem:[#allocation77_spill] sm:$0xff] %v4585_v17 }
 0x43a   :  { %6573 = vst [vmem:[#allocation86_spill] sm:$0xff] %v4589_v24 }
 0x43b   :  { %6574 = vst [vmem:[#allocation93_spill] sm:$0xff] %v4593_v22 }
 0x43c   :  { %6575 = vst [vmem:[#allocation96_spill] sm:$0xff] %v4597_v25  ;;  %v6582_v25 = vld [vmem:[#allocation22_spill] sm:$0xff] }
 0x43d   :  { %6576 = vst [vmem:[#allocation99_spill] sm:$0xff] %v4601_v4  ;;  %v4621_v30 = vadd.f32 %v4501_v37, %v6582_v25  ;;  %v6584_v4 = vld [vmem:[#allocation40_spill] sm:$0xff] }
 0x43e   :  { %6577 = vst [vmem:[#allocation102_spill] sm:$0xff] %v4605_v6  ;;  %v4625_v46 = vadd.f32 %v4501_v37, %v6584_v4  ;;  %v6586_v6 = vld [vmem:[#allocation69_spill] sm:$0xff] }
 0x43f   :  { %6578 = vst [vmem:[#allocation105_spill] sm:$0xff] %v4609_v51  ;;  %v4629_v45 = vadd.f32 %v4501_v37, %v6586_v6  ;;  %v6588_v51 = vld [vmem:[#allocation82_spill] sm:$0xff]  ;;  %v4649_v6 = vadd.f32 %v4501_v37, %v4068_v0  ;;  %v4669_v0 = vadd.f32 %v4501_v37, %v4088_v56  ;;  %v4689_v56 = vadd.f32 %v4501_v37, %v4108_v34 }
 0x440   :  { %6579 = vst [vmem:[#allocation108_spill] sm:$0xff] %v4613_v52  ;;  %v4633_v26 = vadd.f32 %v4501_v37, %v6588_v51  ;;  %v6590_v52 = vld [vmem:[#allocation84_spill] sm:$0xff]  ;;  %v4709_v34 = vadd.f32 %v4501_v37, %v4128_v39 }
 0x441   :  { %6581 = vst [vmem:[#allocation114_spill] sm:$0xff] %v4617_v40  ;;  %v4637_v55 = vadd.f32 %v4501_v37, %v6590_v52  ;;  %v6592_v40 = vld [vmem:[#allocation87_spill] sm:$0xff] }
 0x442   :  { %6583 = vst [vmem:[#allocation115_spill] sm:$0xff] %v4621_v30  ;;  %v4641_v25 = vadd.f32 %v4501_v37, %v6592_v40  ;;  %v6594_v30 = vld [vmem:[#allocation19_spill] sm:$0xff] }
 0x443   :  { %6585 = vst [vmem:[#allocation121_spill] sm:$0xff] %v4625_v46  ;;  %v4645_v4 = vadd.f32 %v4501_v37, %v6594_v30 }
 0x444   :  { %6587 = vst [vmem:[#allocation76_spill] sm:$0xff] %v4629_v45  ;;  %v6597_v45 = vld [vmem:[#allocation21_spill] sm:$0xff] }
 0x445   :  { %6589 = vst [vmem:[#allocation89_spill] sm:$0xff] %v4633_v26  ;;  %v4653_v51 = vadd.f32 %v4501_v37, %v6597_v45  ;;  %v6599_v26 = vld [vmem:[#allocation38_spill] sm:$0xff]  ;;  %v4673_v45 = vadd.f32 %v4501_v37, %v4092_v16 }
 0x446   :  { %6591 = vst [vmem:[#allocation92_spill] sm:$0xff] %v4637_v55  ;;  %v4657_v52 = vadd.f32 %v4501_v37, %v6599_v26  ;;  %v6601_v55 = vld [vmem:[#allocation48_spill] sm:$0xff]  ;;  %v4677_v26 = vadd.f32 %v4501_v37, %v4096_v57 }
 0x447   :  { %6593 = vst [vmem:[#allocation95_spill] sm:$0xff] %v4641_v25  ;;  %v4661_v40 = vadd.f32 %v4501_v37, %v6601_v55  ;;  %v6603_v25 = vld [vmem:[#allocation27_spill] sm:$0xff] }
 0x448   :  { %6595 = vst [vmem:[#allocation98_spill] sm:$0xff] %v4645_v4  ;;  %v4665_v30 = vadd.f32 %v4501_v37, %v6603_v25 }
 0x449   :  { %6596 = vst [vmem:[#allocation101_spill] sm:$0xff] %v4649_v6 }
 0x44a   :  { %6598 = vst [vmem:[#allocation104_spill] sm:$0xff] %v4653_v51 }
 0x44b   :  { %6600 = vst [vmem:[#allocation107_spill] sm:$0xff] %v4657_v52  ;;  %v6608_v52 = vld [vmem:[#allocation33_spill] sm:$0xff] }
 0x44c   :  { %6602 = vst [vmem:[#allocation110_spill] sm:$0xff] %v4661_v40  ;;  %v4681_v55 = vadd.f32 %v4501_v37, %v6608_v52  ;;  %v6610_v40 = vld [vmem:[#allocation36_spill] sm:$0xff] }
 0x44d   :  { %6604 = vst [vmem:[#allocation112_spill] sm:$0xff] %v4665_v30  ;;  %v4685_v25 = vadd.f32 %v4501_v37, %v6610_v40  ;;  %v4705_v40 = vadd.f32 %v4501_v37, %v4124_v11 }
 0x44e   :  { %6605 = vst [vmem:[#allocation47_spill] sm:$0xff] %v4669_v0  ;;  %v6613_v0 = vld [vmem:[#allocation42_spill] sm:$0xff] }
 0x44f   :  { %6606 = vst [vmem:[#allocation63_spill] sm:$0xff] %v4673_v45  ;;  %v4693_v16 = vadd.f32 %v4501_v37, %v6613_v0  ;;  %v6615_v45 = vld [vmem:[#allocation50_spill] sm:$0xff]  ;;  %v4713_v0 = vadd.f32 %v4501_v37, %v4132_v61 }
 0x450   :  { %6607 = vst [vmem:[#allocation116_spill] sm:$0xff] %v4677_v26  ;;  %v4697_v57 = vadd.f32 %v4501_v37, %v6615_v45  ;;  %v6617_v26 = vld [vmem:[#allocation57_spill] sm:$0xff] }
 0x451   :  { %6609 = vst [vmem:[#allocation117_spill] sm:$0xff] %v4681_v55  ;;  %v4701_v52 = vadd.f32 %v4501_v37, %v6617_v26 }
 0x452   :  { %6611 = vst [vmem:[#allocation118_spill] sm:$0xff] %v4685_v25 }
 0x453   :  { %6612 = vst [vmem:[#allocation120_spill] sm:$0xff] %v4689_v56 }
 0x454   :  { %6614 = vst [vmem:[#allocation56_spill] sm:$0xff] %v4693_v16  ;;  %v6621_v16 = vld [vmem:[#allocation66_spill] sm:$0xff] }
 0x455   :  { %6616 = vst [vmem:[#allocation61_spill] sm:$0xff] %v4697_v57  ;;  %v4717_v45 = vadd.f32 %v4501_v37, %v6621_v16  ;;  %v6623_v57 = vld [vmem:[#allocation73_spill] sm:$0xff]  ;;  %v4737_v16 = vadd.f32 %v4501_v37, %v4156_v63 }
 0x456   :  { %6618 = vst [vmem:[#allocation122_spill] sm:$0xff] %v4701_v52  ;;  %v4721_v26 = vadd.f32 %v4501_v37, %v6623_v57  ;;  %v6625_v52 = vld [vmem:[#allocation83_spill] sm:$0xff] }
 0x457   :  { %6619 = vst [vmem:[#allocation123_spill] sm:$0xff] %v4705_v40  ;;  %v4725_v11 = vadd.f32 %v4501_v37, %v6625_v52  ;;  %v6626_v40 = vld [vmem:[#allocation90_spill] sm:$0xff] }
 0x458   :  { %6620 = vst [vmem:[#allocation124_spill] sm:$0xff] %v4709_v34  ;;  %v4729_v39 = vadd.f32 %v4501_v37, %v6626_v40  ;;  %v6628_v34 = vld [vmem:[#allocation111_spill] sm:$0xff]  ;;  %v4749_v40 = vadd.f32 %v4501_v37, %v4168_v54 }
 0x459   :  { %6622 = vst [vmem:[#allocation125_spill] sm:$0xff] %v4717_v45  ;;  %v4733_v61 = vadd.f32 %v4501_v37, %v6628_v34  ;;  %v6631_v45 = vld [vmem:[#allocation113_spill] sm:$0xff] }
 0x45a   :  { %6624 = vst [vmem:[#allocation126_spill] sm:$0xff] %v4721_v26  ;;  %v4741_v57 = vadd.f32 %v4501_v37, %v6631_v45  ;;  %v6633_v26 = vld [vmem:[#allocation119_spill] sm:$0xff] }
 0x45b   :  { %6627 = vst [vmem:[#allocation127_spill] sm:$0xff] %v4729_v39  ;;  %v4745_v52 = vadd.f32 %v4501_v37, %v6633_v26  ;;  %v6636_v39 = vld [vmem:[#allocation68_spill] sm:$0xff] }
 0x45c   :  { %6629 = vst [vmem:[#allocation128_spill] sm:$0xff] %v4733_v61  ;;  %v4753_v34 = vadd.f32 %v4501_v37, %v6636_v39  ;;  %v6638_v61 = vld [vmem:[#allocation132_spill] sm:$0xff] }
 0x45d   :  { %6630 = vst [vmem:[#allocation129_spill] sm:$0xff] %v4737_v16  ;;  %v4757_v63 = vadd.f32 %v4501_v37, %v6638_v61  ;;  %v6640_v16 = vld [vmem:[#allocation2_spill] sm:$0xff] }
 0x45e   :  { %6632 = vst [vmem:[#allocation130_spill] sm:$0xff] %v4741_v57  ;;  %v4761_v45 = vadd.f32 %v4501_v37, %v6640_v16  ;;  %v6642_v57 = vld [vmem:[#allocation3_spill] sm:$0xff] }
 0x45f   :  { %6634 = vst [vmem:[#allocation131_spill] sm:$0xff] %v4745_v52  ;;  %v4765_v26 = vadd.f32 %v4501_v37, %v6642_v57  ;;  %v6644_v52 = vld [vmem:[#allocation4_spill] sm:$0xff]  ;;  %v6807_v9 = vld [vmem:[#allocation123_spill] sm:$0xff] }
 0x460   :  { %6635 = vst [vmem:[#allocation13_spill] sm:$0xff] %v4749_v40  ;;  %v4769_v54 = vadd.f32 %v4501_v37, %v6644_v52  ;;  %v6646_v40 = vld [vmem:[#allocation5_spill] sm:$0xff]  ;;  %v6808_v30 = vld [vmem:[#allocation124_spill] sm:$0xff] }
 0x461   :  { %6637 = vst [vmem:[#allocation22_spill] sm:$0xff] %v4753_v34  ;;  %v4773_v39 = vadd.f32 %v4501_v37, %v6646_v40  ;;  %v6648_v34 = vld [vmem:[#allocation6_spill] sm:$0xff]  ;;  %v6809_v17 = vld [vmem:[#allocation125_spill] sm:$0xff] }
 0x462   :  { %6639 = vst [vmem:[#allocation40_spill] sm:$0xff] %v4757_v63  ;;  %v4777_v61 = vadd.f32 %v4501_v37, %v6648_v34  ;;  %v6650_v63 = vld [vmem:[#allocation8_spill] sm:$0xff]  ;;  %v6810_v24 = vld [vmem:[#allocation126_spill] sm:$0xff]  ;;  %v6811_v25 = vld [vmem:[#allocation127_spill] sm:$0xff] }
 0x463   :  { %6641 = vst [vmem:[#allocation69_spill] sm:$0xff] %v4761_v45  ;;  %v4781_v16 = vadd.f32 %v4501_v37, %v6650_v63  ;;  %v6652_v45 = vld [vmem:[#allocation10_spill] sm:$0xff]  ;;  %v6812_v56 = vld [vmem:[#allocation128_spill] sm:$0xff] }
 0x464   :  { %6643 = vst [vmem:[#allocation82_spill] sm:$0xff] %v4765_v26  ;;  %v4785_v57 = vadd.f32 %v4501_v37, %v6652_v45  ;;  %v6654_v26 = vld [vmem:[#allocation11_spill] sm:$0xff]  ;;  %v6813_v6 = vld [vmem:[#allocation129_spill] sm:$0xff] }
 0x465   :  { %6645 = vst [vmem:[#allocation84_spill] sm:$0xff] %v4769_v54  ;;  %v4789_v52 = vadd.f32 %v4501_v37, %v6654_v26  ;;  %v6656_v54 = vld [vmem:[#allocation15_spill] sm:$0xff] }
 0x466   :  { %6647 = vst [vmem:[#allocation87_spill] sm:$0xff] %v4773_v39  ;;  %v4793_v40 = vadd.f32 %v4501_v37, %v6656_v54  ;;  %v6658_v39 = vld [vmem:[#allocation17_spill] sm:$0xff] }
 0x467   :  { %6649 = vst [vmem:[#allocation19_spill] sm:$0xff] %v4777_v61  ;;  %v4797_v34 = vadd.f32 %v4501_v37, %v6658_v39  ;;  %v6660_v61 = vld [vmem:[#allocation18_spill] sm:$0xff] }
 0x468   :  { %6651 = vst [vmem:[#allocation21_spill] sm:$0xff] %v4781_v16  ;;  %v4801_v63 = vadd.f32 %v4501_v37, %v6660_v61  ;;  %v6662_v16 = vld [vmem:[#allocation20_spill] sm:$0xff] }
 0x469   :  { %6653 = vst [vmem:[#allocation38_spill] sm:$0xff] %v4785_v57  ;;  %v4805_v45 = vadd.f32 %v4501_v37, %v6662_v16  ;;  %v6664_v57 = vld [vmem:[#allocation25_spill] sm:$0xff] }
 0x46a   :  { %6655 = vst [vmem:[#allocation48_spill] sm:$0xff] %v4789_v52  ;;  %v4809_v26 = vadd.f32 %v4501_v37, %v6664_v57  ;;  %v6666_v52 = vld [vmem:[#allocation28_spill] sm:$0xff]  ;;  %v4829_v57 = vadd.f32 %v4501_v37, %v4248_v27  ;;  %v4849_v27 = vadd.f32 %v4501_v37, %v4268_v10  ;;  %v4869_v10 = vadd.f32 %v4501_v37, %v4288_v53 }
 0x46b   :  { %6657 = vst [vmem:[#allocation27_spill] sm:$0xff] %v4793_v40  ;;  %v4813_v54 = vadd.f32 %v4501_v37, %v6666_v52  ;;  %v6667_v40 = vld [vmem:[#allocation31_spill] sm:$0xff]  ;;  %v4889_v53 = vadd.f32 %v4501_v37, %v4308_v20  ;;  %v4909_v20 = vadd.f32 %v4501_v37, %v4328_v38 }
 0x46c   :  { %6659 = vst [vmem:[#allocation33_spill] sm:$0xff] %v4797_v34  ;;  %v4817_v39 = vadd.f32 %v4501_v37, %v6667_v40  ;;  %v6669_v34 = vld [vmem:[#allocation34_spill] sm:$0xff]  ;;  %v4837_v40 = vadd.f32 %v4501_v37, %v4256_v29  ;;  %v4857_v29 = vadd.f32 %v4501_v37, %v4276_v62  ;;  %v4877_v62 = vadd.f32 %v4501_v37, %v4296_v43  ;;  %v6821_v50 = vld [vmem:[#allocation84_spill] sm:$0xff] }
 0x46d   :  { %6661 = vst [vmem:[#allocation36_spill] sm:$0xff] %v4801_v63  ;;  %v4821_v61 = vadd.f32 %v4501_v37, %v6669_v34  ;;  %v6671_v63 = vld [vmem:[#allocation37_spill] sm:$0xff]  ;;  %v4841_v34 = vadd.f32 %v4501_v37, %v4260_v48  ;;  %v4861_v48 = vadd.f32 %v4501_v37, %v4280_v36  ;;  %v4881_v36 = vadd.f32 %v4501_v37, %v4300_v15  ;;  %v6822_v19 = vld [vmem:[#allocation87_spill] sm:$0xff] }
 0x46e   :  { %6663 = vst [vmem:[#allocation42_spill] sm:$0xff] %v4805_v45  ;;  %v4825_v16 = vadd.f32 %v4501_v37, %v6671_v63  ;;  %v4897_v43 = vadd.f32 %v4501_v37, %v4316_v44  ;;  %v4901_v15 = vadd.f32 %v4501_v37, %v4320_v28 }
 0x46f   :  { %6665 = vst [vmem:[#allocation50_spill] sm:$0xff] %v4809_v26  ;;  %v6674_v26 = vld [vmem:[#allocation43_spill] sm:$0xff] }
 0x470   :  { %6668 = vst [vmem:[#allocation57_spill] sm:$0xff] %v4817_v39  ;;  %v4833_v52 = vadd.f32 %v4501_v37, %v6674_v26 }
 0x471   :  { %6670 = vst [vmem:[#allocation66_spill] sm:$0xff] %v4821_v61  ;;  %v6677_v61 = vld [vmem:[#allocation46_spill] sm:$0xff]  ;;  %v6826_v5 = vld [vmem:[#allocation48_spill] sm:$0xff] }
 0x472   :  { %6672 = vst [vmem:[#allocation73_spill] sm:$0xff] %v4825_v16  ;;  %v4845_v63 = vadd.f32 %v4501_v37, %v6677_v61  ;;  %v6827_v55 = vld [vmem:[#allocation27_spill] sm:$0xff] }
 0x473   :  { %6673 = vst [vmem:[#allocation83_spill] sm:$0xff] %v4829_v57  ;;  %v6680_v57 = vld [vmem:[#allocation49_spill] sm:$0xff] }
 0x474   :  { %6675 = vst [vmem:[#allocation90_spill] sm:$0xff] %v4837_v40  ;;  %v4853_v26 = vadd.f32 %v4501_v37, %v6680_v57  ;;  %v6829_v4 = vld [vmem:[#allocation36_spill] sm:$0xff] }
 0x475   :  { %6676 = vst [vmem:[#allocation111_spill] sm:$0xff] %v4841_v34  ;;  %v6684_v34 = vld [vmem:[#allocation52_spill] sm:$0xff] }
 0x476   :  { %6678 = vst [vmem:[#allocation113_spill] sm:$0xff] %v4845_v63  ;;  %v4865_v61 = vadd.f32 %v4501_v37, %v6684_v34  ;;  %v6830_v22 = vld [vmem:[#allocation50_spill] sm:$0xff] }
 0x477   :  { %6679 = vst [vmem:[#allocation119_spill] sm:$0xff] %v4849_v27  ;;  %v6687_v27 = vld [vmem:[#allocation54_spill] sm:$0xff] }
 0x478   :  { %6681 = vst [vmem:[#allocation68_spill] sm:$0xff] %v4853_v26  ;;  %v4873_v57 = vadd.f32 %v4501_v37, %v6687_v27  ;;  %v6831_v33 = vld [vmem:[#allocation66_spill] sm:$0xff] }
 0x479   :  { %6682 = vst [vmem:[#allocation132_spill] sm:$0xff] %v4857_v29 }
 0x47a   :  { %6683 = vst [vmem:[#allocation2_spill] sm:$0xff] %v4861_v48  ;;  %v6690_v48 = vld [vmem:[#allocation58_spill] sm:$0xff]  ;;  %v6832_v51 = vld [vmem:[#allocation83_spill] sm:$0xff] }
 0x47b   :  { %6685 = vst [vmem:[#allocation3_spill] sm:$0xff] %v4865_v61  ;;  %v4885_v34 = vadd.f32 %v4501_v37, %v6690_v48 }
 0x47c   :  { %6686 = vst [vmem:[#allocation4_spill] sm:$0xff] %v4869_v10  ;;  %v6692_v10 = vld [vmem:[#allocation62_spill] sm:$0xff]  ;;  %v6833_v46 = vld [vmem:[#allocation111_spill] sm:$0xff] }
 0x47d   :  { %6688 = vst [vmem:[#allocation5_spill] sm:$0xff] %v4877_v62  ;;  %v4893_v27 = vadd.f32 %v4501_v37, %v6692_v10 }
 0x47e   :  { %6689 = vst [vmem:[#allocation6_spill] sm:$0xff] %v4881_v36  ;;  %v6696_v36 = vld [vmem:[#allocation65_spill] sm:$0xff] }
 0x47f   :  { %6691 = vst [vmem:[#allocation8_spill] sm:$0xff] %v4889_v53  ;;  %v4905_v48 = vadd.f32 %v4501_v37, %v6696_v36  ;;  %v6699_v53 = vld [vmem:[#allocation71_spill] sm:$0xff] }
 0x480   :  { %6693 = vst [vmem:[#allocation10_spill] sm:$0xff] %v4893_v27  ;;  %v4913_v10 = vadd.f32 %v4501_v37, %v6699_v53  ;;  %v6701_v27 = vld [vmem:[#allocation74_spill] sm:$0xff] }
 0x481   :  { %6694 = vst [vmem:[#allocation11_spill] sm:$0xff] %v4897_v43  ;;  %v4917_v44 = vadd.f32 %v4501_v37, %v6701_v27  ;;  %v6703_v43 = vld [vmem:[#allocation78_spill] sm:$0xff]  ;;  %v4937_v27 = vadd.f32 %v4501_v37, %v4356_v21  ;;  %v4957_v21 = vadd.f32 %v4501_v37, %v4376_v2  ;;  %v4977_v2 = vadd.f32 %v4501_v37, %v4396_v7 }
 0x482   :  { %6695 = vst [vmem:[#allocation15_spill] sm:$0xff] %v4901_v15  ;;  %v4921_v28 = vadd.f32 %v4501_v37, %v6703_v43  ;;  %v6705_v15 = vld [vmem:[#allocation80_spill] sm:$0xff]  ;;  %v4941_v43 = vadd.f32 %v4501_v37, %v4360_v49  ;;  %v4961_v49 = vadd.f32 %v4501_v37, %v4380_v58  ;;  %v4981_v58 = vadd.f32 %v4501_v37, %v4400_v35 }
 0x483   :  { %6697 = vst [vmem:[#allocation17_spill] sm:$0xff] %v4905_v48  ;;  %v4925_v36 = vadd.f32 %v4501_v37, %v6705_v15  ;;  %v6707_v48 = vld [vmem:[#allocation7_spill] sm:$0xff]  ;;  %v4997_v7 = vadd.f32 %v4501_v37, %v4416_v18  ;;  %v5001_v35 = vadd.f32 %v4501_v37, %v4420_v14  ;;  %v6836_v16 = vld [vmem:[#allocation4_spill] sm:$0xff] }
 0x484   :  { %6698 = vst [vmem:[#allocation18_spill] sm:$0xff] %v4909_v20  ;;  %v4929_v38 = vadd.f32 %v4501_v37, %v6707_v48  ;;  %v6709_v20 = vld [vmem:[#allocation9_spill] sm:$0xff] }
 0x485   :  { %6700 = vst [vmem:[#allocation20_spill] sm:$0xff] %v4913_v10  ;;  %v4933_v53 = vadd.f32 %v4501_v37, %v6709_v20  ;;  %v4953_v20 = vadd.f32 %v4501_v37, %v4372_v47  ;;  %v4973_v47 = vadd.f32 %v4501_v37, %v4392_v23  ;;  %v4993_v23 = vadd.f32 %v4501_v37, %v4412_v42 }
 0x486   :  { %6702 = vst [vmem:[#allocation25_spill] sm:$0xff] %v4917_v44 }
 0x487   :  { %6704 = vst [vmem:[#allocation28_spill] sm:$0xff] %v4921_v28  ;;  %v6713_v28 = vld [vmem:[#allocation12_spill] sm:$0xff] }
 0x488   :  { %6706 = vst [vmem:[#allocation31_spill] sm:$0xff] %v4925_v36  ;;  %v4945_v15 = vadd.f32 %v4501_v37, %v6713_v28  ;;  %v6715_v36 = vld [vmem:[#allocation14_spill] sm:$0xff] }
 0x489   :  { %6708 = vst [vmem:[#allocation34_spill] sm:$0xff] %v4929_v38  ;;  %v4949_v48 = vadd.f32 %v4501_v37, %v6715_v36  ;;  %v4969_v36 = vadd.f32 %v4501_v37, %v4388_v32 }
 0x48a   :  { %6710 = vst [vmem:[#allocation37_spill] sm:$0xff] %v4933_v53 }
 0x48b   :  { %6711 = vst [vmem:[#allocation43_spill] sm:$0xff] %v4937_v27 }
 0x48c   :  { %6712 = vst [vmem:[#allocation46_spill] sm:$0xff] %v4941_v43  ;;  %v6720_v43 = vld [vmem:[#allocation16_spill] sm:$0xff] }
 0x48d   :  { %6714 = vst [vmem:[#allocation49_spill] sm:$0xff] %v4945_v15  ;;  %v4965_v28 = vadd.f32 %v4501_v37, %v6720_v43  ;;  %v4985_v43 = vadd.f32 %v4501_v37, %v4404_v8 }
 0x48e   :  { %6716 = vst [vmem:[#allocation52_spill] sm:$0xff] %v4949_v48 }
 0x48f   :  { %6717 = vst [vmem:[#allocation54_spill] sm:$0xff] %v4953_v20 }
 0x490   :  { %6718 = vst [vmem:[#allocation58_spill] sm:$0xff] %v4957_v21 }
 0x491   :  { %6719 = vst [vmem:[#allocation62_spill] sm:$0xff] %v4961_v49 }
 0x492   :  { %6721 = vst [vmem:[#allocation65_spill] sm:$0xff] %v4965_v28  ;;  %v6727_v28 = vld [vmem:[#allocation23_spill] sm:$0xff] }
 0x493   :  { %6722 = vst [vmem:[#allocation71_spill] sm:$0xff] %v4969_v36  ;;  %v4989_v32 = vadd.f32 %v4501_v37, %v6727_v28 }
 0x494   :  { %6723 = vst [vmem:[#allocation74_spill] sm:$0xff] %v4973_v47 }
 0x495   :  { %6724 = vst [vmem:[#allocation78_spill] sm:$0xff] %v4977_v2 }
 0x496   :  { %6725 = vst [vmem:[#allocation80_spill] sm:$0xff] %v4981_v58  ;;  %v6732_v58 = vld [vmem:[#allocation26_spill] sm:$0xff] }
 0x497   :  { %6726 = vst [vmem:[#allocation7_spill] sm:$0xff] %v4985_v43  ;;  %v5005_v8 = vadd.f32 %v4501_v37, %v6732_v58  ;;  %v6734_v43 = vld [vmem:[#allocation29_spill] sm:$0xff] }
 0x498   :  { %6728 = vst [vmem:[#allocation9_spill] sm:$0xff] %v4989_v32  ;;  %v5009_v28 = vadd.f32 %v4501_v37, %v6734_v43  ;;  %v6736_v32 = vld [vmem:[#allocation32_spill] sm:$0xff] }
 0x499   :  { %6729 = vst [vmem:[#allocation12_spill] sm:$0xff] %v4993_v23  ;;  %v5013_v42 = vadd.f32 %v4501_v37, %v6736_v32  ;;  %v6738_v23 = vld [vmem:[#allocation35_spill] sm:$0xff] }
 0x49a   :  { %6730 = vst [vmem:[#allocation14_spill] sm:$0xff] %v4997_v7  ;;  %v5017_v18 = vadd.f32 %v4501_v37, %v6738_v23  ;;  %v6740_v7 = vld [vmem:[#allocation41_spill] sm:$0xff] }
 0x49b   :  { %6731 = vst [vmem:[#allocation16_spill] sm:$0xff] %v5001_v35  ;;  %v5021_v14 = vadd.f32 %v4501_v37, %v6740_v7  ;;  %v6742_v35 = vld [vmem:[#allocation45_spill] sm:$0xff] }
 0x49c   :  { %6733 = vst [vmem:[#allocation23_spill] sm:$0xff] %v5005_v8  ;;  %v5025_v58 = vadd.f32 %v4501_v37, %v6742_v35  ;;  %v6744_v8 = vld [vmem:[#allocation51_spill] sm:$0xff] }
 0x49d   :  { %6735 = vst [vmem:[#allocation26_spill] sm:$0xff] %v5009_v28  ;;  %v5029_v43 = vadd.f32 %v4501_v37, %v6744_v8  ;;  %v6746_v28 = vld [vmem:[#allocation55_spill] sm:$0xff] }
 0x49e   :  { %6737 = vst [vmem:[#allocation29_spill] sm:$0xff] %v5013_v42  ;;  %v5033_v32 = vadd.f32 %v4501_v37, %v6746_v28  ;;  %v6748_v42 = vld [vmem:[#allocation60_spill] sm:$0xff] }
 0x49f   :  { %6739 = vst [vmem:[#allocation32_spill] sm:$0xff] %v5017_v18  ;;  %v5037_v23 = vadd.f32 %v4501_v37, %v6748_v42  ;;  %v6750_v18 = vld [vmem:[#allocation64_spill] sm:$0xff] }
 0x4a0   :  { %6741 = vst [vmem:[#allocation35_spill] sm:$0xff] %v5021_v14  ;;  %v5041_v7 = vadd.f32 %v4501_v37, %v6750_v18  ;;  %v6752_v14 = vld [vmem:[#allocation67_spill] sm:$0xff]  ;;  %v6851_v48 = vld [vmem:[#allocation12_spill] sm:$0xff] }
 0x4a1   :  { %6743 = vst [vmem:[#allocation41_spill] sm:$0xff] %v5025_v58  ;;  %v5045_v35 = vadd.f32 %v4501_v37, %v6752_v14  ;;  %v6754_v58 = vld [vmem:[#allocation72_spill] sm:$0xff]  ;;  %v6852_v20 = vld [vmem:[#allocation14_spill] sm:$0xff] }
 0x4a2   :  { %6745 = vst [vmem:[#allocation45_spill] sm:$0xff] %v5029_v43  ;;  %v5049_v8 = vadd.f32 %v4501_v37, %v6754_v58  ;;  %v6756_v43 = vld [vmem:[#allocation75_spill] sm:$0xff]  ;;  %v6853_v21 = vld [vmem:[#allocation16_spill] sm:$0xff] }
 0x4a3   :  { %6747 = vst [vmem:[#allocation51_spill] sm:$0xff] %v5033_v32  ;;  %v5053_v28 = vadd.f32 %v4501_v37, %v6756_v43  ;;  %v6758_v32 = vld [vmem:[#allocation79_spill] sm:$0xff] }
 0x4a4   :  { %6749 = vst [vmem:[#allocation55_spill] sm:$0xff] %v5037_v23  ;;  %v5057_v42 = vadd.f32 %v4501_v37, %v6758_v32  ;;  %v6759_v23 = vld [vmem:[#allocation81_spill] sm:$0xff]  ;;  %v6854_v49 = vld [vmem:[#allocation23_spill] sm:$0xff]  ;;  %v6855_v62 = vld [vmem:[#allocation26_spill] sm:$0xff] }
 0x4a5   :  { %6751 = vst [vmem:[#allocation60_spill] sm:$0xff] %v5041_v7  ;;  %v5061_v18 = vadd.f32 %v4501_v37, %v6759_v23  ;;  %v6761_v7 = vld [vmem:[#allocation85_spill] sm:$0xff]  ;;  %v5081_v23 = vadd.f32 %v4501_v37, %v4505_v60 }
 0x4a6   :  { %6753 = vst [vmem:[#allocation64_spill] sm:$0xff] %v5045_v35  ;;  %v5065_v14 = vadd.f32 %v4501_v37, %v6761_v7  ;;  %v6763_v35 = vld [vmem:[#allocation88_spill] sm:$0xff]  ;;  %v6856_v36 = vld [vmem:[#allocation29_spill] sm:$0xff] }
 0x4a7   :  { %6755 = vst [vmem:[#allocation67_spill] sm:$0xff] %v5049_v8  ;;  %v5069_v58 = vadd.f32 %v4501_v37, %v6763_v35  ;;  %v6765_v8 = vld [vmem:[#allocation91_spill] sm:$0xff]  ;;  %v6857_v47 = vld [vmem:[#allocation32_spill] sm:$0xff] }
 0x4a8   :  { %6757 = vst [vmem:[#allocation72_spill] sm:$0xff] %v5053_v28  ;;  %v5073_v43 = vadd.f32 %v4501_v37, %v6765_v8  ;;  %v6767_v28 = vld [vmem:[#allocation94_spill] sm:$0xff]  ;;  %v6858_v2 = vld [vmem:[#allocation35_spill] sm:$0xff]  ;;  %v6859_v27 = vld [vmem:[#allocation41_spill] sm:$0xff] }
 0x4a9   :  { %6760 = vst [vmem:[#allocation75_spill] sm:$0xff] %v5061_v18  ;;  %v5077_v32 = vadd.f32 %v4501_v37, %v6767_v28  ;;  %v6770_v18 = vld [vmem:[#allocation97_spill] sm:$0xff] }
 0x4aa   :  { %6762 = vst [vmem:[#allocation79_spill] sm:$0xff] %v5065_v14  ;;  %v5085_v7 = vadd.f32 %v4501_v37, %v6770_v18  ;;  %v6772_v14 = vld [vmem:[#allocation100_spill] sm:$0xff]  ;;  %v6860_v26 = vld [vmem:[#allocation45_spill] sm:$0xff]  ;;  %v6861_v15 = vld [vmem:[#allocation51_spill] sm:$0xff] }
 0x4ab   :  { %6764 = vst [vmem:[#allocation81_spill] sm:$0xff] %v5069_v58  ;;  %v5089_v35 = vadd.f32 %v4501_v37, %v6772_v14  ;;  %v6774_v58 = vld [vmem:[#allocation103_spill] sm:$0xff] }
 0x4ac   :  { %6766 = vst [vmem:[#allocation85_spill] sm:$0xff] %v5073_v43  ;;  %v5093_v8 = vadd.f32 %v4501_v37, %v6774_v58  ;;  %v6775_v43 = vld [vmem:[#allocation106_spill] sm:$0xff]  ;;  %v5113_v58 = vadd.f32 %v4501_v37, %v4537_v41  ;;  %v5133_v41 = vadd.f32 %v4501_v37, %v4557_v12  ;;  %v6887_v12 = vld [vmem:[#allocation53_spill] sm:$0xff] }
 0x4ad   :  { %6768 = vst [vmem:[#allocation88_spill] sm:$0xff] %v5077_v32  ;;  %v5097_v28 = vadd.f32 %v4501_v37, %v6775_v43  ;;  %v6777_v32 = vld [vmem:[#allocation109_spill] sm:$0xff]  ;;  %v5117_v43 = vadd.f32 %v4501_v37, %v4541_v3  ;;  %v6864_v40 = vld [vmem:[#allocation64_spill] sm:$0xff]  ;;  %v6888_v3 = vmax.f32 %v6887_v12, 0.0 }
 0x4ae   :  { %6769 = vst [vmem:[#allocation91_spill] sm:$0xff] %v5081_v23  ;;  %v5101_v60 = vadd.f32 %v4501_v37, %v6777_v32  ;;  %v6779_v23 = vld [vmem:[#allocation24_spill] sm:$0xff]  ;;  %v5121_v32 = vadd.f32 %v4501_v37, %v4545_v59  ;;  %v6865_v44 = vld [vmem:[#allocation67_spill] sm:$0xff]  ;;  %v6889_v59 = vmax.f32 %v6809_v17, 0.0 }
 0x4af   :  { %6771 = vst [vmem:[#allocation94_spill] sm:$0xff] %v5085_v7  ;;  %v5105_v18 = vadd.f32 %v4501_v37, %v6779_v23  ;;  %v6780_v7 = vld [vmem:[#allocation30_spill] sm:$0xff]  ;;  %v5125_v23 = vadd.f32 %v4501_v37, %v4549_v1  ;;  %v6866_v10 = vld [vmem:[#allocation72_spill] sm:$0xff] }
 0x4b0   :  { %6773 = vst [vmem:[#allocation97_spill] sm:$0xff] %v5089_v35  ;;  %v5109_v14 = vadd.f32 %v4501_v37, %v6780_v7  ;;  %v5129_v7 = vadd.f32 %v4501_v37, %v4553_v31  ;;  %v6819_v37 = vld [vmem:[#allocation69_spill] sm:$0xff]  ;;  %v6867_v61 = vld [vmem:[#allocation75_spill] sm:$0xff]  ;;  %v6883_v31 = vmax.f32 %v6808_v30, 0.0 }
 0x4b1   :  { %6776 = vst [vmem:[#allocation100_spill] sm:$0xff] %v5097_v28  ;;  %v6868_v39 = vld [vmem:[#allocation79_spill] sm:$0xff] }
 0x4b2   :  { %6778 = vst [vmem:[#allocation103_spill] sm:$0xff] %v5101_v60  ;;  %v6881_v28 = vld [vmem:[#allocation39_spill] sm:$0xff] }
 0x4b3   :  { %6781 = vst [vmem:[#allocation106_spill] sm:$0xff] %v5109_v14  ;;  %v6882_v1 = vmax.f32 %v6881_v28, 0.0  ;;  %v6892_v28 = vmax.f32 %v6810_v24, 0.0 }
 0x4b4   :  { %6782 = vst [vmem:[#allocation109_spill] sm:$0xff] %v5113_v58  ;;  %v6886_v58 = vmax.f32 %v4713_v0, 0.0  ;;  %v6896_v0 = vmax.f32 %v4581_v13, 0.0  ;;  %v6906_v13 = vld [vmem:[#allocation130_spill] sm:$0xff] }
 0x4b5   :  { %6783 = vst [vmem:[#allocation24_spill] sm:$0xff] %v5117_v43  ;;  %v6890_v43 = vld [vmem:[#allocation59_spill] sm:$0xff] }
 0x4b6   :  { %6784 = vst [vmem:[#allocation30_spill] sm:$0xff] %v5121_v32  ;;  %v6880_v32 = vmax.f32 %v6807_v9, 0.0  ;;  %v5295_v53 = vmax.f32 %v6888_v3, %v6886_v58  ;;  %v6891_v9 = vmax.f32 %v6890_v43, 0.0  ;;  %v6897_v58 = vmax.f32 %v6811_v25, 0.0  ;;  %v6898_v3 = vld [vmem:[#allocation77_spill] sm:$0xff] }
 0x4b7   :  { %6785 = vst [vmem:[#allocation133_spill] sm:$0xff] %v5125_v23  ;;  %v6884_v23 = vld [vmem:[#allocation44_spill] sm:$0xff]  ;;  %v6899_v17 = vmax.f32 %v6898_v3, 0.0  ;;  %v6900_v43 = vmax.f32 %v6812_v56, 0.0 }
 0x4b8   :  { %6786 = vst [vmem:[#allocation134_spill] sm:$0xff] %v5129_v7  ;;  %v5283_v60 = vmax.f32 %v6882_v1, %v6880_v32  ;;  %v6885_v7 = vmax.f32 %v6884_v23, 0.0  ;;  %v5301_v35 = vmax.f32 %v6891_v9, %v6889_v59  ;;  %v6893_v32 = vld [vmem:[#allocation70_spill] sm:$0xff]  ;;  %v6895_v23 = vmax.f32 %v4725_v11, 0.0 }
 0x4b9   :  { %6787 = vst [vmem:[#allocation135_spill] sm:$0xff] %v5133_v41  ;;  %v6824_v41 = vld [vmem:[#allocation21_spill] sm:$0xff]  ;;  %v6894_v30 = vmax.f32 %v6893_v32, 0.0  ;;  %v6901_v59 = vld [vmem:[#allocation86_spill] sm:$0xff]  ;;  %v6903_v9 = vmax.f32 %v6813_v6, 0.0 }
 0x4ba   :  { %v5289_v29 = vmax.f32 %v6885_v7, %v6883_v31  ;;  %v5313_v7 = vmax.f32 %v6896_v0, %v6895_v23  ;;  %v5319_v31 = vmax.f32 %v6899_v17, %v6897_v58  ;;  %v6902_v24 = vmax.f32 %v6901_v59, 0.0  ;;  %v6908_v23 = vld [vmem:[#allocation96_spill] sm:$0xff]  ;;  %v6910_v58 = vld [vmem:[#allocation131_spill] sm:$0xff] }
 0x4bb   :  { %v5307_v1 = vmax.f32 %v6894_v30, %v6892_v28  ;;  %v6904_v28 = vld [vmem:[#allocation93_spill] sm:$0xff]  ;;  %v6907_v30 = vmax.f32 %v6906_v13, 0.0  ;;  %v6909_v25 = vmax.f32 %v6908_v23, 0.0  ;;  %v6911_v3 = vmax.f32 %v6910_v58, 0.0  ;;  %v6912_v17 = vld [vmem:[#allocation99_spill] sm:$0xff] }
 0x4bc   :  { %v5325_v12 = vmax.f32 %v6902_v24, %v6900_v43  ;;  %v6905_v11 = vmax.f32 %v6904_v28, 0.0  ;;  %v6913_v56 = vmax.f32 %v6912_v17, 0.0  ;;  %v6914_v43 = vld [vmem:[#allocation13_spill] sm:$0xff]  ;;  %v6916_v24 = vld [vmem:[#allocation102_spill] sm:$0xff] }
 0x4bd   :  { %v5337_v0 = vmax.f32 %v6909_v25, %v6907_v30  ;;  %v6915_v59 = vmax.f32 %v6914_v43, 0.0  ;;  %v6917_v6 = vmax.f32 %v6916_v24, 0.0  ;;  %v6923_v30 = vld [vmem:[#allocation40_spill] sm:$0xff]  ;;  %v6928_v17 = vld [vmem:[#allocation114_spill] sm:$0xff] }
 0x4be   :  { %v5331_v32 = vmax.f32 %v6905_v11, %v6903_v9  ;;  %v5343_v38 = vmax.f32 %v6913_v56, %v6911_v3  ;;  %v6919_v9 = vld [vmem:[#allocation22_spill] sm:$0xff]  ;;  %v6921_v11 = vld [vmem:[#allocation105_spill] sm:$0xff]  ;;  %v6924_v23 = vmax.f32 %v6923_v30, 0.0  ;;  %v6925_v25 = vld [vmem:[#allocation108_spill] sm:$0xff]  ;;  %v6927_v3 = vmax.f32 %v6819_v37, 0.0 }
 0x4bf   :  { %v5349_v63 = vmax.f32 %v6917_v6, %v6915_v59  ;;  %v6920_v28 = vmax.f32 %v6919_v9, 0.0  ;;  %v6922_v13 = vmax.f32 %v6921_v11, 0.0  ;;  %v6926_v58 = vmax.f32 %v6925_v25, 0.0  ;;  %v6931_v59 = vld [vmem:[#allocation82_spill] sm:$0xff]  ;;  %v6933_v6 = vld [vmem:[#allocation115_spill] sm:$0xff]  ;;  %v6936_v11 = vld [vmem:[#allocation121_spill] sm:$0xff] }
 0x4c0   :  { %v6929_v56 = vmax.f32 %v6928_v17, 0.0  ;;  %v6932_v24 = vmax.f32 %v6931_v59, 0.0  ;;  %v6934_v9 = vmax.f32 %v6933_v6, 0.0  ;;  %v6940_v25 = vld [vmem:[#allocation76_spill] sm:$0xff] }
 0x4c1   :  { %6918 = vst [vmem:[#allocation123_spill] sm:$0xff] %v5349_v63  ;;  %v5355_v45 = vmax.f32 %v6922_v13, %v6920_v28  ;;  %v5361_v14 = vmax.f32 %v6926_v58, %v6924_v23  ;;  %v6935_v28 = vmax.f32 %v6821_v50, 0.0  ;;  %v6937_v13 = vmax.f32 %v6936_v11, 0.0  ;;  %v6947_v6 = vld [vmem:[#allocation92_spill] sm:$0xff] }
 0x4c2   :  { %v5367_v43 = vmax.f32 %v6929_v56, %v6927_v3  ;;  %v5373_v63 = vmax.f32 %v6934_v9, %v6932_v24  ;;  %v6939_v23 = vmax.f32 %v6822_v19, 0.0  ;;  %v6941_v37 = vmax.f32 %v6940_v25, 0.0  ;;  %v6942_v3 = vld [vmem:[#allocation19_spill] sm:$0xff]  ;;  %v6944_v56 = vld [vmem:[#allocation89_spill] sm:$0xff]  ;;  %v6955_v25 = vld [vmem:[#allocation98_spill] sm:$0xff] }
 0x4c3   :  { %v5379_v30 = vmax.f32 %v6937_v13, %v6935_v28  ;;  %v6943_v17 = vmax.f32 %v6942_v3, 0.0  ;;  %v6945_v59 = vmax.f32 %v6944_v56, 0.0  ;;  %v6946_v24 = vmax.f32 %v6824_v41, 0.0  ;;  %v6950_v28 = vld [vmem:[#allocation38_spill] sm:$0xff]  ;;  %v6952_v13 = vld [vmem:[#allocation95_spill] sm:$0xff]  ;;  %v6959_v56 = vld [vmem:[#allocation101_spill] sm:$0xff] }
 0x4c4   :  { %6930 = vst [vmem:[#allocation124_spill] sm:$0xff] %v5367_v43  ;;  %v5385_v58 = vmax.f32 %v6941_v37, %v6939_v23  ;;  %v6948_v50 = vmax.f32 %v6947_v6, 0.0  ;;  %v6951_v11 = vmax.f32 %v6950_v28, 0.0  ;;  %v6953_v19 = vmax.f32 %v6952_v13, 0.0  ;;  %v6966_v13 = vld [vmem:[#allocation107_spill] sm:$0xff] }
 0x4c5   :  { %6938 = vst [vmem:[#allocation125_spill] sm:$0xff] %v5379_v30  ;;  %v5391_v43 = vmax.f32 %v6945_v59, %v6943_v17  ;;  %v6954_v23 = vmax.f32 %v6826_v5, 0.0  ;;  %v6956_v37 = vmax.f32 %v6955_v25, 0.0  ;;  %v6958_v17 = vmax.f32 %v6827_v55, 0.0 }
 0x4c6   :  { %v5397_v9 = vmax.f32 %v6948_v50, %v6946_v24  ;;  %v5403_v30 = vmax.f32 %v6953_v19, %v6951_v11  ;;  %v6960_v41 = vmax.f32 %v6959_v56, 0.0  ;;  %v6961_v24 = vld [vmem:[#allocation33_spill] sm:$0xff]  ;;  %v6963_v50 = vld [vmem:[#allocation104_spill] sm:$0xff]  ;;  %v6965_v11 = vmax.f32 %v6829_v4, 0.0 }
 0x4c7   :  { %v5409_v3 = vmax.f32 %v6956_v37, %v6954_v23  ;;  %v6962_v6 = vmax.f32 %v6961_v24, 0.0  ;;  %v6964_v28 = vmax.f32 %v6963_v50, 0.0  ;;  %v6967_v5 = vmax.f32 %v6966_v13, 0.0  ;;  %v6969_v23 = vld [vmem:[#allocation42_spill] sm:$0xff]  ;;  %v6974_v56 = vld [vmem:[#allocation112_spill] sm:$0xff]  ;;  %v6978_v50 = vld [vmem:[#allocation47_spill] sm:$0xff] }
 0x4c8   :  { %6949 = vst [vmem:[#allocation126_spill] sm:$0xff] %v5397_v9  ;;  %v5415_v59 = vmax.f32 %v6960_v41, %v6958_v17  ;;  %v6970_v25 = vmax.f32 %v6969_v23, 0.0  ;;  %v6971_v37 = vld [vmem:[#allocation110_spill] sm:$0xff]  ;;  %v6973_v17 = vmax.f32 %v6830_v22, 0.0  ;;  %v6975_v41 = vmax.f32 %v6974_v56, 0.0 }
 0x4c9   :  { %6957 = vst [vmem:[#allocation127_spill] sm:$0xff] %v5409_v3  ;;  %v5421_v9 = vmax.f32 %v6964_v28, %v6962_v6  ;;  %v5427_v19 = vmax.f32 %v6967_v5, %v6965_v11  ;;  %v6972_v55 = vmax.f32 %v6971_v37, 0.0  ;;  %v6977_v6 = vmax.f32 %v4813_v54, 0.0  ;;  %v6980_v11 = vld [vmem:[#allocation57_spill] sm:$0xff]  ;;  %v6982_v5 = vld [vmem:[#allocation63_spill] sm:$0xff]  ;;  %v6985_v37 = vld [vmem:[#allocation116_spill] sm:$0xff] }
 0x4ca   :  { %v5439_v24 = vmax.f32 %v6975_v41, %v6973_v17  ;;  %v6979_v4 = vmax.f32 %v6978_v50, 0.0  ;;  %v6981_v13 = vmax.f32 %v6980_v11, 0.0  ;;  %v6983_v23 = vmax.f32 %v6982_v5, 0.0  ;;  %v6988_v17 = vld [vmem:[#allocation73_spill] sm:$0xff]  ;;  %v6993_v50 = vld [vmem:[#allocation118_spill] sm:$0xff]  ;;  %v6997_v5 = vld [vmem:[#allocation120_spill] sm:$0xff] }
 0x4cb   :  { %6968 = vst [vmem:[#allocation128_spill] sm:$0xff] %v5427_v19  ;;  %v5433_v3 = vmax.f32 %v6972_v55, %v6970_v25  ;;  %v6984_v25 = vmax.f32 %v6831_v33, 0.0  ;;  %v6986_v22 = vmax.f32 %v6985_v37, 0.0  ;;  %v6989_v56 = vmax.f32 %v6988_v17, 0.0  ;;  %v6990_v41 = vld [vmem:[#allocation117_spill] sm:$0xff] }
 0x4cc   :  { %6976 = vst [vmem:[#allocation129_spill] sm:$0xff] %v5439_v24  ;;  %v5445_v28 = vmax.f32 %v6979_v4, %v6977_v6  ;;  %v5451_v19 = vmax.f32 %v6983_v23, %v6981_v13  ;;  %v6991_v54 = vmax.f32 %v6990_v41, 0.0  ;;  %v6992_v6 = vmax.f32 %v6832_v51, 0.0  ;;  %v7006_v41 = vld [vmem:[#allocation61_spill] sm:$0xff] }
 0x4cd   :  { %v5457_v55 = vmax.f32 %v6986_v22, %v6984_v25  ;;  %v6994_v4 = vmax.f32 %v6993_v50, 0.0  ;;  %v6996_v13 = vmax.f32 %v4833_v52, 0.0  ;;  %v6998_v33 = vmax.f32 %v6997_v5, 0.0  ;;  %v7000_v25 = vld [vmem:[#allocation90_spill] sm:$0xff]  ;;  %v7002_v22 = vld [vmem:[#allocation56_spill] sm:$0xff]  ;;  %v7015_v5 = vld [vmem:[#allocation119_spill] sm:$0xff] }
 0x4ce   :  { %v5463_v24 = vmax.f32 %v6991_v54, %v6989_v56  ;;  %v7001_v37 = vmax.f32 %v7000_v25, 0.0  ;;  %v7003_v17 = vmax.f32 %v7002_v22, 0.0  ;;  %v7005_v56 = vmax.f32 %v6833_v46, 0.0  ;;  %v7018_v22 = vld [vmem:[#allocation68_spill] sm:$0xff] }
 0x4cf   :  { %6987 = vst [vmem:[#allocation69_spill] sm:$0xff] %v5457_v55  ;;  %v5469_v11 = vmax.f32 %v6994_v4, %v6992_v6  ;;  %v5475_v23 = vmax.f32 %v6998_v33, %v6996_v13  ;;  %v7007_v51 = vmax.f32 %v7006_v41, 0.0  ;;  %v7009_v6 = vld [vmem:[#allocation113_spill] sm:$0xff]  ;;  %v7011_v4 = vld [vmem:[#allocation122_spill] sm:$0xff]  ;;  %v7014_v13 = vmax.f32 %v6851_v48, 0.0 }
 0x4d0   :  { %v5481_v55 = vmax.f32 %v7003_v17, %v7001_v37  ;;  %v7010_v50 = vmax.f32 %v7009_v6, 0.0  ;;  %v7012_v52 = vmax.f32 %v7011_v4, 0.0  ;;  %v7016_v33 = vmax.f32 %v7015_v5, 0.0  ;;  %v7024_v4 = vld [vmem:[#allocation2_spill] sm:$0xff] }
 0x4d1   :  { %6995 = vst [vmem:[#allocation84_spill] sm:$0xff] %v5469_v11  ;;  %v5487_v54 = vmax.f32 %v7007_v51, %v7005_v56  ;;  %v7017_v37 = vmax.f32 %v6852_v20, 0.0  ;;  %v7019_v17 = vmax.f32 %v7018_v22, 0.0  ;;  %v7020_v41 = vmax.f32 %v6853_v21, 0.0  ;;  %v7021_v56 = vld [vmem:[#allocation132_spill] sm:$0xff] }
 0x4d2   :  { %6999 = vst [vmem:[#allocation87_spill] sm:$0xff] %v5475_v23  ;;  %v5493_v11 = vmax.f32 %v7012_v52, %v7010_v50  ;;  %v2209_v25 = vmax.f32 %v7016_v33, %v7014_v13  ;;  %v7022_v51 = vmax.f32 %v7021_v56, 0.0  ;;  %v7023_v6 = vmax.f32 %v6854_v49, 0.0 }
 0x4d3   :  { %7004 = vst [vmem:[#allocation21_spill] sm:$0xff] %v5481_v55  ;;  %v2210_v46 = vmax.f32 %v7019_v17, %v7017_v37  ;;  %v7025_v50 = vmax.f32 %v7024_v4, 0.0  ;;  %v7026_v48 = vmax.f32 %v6855_v62, 0.0  ;;  %v7029_v20 = vmax.f32 %v6856_v36, 0.0 }
 0x4d4   :  { %7008 = vst [vmem:[#allocation48_spill] sm:$0xff] %v5487_v54  ;;  %v2211_v54 = vmax.f32 %v7022_v51, %v7020_v41  ;;  %v7030_v33 = vmax.f32 %v6836_v16, 0.0  ;;  %v7031_v21 = vmax.f32 %v6857_v47, 0.0  ;;  %v7032_v22 = vmax.f32 %v4873_v57, 0.0  ;;  %v7034_v41 = vld [vmem:[#allocation5_spill] sm:$0xff] }
 0x4d5   :  { %7013 = vst [vmem:[#allocation27_spill] sm:$0xff] %v5493_v11  ;;  %v2212_v52 = vmax.f32 %v7025_v50, %v7023_v6  ;;  %v7027_v11 = vld [vmem:[#allocation3_spill] sm:$0xff]  ;;  %v7033_v49 = vmax.f32 %v6858_v2, 0.0  ;;  %v7035_v56 = vmax.f32 %v7034_v41, 0.0  ;;  %v7036_v62 = vmax.f32 %v6859_v27, 0.0  ;;  %v7037_v6 = vld [vmem:[#allocation6_spill] sm:$0xff] }
 0x4d6   :  { %v7028_v5 = vmax.f32 %v7027_v11, 0.0  ;;  %v2214_v37 = vmax.f32 %v7030_v33, %v7029_v20  ;;  %v2215_v17 = vmax.f32 %v7032_v22, %v7031_v21  ;;  %v7038_v11 = vmax.f32 %v7037_v6, 0.0  ;;  %v7044_v20 = vld [vmem:[#allocation55_spill] sm:$0xff]  ;;  %v7046_v33 = vld [vmem:[#allocation10_spill] sm:$0xff] }
 0x4d7   :  { %v2216_v51 = vmax.f32 %v7035_v56, %v7033_v49  ;;  %v7039_v36 = vmax.f32 %v6860_v26, 0.0  ;;  %v7040_v16 = vmax.f32 %v4885_v34, 0.0  ;;  %v7041_v47 = vmax.f32 %v6861_v15, 0.0  ;;  %v7048_v49 = vld [vmem:[#allocation60_spill] sm:$0xff]  ;;  %v7050_v41 = vld [vmem:[#allocation11_spill] sm:$0xff] }
 0x4d8   :  { %v2213_v13 = vmax.f32 %v7028_v5, %v7026_v48  ;;  %v2217_v4 = vmax.f32 %v7038_v11, %v7036_v62  ;;  %v7042_v48 = vld [vmem:[#allocation8_spill] sm:$0xff]  ;;  %v7045_v2 = vmax.f32 %v7044_v20, 0.0  ;;  %v7047_v21 = vmax.f32 %v7046_v33, 0.0  ;;  %v7053_v6 = vld [vmem:[#allocation15_spill] sm:$0xff] }
 0x4d9   :  { %v2218_v50 = vmax.f32 %v7040_v16, %v7039_v36  ;;  %v7043_v57 = vmax.f32 %v7042_v48, 0.0  ;;  %v7049_v27 = vmax.f32 %v7048_v49, 0.0  ;;  %v7051_v56 = vmax.f32 %v7050_v41, 0.0  ;;  %v7056_v36 = vld [vmem:[#allocation17_spill] sm:$0xff] }
 0x4da   :  { %v2220_v22 = vmax.f32 %v7047_v21, %v7045_v2  ;;  %v7052_v26 = vmax.f32 %v6864_v40, 0.0  ;;  %v7054_v34 = vmax.f32 %v7053_v6, 0.0  ;;  %v7055_v15 = vmax.f32 %v6865_v44, 0.0  ;;  %v7062_v21 = vld [vmem:[#allocation20_spill] sm:$0xff]  ;;  %v7065_v41 = vld [vmem:[#allocation25_spill] sm:$0xff] }
 0x4db   :  { %v2219_v5 = vmax.f32 %v7043_v57, %v7041_v47  ;;  %v2221_v62 = vmax.f32 %v7051_v56, %v7049_v27  ;;  %v7057_v16 = vmax.f32 %v7056_v36, 0.0  ;;  %v7058_v48 = vmax.f32 %v6866_v10, 0.0  ;;  %v7059_v57 = vld [vmem:[#allocation18_spill] sm:$0xff]  ;;  %v7068_v6 = vld [vmem:[#allocation28_spill] sm:$0xff]  ;;  %v7070_v10 = vld [vmem:[#allocation81_spill] sm:$0xff] }
 0x4dc   :  { %v2222_v11 = vmax.f32 %v7054_v34, %v7052_v26  ;;  %v7060_v20 = vmax.f32 %v7059_v57, 0.0  ;;  %v7061_v33 = vmax.f32 %v5057_v42, 0.0  ;;  %v7063_v49 = vmax.f32 %v7062_v21, 0.0  ;;  %v7074_v42 = vld [vmem:[#allocation85_spill] sm:$0xff]  ;;  %v7076_v21 = vld [vmem:[#allocation34_spill] sm:$0xff] }
 0x4dd   :  { %v2223_v47 = vmax.f32 %v7057_v16, %v7055_v15  ;;  %v7064_v40 = vmax.f32 %v6867_v61, 0.0  ;;  %v7066_v56 = vmax.f32 %v7065_v41, 0.0  ;;  %v7067_v44 = vmax.f32 %v6868_v39, 0.0  ;;  %v7072_v16 = vld [vmem:[#allocation31_spill] sm:$0xff]  ;;  %v7078_v61 = vld [vmem:[#allocation88_spill] sm:$0xff] }
 0x4de   :  { %v2224_v2 = vmax.f32 %v7060_v20, %v7058_v48  ;;  %v2225_v27 = vmax.f32 %v7063_v49, %v7061_v33  ;;  %v7069_v34 = vmax.f32 %v7068_v6, 0.0  ;;  %v7071_v36 = vmax.f32 %v7070_v10, 0.0  ;;  %v7082_v6 = vld [vmem:[#allocation91_spill] sm:$0xff] }
 0x4df   :  { %v2226_v26 = vmax.f32 %v7066_v56, %v7064_v40  ;;  %v7073_v48 = vmax.f32 %v7072_v16, 0.0  ;;  %v7075_v20 = vmax.f32 %v7074_v42, 0.0  ;;  %v7077_v33 = vmax.f32 %v7076_v21, 0.0  ;;  %v7080_v40 = vld [vmem:[#allocation37_spill] sm:$0xff]  ;;  %v7086_v16 = vld [vmem:[#allocation94_spill] sm:$0xff] }
 0x4e0   :  { %v5571_v15 = vmax.f32 %v7069_v34, %v7067_v44  ;;  %v7079_v41 = vmax.f32 %v7078_v61, 0.0  ;;  %v7081_v56 = vmax.f32 %v7080_v40, 0.0  ;;  %v7083_v44 = vmax.f32 %v7082_v6, 0.0  ;;  %v7084_v34 = vld [vmem:[#allocation43_spill] sm:$0xff]  ;;  %v7092_v6 = vld [vmem:[#allocation49_spill] sm:$0xff] }
 0x4e1   :  { %v2228_v57 = vmax.f32 %v7073_v48, %v7071_v36  ;;  %v5581_v49 = vmax.f32 %v7077_v33, %v7075_v20  ;;  %v7085_v55 = vmax.f32 %v7084_v34, 0.0  ;;  %v7087_v36 = vmax.f32 %v7086_v16, 0.0  ;;  %v7088_v48 = vld [vmem:[#allocation46_spill] sm:$0xff] }
 0x4e2   :  { %v5587_v39 = vmax.f32 %v7081_v56, %v7079_v41  ;;  %v7089_v42 = vmax.f32 %v7088_v48, 0.0  ;;  %v2245_v20 = vmax.f32 %v5283_v60, %v2209_v25  ;;  %v2246_v21 = vmax.f32 %v5289_v29, %v2210_v46 }
 0x4e3   :  { %v5593_v10 = vmax.f32 %v7085_v55, %v7083_v44  ;;  %v2247_v33 = vmax.f32 %v5295_v53, %v2211_v54  ;;  %v2248_v61 = vmax.f32 %v5301_v35, %v2212_v52  ;;  %v2249_v41 = vmax.f32 %v5307_v1, %v2213_v13  ;;  %v7090_v55 = vld [vmem:[#allocation97_spill] sm:$0xff]  ;;  %v7097_v35 = vld [vmem:[#allocation100_spill] sm:$0xff]  ;;  %v7099_v1 = vld [vmem:[#allocation54_spill] sm:$0xff] }
 0x4e4   :  { %v5599_v23 = vmax.f32 %v7089_v42, %v7087_v36  ;;  %v2250_v40 = vmax.f32 %v5313_v7, %v2214_v37  ;;  %v7091_v56 = vmax.f32 %v7090_v55, 0.0  ;;  %v7093_v44 = vmax.f32 %v7092_v6, 0.0  ;;  %v7095_v36 = vld [vmem:[#allocation52_spill] sm:$0xff]  ;;  %v7101_v52 = vld [vmem:[#allocation103_spill] sm:$0xff]  ;;  %v7103_v37 = vld [vmem:[#allocation58_spill] sm:$0xff] }
 0x4e5   :  { %v7094_v16 = vmax.f32 %v5093_v8, 0.0  ;;  %v7096_v60 = vmax.f32 %v7095_v36, 0.0  ;;  %v2251_v29 = vmax.f32 %v5319_v31, %v2215_v17  ;;  %v2252_v53 = vmax.f32 %v5325_v12, %v2216_v51  ;;  %v7106_v31 = vld [vmem:[#allocation62_spill] sm:$0xff]  ;;  %v7108_v6 = vld [vmem:[#allocation123_spill] sm:$0xff] }
 0x4e6   :  { %v5611_v34 = vmax.f32 %v7093_v44, %v7091_v56  ;;  %v7098_v54 = vmax.f32 %v7097_v35, 0.0  ;;  %v7100_v46 = vmax.f32 %v7099_v1, 0.0  ;;  %v7102_v13 = vmax.f32 %v7101_v52, 0.0  ;;  %v7109_v1 = vld [vmem:[#allocation106_spill] sm:$0xff] }
 0x4e7   :  { %v2234_v25 = vmax.f32 %v7096_v60, %v7094_v16  ;;  %v7104_v48 = vmax.f32 %v7103_v37, 0.0  ;;  %v2253_v8 = vmax.f32 %v5331_v32, %v2217_v4  ;;  %v2254_v55 = vmax.f32 %v5337_v0, %v2218_v50  ;;  %v7111_v4 = vld [vmem:[#allocation65_spill] sm:$0xff] }
 0x4e8   :  { %v5623_v7 = vmax.f32 %v7100_v46, %v7098_v54  ;;  %v7105_v56 = vmax.f32 %v5105_v18, 0.0  ;;  %v7107_v17 = vmax.f32 %v7106_v31, 0.0  ;;  %v2255_v51 = vmax.f32 %v5343_v38, %v2219_v5  ;;  %v7113_v18 = vld [vmem:[#allocation124_spill] sm:$0xff]  ;;  %v7114_v38 = vld [vmem:[#allocation109_spill] sm:$0xff] }
 0x4e9   :  { %v2236_v42 = vmax.f32 %v7104_v48, %v7102_v13  ;;  %v2256_v44 = vmax.f32 %v7108_v6, %v2220_v22  ;;  %v2257_v16 = vmax.f32 %v5355_v45, %v2221_v62  ;;  %v2258_v36 = vmax.f32 %v5361_v14, %v2222_v11  ;;  %v7116_v22 = vld [vmem:[#allocation71_spill] sm:$0xff]  ;;  %v7118_v62 = vld [vmem:[#allocation125_spill] sm:$0xff]  ;;  %v7131_v31 = vld [vmem:[#allocation80_spill] sm:$0xff] }
 0x4ea   :  { %v2237_v12 = vmax.f32 %v7107_v17, %v7105_v56  ;;  %v2802_v60 = vpack.c.bf16 %v2246_v21, %v2245_v20  ;;  %v2807_v35 = vpack.c.bf16 %v2248_v61, %v2247_v33  ;;  %v2812_v54 = vpack.c.bf16 %v2250_v40, %v2249_v41  ;;  %v7119_v21 = vld [vmem:[#allocation24_spill] sm:$0xff]  ;;  %v7123_v41 = vld [vmem:[#allocation126_spill] sm:$0xff] }
 0x4eb   :  { %v7110_v32 = vmax.f32 %v7109_v1, 0.0  ;;  %v7112_v0 = vmax.f32 %v7111_v4, 0.0  ;;  %v2259_v46 = vmax.f32 %v7113_v18, %v2223_v47  ;;  %v2260_v52 = vmax.f32 %v5373_v63, %v2224_v2  ;;  %v7121_v47 = vld [vmem:[#allocation74_spill] sm:$0xff] }
 0x4ec   :  { %v2817_v13 = vpack.c.bf16 %v2252_v53, %v2251_v29  ;;  %v7115_v5 = vmax.f32 %v7114_v38, 0.0  ;;  %v7117_v37 = vmax.f32 %v7116_v22, 0.0  ;;  %v2261_v14 = vmax.f32 %v7118_v62, %v2225_v27  ;;  %2803 = vst [vmem:[%s5754_s4] sm:$0xff] %v2802_v60   ;;  %v7124_v27 = vld [vmem:[#allocation30_spill] sm:$0xff]  ;;  %v7135_v60 = vld [vmem:[#allocation7_spill] sm:$0xff] }
 0x4ed   :  { %v2238_v50 = vmax.f32 %v7112_v0, %v7110_v32  ;;  %v2262_v11 = vmax.f32 %v5385_v58, %v2226_v26  ;;  %v2822_v20 = vpack.c.bf16 %v2254_v55, %v2253_v8  ;;  %v7120_v33 = vmax.f32 %v7119_v21, 0.0  ;;  %2889 = vst [vmem:[%s5754_s4 + $0x8] sm:$0xff] %v2807_v35   ;;  %v7126_v29 = vld [vmem:[#allocation78_spill] sm:$0xff]  ;;  %v7128_v55 = vld [vmem:[#allocation127_spill] sm:$0xff]  ;;  %v7137_v35 = vld [vmem:[#allocation128_spill] sm:$0xff] }
 0x4ee   :  { %v2239_v45 = vmax.f32 %v7117_v37, %v7115_v5  ;;  %v7122_v61 = vmax.f32 %v7121_v47, 0.0  ;;  %v2263_v2 = vmax.f32 %v5391_v43, %v5571_v15  ;;  %v2264_v40 = vmax.f32 %v7123_v41, %v2228_v57  ;;  %2890 = vst [vmem:[%s5754_s4 + $0x10] sm:$0xff] %v2812_v54   ;;  %v7129_v15 = vld [vmem:[#allocation133_spill] sm:$0xff]  ;;  %v7144_v5 = vld [vmem:[#allocation84_spill] sm:$0xff] }
 0x4ef   :  { %v2827_v58 = vpack.c.bf16 %v2256_v44, %v2255_v51  ;;  %v7125_v26 = vmax.f32 %v7124_v27, 0.0  ;;  %v7127_v53 = vmax.f32 %v7126_v29, 0.0  ;;  %v2265_v8 = vmax.f32 %v5403_v30, %v5581_v49  ;;  %2891 = vst [vmem:[%s5754_s4 + $0x18] sm:$0xff] %v2817_v13   ;;  %v7133_v49 = vld [vmem:[#allocation134_spill] sm:$0xff]  ;;  %v7142_v0 = vld [vmem:[#allocation129_spill] sm:$0xff] }
 0x4f0   :  { %v2240_v63 = vmax.f32 %v7122_v61, %v7120_v33  ;;  %v2266_v56 = vmax.f32 %v7128_v55, %v5587_v39  ;;  %v2832_v43 = vpack.c.bf16 %v2258_v36, %v2257_v16  ;;  %v7130_v57 = vmax.f32 %v7129_v15, 0.0  ;;  %2892 = vst [vmem:[%s5754_s4 + $0x20] sm:$0xff] %v2822_v20   ;;  %v7146_v37 = vld [vmem:[#allocation21_spill] sm:$0xff] }
 0x4f1   :  { %v2241_v48 = vmax.f32 %v7127_v53, %v7125_v26  ;;  %v7132_v17 = vmax.f32 %v7131_v31, 0.0  ;;  %v2267_v6 = vmax.f32 %v5415_v59, %v5593_v10  ;;  %v2268_v44 = vmax.f32 %v5421_v9, %v5599_v23  ;;  %v7138_v59 = vld [vmem:[#allocation135_spill] sm:$0xff]  ;;  %v7140_v10 = vld [vmem:[#allocation9_spill] sm:$0xff]  ;;  %2893 = vst [vmem:[%s5754_s4 + $0x28] sm:$0xff] %v2827_v58  }
 0x4f2   :  { %v2837_v30 = vpack.c.bf16 %v2260_v52, %v2259_v46  ;;  %v7134_v39 = vmax.f32 %v7133_v49, 0.0  ;;  %v7136_v16 = vmax.f32 %v7135_v60, 0.0  ;;  %v2269_v54 = vmax.f32 %v7137_v35, %v5611_v34  ;;  %2894 = vst [vmem:[%s5754_s4 + $0x30] sm:$0xff] %v2832_v43  }
 0x4f3   :  { %v2242_v51 = vmax.f32 %v7132_v17, %v7130_v57  ;;  %v2270_v1 = vmax.f32 %v5433_v3, %v2234_v25  ;;  %v2842_v9 = vpack.c.bf16 %v2262_v11, %v2261_v14  ;;  %v7139_v23 = vmax.f32 %v7138_v59, 0.0  ;;  %v7143_v25 = vld [vmem:[#allocation69_spill] sm:$0xff]  ;;  %v7148_v14 = vld [vmem:[#allocation27_spill] sm:$0xff] }
 0x4f4   :  { %v2243_v36 = vmax.f32 %v7136_v16, %v7134_v39  ;;  %v7141_v32 = vmax.f32 %v7140_v10, 0.0  ;;  %v2271_v18 = vmax.f32 %v7142_v0, %v5623_v7  ;;  %v2272_v46 = vmax.f32 %v5445_v28, %v2236_v42  ;;  %2895 = vst [vmem:[%s5754_s4 + $0x38] sm:$0xff] %v2837_v30   ;;  %v7145_v42 = vld [vmem:[#allocation87_spill] sm:$0xff] }
 0x4f5   :  { %v2847_v3 = vpack.c.bf16 %v2264_v40, %v2263_v2  ;;  %v2273_v34 = vmax.f32 %v5451_v19, %v2237_v12  ;;  %v2274_v52 = vmax.f32 %v7143_v25, %v2238_v50  ;;  %v2852_v13 = vpack.c.bf16 %v2266_v56, %v2265_v8  ;;  %2896 = vst [vmem:[%s5754_s4 + $0x40] sm:$0xff] %v2842_v9   ;;  %v7147_v50 = vld [vmem:[#allocation48_spill] sm:$0xff] }
 0x4f6   :  { %v2244_v4 = vmax.f32 %v7141_v32, %v7139_v23  ;;  %v2275_v38 = vmax.f32 %v5463_v24, %v2239_v45  ;;  %v2276_v7 = vmax.f32 %v7144_v5, %v2240_v63  ;;  %v2857_v28 = vpack.c.bf16 %v2268_v44, %v2267_v6 }
 0x4f7   :  { %v2277_v22 = vmax.f32 %v7145_v42, %v2241_v48  ;;  %v2278_v19 = vmax.f32 %v7146_v37, %v2242_v51  ;;  %v2862_v12 = vpack.c.bf16 %v2270_v1, %v2269_v54  ;;  %v2279_v62 = vmax.f32 %v7147_v50, %v2243_v36  ;;  %2897 = vst [vmem:[%s5754_s4 + $0x48] sm:$0xff] %v2847_v3  }
 0x4f8   :  { %v2280_v24 = vmax.f32 %v7148_v14, %v2244_v4  ;;  %v2867_v45 = vpack.c.bf16 %v2272_v46, %v2271_v18  ;;  %2898 = vst [vmem:[%s5754_s4 + $0x50] sm:$0xff] %v2852_v13   ;;  %v2872_v11 = vpack.c.bf16 %v2274_v52, %v2273_v34  ;;  %v2877_v20 = vpack.c.bf16 %v2276_v7, %v2275_v38 }
 0x4f9   :  { %2899 = vst [vmem:[%s5754_s4 + $0x58] sm:$0xff] %v2857_v28   ;;  %v2882_v21 = vpack.c.bf16 %v2278_v19, %v2277_v22 }
 0x4fa   :  { %2900 = vst [vmem:[%s5754_s4 + $0x60] sm:$0xff] %v2862_v12   ;;  %v2887_v33 = vpack.c.bf16 %v2280_v24, %v2279_v62 }
 0x4fb   :  { %2901 = vst [vmem:[%s5754_s4 + $0x68] sm:$0xff] %v2867_v45  }
 0x4fc   :  { %2902 = vst [vmem:[%s5754_s4 + $0x70] sm:$0xff] %v2872_v11  }
 0x4fd   :  { %2903 = vst [vmem:[%s5754_s4 + $0x78] sm:$0xff] %v2877_v20  }
 0x4fe   :  { %2904 = vst [vmem:[%s5754_s4 + $0x80] sm:$0xff] %v2882_v21  }
 0x4ff   :  { %2905 = vst [vmem:[%s5754_s4 + $0x88] sm:$0xff] %v2887_v33  }

// kernel: qzd_forward.4
= control target key start
LH: loop header
LB: loop body
LE: loop exit
PB: predicated region body
PF: predicated region fallthrough
CT: control target
= control target key end

     0   :  { %vm762_vm0 = vcmask 261120   ;;  %s2616_s1 = inlined_call_operand.vmem [shape: bf16[800,128], index: 1, kind: input, shape index: {}]   ;;  %s2617_s0 = inlined_call_operand.vmem [shape: bf16[128,800], index: 0, kind: input, shape index: {}]   ;;  %s2618_s2 = inlined_call_operand.vmem [shape: f32[1,128], index: 2, kind: input, shape index: {}]   ;;  %s2619_s3 = inlined_call_operand.vmem [shape: f32[1,128], index: 3, kind: input, shape index: {}]   ;;  %s2620_s4 = inlined_call_operand.vmem [shape: bf16[32,128], index: 4, kind: output, shape index: {}]  }
   0x1   :  { %v1802_v0 = vld [vmem:[%s2616_s1 + $0x38] sm:$0xff]  ;;  %v1801_v3 = vld [vmem:[%s2616_s1 + $0x30] sm:$0xff]  ;;  %v1800_v6 = vld [vmem:[%s2616_s1 + $0x28] sm:$0xff] }
   0x2   :  { %v1917_v1 = vld [vmem:[%s2616_s1 + $0xb8] sm:$0xff]  ;;  %787 = vmatpush.bf16.msra.mxu0 %v1802_v0  ;;  %1856 = vmatpush.bf16.msra.mxu3 %v1802_v0  ;;  %v1932_v4 = vld [vmem:[%s2616_s1 + $0xb0] sm:$0xff]  ;;  %v1947_v7 = vld [vmem:[%s2616_s1 + $0xa8] sm:$0xff] }
   0x3   :  { %v1922_v2 = vld [vmem:[%s2616_s1 + $0x78] sm:$0xff]  ;;  %1872 = vmatpush.bf16.msra.mxu2 %v1917_v1  ;;  %v1937_v5 = vld [vmem:[%s2616_s1 + $0x70] sm:$0xff]  ;;  %v1952_v8 = vld [vmem:[%s2616_s1 + $0x68] sm:$0xff] }
   0x4   :  { %1864 = vmatpush.bf16.msra.mxu1 %v1922_v2  ;;  %v1799_v9 = vld [vmem:[%s2616_s1 + $0x20] sm:$0xff]  ;;  %v1798_v12 = vld [vmem:[%s2616_s1 + $0x18] sm:$0xff]  ;;  %v1797_v15 = vld [vmem:[%s2616_s1 + $0x10] sm:$0xff] }
   0x5   :  { %v1962_v10 = vld [vmem:[%s2616_s1 + $0xa0] sm:$0xff]  ;;  %v1977_v13 = vld [vmem:[%s2616_s1 + $0x98] sm:$0xff]  ;;  %v1992_v16 = vld [vmem:[%s2616_s1 + $0x90] sm:$0xff] }
   0x6   :  { %788 = vmatpush.bf16.msra.mxu0 %v1801_v3  ;;  %1857 = vmatpush.bf16.msra.mxu3 %v1801_v3  ;;  %v1967_v11 = vld [vmem:[%s2616_s1 + $0x60] sm:$0xff]  ;;  %v1982_v14 = vld [vmem:[%s2616_s1 + $0x58] sm:$0xff]  ;;  %v1997_v17 = vld [vmem:[%s2616_s1 + $0x50] sm:$0xff] }
   0x7   :  { %1873 = vmatpush.bf16.msra.mxu2 %v1932_v4  ;;  %v1796_v18 = vld [vmem:[%s2616_s1 + $0x8] sm:$0xff]  ;;  %v1795_v21 = vld [vmem:[%s2616_s1] sm:$0xff]  ;;  %v1742_v25 = vld [vmem:[%s2617_s0 + $0x18] sm:$0xf0] }
   0x8   :  { %1865 = vmatpush.bf16.msra.mxu1 %v1937_v5  ;;  %v2007_v19 = vld [vmem:[%s2616_s1 + $0x88] sm:$0xff]  ;;  %v2020_v22 = vld [vmem:[%s2616_s1 + $0x80] sm:$0xff]  ;;  %v1365_v26 = vld [vmem:[%s2617_s0 + $0x70] sm:$0xf] }
   0x9   :  { %v2012_v20 = vld [vmem:[%s2616_s1 + $0x48] sm:$0xff]  ;;  %v2025_v23 = vld [vmem:[%s2616_s1 + $0x40] sm:$0xff]  ;;  %v1373_v28 = vld [vmem:[%s2617_s0 + $0x78] sm:$0xf] }
   0xa   :  { %789 = vmatpush.bf16.msra.mxu0 %v1800_v6  ;;  %1858 = vmatpush.bf16.msra.mxu3 %v1800_v6  ;;  %v1309_v24 = vld [vmem:[%s2617_s0] sm:$0xf]  ;;  %v1756_v27 = vld [vmem:[%s2617_s0 + $0x88] sm:$0xf0]  ;;  %v1757_v29 = vld [vmem:[%s2617_s0 + $0x90] sm:$0xf0] }
   0xb   :  { %1874 = vmatpush.bf16.msra.mxu2 %v1947_v7  ;;  %v1753_v30 = vld [vmem:[%s2617_s0 + $0x74] sm:$0xf]  ;;  %v1367_v31 = vld [vmem:[%s2617_s0 + $0x8c] sm:$0xf0]  ;;  %v1826_v32 = vld [vmem:[%s2616_s1 + $0xf8] sm:$0xff]  ;;  %v1310_v33 = vor.u32 %v1742_v25, %v1309_v24  ;;  %v1366_v34 = vor.u32 %v1756_v27, %v1365_v26  ;;  %v1374_v35 = vor.u32 %v1757_v29, %v1373_v28 }
   0xc   :  { %1866 = vmatpush.bf16.msra.mxu1 %v1952_v8  ;;  %v1370_v36 = vor.u32 %v1753_v30, %v1367_v31  ;;  %v1844_v37 = vld [vmem:[%s2616_s1 + $0x188] sm:$0xff]  ;;  %v1842_v38 = vld [vmem:[%s2616_s1 + $0x178] sm:$0xff]  ;;  %v1825_v39 = vld [vmem:[%s2616_s1 + $0xf0] sm:$0xff] }
   0xd   :  { %v1841_v40 = vld [vmem:[%s2616_s1 + $0x170] sm:$0xff]  ;;  %v1824_v41 = vld [vmem:[%s2616_s1 + $0xe8] sm:$0xff]  ;;  %v1823_v43 = vld [vmem:[%s2616_s1 + $0xe0] sm:$0xff] }
   0xe   :  { %790 = vmatpush.bf16.msra.mxu0 %v1799_v9  ;;  %1859 = vmatpush.bf16.msra.mxu3 %v1799_v9  ;;  %v1840_v42 = vld [vmem:[%s2616_s1 + $0x168] sm:$0xff]  ;;  %v1337_v44 = vld [vmem:[%s2617_s0 + $0x38] sm:$0xf]  ;;  %v1749_v45 = vld [vmem:[%s2617_s0 + $0x50] sm:$0xf0] }
   0xf   :  { %1875 = vmatpush.bf16.msra.mxu2 %v1962_v10  ;;  %v1393_v46 = vld [vmem:[%s2617_s0 + $0xa8] sm:$0xf]  ;;  %v1763_v47 = vld [vmem:[%s2617_s0 + $0xc0] sm:$0xf0]  ;;  %v1401_v48 = vld [vmem:[%s2617_s0 + $0xb0] sm:$0xf]  ;;  %v1338_v53 = vor.u32 %v1749_v45, %v1337_v44 }
  0x10   :  { %1867 = vmatpush.bf16.msra.mxu1 %v1967_v11  ;;  %v1764_v49 = vld [vmem:[%s2617_s0 + $0xc8] sm:$0xf0]  ;;  %v1395_v51 = vld [vmem:[%s2617_s0 + $0xc4] sm:$0xf0]  ;;  %v1839_v52 = vld [vmem:[%s2616_s1 + $0x160] sm:$0xff]  ;;  %v1394_v54 = vor.u32 %v1763_v47, %v1393_v46 }
  0x11   :  { %v1760_v50 = vld [vmem:[%s2617_s0 + $0xac] sm:$0xf]  ;;  %v1402_v55 = vor.u32 %v1764_v49, %v1401_v48  ;;  %v1822_v57 = vld [vmem:[%s2616_s1 + $0xd8] sm:$0xff]  ;;  %v1843_v58 = vld [vmem:[%s2616_s1 + $0x180] sm:$0xff] }
  0x12   :  { %791 = vmatpush.bf16.msra.mxu0 %v1798_v12  ;;  %1860 = vmatpush.bf16.msra.mxu3 %v1798_v12  ;;  %v1398_v56 = vor.u32 %v1760_v50, %v1395_v51  ;;  %v1838_v59 = vld [vmem:[%s2616_s1 + $0x158] sm:$0xff]  ;;  %v1821_v60 = vld [vmem:[%s2616_s1 + $0xd0] sm:$0xff]  ;;  %v1421_v61 = vld [vmem:[%s2617_s0 + $0xe0] sm:$0xf] }
  0x13   :  { %1876 = vmatpush.bf16.msra.mxu2 %v1977_v13  ;;  %v1770_v62 = vld [vmem:[%s2617_s0 + $0xf8] sm:$0xf0]  ;;  %v1739_v63 = vld [vmem:[%s2617_s0 + $0x4] sm:$0xf]  ;;  %v1311_v0 = vld [vmem:[%s2617_s0 + $0x1c] sm:$0xf0] }
  0x14   :  { %1868 = vmatpush.bf16.msra.mxu1 %v1982_v14  ;;  %v1771_v3 = vld [vmem:[%s2617_s0 + $0x100] sm:$0xf0]  ;;  %v1423_v6 = vld [vmem:[%s2617_s0 + $0xfc] sm:$0xf0]  ;;  %v1314_v9 = vor.u32 %v1739_v63, %v1311_v0  ;;  %v1477_v30 = vld [vmem:[%s2617_s0 + $0x150] sm:$0xf] }
  0x15   :  { %v1819_v28 = vld [vmem:[%s2616_s1 + $0xc0] sm:$0xff]  ;;  %v1750_v46 = vld [vmem:[%s2617_s0 + $0x58] sm:$0xf0]  ;;  %v1513_v47 = vld [vmem:[%s2617_s0 + $0x190] sm:$0xf] }
  0x16   :  { %792 = vmatpush.bf16.msra.mxu0 %v1797_v15  ;;  %1861 = vmatpush.bf16.msra.mxu3 %v1797_v15  ;;  %v1820_v15 = vld [vmem:[%s2616_s1 + $0xc8] sm:$0xff]  ;;  %v1835_v29 = vld [vmem:[%s2616_s1 + $0x140] sm:$0xff]  ;;  %v1829_v51 = vld [vmem:[%s2616_s1 + $0x110] sm:$0xff] }
  0x17   :  { %1877 = vmatpush.bf16.msra.mxu2 %v1992_v16  ;;  %v1743_v31 = vld [vmem:[%s2617_s0 + $0x20] sm:$0xf0]  ;;  %v1345_v45 = vld [vmem:[%s2617_s0 + $0x40] sm:$0xf]  ;;  %v1792_v48 = vld [vmem:[%s2617_s0 + $0x1a8] sm:$0xf0] }
  0x18   :  { %1869 = vmatpush.bf16.msra.mxu1 %v1997_v17  ;;  %v1791_v44 = vld [vmem:[%s2617_s0 + $0x1a0] sm:$0xf0]  ;;  %v1788_v49 = vld [vmem:[%s2617_s0 + $0x18c] sm:$0xf]  ;;  %v1507_v50 = vld [vmem:[%s2617_s0 + $0x1a4] sm:$0xf0] }
  0x19   :  { %v1745_v63 = vld [vmem:[%s2617_s0 + $0x30] sm:$0xf0] }
  0x1a   :  { %793 = vmatpush.bf16.msra.mxu0 %v1796_v18  ;;  %1862 = vmatpush.bf16.msra.mxu3 %v1796_v18  ;;  %v1746_v18 = vld [vmem:[%s2617_s0 + $0x3c] sm:$0xf]  ;;  %v1741_v0 = vld [vmem:[%s2617_s0 + $0x14] sm:$0xf] }
  0x1b   :  { %1878 = vmatpush.bf16.msra.mxu2 %v2007_v19 }
  0x1c   :  { %1870 = vmatpush.bf16.msra.mxu1 %v2012_v20 }
  0x1e   :  { %794 = vmatpush.bf16.msra.mxu0 %v1795_v21  ;;  %1863 = vmatpush.bf16.msra.mxu3 %v1795_v21  ;;  %v1774_v21 = vld [vmem:[%s2617_s0 + $0x11c] sm:$0xf] }
  0x1f   :  { %1879 = vmatpush.bf16.msra.mxu2 %v2020_v22 }
  0x20   :  { %1871 = vmatpush.bf16.msra.mxu1 %v2025_v23 }
  0x21   :  { %795 = vmatmul.bf16.vlgmr.msra.gmra.mxu0 %v1310_v33  ;;  %805 = vmatmul.bf16.vlgmr.msra.gmra.mxu3 %v1366_v34  ;;  %v1785_v33 = vld [vmem:[%s2617_s0 + $0x170] sm:$0xf0] }
  0x22   :  { %934 = vmatpush.bf16.msrb.mxu3 %v1826_v32  ;;  %836 = vmatpush.bf16.msrb.mxu0 %v1922_v2  ;;  %v1429_v2 = vld [vmem:[%s2617_s0 + $0xe8] sm:$0xf]  ;;  %v1485_v32 = vld [vmem:[%s2617_s0 + $0x158] sm:$0xf]  ;;  %v1781_v34 = vld [vmem:[%s2617_s0 + $0x154] sm:$0xf] }
  0x23   :  { %903 = vmatmul.bf16.vlgmr.msra.gmra.mxu2 %v1374_v35  ;;  %854 = vmatmul.bf16.vlgmr.msra.gmra.mxu1 %v1370_v36  ;;  %v1479_v35 = vld [vmem:[%s2617_s0 + $0x16c] sm:$0xf0] }
  0x24   :  { %1087 = vmatpush.bf16.msrb.mxu2 %v1844_v37  ;;  %1032 = vmatpush.bf16.msrb.mxu1 %v1842_v38  ;;  %v1833_v36 = vld [vmem:[%s2616_s1 + $0x130] sm:$0xff] }
  0x26   :  { %837 = vmatpush.bf16.msrb.mxu0 %v1937_v5  ;;  %935 = vmatpush.bf16.msrb.mxu3 %v1825_v39  ;;  %v1767_v5 = vld [vmem:[%s2617_s0 + $0xe4] sm:$0xf]  ;;  %v1482_v39 = vor.u32 %v1781_v34, %v1479_v35 }
  0x27   :  { %v1426_v12 = vor.u32 %v1767_v5, %v1423_v6 }
  0x28   :  { %1033 = vmatpush.bf16.msrb.mxu1 %v1841_v40  ;;  %1088 = vmatpush.bf16.msrb.mxu2 %v1843_v58  ;;  %v1832_v40 = vld [vmem:[%s2616_s1 + $0x128] sm:$0xff] }
  0x29   :  { %v1740_v58 = vld [vmem:[%s2617_s0 + $0xc] sm:$0xf] }
  0x2a   :  { %838 = vmatpush.bf16.msrb.mxu0 %v1952_v8  ;;  %936 = vmatpush.bf16.msrb.mxu3 %v1824_v41  ;;  %v1422_v8 = vor.u32 %v1770_v62, %v1421_v61  ;;  %v1831_v41 = vld [vmem:[%s2616_s1 + $0x120] sm:$0xff]  ;;  %v1744_v61 = vld [vmem:[%s2617_s0 + $0x28] sm:$0xf0]  ;;  %v1333_v62 = vld [vmem:[%s2617_s0 + $0x18] sm:$0xf] }
  0x2b   :  { %v1334_v6 = vor.u32 %v1745_v63, %v1333_v62  ;;  %v1768_v62 = vld [vmem:[%s2617_s0 + $0xec] sm:$0xf]  ;;  %v1431_v63 = vld [vmem:[%s2617_s0 + $0x104] sm:$0xf0] }
  0x2c   :  { %1034 = vmatpush.bf16.msrb.mxu1 %v1840_v42  ;;  %v1830_v42 = vld [vmem:[%s2616_s1 + $0x118] sm:$0xff] }
  0x2e   :  { %839 = vmatpush.bf16.msrb.mxu0 %v1967_v11  ;;  %937 = vmatpush.bf16.msrb.mxu3 %v1823_v43  ;;  %v1430_v11 = vor.u32 %v1771_v3, %v1429_v2  ;;  %v1505_v43 = vld [vmem:[%s2617_s0 + $0x188] sm:$0xf]  ;;  %v1327_v2 = vld [vmem:[%s2617_s0 + $0x2c] sm:$0xf0] }
  0x30   :  { %1035 = vmatpush.bf16.msrb.mxu1 %v1839_v52  ;;  %v1506_v52 = vor.u32 %v1791_v44, %v1505_v43  ;;  %v1766_v43 = vld [vmem:[%s2617_s0 + $0xd8] sm:$0xf0] }
  0x31   :  { %800 = vmatmul.bf16.gmra.mxu0 %v1338_v53  ;;  %810 = vmatmul.bf16.gmra.mxu3 %v1394_v54  ;;  %v1346_v53 = vor.u32 %v1750_v46, %v1345_v45  ;;  %v1514_v54 = vor.u32 %v1792_v48, %v1513_v47  ;;  %v1762_v44 = vld [vmem:[%s2617_s0 + $0xbc] sm:$0xf]  ;;  %v1411_v45 = vld [vmem:[%s2617_s0 + $0xd4] sm:$0xf0] }
  0x32   :  { %840 = vmatpush.bf16.msrb.mxu0 %v1982_v14  ;;  %938 = vmatpush.bf16.msrb.mxu3 %v1822_v57  ;;  %v1837_v14 = vld [vmem:[%s2616_s1 + $0x150] sm:$0xff]  ;;  %v1827_v57 = vld [vmem:[%s2616_s1 + $0x100] sm:$0xff] }
  0x33   :  { %908 = vmatmul.bf16.gmra.mxu2 %v1402_v55  ;;  %859 = vmatmul.bf16.gmra.mxu1 %v1398_v56  ;;  %v1510_v55 = vor.u32 %v1788_v49, %v1507_v50  ;;  %v1828_v56 = vld [vmem:[%s2616_s1 + $0x108] sm:$0xff] }
  0x34   :  { %1036 = vmatpush.bf16.msrb.mxu1 %v1838_v59  ;;  %v1319_v59 = vld [vmem:[%s2617_s0 + $0x24] sm:$0xf0] }
  0x35   :  { %v1322_v3 = vor.u32 %v1740_v58, %v1319_v59 }
  0x36   :  { %841 = vmatpush.bf16.msrb.mxu0 %v1997_v17  ;;  %939 = vmatpush.bf16.msrb.mxu3 %v1821_v60  ;;  %v1777_v17 = vld [vmem:[%s2617_s0 + $0x130] sm:$0xf0]  ;;  %v1325_v60 = vld [vmem:[%s2617_s0 + $0x10] sm:$0xf] }
  0x37   :  { %v1326_v5 = vor.u32 %v1744_v61, %v1325_v60 }
  0x38   :  { %1037 = vmatpush.bf16.msrb.mxu1 %v1837_v14  ;;  %v1751_v14 = vld [vmem:[%s2617_s0 + $0x60] sm:$0xf0] }
  0x3a   :  { %842 = vmatpush.bf16.msrb.mxu0 %v2012_v20  ;;  %940 = vmatpush.bf16.msrb.mxu3 %v1820_v15  ;;  %v1778_v20 = vld [vmem:[%s2617_s0 + $0x138] sm:$0xf0]  ;;  %v1361_v15 = vld [vmem:[%s2617_s0 + $0x50] sm:$0xf] }
  0x3e   :  { %843 = vmatpush.bf16.msrb.mxu0 %v2025_v23  ;;  %v1451_v23 = vld [vmem:[%s2617_s0 + $0x134] sm:$0xf0]  ;;  %941 = vmatpush.bf16.msrb.mxu3 %v1819_v28  ;;  %v1755_v28 = vld [vmem:[%s2617_s0 + $0x84] sm:$0xf] }
  0x3f   :  { %v1454_v27 = vor.u32 %v1774_v21, %v1451_v23  ;;  %v1754_v23 = vld [vmem:[%s2617_s0 + $0x7c] sm:$0xf] }
  0x41   :  { %815 = vmatmul.bf16.gmra.mxu3 %v1422_v8  ;;  %844 = vmatmul.bf16.vlgmr.msrb.gmra.mxu0 %v1314_v9  ;;  %v1330_v8 = vor.u32 %v1741_v0, %v1327_v2  ;;  %v1747_v9 = vld [vmem:[%s2617_s0 + $0x44] sm:$0xf]  ;;  %v1437_v0 = vld [vmem:[%s2617_s0 + $0xf0] sm:$0xf]  ;;  %v1772_v2 = vld [vmem:[%s2617_s0 + $0x108] sm:$0xf0] }
  0x42   :  { %885 = vmatpush.bf16.msra.mxu0 %v1917_v1  ;;  %v1449_v1 = vld [vmem:[%s2617_s0 + $0x118] sm:$0xf] }
  0x43   :  { %913 = vmatmul.bf16.gmra.mxu2 %v1430_v11  ;;  %864 = vmatmul.bf16.gmra.mxu1 %v1426_v12  ;;  %v1450_v24 = vor.u32 %v1777_v17, %v1449_v1  ;;  %v1347_v11 = vld [vmem:[%s2617_s0 + $0x5c] sm:$0xf0]  ;;  %v1353_v12 = vld [vmem:[%s2617_s0 + $0x48] sm:$0xf]  ;;  %v1752_v1 = vld [vmem:[%s2617_s0 + $0x68] sm:$0xf0] }
  0x44   :  { %v1748_v17 = vld [vmem:[%s2617_s0 + $0x4c] sm:$0xf] }
  0x46   :  { %886 = vmatpush.bf16.msra.mxu0 %v1932_v4  ;;  %v1339_v4 = vld [vmem:[%s2617_s0 + $0x54] sm:$0xf0] }
  0x47   :  { %v1342_v25 = vor.u32 %v1746_v18, %v1339_v4  ;;  %v1355_v18 = vld [vmem:[%s2617_s0 + $0x64] sm:$0xf0]  ;;  %v1350_v4 = vor.u32 %v1747_v9, %v1347_v11 }
  0x48   :  { %v1358_v21 = vor.u32 %v1748_v17, %v1355_v18 }
  0x4a   :  { %887 = vmatpush.bf16.msra.mxu0 %v1947_v7  ;;  %v1457_v7 = vld [vmem:[%s2617_s0 + $0x120] sm:$0xf] }
  0x4b   :  { %v1458_v26 = vor.u32 %v1778_v20, %v1457_v7  ;;  %v1354_v7 = vor.u32 %v1751_v14, %v1353_v12  ;;  %v1362_v20 = vor.u32 %v1752_v1, %v1361_v15  ;;  %v1434_v14 = vor.u32 %v1768_v62, %v1431_v63 }
  0x4c   :  { %v1438_v15 = vor.u32 %v1772_v2, %v1437_v0 }
  0x4e   :  { %888 = vmatpush.bf16.msra.mxu0 %v1962_v10  ;;  %v1836_v10 = vld [vmem:[%s2616_s1 + $0x148] sm:$0xff] }
  0x4f   :  { %1038 = vmatpush.bf16.msrb.mxu1 %v1836_v10  ;;  %v1759_v10 = vld [vmem:[%s2617_s0 + $0xa0] sm:$0xf0] }
  0x51   :  { %820 = vmatmul.bf16.gmra.mxu3 %v1450_v24  ;;  %849 = vmatmul.bf16.gmra.mxu0 %v1342_v25  ;;  %v1375_v24 = vld [vmem:[%s2617_s0 + $0x94] sm:$0xf0]  ;;  %v1381_v25 = vld [vmem:[%s2617_s0 + $0x80] sm:$0xf] }
  0x52   :  { %889 = vmatpush.bf16.msra.mxu0 %v1977_v13  ;;  %v1834_v13 = vld [vmem:[%s2616_s1 + $0x138] sm:$0xff] }
  0x53   :  { %918 = vmatmul.bf16.gmra.mxu2 %v1458_v26  ;;  %869 = vmatmul.bf16.gmra.mxu1 %v1454_v27  ;;  %v1758_v26 = vld [vmem:[%s2617_s0 + $0x98] sm:$0xf0]  ;;  %v1389_v27 = vld [vmem:[%s2617_s0 + $0x88] sm:$0xf] }
  0x54   :  { %1039 = vmatpush.bf16.msrb.mxu1 %v1835_v29  ;;  %v1378_v29 = vor.u32 %v1754_v23, %v1375_v24 }
  0x56   :  { %890 = vmatpush.bf16.msra.mxu0 %v1992_v16  ;;  %v1784_v16 = vld [vmem:[%s2617_s0 + $0x168] sm:$0xf0] }
  0x57   :  { %v1478_v37 = vor.u32 %v1784_v16, %v1477_v30  ;;  %v1382_v30 = vor.u32 %v1758_v26, %v1381_v25 }
  0x5a   :  { %891 = vmatpush.bf16.msra.mxu0 %v2007_v19  ;;  %v1317_v19 = vld [vmem:[%s2617_s0 + $0x8] sm:$0xf] }
  0x5b   :  { %v1318_v38 = vor.u32 %v1743_v31, %v1317_v19  ;;  %v1390_v19 = vor.u32 %v1759_v10, %v1389_v27 }
  0x5e   :  { %892 = vmatpush.bf16.msra.mxu0 %v2020_v22  ;;  %v1486_v22 = vor.u32 %v1785_v33, %v1485_v32 }
  0x61   :  { %825 = vmatmul.bf16.gmra.mxu3 %v1478_v37  ;;  %893 = vmatmul.bf16.vlgmr.msra.gmra.mxu0 %v1318_v38 }
  0x62   :  { %983 = vmatpush.bf16.msrb.mxu0 %v1834_v13  ;;  %v1383_v13 = vld [vmem:[%s2617_s0 + $0x9c] sm:$0xf0] }
  0x63   :  { %923 = vmatmul.bf16.gmra.mxu2 %v1486_v22  ;;  %874 = vmatmul.bf16.gmra.mxu1 %v1482_v39  ;;  %v1386_v31 = vor.u32 %v1755_v28, %v1383_v13  ;;  %v1761_v22 = vld [vmem:[%s2617_s0 + $0xb4] sm:$0xf]  ;;  %v1403_v39 = vld [vmem:[%s2617_s0 + $0xcc] sm:$0xf0]  ;;  %v1775_v28 = vld [vmem:[%s2617_s0 + $0x124] sm:$0xf] }
  0x64   :  { %v1406_v49 = vor.u32 %v1761_v22, %v1403_v39  ;;  %v1459_v13 = vld [vmem:[%s2617_s0 + $0x13c] sm:$0xf0] }
  0x66   :  { %984 = vmatpush.bf16.msrb.mxu0 %v1833_v36 }
  0x6a   :  { %985 = vmatpush.bf16.msrb.mxu0 %v1832_v40  ;;  %v1409_v40 = vld [vmem:[%s2617_s0 + $0xb8] sm:$0xf] }
  0x6e   :  { %986 = vmatpush.bf16.msrb.mxu0 %v1831_v41  ;;  %v1765_v41 = vld [vmem:[%s2617_s0 + $0xd0] sm:$0xf0] }
  0x6f   :  { %v1410_v50 = vor.u32 %v1765_v41, %v1409_v40 }
  0x71   :  { %830 = vmatmul.bf16.gmra.mxu3 %v1506_v52  ;;  %898 = vmatmul.bf16.gmra.mxu0 %v1346_v53  ;;  %v1414_v53 = vor.u32 %v1762_v44, %v1411_v45 }
  0x72   :  { %987 = vmatpush.bf16.msrb.mxu0 %v1830_v42  ;;  %v1417_v42 = vld [vmem:[%s2617_s0 + $0xc0] sm:$0xf] }
  0x73   :  { %928 = vmatmul.bf16.gmra.mxu2 %v1514_v54  ;;  %879 = vmatmul.bf16.gmra.mxu1 %v1510_v55  ;;  %v1418_v52 = vor.u32 %v1766_v43, %v1417_v42 }
  0x76   :  { %988 = vmatpush.bf16.msrb.mxu0 %v1829_v51 }
  0x7a   :  { %989 = vmatpush.bf16.msrb.mxu0 %v1828_v56 }
  0x7e   :  { %990 = vmatpush.bf16.msrb.mxu0 %v1827_v57 }
  0x81   :  { %942 = vmatmul.bf16.vlgmr.msrb.gmra.mxu3 %v1322_v3  ;;  %991 = vmatmul.bf16.vlgmr.msrb.gmra.mxu0 %v1326_v5  ;;  %v1445_v3 = vld [vmem:[%s2617_s0 + $0xf8] sm:$0xf]  ;;  %v1773_v5 = vld [vmem:[%s2617_s0 + $0x110] sm:$0xf0] }
  0x82   :  { %v1446_v17 = vor.u32 %v1773_v5, %v1445_v3 }
  0x83   :  { %1731 = vmatmul.msk.bf16.vlgmr.msrb.gmra.mxu2 %vm762_vm0, %v1334_v6  ;;  %1040 = vmatmul.bf16.vlgmr.msrb.gmra.mxu1 %v1330_v8  ;;  %v1769_v6 = vld [vmem:[%s2617_s0 + $0xf4] sm:$0xf]  ;;  %v1439_v8 = vld [vmem:[%s2617_s0 + $0x10c] sm:$0xf0] }
  0x84   :  { %v1442_v18 = vor.u32 %v1769_v6, %v1439_v8 }
  0x91   :  { %947 = vmatmul.bf16.gmra.mxu3 %v1350_v4  ;;  %996 = vmatmul.bf16.gmra.mxu0 %v1354_v7 }
  0x93   :  { %1732 = vmatmul.msk.bf16.gmra.mxu2 %vm762_vm0, %v1362_v20  ;;  %1045 = vmatmul.bf16.gmra.mxu1 %v1358_v21 }
  0x9e   :  { %v796_v16 = vpop.f32.mrf.mxu0 }
  0xa0   :  { %v855_v32 = vpop.f32.mrf.mxu1 }
  0xa1   :  { %952 = vmatmul.bf16.gmra.mxu3 %v1378_v29  ;;  %1001 = vmatmul.bf16.gmra.mxu0 %v1382_v30  ;;  %v1465_v29 = vld [vmem:[%s2617_s0 + $0x128] sm:$0xf]  ;;  %v1779_v30 = vld [vmem:[%s2617_s0 + $0x140] sm:$0xf0] }
  0xa3   :  { %1733 = vmatmul.msk.bf16.gmra.mxu2 %vm762_vm0, %v1390_v19  ;;  %1050 = vmatmul.bf16.gmra.mxu1 %v1386_v31  ;;  %v1780_v19 = vld [vmem:[%s2617_s0 + $0x148] sm:$0xf0] }
  0xa4   :  { %v806_v33 = vpop.f32.mrf.mxu3  ;;  %v1776_v31 = vld [vmem:[%s2617_s0 + $0x12c] sm:$0xf] }
  0xa5   :  { %v856_v34 = vadd.f32 %v855_v32, %v806_v33  ;;  %v1467_v32 = vld [vmem:[%s2617_s0 + $0x144] sm:$0xf0] }
  0xa6   :  { %v904_v35 = vpop.f32.mrf.mxu2  ;;  %v798_v36 = vpop.f32.mrf.mxu0  ;;  %v1470_v40 = vor.u32 %v1776_v31, %v1467_v32 }
  0xa7   :  { %v2344_v37 = vadd.f32 %v904_v35, %v856_v34 }
  0xa8   :  { %v857_v38 = vpop.f32.mrf.mxu1 }
  0xac   :  { %v808_v46 = vpop.f32.mrf.mxu3 }
  0xad   :  { %v858_v47 = vadd.f32 %v857_v38, %v808_v46  ;;  %v1466_v38 = vor.u32 %v1779_v30, %v1465_v29 }
  0xae   :  { %v906_v48 = vpop.f32.mrf.mxu2  ;;  %v801_v51 = vpop.f32.mrf.mxu0 }
  0xaf   :  { %v2370_v54 = vadd.f32 %v906_v48, %v858_v47 }
  0xb0   :  { %v860_v55 = vpop.f32.mrf.mxu1 }
  0xb1   :  { %957 = vmatmul.bf16.gmra.mxu3 %v1406_v49  ;;  %1006 = vmatmul.bf16.gmra.mxu0 %v1410_v50 }
  0xb3   :  { %1734 = vmatmul.msk.bf16.gmra.mxu2 %vm762_vm0, %v1418_v52  ;;  %1055 = vmatmul.bf16.gmra.mxu1 %v1414_v53  ;;  %v1782_v52 = vld [vmem:[%s2617_s0 + $0x15c] sm:$0xf]  ;;  %v1493_v53 = vld [vmem:[%s2617_s0 + $0x160] sm:$0xf] }
  0xb4   :  { %v811_v56 = vpop.f32.mrf.mxu3 }
  0xb5   :  { %v861_v57 = vadd.f32 %v860_v55, %v811_v56  ;;  %v1786_v55 = vld [vmem:[%s2617_s0 + $0x178] sm:$0xf0]  ;;  %v1501_v56 = vld [vmem:[%s2617_s0 + $0x168] sm:$0xf] }
  0xb6   :  { %v909_v58 = vpop.f32.mrf.mxu2  ;;  %v803_v59 = vpop.f32.mrf.mxu0  ;;  %v1494_v2 = vor.u32 %v1786_v55, %v1493_v53 }
  0xb7   :  { %v2373_v60 = vadd.f32 %v909_v58, %v861_v57  ;;  %v1787_v57 = vld [vmem:[%s2617_s0 + $0x180] sm:$0xf0] }
  0xb8   :  { %v862_v61 = vpop.f32.mrf.mxu1  ;;  %v1783_v58 = vld [vmem:[%s2617_s0 + $0x164] sm:$0xf]  ;;  %v1502_v5 = vor.u32 %v1787_v57, %v1501_v56 }
  0xbc   :  { %v813_v9 = vpop.f32.mrf.mxu3 }
  0xbd   :  { %v863_v11 = vadd.f32 %v862_v61, %v813_v9 }
  0xbe   :  { %v911_v12 = vpop.f32.mrf.mxu2  ;;  %v845_v1 = vpop.f32.mrf.mxu0 }
  0xbf   :  { %v2399_v4 = vadd.f32 %v911_v12, %v863_v11  ;;  %v846_v7 = vadd.f32 %v845_v1, %v796_v16  ;;  %v1473_v16 = vld [vmem:[%s2617_s0 + $0x130] sm:$0xf] }
  0xc0   :  { %v865_v20 = vpop.f32.mrf.mxu1  ;;  %v1474_v39 = vor.u32 %v1780_v19, %v1473_v16 }
  0xc1   :  { %962 = vmatmul.bf16.gmra.mxu3 %v1434_v14  ;;  %1011 = vmatmul.bf16.gmra.mxu0 %v1438_v15 }
  0xc3   :  { %1735 = vmatmul.msk.bf16.gmra.mxu2 %vm762_vm0, %v1446_v17  ;;  %1060 = vmatmul.bf16.gmra.mxu1 %v1442_v18 }
  0xc4   :  { %v816_v21 = vpop.f32.mrf.mxu3 }
  0xc5   :  { %v866_v23 = vadd.f32 %v865_v20, %v816_v21  ;;  %v1789_v21 = vld [vmem:[%s2617_s0 + $0x194] sm:$0xf] }
  0xc6   :  { %v914_v24 = vpop.f32.mrf.mxu2  ;;  %v847_v25 = vpop.f32.mrf.mxu0 }
  0xc7   :  { %v2402_v26 = vadd.f32 %v914_v24, %v866_v23  ;;  %v848_v27 = vadd.f32 %v847_v25, %v798_v36  ;;  %v1462_v36 = vor.u32 %v1775_v28, %v1459_v13  ;;  %v1521_v23 = vld [vmem:[%s2617_s0 + $0x198] sm:$0xf]  ;;  %v1793_v24 = vld [vmem:[%s2617_s0 + $0x1b0] sm:$0xf0]  ;;  %v1529_v25 = vld [vmem:[%s2617_s0 + $0x1a0] sm:$0xf] }
  0xc8   :  { %v867_v10 = vpop.f32.mrf.mxu1  ;;  %v1523_v28 = vld [vmem:[%s2617_s0 + $0x1b4] sm:$0xf0]  ;;  %v1522_v19 = vor.u32 %v1793_v24, %v1521_v23 }
  0xcc   :  { %v818_v33 = vpop.f32.mrf.mxu3 }
  0xcd   :  { %v868_v34 = vadd.f32 %v867_v10, %v818_v33  ;;  %v1790_v10 = vld [vmem:[%s2617_s0 + $0x19c] sm:$0xf] }
  0xce   :  { %v916_v35 = vpop.f32.mrf.mxu2  ;;  %v850_v22 = vpop.f32.mrf.mxu0  ;;  %v1526_v33 = vor.u32 %v1790_v10, %v1523_v28 }
  0xcf   :  { %v2428_v41 = vadd.f32 %v916_v35, %v868_v34  ;;  %v851_v42 = vadd.f32 %v850_v22, %v801_v51  ;;  %v1487_v51 = vld [vmem:[%s2617_s0 + $0x174] sm:$0xf0] }
  0xd0   :  { %v870_v43 = vpop.f32.mrf.mxu1  ;;  %v1490_v0 = vor.u32 %v1782_v52, %v1487_v51 }
  0xd1   :  { %967 = vmatmul.bf16.gmra.mxu3 %v1462_v36  ;;  %1016 = vmatmul.bf16.gmra.mxu0 %v1466_v38 }
  0xd3   :  { %1736 = vmatmul.msk.bf16.gmra.mxu2 %vm762_vm0, %v1474_v39  ;;  %1065 = vmatmul.bf16.gmra.mxu1 %v1470_v40 }
  0xd4   :  { %v821_v44 = vpop.f32.mrf.mxu3 }
  0xd5   :  { %v871_v45 = vadd.f32 %v870_v43, %v821_v44 }
  0xd6   :  { %v919_v46 = vpop.f32.mrf.mxu2  ;;  %v852_v47 = vpop.f32.mrf.mxu0 }
  0xd7   :  { %v2431_v48 = vadd.f32 %v919_v46, %v871_v45  ;;  %v853_v49 = vadd.f32 %v852_v47, %v803_v59  ;;  %v1495_v59 = vld [vmem:[%s2617_s0 + $0x17c] sm:$0xf0] }
  0xd8   :  { %v872_v50 = vpop.f32.mrf.mxu1  ;;  %v1498_v6 = vor.u32 %v1783_v58, %v1495_v59 }
  0xdc   :  { %v823_v61 = vpop.f32.mrf.mxu3 }
  0xdd   :  { %v873_v62 = vadd.f32 %v872_v50, %v823_v61 }
  0xde   :  { %v921_v63 = vpop.f32.mrf.mxu2  ;;  %v894_v3 = vpop.f32.mrf.mxu0 }
  0xdf   :  { %v2457_v8 = vadd.f32 %v921_v63, %v873_v62  ;;  %v895_v9 = vadd.f32 %v894_v3, %v846_v7  ;;  %v1515_v7 = vld [vmem:[%s2617_s0 + $0x1ac] sm:$0xf0] }
  0xe0   :  { %v875_v11 = vpop.f32.mrf.mxu1  ;;  %v1518_v16 = vor.u32 %v1789_v21, %v1515_v7 }
  0xe1   :  { %972 = vmatmul.bf16.gmra.mxu3 %v1490_v0  ;;  %1021 = vmatmul.bf16.gmra.mxu0 %v1494_v2 }
  0xe3   :  { %1737 = vmatmul.msk.bf16.gmra.mxu2 %vm762_vm0, %v1502_v5  ;;  %1070 = vmatmul.bf16.gmra.mxu1 %v1498_v6 }
  0xe4   :  { %v826_v12 = vpop.f32.mrf.mxu3 }
  0xe5   :  { %v876_v14 = vadd.f32 %v875_v11, %v826_v12 }
  0xe6   :  { %v924_v15 = vpop.f32.mrf.mxu2  ;;  %v896_v1 = vpop.f32.mrf.mxu0 }
  0xe7   :  { %v2460_v17 = vadd.f32 %v924_v15, %v876_v14  ;;  %v897_v18 = vadd.f32 %v896_v1, %v848_v27  ;;  %v1794_v27 = vld [vmem:[%s2617_s0 + $0x1b8] sm:$0xf0] }
  0xe8   :  { %v877_v20 = vpop.f32.mrf.mxu1  ;;  %v1530_v32 = vor.u32 %v1794_v27, %v1529_v25 }
  0xec   :  { %v828_v13 = vpop.f32.mrf.mxu3 }
  0xed   :  { %v878_v29 = vadd.f32 %v877_v20, %v828_v13 }
  0xee   :  { %v926_v30 = vpop.f32.mrf.mxu2  ;;  %v899_v31 = vpop.f32.mrf.mxu0 }
  0xef   :  { %v2486_v34 = vadd.f32 %v926_v30, %v878_v29  ;;  %v900_v35 = vadd.f32 %v899_v31, %v851_v42 }
  0xf0   :  { %v880_v36 = vpop.f32.mrf.mxu1 }
  0xf1   :  { %977 = vmatmul.bf16.gmra.mxu3 %v1518_v16  ;;  %1026 = vmatmul.bf16.gmra.mxu0 %v1522_v19 }
  0xf3   :  { %1738 = vmatmul.msk.bf16.gmra.mxu2 %vm762_vm0, %v1530_v32  ;;  %1075 = vmatmul.bf16.gmra.mxu1 %v1526_v33 }
  0xf4   :  { %v831_v38 = vpop.f32.mrf.mxu3 }
  0xf5   :  { %v881_v22 = vadd.f32 %v880_v36, %v831_v38 }
  0xf6   :  { %v929_v39 = vpop.f32.mrf.mxu2  ;;  %v901_v40 = vpop.f32.mrf.mxu0 }
  0xf7   :  { %v2489_v43 = vadd.f32 %v929_v39, %v881_v22  ;;  %v902_v44 = vadd.f32 %v901_v40, %v853_v49 }
  0xf8   :  { %v882_v45 = vpop.f32.mrf.mxu1 }
  0xfc   :  { %v833_v46 = vpop.f32.mrf.mxu3 }
  0xfd   :  { %v883_v47 = vadd.f32 %v882_v45, %v833_v46 }
  0xfe   :  { %v931_v50 = vpop.f32.mrf.mxu2  ;;  %v992_v52 = vpop.f32.mrf.mxu0 }
  0xff   :  { %v2491_v51 = vadd.f32 %v931_v50, %v883_v47 }
 0x100   :  { %v1041_v42 = vpop.f32.mrf.mxu1 }
 0x104   :  { %v943_v53 = vpop.f32.mrf.mxu3 }
 0x105   :  { %v944_v55 = vadd.f32 %v943_v53, %v895_v9 }
 0x106   :  { %v1090_v56 = vpop.f32.mrf.mxu2  ;;  %v994_v57 = vpop.f32.mrf.mxu0 }
 0x107   :  { %v993_v58 = vadd.f32 %v992_v52, %v944_v55 }
 0x108   :  { %v1043_v59 = vpop.f32.mrf.mxu1 }
 0x109   :  { %v1042_v61 = vadd.f32 %v1041_v42, %v993_v58 }
 0x10b   :  { %v2493_v62 = vadd.f32 %v1090_v56, %v1042_v61 }
 0x10c   :  { %v945_v63 = vpop.f32.mrf.mxu3 }
 0x10d   :  { %v946_v0 = vadd.f32 %v945_v63, %v897_v18 }
 0x10e   :  { %v1092_v49 = vpop.f32.mrf.mxu2  ;;  %v997_v2 = vpop.f32.mrf.mxu0 }
 0x10f   :  { %v995_v3 = vadd.f32 %v994_v57, %v946_v0 }
 0x110   :  { %v1046_v5 = vpop.f32.mrf.mxu1 }
 0x111   :  { %v1044_v6 = vadd.f32 %v1043_v59, %v995_v3 }
 0x113   :  { %v2495_v11 = vadd.f32 %v1092_v49, %v1044_v6 }
 0x114   :  { %v948_v12 = vpop.f32.mrf.mxu3 }
 0x115   :  { %v949_v14 = vadd.f32 %v948_v12, %v900_v35 }
 0x116   :  { %v1095_v15 = vpop.f32.mrf.mxu2  ;;  %v999_v9 = vpop.f32.mrf.mxu0 }
 0x117   :  { %v998_v1 = vadd.f32 %v997_v2, %v949_v14 }
 0x118   :  { %v1048_v20 = vpop.f32.mrf.mxu1 }
 0x119   :  { %v1047_v21 = vadd.f32 %v1046_v5, %v998_v1 }
 0x11b   :  { %v2497_v7 = vadd.f32 %v1095_v15, %v1047_v21 }
 0x11c   :  { %v950_v23 = vpop.f32.mrf.mxu3 }
 0x11d   :  { %v951_v24 = vadd.f32 %v950_v23, %v902_v44 }
 0x11e   :  { %v1097_v25 = vpop.f32.mrf.mxu2  ;;  %v1002_v18 = vpop.f32.mrf.mxu0 }
 0x11f   :  { %v1000_v27 = vadd.f32 %v999_v9, %v951_v24 }
 0x120   :  { %v1051_v10 = vpop.f32.mrf.mxu1 }
 0x121   :  { %v1049_v28 = vadd.f32 %v1048_v20, %v1000_v27 }
 0x123   :  { %v2499_v13 = vadd.f32 %v1097_v25, %v1049_v28  ;;  %v1130_v25 = vadd.f32 %v2495_v11, %v2493_v62 }
 0x124   :  { %v953_v29 = vpop.f32.mrf.mxu3 }
 0x125   :  { %v954_v30 = vadd.f32 %v953_v29, %v2344_v37 }
 0x126   :  { %v1100_v16 = vpop.f32.mrf.mxu2  ;;  %v1004_v19 = vpop.f32.mrf.mxu0 }
 0x127   :  { %v1003_v31 = vadd.f32 %v1002_v18, %v954_v30 }
 0x128   :  { %v1053_v32 = vpop.f32.mrf.mxu1 }
 0x129   :  { %v1052_v33 = vadd.f32 %v1051_v10, %v1003_v31 }
 0x12b   :  { %v2502_v35 = vadd.f32 %v1100_v16, %v1052_v33 }
 0x12c   :  { %v955_v36 = vpop.f32.mrf.mxu3 }
 0x12d   :  { %v956_v6 = vadd.f32 %v955_v36, %v2370_v54  ;;  %v1131_v54 = vadd.f32 %v1130_v25, %v2497_v7 }
 0x12e   :  { %v1102_v38 = vpop.f32.mrf.mxu2  ;;  %v1007_v22 = vpop.f32.mrf.mxu0 }
 0x12f   :  { %v1005_v9 = vadd.f32 %v1004_v19, %v956_v6 }
 0x130   :  { %v1056_v39 = vpop.f32.mrf.mxu1 }
 0x131   :  { %v1054_v18 = vadd.f32 %v1053_v32, %v1005_v9 }
 0x133   :  { %v2514_v16 = vadd.f32 %v1102_v38, %v1054_v18 }
 0x134   :  { %v958_v40 = vpop.f32.mrf.mxu3 }
 0x135   :  { %v959_v14 = vadd.f32 %v958_v40, %v2373_v60 }
 0x136   :  { %v1105_v44 = vpop.f32.mrf.mxu2  ;;  %v1009_v45 = vpop.f32.mrf.mxu0 }
 0x137   :  { %v1008_v23 = vadd.f32 %v1007_v22, %v959_v14  ;;  %v1885_v14 = vmov 128.0  }
 0x138   :  { %v1058_v46 = vpop.f32.mrf.mxu1  ;;  %1881 = vrcp.f32 %v1885_v14 }
 0x139   :  { %v1057_v28 = vadd.f32 %v1056_v39, %v1008_v23 }
 0x13c   :  { %v960_v47 = vpop.f32.mrf.mxu3 }
 0x13d   :  { %v961_v1 = vadd.f32 %v960_v47, %v2399_v4  ;;  %v1132_v4 = vadd.f32 %v1131_v54, %v2499_v13 }
 0x13e   :  { %v1107_v50 = vpop.f32.mrf.mxu2  ;;  %v1012_v52 = vpop.f32.mrf.mxu0 }
 0x13f   :  { %v1010_v27 = vadd.f32 %v1009_v45, %v961_v1  ;;  %v1133_v36 = vadd.f32 %v1132_v4, %v2502_v35  ;;  %v1882_v23 = vpop.eup %1881 }
 0x140   :  { %v1061_v42 = vpop.f32.mrf.mxu1  ;;  %v1152_v54 = vmul.f32 128.0, %v1882_v23  ;;  %vm1156_vm1 = vweird.f32 %v1882_v23 }
 0x141   :  { %v1059_v19 = vadd.f32 %v1058_v46, %v1010_v27 }
 0x142   :  { %v1153_v4 = vsub.f32 1.0, %v1152_v54 }
 0x143   :  { %v2522_v47 = vadd.f32 %v1107_v50, %v1059_v19 }
 0x144   :  { %v963_v37 = vpop.f32.mrf.mxu3 }
 0x145   :  { %v964_v24 = vadd.f32 %v963_v37, %v2402_v26 }
 0x146   :  { %v1110_v53 = vpop.f32.mrf.mxu2  ;;  %v1014_v55 = vpop.f32.mrf.mxu0 }
 0x147   :  { %v1013_v60 = vadd.f32 %v1012_v52, %v964_v24 }
 0x148   :  { %v1063_v56 = vpop.f32.mrf.mxu1 }
 0x149   :  { %v1062_v22 = vadd.f32 %v1061_v42, %v1013_v60 }
 0x14c   :  { %v965_v57 = vpop.f32.mrf.mxu3 }
 0x14d   :  { %v966_v10 = vadd.f32 %v965_v57, %v2428_v41  ;;  %v2518_v41 = vadd.f32 %v1105_v44, %v1057_v28 }
 0x14e   :  { %v1112_v58 = vpop.f32.mrf.mxu2  ;;  %v1017_v59 = vpop.f32.mrf.mxu0 }
 0x14f   :  { %v1015_v33 = vadd.f32 %v1014_v55, %v966_v10 }
 0x150   :  { %v1066_v61 = vpop.f32.mrf.mxu1 }
 0x151   :  { %v1064_v38 = vadd.f32 %v1063_v56, %v1015_v33 }
 0x154   :  { %v968_v63 = vpop.f32.mrf.mxu3 }
 0x155   :  { %v969_v30 = vadd.f32 %v968_v63, %v2431_v48  ;;  %v1134_v48 = vadd.f32 %v1133_v36, %v2514_v16  ;;  %v2529_v63 = vadd.f32 %v1112_v58, %v1064_v38 }
 0x156   :  { %v1115_v0 = vpop.f32.mrf.mxu2  ;;  %v1019_v49 = vpop.f32.mrf.mxu0 }
 0x157   :  { %v1018_v40 = vadd.f32 %v1017_v59, %v969_v30  ;;  %v1135_v37 = vadd.f32 %v1134_v48, %v2518_v41 }
 0x158   :  { %v1068_v2 = vpop.f32.mrf.mxu1 }
 0x159   :  { %v1067_v55 = vadd.f32 %v1066_v61, %v1018_v40  ;;  %v1136_v42 = vadd.f32 %v1135_v37, %v2522_v47 }
 0x15c   :  { %v970_v3 = vpop.f32.mrf.mxu3 }
 0x15d   :  { %v971_v32 = vadd.f32 %v970_v3, %v2457_v8  ;;  %v2526_v8 = vadd.f32 %v1110_v53, %v1062_v22 }
 0x15e   :  { %v1117_v5 = vpop.f32.mrf.mxu2  ;;  %v1022_v12 = vpop.f32.mrf.mxu0 }
 0x15f   :  { %v1020_v46 = vadd.f32 %v1019_v49, %v971_v32  ;;  %v1137_v56 = vadd.f32 %v1136_v42, %v2526_v8 }
 0x160   :  { %v1071_v15 = vpop.f32.mrf.mxu1 }
 0x164   :  { %v973_v20 = vpop.f32.mrf.mxu3 }
 0x165   :  { %v974_v45 = vadd.f32 %v973_v20, %v2460_v17  ;;  %v1069_v17 = vadd.f32 %v1068_v2, %v1020_v46 }
 0x166   :  { %v1120_v21 = vpop.f32.mrf.mxu2  ;;  %v1024_v29 = vpop.f32.mrf.mxu0 }
 0x167   :  { %v1023_v44 = vadd.f32 %v1022_v12, %v974_v45  ;;  %v1138_v12 = vadd.f32 %v1137_v56, %v2529_v63  ;;  %v2536_v9 = vadd.f32 %v1117_v5, %v1069_v17 }
 0x168   :  { %v1073_v26 = vpop.f32.mrf.mxu1 }
 0x169   :  { %v1072_v6 = vadd.f32 %v1071_v15, %v1023_v44 }
 0x16b   :  { %v2539_v1 = vadd.f32 %v1120_v21, %v1072_v6 }
 0x16c   :  { %v975_v31 = vpop.f32.mrf.mxu3 }
 0x16d   :  { %v976_v52 = vadd.f32 %v975_v31, %v2486_v34  ;;  %v2533_v34 = vadd.f32 %v1115_v0, %v1067_v55 }
 0x16e   :  { %v1122_v39 = vpop.f32.mrf.mxu2  ;;  %v1027_v57 = vpop.f32.mrf.mxu0 }
 0x16f   :  { %v1025_v3 = vadd.f32 %v1024_v29, %v976_v52  ;;  %v1139_v2 = vadd.f32 %v1138_v12, %v2533_v34 }
 0x170   :  { %v1076_v49 = vpop.f32.mrf.mxu1 }
 0x171   :  { %v1074_v58 = vadd.f32 %v1073_v26, %v1025_v3  ;;  %v1140_v0 = vadd.f32 %v1139_v2, %v2536_v9  ;;  %v1154_v26 = vmul.f32 %v1882_v23, %v1153_v4 }
 0x173   :  { %v2542_v24 = vadd.f32 %v1122_v39, %v1074_v58  ;;  %v1141_v18 = vadd.f32 %v1140_v0, %v2539_v1  ;;  %v1155_v32 = vadd.f32 %v1882_v23, %v1154_v26 }
 0x174   :  { %v978_v59 = vpop.f32.mrf.mxu3 }
 0x175   :  { %v979_v50 = vadd.f32 %v978_v59, %v2489_v43  ;;  %v1142_v21 = vadd.f32 %v1141_v18, %v2542_v24  ;;  %v1157_v39 = vsel %vm1156_vm1, %v1882_v23, %v1155_v32 }
 0x176   :  { %v1125_v61 = vpop.f32.mrf.mxu2  ;;  %v1029_v25 = vpop.f32.mrf.mxu0 }
 0x177   :  { %v1028_v53 = vadd.f32 %v1027_v57, %v979_v50 }
 0x178   :  { %v1078_v10 = vpop.f32.mrf.mxu1 }
 0x179   :  { %v1077_v43 = vadd.f32 %v1076_v49, %v1028_v53 }
 0x17b   :  { %v2546_v27 = vadd.f32 %v1125_v61, %v1077_v43 }
 0x17c   :  { %v980_v20 = vpop.f32.mrf.mxu3 }
 0x17d   :  { %v981_v15 = vadd.f32 %v980_v20, %v2491_v51  ;;  %v1143_v29 = vadd.f32 %v1142_v21, %v2546_v27 }
 0x17e   :  { %v1127_v60 = vpop.f32.mrf.mxu2 }
 0x17f   :  { %v1030_v5 = vadd.f32 %v1029_v25, %v981_v15 }
 0x181   :  { %v1079_v28 = vadd.f32 %v1078_v10, %v1030_v5 }
 0x183   :  { %v2550_v30 = vadd.f32 %v1127_v60, %v1079_v28 }
 0x185   :  { %v1144_v19 = vadd.f32 %v1143_v29, %v2550_v30 }
 0x187   :  { %v1145_v51 = vrot.slane %v1144_v19, 4 }
 0x189   :  { %v1146_v31 = vadd.f32 %v1145_v51, %v1144_v19 }
 0x18b   :  { %v1147_v33 = vrot.slane %v1146_v31, 2 }
 0x18d   :  { %v1148_v36 = vadd.f32 %v1147_v33, %v1146_v31 }
 0x18f   :  { %v1149_v22 = vrot.slane %v1148_v36, 1 }
 0x191   :  { %v1150_v40 = vadd.f32 %v1149_v22, %v1148_v36 }
 0x193   :  { %v2553_v45 = vmul.f32 %v1157_v39, %v1150_v40 }
 0x195   :  { %v1159_v48 = vsub.f32 %v2493_v62, %v2553_v45  ;;  %v1160_v38 = vsub.f32 %v2495_v11, %v2553_v45  ;;  %v1161_v46 = vsub.f32 %v2497_v7, %v2553_v45  ;;  %v1162_v55 = vsub.f32 %v2499_v13, %v2553_v45 }
 0x196   :  { %v1163_v44 = vsub.f32 %v2502_v35, %v2553_v45  ;;  %v1164_v59 = vsub.f32 %v2514_v16, %v2553_v45  ;;  %v1165_v50 = vsub.f32 %v2518_v41, %v2553_v45  ;;  %v1166_v6 = vsub.f32 %v2522_v47, %v2553_v45 }
 0x197   :  { %v1175_v52 = vmul.f32 %v1159_v48, %v1159_v48  ;;  %v1176_v37 = vmul.f32 %v1160_v38, %v1160_v38  ;;  %v1177_v42 = vmul.f32 %v1161_v46, %v1161_v46  ;;  %v1178_v17 = vmul.f32 %v1162_v55, %v1162_v55 }
 0x198   :  { %v1179_v56 = vmul.f32 %v1163_v44, %v1163_v44  ;;  %v1180_v53 = vmul.f32 %v1164_v59, %v1164_v59  ;;  %v1167_v61 = vsub.f32 %v2526_v8, %v2553_v45  ;;  %v1181_v12 = vmul.f32 %v1165_v50, %v1165_v50 }
 0x199   :  { %v1191_v57 = vadd.f32 %v1176_v37, %v1175_v52  ;;  %v1168_v2 = vsub.f32 %v2529_v63, %v2553_v45  ;;  %v1182_v43 = vmul.f32 %v1166_v6, %v1166_v6  ;;  %v1169_v23 = vsub.f32 %v2533_v34, %v2553_v45 }
 0x19a   :  { %v1183_v0 = vmul.f32 %v1167_v61, %v1167_v61  ;;  %v1170_v25 = vsub.f32 %v2536_v9, %v2553_v45  ;;  %v1171_v10 = vsub.f32 %v2539_v1, %v2553_v45  ;;  %v1172_v28 = vsub.f32 %v2542_v24, %v2553_v45 }
 0x19b   :  { %v1192_v3 = vadd.f32 %v1191_v57, %v1177_v42  ;;  %v1184_v18 = vmul.f32 %v1168_v2, %v1168_v2  ;;  %v1185_v54 = vmul.f32 %v1169_v23, %v1169_v23  ;;  %v1173_v4 = vsub.f32 %v2546_v27, %v2553_v45 }
 0x19c   :  { %v1186_v60 = vmul.f32 %v1170_v25, %v1170_v25  ;;  %v1187_v19 = vmul.f32 %v1171_v10, %v1171_v10  ;;  %v1174_v26 = vsub.f32 %v2550_v30, %v2553_v45  ;;  %v1188_v31 = vmul.f32 %v1172_v28, %v1172_v28 }
 0x19d   :  { %v1193_v49 = vadd.f32 %v1192_v3, %v1178_v17  ;;  %v1189_v32 = vmul.f32 %v1173_v4, %v1173_v4 }
 0x19e   :  { %v1190_v22 = vmul.f32 %v1174_v26, %v1174_v26 }
 0x19f   :  { %v1194_v14 = vadd.f32 %v1193_v49, %v1179_v56  ;;  %v1213_v49 = vld [vmem:[%s2618_s2] sm:$0x1] }
 0x1a1   :  { %v1195_v58 = vadd.f32 %v1194_v14, %v1180_v53 }
 0x1a3   :  { %v1196_v20 = vadd.f32 %v1195_v58, %v1181_v12 }
 0x1a5   :  { %v1197_v15 = vadd.f32 %v1196_v20, %v1182_v43 }
 0x1a7   :  { %v1198_v5 = vadd.f32 %v1197_v15, %v1183_v0 }
 0x1a9   :  { %v1199_v21 = vadd.f32 %v1198_v5, %v1184_v18 }
 0x1ab   :  { %v1200_v29 = vadd.f32 %v1199_v21, %v1185_v54 }
 0x1ad   :  { %v1201_v51 = vadd.f32 %v1200_v29, %v1186_v60 }
 0x1af   :  { %v1202_v33 = vadd.f32 %v1201_v51, %v1187_v19 }
 0x1b1   :  { %v1203_v36 = vadd.f32 %v1202_v33, %v1188_v31 }
 0x1b3   :  { %v1204_v40 = vadd.f32 %v1203_v36, %v1189_v32 }
 0x1b5   :  { %v1205_v48 = vadd.f32 %v1204_v40, %v1190_v22 }
 0x1b7   :  { %v1206_v38 = vrot.slane %v1205_v48, 4 }
 0x1b9   :  { %v1207_v46 = vadd.f32 %v1206_v38, %v1205_v48 }
 0x1bb   :  { %v1208_v52 = vrot.slane %v1207_v46, 2 }
 0x1bd   :  { %v1209_v37 = vadd.f32 %v1208_v52, %v1207_v46 }
 0x1bf   :  { %v1210_v55 = vrot.slane %v1209_v37, 1 }
 0x1c1   :  { %v1211_v44 = vadd.f32 %v1210_v55, %v1209_v37 }
 0x1c3   :  { %v1212_v42 = vmul.f32 %v1211_v44, %v1157_v39  ;;  %v1226_v39 = vld [vmem:[%s2619_s3] sm:$0x1] }
 0x1c5   :  { %v1214_v57 = vadd.f32 1e-05, %v1212_v42 }
 0x1c7   :  { %1883 = vrsqrt.f32 %v1214_v57  ;;  %vm1221_vm3 = vweird.f32 %v1214_v57 }
 0x1cd   :  { %v1884_v59 = vpop.eup %1883 }
 0x1ce   :  { %v1216_v17 = vmul.f32 %v1884_v59, %v1214_v57  ;;  %vm1222_vm2 = vweird.f32 %v1884_v59 }
 0x1cf   :  { %vm1223_vm4 = vmor %vm1221_vm3, %vm1222_vm2 }
 0x1d0   :  { %v1217_v3 = vmul.f32 %v1884_v59, %v1216_v17 }
 0x1d2   :  { %v1218_v50 = vmul.f32 0.5, %v1217_v3 }
 0x1d4   :  { %v1219_v56 = vsub.f32 1.5, %v1218_v50 }
 0x1d6   :  { %v1220_v6 = vmul.f32 %v1884_v59, %v1219_v56 }
 0x1d8   :  { %v1224_v53 = vsel %vm1223_vm4, %v1884_v59, %v1220_v6 }
 0x1d9   :  { %v1225_v14 = vmul.f32 %v1224_v53, %v1213_v49 }
 0x1db   :  { %v1227_v61 = vmul.f32 %v1225_v14, %v2553_v45  ;;  %v1230_v12 = vperm.slane %v1225_v14, 0 }
 0x1dd   :  { %v1228_v58 = vsub.f32 %v1226_v39, %v1227_v61  ;;  %v1232_v2 = vmul.f32 %v1230_v12, %v2493_v62  ;;  %v1233_v43 = vmul.f32 %v1230_v12, %v2495_v11  ;;  %v1234_v20 = vmul.f32 %v1230_v12, %v2497_v7 }
 0x1de   :  { %v1235_v23 = vmul.f32 %v1230_v12, %v2499_v13  ;;  %v1236_v0 = vmul.f32 %v1230_v12, %v2502_v35  ;;  %v1237_v15 = vmul.f32 %v1230_v12, %v2514_v16  ;;  %v1238_v25 = vmul.f32 %v1230_v12, %v2518_v41 }
 0x1df   :  { %v1239_v18 = vmul.f32 %v1230_v12, %v2522_v47  ;;  %v1240_v45 = vmul.f32 %v1230_v12, %v2526_v8  ;;  %v1241_v5 = vmul.f32 %v1230_v12, %v2529_v63  ;;  %v1242_v62 = vmul.f32 %v1230_v12, %v2533_v34 }
 0x1e0   :  { %v1243_v11 = vmul.f32 %v1230_v12, %v2536_v9  ;;  %v1249_v10 = vperm.slane %v1228_v58, 0  ;;  %v1244_v7 = vmul.f32 %v1230_v12, %v2539_v1  ;;  %v1245_v13 = vmul.f32 %v1230_v12, %v2542_v24 }
 0x1e1   :  { %v1246_v35 = vmul.f32 %v1230_v12, %v2546_v27  ;;  %v1247_v16 = vmul.f32 %v1230_v12, %v2550_v30 }
 0x1e2   :  { %v1251_v41 = vadd.f32 %v1249_v10, %v1232_v2  ;;  %v1252_v54 = vadd.f32 %v1249_v10, %v1233_v43  ;;  %v1253_v47 = vadd.f32 %v1249_v10, %v1234_v20  ;;  %v1254_v21 = vadd.f32 %v1249_v10, %v1235_v23 }
 0x1e3   :  { %v1255_v8 = vadd.f32 %v1249_v10, %v1236_v0  ;;  %v1256_v28 = vadd.f32 %v1249_v10, %v1237_v15  ;;  %v1257_v63 = vadd.f32 %v1249_v10, %v1238_v25  ;;  %v1258_v60 = vadd.f32 %v1249_v10, %v1239_v18 }
 0x1e4   :  { %v1259_v34 = vadd.f32 %v1249_v10, %v1240_v45  ;;  %v1260_v29 = vadd.f32 %v1249_v10, %v1241_v5  ;;  %v1261_v9 = vadd.f32 %v1249_v10, %v1242_v62  ;;  %v1262_v4 = vadd.f32 %v1249_v10, %v1243_v11 }
 0x1e5   :  { %v1263_v19 = vadd.f32 %v1249_v10, %v1244_v7  ;;  %v1264_v1 = vadd.f32 %v1249_v10, %v1245_v13  ;;  %v1265_v51 = vadd.f32 %v1249_v10, %v1246_v35  ;;  %v1266_v24 = vadd.f32 %v1249_v10, %v1247_v16 }
 0x1e6   :  { %v1267_v26 = vmax.f32 %v1251_v41, 0.0  ;;  %v1268_v27 = vmax.f32 %v1252_v54, 0.0  ;;  %v1269_v31 = vmax.f32 %v1253_v47, 0.0  ;;  %v1270_v30 = vmax.f32 %v1254_v21, 0.0 }
 0x1e7   :  { %v1271_v33 = vmax.f32 %v1255_v8, 0.0  ;;  %v1272_v32 = vmax.f32 %v1256_v28, 0.0  ;;  %v1273_v36 = vmax.f32 %v1257_v63, 0.0  ;;  %v1274_v22 = vmax.f32 %v1258_v60, 0.0 }
 0x1e8   :  { %v1275_v40 = vmax.f32 %v1259_v34, 0.0  ;;  %v1276_v48 = vmax.f32 %v1260_v29, 0.0  ;;  %v1277_v38 = vmax.f32 %v1261_v9, 0.0  ;;  %v1278_v46 = vmax.f32 %v1262_v4, 0.0 }
 0x1e9   :  { %v1279_v52 = vmax.f32 %v1263_v19, 0.0  ;;  %v1280_v37 = vmax.f32 %v1264_v1, 0.0  ;;  %v1281_v55 = vmax.f32 %v1265_v51, 0.0  ;;  %v1282_v44 = vmax.f32 %v1266_v24, 0.0 }
 0x1ea   :  { %v1283_v42 = vmax.f32 %v1267_v26, %v1271_v33  ;;  %v1284_v57 = vmax.f32 %v1268_v27, %v1272_v32  ;;  %v1285_v59 = vmax.f32 %v1269_v31, %v1273_v36  ;;  %v1286_v17 = vmax.f32 %v1270_v30, %v1274_v22 }
 0x1eb   :  { %v1287_v3 = vmax.f32 %v1275_v40, %v1279_v52  ;;  %v1288_v50 = vmax.f32 %v1276_v48, %v1280_v37  ;;  %v1289_v56 = vmax.f32 %v1277_v38, %v1281_v55  ;;  %v1290_v49 = vmax.f32 %v1278_v46, %v1282_v44 }
 0x1ed   :  { %v1291_v6 = vmax.f32 %v1283_v42, %v1287_v3  ;;  %v1292_v53 = vmax.f32 %v1284_v57, %v1288_v50  ;;  %v1293_v14 = vmax.f32 %v1285_v59, %v1289_v56  ;;  %v1294_v39 = vmax.f32 %v1286_v17, %v1290_v49 }
 0x1ef   :  { %v1848_v61 = vpack.c.bf16 %v1292_v53, %v1291_v6  ;;  %v1853_v12 = vpack.c.bf16 %v1294_v39, %v1293_v14 }
 0x1f1   :  { %1849 = vst [vmem:[%s2620_s4] sm:$0xff] %v1848_v61  }
 0x1f2   :  { %1855 = vst [vmem:[%s2620_s4 + $0x8] sm:$0xff] %v1853_v12  }

// kernel: qzd_forward.5
= control target key start
LH: loop header
LB: loop body
LE: loop exit
PB: predicated region body
PF: predicated region fallthrough
CT: control target
= control target key end

     0   :  { %16 = vsyncpa [#allocation3], 0  ;;  %s6512_s0 = inlined_call_operand.vmem [shape: bf16[2,1024], index: 0, kind: input, shape index: {}]   ;;  %s6513_s1 = inlined_call_operand.vmem [shape: bf16[1024,512], index: 1, kind: input, shape index: {}]   ;;  %s6514_s2 = inlined_call_operand.vmem [shape: f32[1,512], index: 2, kind: input, shape index: {}]   ;;  %s6515_s3 = inlined_call_operand.vmem [shape: bf16[512,256], index: 3, kind: input, shape index: {}]   ;;  %s6516_s4 = inlined_call_operand.vmem [shape: f32[1,256], index: 4, kind: input, shape index: {}]   ;;  %s6517_s5 = inlined_call_operand.vmem [shape: bf16[128,128], index: 5, kind: input, shape index: {}]   ;;  %s6518_s6 = inlined_call_operand.vmem [shape: f32[1,128], index: 6, kind: input, shape index: {}]   ;;  %s6519_s7 = inlined_call_operand.vmem [shape: f32[2,128], index: 7, kind: input, shape index: {}]   ;;  %s6520_s8 = inlined_call_operand.hbm [shape: f32[2,128], index: 8, kind: output, shape index: {0}]   ;;  %s6521_s9 = inlined_call_operand.hbm [shape: f32[2,128], index: 9, kind: output, shape index: {1}]   ;;  %s6522_s10 = inlined_call_operand.hbm [shape: f32[2,128], index: 10, kind: output, shape index: {2}]  }
   0x1   :  { %v2783_v0 = vld [vmem:[%s6513_s1 + $0xe0] sm:$0xf]  ;;  %v4011_v1 = vld [vmem:[%s6513_s1 + $0xec] sm:$0xf0] }
   0x2   :  { %v2911_v2 = vld [vmem:[%s6513_s1 + $0x1e0] sm:$0xf]  ;;  %v2784_v3 = vor.u32 %v4011_v1, %v2783_v0  ;;  %v4043_v4 = vld [vmem:[%s6513_s1 + $0x1ec] sm:$0xf0] }
   0x3   :  { %v3039_v5 = vld [vmem:[%s6513_s1 + $0x2e0] sm:$0xf]  ;;  %v4075_v6 = vld [vmem:[%s6513_s1 + $0x2ec] sm:$0xf0]  ;;  %v2912_v7 = vor.u32 %v4043_v4, %v2911_v2 }
   0x4   :  { %v3040_v8 = vor.u32 %v4075_v6, %v3039_v5  ;;  %v3167_v9 = vld [vmem:[%s6513_s1 + $0x3e0] sm:$0xf]  ;;  %v4107_v10 = vld [vmem:[%s6513_s1 + $0x3ec] sm:$0xf0]  ;;  %1599 = vmatpush.bf16.msra.mxu0 %v2784_v3 }
   0x5   :  { %v2767_v11 = vld [vmem:[%s6513_s1 + $0xc0] sm:$0xf]  ;;  %v3168_v12 = vor.u32 %v4107_v10, %v3167_v9  ;;  %v4007_v13 = vld [vmem:[%s6513_s1 + $0xcc] sm:$0xf0]  ;;  %1612 = vmatpush.bf16.msra.mxu1 %v2912_v7 }
   0x6   :  { %v2895_v14 = vld [vmem:[%s6513_s1 + $0x1c0] sm:$0xf]  ;;  %v4039_v15 = vld [vmem:[%s6513_s1 + $0x1cc] sm:$0xf0]  ;;  %1625 = vmatpush.bf16.msra.mxu2 %v3040_v8  ;;  %v2768_v16 = vor.u32 %v4007_v13, %v2767_v11 }
   0x7   :  { %v2896_v17 = vor.u32 %v4039_v15, %v2895_v14  ;;  %v3023_v18 = vld [vmem:[%s6513_s1 + $0x2c0] sm:$0xf]  ;;  %v4071_v19 = vld [vmem:[%s6513_s1 + $0x2cc] sm:$0xf0]  ;;  %1638 = vmatpush.bf16.msra.mxu3 %v3168_v12 }
   0x8   :  { %v3151_v20 = vld [vmem:[%s6513_s1 + $0x3c0] sm:$0xf]  ;;  %v3024_v21 = vor.u32 %v4071_v19, %v3023_v18  ;;  %v4103_v22 = vld [vmem:[%s6513_s1 + $0x3cc] sm:$0xf0]  ;;  %1600 = vmatpush.bf16.msra.mxu0 %v2768_v16 }
   0x9   :  { %v2751_v23 = vld [vmem:[%s6513_s1 + $0xa0] sm:$0xf]  ;;  %v4003_v24 = vld [vmem:[%s6513_s1 + $0xac] sm:$0xf0]  ;;  %v3152_v25 = vor.u32 %v4103_v22, %v3151_v20  ;;  %1613 = vmatpush.bf16.msra.mxu1 %v2896_v17 }
   0xa   :  { %v2879_v26 = vld [vmem:[%s6513_s1 + $0x1a0] sm:$0xf]  ;;  %v4035_v27 = vld [vmem:[%s6513_s1 + $0x1ac] sm:$0xf0]  ;;  %v2752_v29 = vor.u32 %v4003_v24, %v2751_v23  ;;  %1626 = vmatpush.bf16.msra.mxu2 %v3024_v21 }
   0xb   :  { %v3007_v28 = vld [vmem:[%s6513_s1 + $0x2a0] sm:$0xf]  ;;  %v4067_v30 = vld [vmem:[%s6513_s1 + $0x2ac] sm:$0xf0]  ;;  %v2880_v33 = vor.u32 %v4035_v27, %v2879_v26  ;;  %1639 = vmatpush.bf16.msra.mxu3 %v3152_v25 }
   0xc   :  { %v3135_v31 = vld [vmem:[%s6513_s1 + $0x3a0] sm:$0xf]  ;;  %v4099_v32 = vld [vmem:[%s6513_s1 + $0x3ac] sm:$0xf0]  ;;  %v3008_v34 = vor.u32 %v4067_v30, %v3007_v28  ;;  %1601 = vmatpush.bf16.msra.mxu0 %v2752_v29 }
   0xd   :  { %v2735_v35 = vld [vmem:[%s6513_s1 + $0x80] sm:$0xf]  ;;  %v3999_v36 = vld [vmem:[%s6513_s1 + $0x8c] sm:$0xf0]  ;;  %v3136_v38 = vor.u32 %v4099_v32, %v3135_v31  ;;  %1614 = vmatpush.bf16.msra.mxu1 %v2880_v33 }
   0xe   :  { %v2863_v37 = vld [vmem:[%s6513_s1 + $0x180] sm:$0xf]  ;;  %v4031_v39 = vld [vmem:[%s6513_s1 + $0x18c] sm:$0xf0]  ;;  %v2736_v44 = vor.u32 %v3999_v36, %v2735_v35  ;;  %1627 = vmatpush.bf16.msra.mxu2 %v3008_v34 }
   0xf   :  { %v2991_v40 = vld [vmem:[%s6513_s1 + $0x280] sm:$0xf]  ;;  %v4063_v41 = vld [vmem:[%s6513_s1 + $0x28c] sm:$0xf0]  ;;  %v2864_v45 = vor.u32 %v4031_v39, %v2863_v37  ;;  %1640 = vmatpush.bf16.msra.mxu3 %v3136_v38 }
  0x10   :  { %v3119_v42 = vld [vmem:[%s6513_s1 + $0x380] sm:$0xf]  ;;  %v4095_v43 = vld [vmem:[%s6513_s1 + $0x38c] sm:$0xf0]  ;;  %v2992_v46 = vor.u32 %v4063_v41, %v2991_v40  ;;  %1602 = vmatpush.bf16.msra.mxu0 %v2736_v44 }
  0x11   :  { %v2719_v47 = vld [vmem:[%s6513_s1 + $0x60] sm:$0xf]  ;;  %v3995_v48 = vld [vmem:[%s6513_s1 + $0x6c] sm:$0xf0]  ;;  %v3120_v50 = vor.u32 %v4095_v43, %v3119_v42  ;;  %1615 = vmatpush.bf16.msra.mxu1 %v2864_v45 }
  0x12   :  { %v2847_v49 = vld [vmem:[%s6513_s1 + $0x160] sm:$0xf]  ;;  %v4027_v51 = vld [vmem:[%s6513_s1 + $0x16c] sm:$0xf0]  ;;  %v2720_v56 = vor.u32 %v3995_v48, %v2719_v47  ;;  %1628 = vmatpush.bf16.msra.mxu2 %v2992_v46 }
  0x13   :  { %v2975_v52 = vld [vmem:[%s6513_s1 + $0x260] sm:$0xf]  ;;  %v4059_v53 = vld [vmem:[%s6513_s1 + $0x26c] sm:$0xf0]  ;;  %v2848_v57 = vor.u32 %v4027_v51, %v2847_v49  ;;  %1641 = vmatpush.bf16.msra.mxu3 %v3120_v50 }
  0x14   :  { %v3103_v54 = vld [vmem:[%s6513_s1 + $0x360] sm:$0xf]  ;;  %v4091_v55 = vld [vmem:[%s6513_s1 + $0x36c] sm:$0xf0]  ;;  %v2976_v58 = vor.u32 %v4059_v53, %v2975_v52  ;;  %1603 = vmatpush.bf16.msra.mxu0 %v2720_v56 }
  0x15   :  { %v2703_v59 = vld [vmem:[%s6513_s1 + $0x40] sm:$0xf]  ;;  %v3991_v60 = vld [vmem:[%s6513_s1 + $0x4c] sm:$0xf0]  ;;  %v3104_v62 = vor.u32 %v4091_v55, %v3103_v54  ;;  %1616 = vmatpush.bf16.msra.mxu1 %v2848_v57 }
  0x16   :  { %v2831_v61 = vld [vmem:[%s6513_s1 + $0x140] sm:$0xf]  ;;  %v4023_v63 = vld [vmem:[%s6513_s1 + $0x14c] sm:$0xf0]  ;;  %v2704_v4 = vor.u32 %v3991_v60, %v2703_v59  ;;  %1629 = vmatpush.bf16.msra.mxu2 %v2976_v58 }
  0x17   :  { %v2959_v0 = vld [vmem:[%s6513_s1 + $0x240] sm:$0xf]  ;;  %v4055_v1 = vld [vmem:[%s6513_s1 + $0x24c] sm:$0xf0]  ;;  %v2832_v5 = vor.u32 %v4023_v63, %v2831_v61  ;;  %1642 = vmatpush.bf16.msra.mxu3 %v3104_v62 }
  0x18   :  { %v3087_v2 = vld [vmem:[%s6513_s1 + $0x340] sm:$0xf]  ;;  %v4087_v3 = vld [vmem:[%s6513_s1 + $0x34c] sm:$0xf0]  ;;  %v2960_v6 = vor.u32 %v4055_v1, %v2959_v0  ;;  %1604 = vmatpush.bf16.msra.mxu0 %v2704_v4 }
  0x19   :  { %v2687_v7 = vld [vmem:[%s6513_s1 + $0x20] sm:$0xf]  ;;  %v3987_v8 = vld [vmem:[%s6513_s1 + $0x2c] sm:$0xf0]  ;;  %v3088_v10 = vor.u32 %v4087_v3, %v3087_v2  ;;  %1617 = vmatpush.bf16.msra.mxu1 %v2832_v5 }
  0x1a   :  { %v2815_v9 = vld [vmem:[%s6513_s1 + $0x120] sm:$0xf]  ;;  %v4019_v11 = vld [vmem:[%s6513_s1 + $0x12c] sm:$0xf0]  ;;  %v2688_v16 = vor.u32 %v3987_v8, %v2687_v7  ;;  %1630 = vmatpush.bf16.msra.mxu2 %v2960_v6 }
  0x1b   :  { %v2943_v12 = vld [vmem:[%s6513_s1 + $0x220] sm:$0xf]  ;;  %v4051_v13 = vld [vmem:[%s6513_s1 + $0x22c] sm:$0xf0]  ;;  %v2816_v19 = vor.u32 %v4019_v11, %v2815_v9  ;;  %1643 = vmatpush.bf16.msra.mxu3 %v3088_v10 }
  0x1c   :  { %v3071_v14 = vld [vmem:[%s6513_s1 + $0x320] sm:$0xf]  ;;  %v4083_v15 = vld [vmem:[%s6513_s1 + $0x32c] sm:$0xf0]  ;;  %v2944_v20 = vor.u32 %v4051_v13, %v2943_v12  ;;  %1605 = vmatpush.bf16.msra.mxu0 %v2688_v16 }
  0x1d   :  { %v2671_v17 = vld [vmem:[%s6513_s1] sm:$0xf]  ;;  %v3983_v18 = vld [vmem:[%s6513_s1 + $0xc] sm:$0xf0]  ;;  %v3072_v24 = vor.u32 %v4083_v15, %v3071_v14  ;;  %1618 = vmatpush.bf16.msra.mxu1 %v2816_v19 }
  0x1e   :  { %v2799_v21 = vld [vmem:[%s6513_s1 + $0x100] sm:$0xf]  ;;  %v4015_v22 = vld [vmem:[%s6513_s1 + $0x10c] sm:$0xf0]  ;;  %v2672_v31 = vor.u32 %v3983_v18, %v2671_v17  ;;  %1631 = vmatpush.bf16.msra.mxu2 %v2944_v20 }
  0x1f   :  { %v2927_v23 = vld [vmem:[%s6513_s1 + $0x200] sm:$0xf]  ;;  %v4047_v25 = vld [vmem:[%s6513_s1 + $0x20c] sm:$0xf0]  ;;  %v2800_v35 = vor.u32 %v4015_v22, %v2799_v21  ;;  %1644 = vmatpush.bf16.msra.mxu3 %v3072_v24 }
  0x20   :  { %v3055_v26 = vld [vmem:[%s6513_s1 + $0x300] sm:$0xf]  ;;  %v4079_v27 = vld [vmem:[%s6513_s1 + $0x30c] sm:$0xf0]  ;;  %v2928_v36 = vor.u32 %v4047_v25, %v2927_v23  ;;  %1606 = vmatpush.bf16.msra.mxu0 %v2672_v31 }
  0x21   :  { %v3295_v28 = vld [vmem:[%s6513_s1 + $0x4e0] sm:$0xf]  ;;  %v4139_v29 = vld [vmem:[%s6513_s1 + $0x4ec] sm:$0xf0]  ;;  %v3056_v39 = vor.u32 %v4079_v27, %v3055_v26  ;;  %1619 = vmatpush.bf16.msra.mxu1 %v2800_v35 }
  0x22   :  { %v3423_v30 = vld [vmem:[%s6513_s1 + $0x5e0] sm:$0xf]  ;;  %v4171_v32 = vld [vmem:[%s6513_s1 + $0x5ec] sm:$0xf0]  ;;  %v3296_v40 = vor.u32 %v4139_v29, %v3295_v28  ;;  %1632 = vmatpush.bf16.msra.mxu2 %v2928_v36 }
  0x23   :  { %v3551_v33 = vld [vmem:[%s6513_s1 + $0x6e0] sm:$0xf]  ;;  %v4203_v34 = vld [vmem:[%s6513_s1 + $0x6ec] sm:$0xf0]  ;;  %v3424_v41 = vor.u32 %v4171_v32, %v3423_v30  ;;  %1645 = vmatpush.bf16.msra.mxu3 %v3056_v39 }
  0x24   :  { %v3679_v37 = vld [vmem:[%s6513_s1 + $0x7e0] sm:$0xf]  ;;  %v4235_v38 = vld [vmem:[%s6513_s1 + $0x7ec] sm:$0xf0]  ;;  %v3552_v42 = vor.u32 %v4203_v34, %v3551_v33  ;;  %1651 = vmatpush.bf16.msrb.mxu0 %v3296_v40 }
  0x25   :  { %v3279_v43 = vld [vmem:[%s6513_s1 + $0x4c0] sm:$0xf]  ;;  %v4135_v44 = vld [vmem:[%s6513_s1 + $0x4cc] sm:$0xf0]  ;;  %v3680_v46 = vor.u32 %v4235_v38, %v3679_v37  ;;  %1664 = vmatpush.bf16.msrb.mxu1 %v3424_v41 }
  0x26   :  { %v3407_v45 = vld [vmem:[%s6513_s1 + $0x5c0] sm:$0xf]  ;;  %v4167_v47 = vld [vmem:[%s6513_s1 + $0x5cc] sm:$0xf0]  ;;  %v3280_v52 = vor.u32 %v4135_v44, %v3279_v43  ;;  %1677 = vmatpush.bf16.msrb.mxu2 %v3552_v42 }
  0x27   :  { %v3535_v48 = vld [vmem:[%s6513_s1 + $0x6c0] sm:$0xf]  ;;  %v4199_v49 = vld [vmem:[%s6513_s1 + $0x6cc] sm:$0xf0]  ;;  %v3408_v53 = vor.u32 %v4167_v47, %v3407_v45  ;;  %1690 = vmatpush.bf16.msrb.mxu3 %v3680_v46 }
  0x28   :  { %v3663_v50 = vld [vmem:[%s6513_s1 + $0x7c0] sm:$0xf]  ;;  %v4231_v51 = vld [vmem:[%s6513_s1 + $0x7cc] sm:$0xf0]  ;;  %v3536_v54 = vor.u32 %v4199_v49, %v3535_v48  ;;  %1652 = vmatpush.bf16.msrb.mxu0 %v3280_v52 }
  0x29   :  { %v3263_v55 = vld [vmem:[%s6513_s1 + $0x4a0] sm:$0xf]  ;;  %v4131_v56 = vld [vmem:[%s6513_s1 + $0x4ac] sm:$0xf0]  ;;  %v3664_v58 = vor.u32 %v4231_v51, %v3663_v50  ;;  %1665 = vmatpush.bf16.msrb.mxu1 %v3408_v53 }
  0x2a   :  { %v3391_v57 = vld [vmem:[%s6513_s1 + $0x5a0] sm:$0xf]  ;;  %v4163_v59 = vld [vmem:[%s6513_s1 + $0x5ac] sm:$0xf0]  ;;  %v3264_v0 = vor.u32 %v4131_v56, %v3263_v55  ;;  %1678 = vmatpush.bf16.msrb.mxu2 %v3536_v54 }
  0x2b   :  { %v3519_v60 = vld [vmem:[%s6513_s1 + $0x6a0] sm:$0xf]  ;;  %v4195_v61 = vld [vmem:[%s6513_s1 + $0x6ac] sm:$0xf0]  ;;  %v3392_v3 = vor.u32 %v4163_v59, %v3391_v57  ;;  %1691 = vmatpush.bf16.msrb.mxu3 %v3664_v58 }
  0x2c   :  { %v3647_v62 = vld [vmem:[%s6513_s1 + $0x7a0] sm:$0xf]  ;;  %v4227_v63 = vld [vmem:[%s6513_s1 + $0x7ac] sm:$0xf0]  ;;  %v3520_v4 = vor.u32 %v4195_v61, %v3519_v60  ;;  %1653 = vmatpush.bf16.msrb.mxu0 %v3264_v0 }
  0x2d   :  { %v3247_v1 = vld [vmem:[%s6513_s1 + $0x480] sm:$0xf]  ;;  %v4127_v5 = vld [vmem:[%s6513_s1 + $0x48c] sm:$0xf0]  ;;  %v3648_v7 = vor.u32 %v4227_v63, %v3647_v62  ;;  %1666 = vmatpush.bf16.msrb.mxu1 %v3392_v3  ;;  %v4041_v3 = vld [vmem:[%s6513_s1 + $0x1e4] sm:$0xf] }
  0x2e   :  { %v34_v2 = vld [vmem:[%s6512_s0] sm:$0xff]  ;;  %v4159_v8 = vld [vmem:[%s6513_s1 + $0x58c] sm:$0xf0]  ;;  %v3248_v13 = vor.u32 %v4127_v5, %v3247_v1  ;;  %1679 = vmatpush.bf16.msrb.mxu2 %v3520_v4  ;;  %v2913_v5 = vld [vmem:[%s6513_s1 + $0x1f0] sm:$0xf0] }
  0x2f   :  { %v3375_v6 = vld [vmem:[%s6513_s1 + $0x580] sm:$0xf]  ;;  %302 = vst [vmem:[#allocation1] ss:$9 sm:$0xff] %v34_v2  ;;  %v4191_v10 = vld [vmem:[%s6513_s1 + $0x68c] sm:$0xf0]  ;;  %1692 = vmatpush.bf16.msrb.mxu3 %v3648_v7 }
  0x30   :  { %v3503_v9 = vld [vmem:[%s6513_s1 + $0x680] sm:$0xf]  ;;  %v4223_v12 = vld [vmem:[%s6513_s1 + $0x78c] sm:$0xf0]  ;;  %v3376_v14 = vor.u32 %v4159_v8, %v3375_v6  ;;  %1654 = vmatpush.bf16.msrb.mxu0 %v3248_v13  ;;  %v4009_v1 = vld [vmem:[%s6513_s1 + $0xe4] sm:$0xf] }
  0x31   :  { %v3631_v11 = vld [vmem:[%s6513_s1 + $0x780] sm:$0xf]  ;;  %v3504_v15 = vor.u32 %v4191_v10, %v3503_v9  ;;  %v4123_v17 = vld [vmem:[%s6513_s1 + $0x46c] sm:$0xf0]  ;;  %v2785_v2 = vld [vmem:[%s6513_s1 + $0xf0] sm:$0xf0] }
  0x32   :  { %v3231_v16 = vld [vmem:[%s6513_s1 + $0x460] sm:$0xf]  ;;  %v3632_v19 = vor.u32 %v4223_v12, %v3631_v11  ;;  %v4155_v20 = vld [vmem:[%s6513_s1 + $0x56c] sm:$0xf0]  ;;  %1667 = vmatpush.bf16.msrb.mxu1 %v3376_v14  ;;  %v4073_v6 = vld [vmem:[%s6513_s1 + $0x2e4] sm:$0xf]  ;;  %v2788_v13 = vor.u32 %v4009_v1, %v2785_v2  ;;  %v2916_v14 = vor.u32 %v4041_v3, %v2913_v5 }
  0x33   :  { %v3359_v18 = vld [vmem:[%s6513_s1 + $0x560] sm:$0xf]  ;;  %v4187_v22 = vld [vmem:[%s6513_s1 + $0x66c] sm:$0xf0]  ;;  %v3232_v26 = vor.u32 %v4123_v17, %v3231_v16  ;;  %1680 = vmatpush.bf16.msrb.mxu2 %v3504_v15  ;;  %v3041_v7 = vld [vmem:[%s6513_s1 + $0x2f0] sm:$0xf0] }
  0x34   :  { %v3487_v21 = vld [vmem:[%s6513_s1 + $0x660] sm:$0xf]  ;;  %v4219_v24 = vld [vmem:[%s6513_s1 + $0x76c] sm:$0xf0]  ;;  %v3360_v30 = vor.u32 %v4155_v20, %v3359_v18  ;;  %1693 = vmatpush.bf16.msrb.mxu3 %v3632_v19  ;;  %v4105_v10 = vld [vmem:[%s6513_s1 + $0x3e4] sm:$0xf]  ;;  %v3044_v15 = vor.u32 %v4073_v6, %v3041_v7 }
  0x35   :  { %v3615_v23 = vld [vmem:[%s6513_s1 + $0x760] sm:$0xf]  ;;  %v3488_v31 = vor.u32 %v4187_v22, %v3487_v21  ;;  %v4119_v32 = vld [vmem:[%s6513_s1 + $0x44c] sm:$0xf0]  ;;  %1655 = vmatpush.bf16.msrb.mxu0 %v3232_v26  ;;  %v3169_v11 = vld [vmem:[%s6513_s1 + $0x3f0] sm:$0xf0] }
  0x36   :  { %v3215_v25 = vld [vmem:[%s6513_s1 + $0x440] sm:$0xf]  ;;  %v4776_v27 = vld [vmem:[#allocation1 + $0x12] sm:$0xff]  ;;  %v4788_v34 = vld [vmem:[#allocation1 + $0x9] sm:$0xff]  ;;  %v3616_v35 = vor.u32 %v4219_v24, %v3615_v23  ;;  %1668 = vmatpush.bf16.msrb.mxu1 %v3360_v30  ;;  %v3172_v19 = vor.u32 %v4105_v10, %v3169_v11 }
  0x37   :  { %v4778_v28 = vld [vmem:[#allocation1] sm:$0xff]  ;;  %v4151_v36 = vld [vmem:[%s6513_s1 + $0x54c] sm:$0xf0]  ;;  %1633 = vmatmul.bf16.vlgmr.msra.gmra.mxu2 %v4776_v27  ;;  %v3216_v41 = vor.u32 %v4119_v32, %v3215_v25  ;;  %1620 = vmatmul.bf16.vlgmr.msra.gmra.mxu1 %v4788_v34  ;;  %v2769_v17 = vld [vmem:[%s6513_s1 + $0xd0] sm:$0xf0] }
  0x38   :  { %v4780_v29 = vld [vmem:[#allocation1 + $0x1b] sm:$0xff]  ;;  %v4183_v38 = vld [vmem:[%s6513_s1 + $0x64c] sm:$0xf0]  ;;  %1607 = vmatmul.bf16.vlgmr.msra.gmra.mxu0 %v4778_v28  ;;  %1681 = vmatpush.bf16.msrb.mxu2 %v3488_v31  ;;  %v4005_v16 = vld [vmem:[%s6513_s1 + $0xc4] sm:$0xf] }
  0x39   :  { %v3343_v33 = vld [vmem:[%s6513_s1 + $0x540] sm:$0xf]  ;;  %v4215_v40 = vld [vmem:[%s6513_s1 + $0x74c] sm:$0xf0]  ;;  %1646 = vmatmul.bf16.vlgmr.msra.gmra.mxu3 %v4780_v29  ;;  %1656 = vmatpush.bf16.msrb.mxu0 %v3216_v41  ;;  %v4037_v18 = vld [vmem:[%s6513_s1 + $0x1c4] sm:$0xf]  ;;  %v2772_v26 = vor.u32 %v4005_v16, %v2769_v17 }
  0x3a   :  { %v3471_v37 = vld [vmem:[%s6513_s1 + $0x640] sm:$0xf]  ;;  %v3344_v42 = vor.u32 %v4151_v36, %v3343_v33  ;;  %v4115_v45 = vld [vmem:[%s6513_s1 + $0x42c] sm:$0xf0]  ;;  %1694 = vmatpush.bf16.msrb.mxu3 %v3616_v35  ;;  %v2897_v20 = vld [vmem:[%s6513_s1 + $0x1d0] sm:$0xf0] }
  0x3b   :  { %v3599_v39 = vld [vmem:[%s6513_s1 + $0x740] sm:$0xf]  ;;  %v3472_v43 = vor.u32 %v4183_v38, %v3471_v37  ;;  %v4147_v48 = vld [vmem:[%s6513_s1 + $0x52c] sm:$0xf0]  ;;  %v4069_v21 = vld [vmem:[%s6513_s1 + $0x2c4] sm:$0xf]  ;;  %v2900_v33 = vor.u32 %v4037_v18, %v2897_v20 }
  0x3c   :  { %v3199_v44 = vld [vmem:[%s6513_s1 + $0x420] sm:$0xf]  ;;  %v3600_v47 = vor.u32 %v4215_v40, %v3599_v39  ;;  %v4179_v50 = vld [vmem:[%s6513_s1 + $0x62c] sm:$0xf0]  ;;  %1669 = vmatpush.bf16.msrb.mxu1 %v3344_v42  ;;  %v3025_v22 = vld [vmem:[%s6513_s1 + $0x2d0] sm:$0xf0] }
  0x3d   :  { %v3327_v46 = vld [vmem:[%s6513_s1 + $0x520] sm:$0xf]  ;;  %v4211_v52 = vld [vmem:[%s6513_s1 + $0x72c] sm:$0xf0]  ;;  %v3200_v53 = vor.u32 %v4115_v45, %v3199_v44  ;;  %1682 = vmatpush.bf16.msrb.mxu2 %v3472_v43  ;;  %v4101_v23 = vld [vmem:[%s6513_s1 + $0x3c4] sm:$0xf]  ;;  %v3028_v35 = vor.u32 %v4069_v21, %v3025_v22 }
  0x3e   :  { %v3455_v49 = vld [vmem:[%s6513_s1 + $0x620] sm:$0xf]  ;;  %v4111_v55 = vld [vmem:[%s6513_s1 + $0x40c] sm:$0xf0]  ;;  %v3328_v56 = vor.u32 %v4147_v48, %v3327_v46  ;;  %1695 = vmatpush.bf16.msrb.mxu3 %v3600_v47  ;;  %v3153_v24 = vld [vmem:[%s6513_s1 + $0x3d0] sm:$0xf0] }
  0x3f   :  { %v3583_v51 = vld [vmem:[%s6513_s1 + $0x720] sm:$0xf]  ;;  %v3456_v57 = vor.u32 %v4179_v50, %v3455_v49  ;;  %v4143_v59 = vld [vmem:[%s6513_s1 + $0x50c] sm:$0xf0]  ;;  %1657 = vmatpush.bf16.msrb.mxu0 %v3200_v53  ;;  %v4905_v25 = vld [vmem:[#allocation1 + $0x36] sm:$0xff]  ;;  %v3156_v39 = vor.u32 %v4101_v23, %v3153_v24 }
  0x40   :  { %v3183_v54 = vld [vmem:[%s6513_s1 + $0x400] sm:$0xf]  ;;  %v3584_v61 = vor.u32 %v4211_v52, %v3583_v51  ;;  %v4175_v62 = vld [vmem:[%s6513_s1 + $0x60c] sm:$0xf0]  ;;  %1670 = vmatpush.bf16.msrb.mxu1 %v3328_v56  ;;  %v4001_v30 = vld [vmem:[%s6513_s1 + $0xa4] sm:$0xf] }
  0x41   :  { %v3311_v58 = vld [vmem:[%s6513_s1 + $0x500] sm:$0xf]  ;;  %v4207_v0 = vld [vmem:[%s6513_s1 + $0x70c] sm:$0xf0]  ;;  %v3184_v4 = vor.u32 %v4111_v55, %v3183_v54  ;;  %1683 = vmatpush.bf16.msrb.mxu2 %v3456_v57  ;;  %v4910_v31 = vld [vmem:[#allocation1 + $0x24] sm:$0xff] }
  0x42   :  { %v3439_v60 = vld [vmem:[%s6513_s1 + $0x600] sm:$0xf]  ;;  %v3312_v8 = vor.u32 %v4143_v59, %v3311_v58  ;;  %1696 = vmatpush.bf16.msrb.mxu3 %v3584_v61  ;;  %v2753_v36 = vld [vmem:[%s6513_s1 + $0xb0] sm:$0xf0]  ;;  %v4033_v37 = vld [vmem:[%s6513_s1 + $0x1a4] sm:$0xf] }
  0x43   :  { %v3567_v63 = vld [vmem:[%s6513_s1 + $0x700] sm:$0xf]  ;;  %v3440_v9 = vor.u32 %v4175_v62, %v3439_v60  ;;  %1658 = vmatpush.bf16.msrb.mxu0 %v3184_v4  ;;  %v4920_v38 = vld [vmem:[#allocation1 + $0x2d] sm:$0xff]  ;;  %v4065_v41 = vld [vmem:[%s6513_s1 + $0x2a4] sm:$0xf]  ;;  %v2756_v45 = vor.u32 %v4001_v30, %v2753_v36 }
  0x44   :  { %v3568_v12 = vor.u32 %v4207_v0, %v3567_v63  ;;  %1671 = vmatpush.bf16.msrb.mxu1 %v3312_v8  ;;  %v4912_v32 = vld [vmem:[#allocation1 + $0x3f] sm:$0xff]  ;;  %v2881_v40 = vld [vmem:[%s6513_s1 + $0x1b0] sm:$0xf0] }
  0x45   :  { %1684 = vmatpush.bf16.msrb.mxu2 %v3440_v9  ;;  %v3009_v42 = vld [vmem:[%s6513_s1 + $0x2b0] sm:$0xf0]  ;;  %v4097_v43 = vld [vmem:[%s6513_s1 + $0x3a4] sm:$0xf]  ;;  %v2884_v46 = vor.u32 %v4033_v37, %v2881_v40 }
  0x46   :  { %1697 = vmatpush.bf16.msrb.mxu3 %v3568_v12  ;;  %v3137_v44 = vld [vmem:[%s6513_s1 + $0x3b0] sm:$0xf0]  ;;  %v3012_v47 = vor.u32 %v4065_v41, %v3009_v42  ;;  %v3997_v48 = vld [vmem:[%s6513_s1 + $0x84] sm:$0xf] }
  0x47   :  { %1703 = vmatpush.bf16.msra.mxu0 %v2788_v13  ;;  %1672 = vmatmul.bf16.vlgmr.msrb.gmra.mxu1 %v4920_v38  ;;  %v2737_v49 = vld [vmem:[%s6513_s1 + $0x90] sm:$0xf0]  ;;  %v4029_v50 = vld [vmem:[%s6513_s1 + $0x184] sm:$0xf]  ;;  %v3140_v51 = vor.u32 %v4097_v43, %v3137_v44 }
  0x48   :  { %1716 = vmatpush.bf16.msra.mxu1 %v2916_v14  ;;  %1685 = vmatmul.bf16.vlgmr.msrb.gmra.mxu2 %v4905_v25  ;;  %v2865_v52 = vld [vmem:[%s6513_s1 + $0x190] sm:$0xf0]  ;;  %v4061_v53 = vld [vmem:[%s6513_s1 + $0x284] sm:$0xf]  ;;  %v2740_v57 = vor.u32 %v3997_v48, %v2737_v49 }
  0x49   :  { %1729 = vmatpush.bf16.msra.mxu2 %v3044_v15  ;;  %1659 = vmatmul.bf16.vlgmr.msrb.gmra.mxu0 %v4910_v31  ;;  %v2993_v54 = vld [vmem:[%s6513_s1 + $0x290] sm:$0xf0]  ;;  %v4093_v55 = vld [vmem:[%s6513_s1 + $0x384] sm:$0xf]  ;;  %v2868_v58 = vor.u32 %v4029_v50, %v2865_v52 }
  0x4a   :  { %1742 = vmatpush.bf16.msra.mxu3 %v3172_v19  ;;  %v3121_v56 = vld [vmem:[%s6513_s1 + $0x390] sm:$0xf0]  ;;  %v2996_v59 = vor.u32 %v4061_v53, %v2993_v54  ;;  %v3993_v60 = vld [vmem:[%s6513_s1 + $0x64] sm:$0xf] }
  0x4b   :  { %1698 = vmatmul.bf16.vlgmr.msrb.gmra.mxu3 %v4912_v32  ;;  %1704 = vmatpush.bf16.msra.mxu0 %v2772_v26  ;;  %v2721_v61 = vld [vmem:[%s6513_s1 + $0x70] sm:$0xf0]  ;;  %v4025_v62 = vld [vmem:[%s6513_s1 + $0x164] sm:$0xf]  ;;  %v3124_v63 = vor.u32 %v4093_v55, %v3121_v56 }
  0x4c   :  { %1717 = vmatpush.bf16.msra.mxu1 %v2900_v33  ;;  %v2849_v0 = vld [vmem:[%s6513_s1 + $0x170] sm:$0xf0]  ;;  %v4057_v1 = vld [vmem:[%s6513_s1 + $0x264] sm:$0xf]  ;;  %v2724_v5 = vor.u32 %v3993_v60, %v2721_v61 }
  0x4d   :  { %1730 = vmatpush.bf16.msra.mxu2 %v3028_v35  ;;  %v2977_v2 = vld [vmem:[%s6513_s1 + $0x270] sm:$0xf0]  ;;  %v4089_v3 = vld [vmem:[%s6513_s1 + $0x364] sm:$0xf]  ;;  %v2852_v6 = vor.u32 %v4025_v62, %v2849_v0 }
  0x4e   :  { %1743 = vmatpush.bf16.msra.mxu3 %v3156_v39  ;;  %v3105_v4 = vld [vmem:[%s6513_s1 + $0x370] sm:$0xf0]  ;;  %v2980_v7 = vor.u32 %v4057_v1, %v2977_v2  ;;  %v3989_v8 = vld [vmem:[%s6513_s1 + $0x44] sm:$0xf] }
  0x4f   :  { %1705 = vmatpush.bf16.msra.mxu0 %v2756_v45  ;;  %v2705_v9 = vld [vmem:[%s6513_s1 + $0x50] sm:$0xf0]  ;;  %v4021_v10 = vld [vmem:[%s6513_s1 + $0x144] sm:$0xf]  ;;  %v3108_v11 = vor.u32 %v4089_v3, %v3105_v4 }
  0x50   :  { %1718 = vmatpush.bf16.msra.mxu1 %v2884_v46  ;;  %v2833_v12 = vld [vmem:[%s6513_s1 + $0x150] sm:$0xf0]  ;;  %v4053_v13 = vld [vmem:[%s6513_s1 + $0x244] sm:$0xf]  ;;  %v2708_v17 = vor.u32 %v3989_v8, %v2705_v9 }
  0x51   :  { %1731 = vmatpush.bf16.msra.mxu2 %v3012_v47  ;;  %v2961_v14 = vld [vmem:[%s6513_s1 + $0x250] sm:$0xf0]  ;;  %v4085_v15 = vld [vmem:[%s6513_s1 + $0x344] sm:$0xf]  ;;  %v2836_v18 = vor.u32 %v4021_v10, %v2833_v12 }
  0x52   :  { %1744 = vmatpush.bf16.msra.mxu3 %v3140_v51  ;;  %v3089_v16 = vld [vmem:[%s6513_s1 + $0x350] sm:$0xf0]  ;;  %v2964_v19 = vor.u32 %v4053_v13, %v2961_v14  ;;  %v3985_v20 = vld [vmem:[%s6513_s1 + $0x24] sm:$0xf] }
  0x53   :  { %1706 = vmatpush.bf16.msra.mxu0 %v2740_v57  ;;  %v2689_v21 = vld [vmem:[%s6513_s1 + $0x30] sm:$0xf0]  ;;  %v4017_v22 = vld [vmem:[%s6513_s1 + $0x124] sm:$0xf]  ;;  %v3092_v23 = vor.u32 %v4085_v15, %v3089_v16 }
  0x54   :  { %1719 = vmatpush.bf16.msra.mxu1 %v2868_v58  ;;  %v2817_v24 = vld [vmem:[%s6513_s1 + $0x130] sm:$0xf0]  ;;  %v4049_v26 = vld [vmem:[%s6513_s1 + $0x224] sm:$0xf]  ;;  %v2692_v37 = vor.u32 %v3985_v20, %v2689_v21 }
  0x55   :  { %1732 = vmatpush.bf16.msra.mxu2 %v2996_v59  ;;  %v2945_v30 = vld [vmem:[%s6513_s1 + $0x230] sm:$0xf0]  ;;  %v4081_v33 = vld [vmem:[%s6513_s1 + $0x324] sm:$0xf]  ;;  %v2820_v42 = vor.u32 %v4017_v22, %v2817_v24 }
  0x56   :  { %1745 = vmatpush.bf16.msra.mxu3 %v3124_v63  ;;  %v3073_v35 = vld [vmem:[%s6513_s1 + $0x330] sm:$0xf0]  ;;  %v3981_v36 = vld [vmem:[%s6513_s1 + $0x4] sm:$0xf]  ;;  %v2948_v43 = vor.u32 %v4049_v26, %v2945_v30 }
  0x57   :  { %1707 = vmatpush.bf16.msra.mxu0 %v2724_v5  ;;  %v2673_v39 = vld [vmem:[%s6513_s1 + $0x10] sm:$0xf0]  ;;  %v4013_v40 = vld [vmem:[%s6513_s1 + $0x104] sm:$0xf]  ;;  %v3076_v47 = vor.u32 %v4081_v33, %v3073_v35 }
  0x58   :  { %1720 = vmatpush.bf16.msra.mxu1 %v2852_v6  ;;  %v2801_v41 = vld [vmem:[%s6513_s1 + $0x110] sm:$0xf0]  ;;  %v4045_v44 = vld [vmem:[%s6513_s1 + $0x204] sm:$0xf] }
  0x59   :  { %1733 = vmatpush.bf16.msra.mxu2 %v2980_v7  ;;  %v2929_v45 = vld [vmem:[%s6513_s1 + $0x210] sm:$0xf0]  ;;  %v4077_v46 = vld [vmem:[%s6513_s1 + $0x304] sm:$0xf] }
  0x5a   :  { %1746 = vmatpush.bf16.msra.mxu3 %v3108_v11  ;;  %v3057_v48 = vld [vmem:[%s6513_s1 + $0x310] sm:$0xf0]  ;;  %v4137_v49 = vld [vmem:[%s6513_s1 + $0x4e4] sm:$0xf] }
  0x5b   :  { %1708 = vmatpush.bf16.msra.mxu0 %v2708_v17  ;;  %v3297_v50 = vld [vmem:[%s6513_s1 + $0x4f0] sm:$0xf0]  ;;  %v4169_v51 = vld [vmem:[%s6513_s1 + $0x5e4] sm:$0xf] }
  0x5c   :  { %1721 = vmatpush.bf16.msra.mxu1 %v2836_v18 }
  0x5d   :  { %1734 = vmatpush.bf16.msra.mxu2 %v2964_v19 }
  0x5e   :  { %1747 = vmatpush.bf16.msra.mxu3 %v3092_v23 }
  0x5f   :  { %17 = vsyncpa [#allocation5], 0  ;;  %1709 = vmatpush.bf16.msra.mxu0 %v2692_v37  ;;  %v2676_v52 = vor.u32 %v3981_v36, %v2673_v39  ;;  %v3425_v53 = vld [vmem:[%s6513_s1 + $0x5f0] sm:$0xf0]  ;;  %v4201_v54 = vld [vmem:[%s6513_s1 + $0x6e4] sm:$0xf]  ;;  %v2804_v56 = vor.u32 %v4013_v40, %v2801_v41  ;;  %v2932_v57 = vor.u32 %v4045_v44, %v2929_v45  ;;  %v3060_v60 = vor.u32 %v4077_v46, %v3057_v48 }
  0x60   :  { %v3553_v55 = vld [vmem:[%s6513_s1 + $0x6f0] sm:$0xf0]  ;;  %1722 = vmatpush.bf16.msra.mxu1 %v2820_v42  ;;  %v4233_v58 = vld [vmem:[%s6513_s1 + $0x7e4] sm:$0xf]  ;;  %v3300_v61 = vor.u32 %v4137_v49, %v3297_v50  ;;  %v3428_v62 = vor.u32 %v4169_v51, %v3425_v53  ;;  %s4400_s28 = smov [#allocation4]   ;;  %s2629_s11 = sshll.u32 %s6520_s8, 4  ;;  %s2630_s11 = int_to_ptr.hbm [resolvable:$true] %s2629_s11 }
  0x61   :  { %1735 = vmatpush.bf16.msra.mxu2 %v2948_v43  ;;  %v3681_v59 = vld [vmem:[%s6513_s1 + $0x7f0] sm:$0xf0]  ;;  %v3556_v63 = vor.u32 %v4201_v54, %v3553_v55  ;;  %v4133_v0 = vld [vmem:[%s6513_s1 + $0x4c4] sm:$0xf]  ;;  %s2638_s29 = sshll.u32 %s4400_s28, 4  ;;  %s4402_s14 = smov [#allocation6]   ;;  %s2639_s29 = int_to_ptr.vmem [resolvable:$true] %s2638_s29 }
  0x62   :  { %1748 = vmatpush.bf16.msra.mxu3 %v3076_v47  ;;  %v3281_v1 = vld [vmem:[%s6513_s1 + $0x4d0] sm:$0xf0]  ;;  %v4165_v2 = vld [vmem:[%s6513_s1 + $0x5c4] sm:$0xf]  ;;  %v3684_v3 = vor.u32 %v4233_v58, %v3681_v59  ;;  %s2651_s17 = sshll.u32 %s6522_s10, 4  ;;  %s2652_s17 = int_to_ptr.hbm [resolvable:$true] %s2651_s17 }
  0x63   :  { %1710 = vmatpush.bf16.msra.mxu0 %v2676_v52  ;;  %v3409_v4 = vld [vmem:[%s6513_s1 + $0x5d0] sm:$0xf0]  ;;  %v4197_v5 = vld [vmem:[%s6513_s1 + $0x6c4] sm:$0xf]  ;;  %v3284_v9 = vor.u32 %v4133_v0, %v3281_v1 }
  0x64   :  { %v3537_v6 = vld [vmem:[%s6513_s1 + $0x6d0] sm:$0xf0]  ;;  %1723 = vmatpush.bf16.msra.mxu1 %v2804_v56  ;;  %v4229_v7 = vld [vmem:[%s6513_s1 + $0x7c4] sm:$0xf]  ;;  %v3412_v10 = vor.u32 %v4165_v2, %v3409_v4 }
  0x65   :  { %1736 = vmatpush.bf16.msra.mxu2 %v2932_v57  ;;  %v3665_v8 = vld [vmem:[%s6513_s1 + $0x7d0] sm:$0xf0]  ;;  %v3540_v11 = vor.u32 %v4197_v5, %v3537_v6  ;;  %v4129_v12 = vld [vmem:[%s6513_s1 + $0x4a4] sm:$0xf] }
  0x66   :  { %1749 = vmatpush.bf16.msra.mxu3 %v3060_v60  ;;  %v3265_v13 = vld [vmem:[%s6513_s1 + $0x4b0] sm:$0xf0]  ;;  %v4161_v14 = vld [vmem:[%s6513_s1 + $0x5a4] sm:$0xf]  ;;  %v3668_v15 = vor.u32 %v4229_v7, %v3665_v8  ;;  %1711 = vmatmul.bf16.vlgmr.msra.gmra.mxu0 %v4778_v28 }
  0x67   :  { %1755 = vmatpush.bf16.msrb.mxu0 %v3300_v61  ;;  %v3393_v16 = vld [vmem:[%s6513_s1 + $0x5b0] sm:$0xf0]  ;;  %v4193_v17 = vld [vmem:[%s6513_s1 + $0x6a4] sm:$0xf]  ;;  %v3268_v21 = vor.u32 %v4129_v12, %v3265_v13  ;;  %1724 = vmatmul.bf16.vlgmr.msra.gmra.mxu1 %v4788_v34 }
  0x68   :  { %1768 = vmatpush.bf16.msrb.mxu1 %v3428_v62  ;;  %v3521_v18 = vld [vmem:[%s6513_s1 + $0x6b0] sm:$0xf0]  ;;  %1737 = vmatmul.bf16.vlgmr.msra.gmra.mxu2 %v4776_v27  ;;  %v4225_v19 = vld [vmem:[%s6513_s1 + $0x7a4] sm:$0xf]  ;;  %v3396_v22 = vor.u32 %v4161_v14, %v3393_v16 }
  0x69   :  { %1781 = vmatpush.bf16.msrb.mxu2 %v3556_v63  ;;  %v3649_v20 = vld [vmem:[%s6513_s1 + $0x7b0] sm:$0xf0]  ;;  %1750 = vmatmul.bf16.vlgmr.msra.gmra.mxu3 %v4780_v29  ;;  %v3524_v23 = vor.u32 %v4193_v17, %v3521_v18  ;;  %v4125_v24 = vld [vmem:[%s6513_s1 + $0x484] sm:$0xf] }
  0x6a   :  { %1794 = vmatpush.bf16.msrb.mxu3 %v3684_v3  ;;  %v3249_v26 = vld [vmem:[%s6513_s1 + $0x490] sm:$0xf0]  ;;  %v4157_v30 = vld [vmem:[%s6513_s1 + $0x584] sm:$0xf]  ;;  %v3652_v33 = vor.u32 %v4225_v19, %v3649_v20 }
  0x6b   :  { %1756 = vmatpush.bf16.msrb.mxu0 %v3284_v9  ;;  %v3377_v35 = vld [vmem:[%s6513_s1 + $0x590] sm:$0xf0]  ;;  %v4189_v36 = vld [vmem:[%s6513_s1 + $0x684] sm:$0xf]  ;;  %v3252_v41 = vor.u32 %v4125_v24, %v3249_v26  ;;  %v2791_v26 = vld [vmem:[%s6513_s1 + $0xe8] sm:$0xf] }
  0x6c   :  { %1769 = vmatpush.bf16.msrb.mxu1 %v3412_v10  ;;  %v3505_v37 = vld [vmem:[%s6513_s1 + $0x690] sm:$0xf0]  ;;  %v4221_v39 = vld [vmem:[%s6513_s1 + $0x784] sm:$0xf]  ;;  %v3380_v42 = vor.u32 %v4157_v30, %v3377_v35  ;;  %v4012_v30 = vld [vmem:[%s6513_s1 + $0xf4] sm:$0xf0] }
  0x6d   :  { %1782 = vmatpush.bf16.msrb.mxu2 %v3540_v11  ;;  %v3633_v40 = vld [vmem:[%s6513_s1 + $0x790] sm:$0xf0]  ;;  %v3508_v43 = vor.u32 %v4189_v36, %v3505_v37  ;;  %v4121_v44 = vld [vmem:[%s6513_s1 + $0x464] sm:$0xf]  ;;  %v4044_v36 = vld [vmem:[%s6513_s1 + $0x1f4] sm:$0xf0] }
  0x6e   :  { %1795 = vmatpush.bf16.msrb.mxu3 %v3668_v15  ;;  %v3233_v45 = vld [vmem:[%s6513_s1 + $0x470] sm:$0xf0]  ;;  %v4153_v46 = vld [vmem:[%s6513_s1 + $0x564] sm:$0xf]  ;;  %v3636_v47 = vor.u32 %v4221_v39, %v3633_v40  ;;  %v3047_v37 = vld [vmem:[%s6513_s1 + $0x2e8] sm:$0xf] }
  0x6f   :  { %1757 = vmatpush.bf16.msrb.mxu0 %v3268_v21  ;;  %v3361_v48 = vld [vmem:[%s6513_s1 + $0x570] sm:$0xf0]  ;;  %v4185_v49 = vld [vmem:[%s6513_s1 + $0x664] sm:$0xf]  ;;  %v3236_v53 = vor.u32 %v4121_v44, %v3233_v45  ;;  %v4076_v39 = vld [vmem:[%s6513_s1 + $0x2f4] sm:$0xf0]  ;;  %v2792_v45 = vor.u32 %v4012_v30, %v2791_v26 }
  0x70   :  { %1770 = vmatpush.bf16.msrb.mxu1 %v3396_v22  ;;  %v3489_v50 = vld [vmem:[%s6513_s1 + $0x670] sm:$0xf0]  ;;  %v4217_v51 = vld [vmem:[%s6513_s1 + $0x764] sm:$0xf]  ;;  %v3364_v54 = vor.u32 %v4153_v46, %v3361_v48  ;;  %v2775_v48 = vld [vmem:[%s6513_s1 + $0xc8] sm:$0xf] }
  0x71   :  { %1783 = vmatpush.bf16.msrb.mxu2 %v3524_v23  ;;  %v3617_v52 = vld [vmem:[%s6513_s1 + $0x770] sm:$0xf0]  ;;  %v3492_v55 = vor.u32 %v4185_v49, %v3489_v50  ;;  %v4117_v56 = vld [vmem:[%s6513_s1 + $0x444] sm:$0xf]  ;;  %v4008_v49 = vld [vmem:[%s6513_s1 + $0xd4] sm:$0xf0] }
  0x72   :  { %1796 = vmatpush.bf16.msrb.mxu3 %v3652_v33  ;;  %v3217_v57 = vld [vmem:[%s6513_s1 + $0x450] sm:$0xf0]  ;;  %v4149_v58 = vld [vmem:[%s6513_s1 + $0x544] sm:$0xf]  ;;  %v3620_v59 = vor.u32 %v4217_v51, %v3617_v52  ;;  %v2919_v33 = vld [vmem:[%s6513_s1 + $0x1e8] sm:$0xf] }
  0x73   :  { %1758 = vmatpush.bf16.msrb.mxu0 %v3252_v41  ;;  %v3345_v60 = vld [vmem:[%s6513_s1 + $0x550] sm:$0xf0]  ;;  %v4181_v61 = vld [vmem:[%s6513_s1 + $0x644] sm:$0xf]  ;;  %v3220_v1 = vor.u32 %v4117_v56, %v3217_v57  ;;  %v2920_v46 = vor.u32 %v4044_v36, %v2919_v33  ;;  %v2903_v50 = vld [vmem:[%s6513_s1 + $0x1c8] sm:$0xf]  ;;  %v2776_v57 = vor.u32 %v4008_v49, %v2775_v48 }
  0x74   :  { %1771 = vmatpush.bf16.msrb.mxu1 %v3380_v42  ;;  %v3473_v62 = vld [vmem:[%s6513_s1 + $0x650] sm:$0xf0]  ;;  %v4213_v63 = vld [vmem:[%s6513_s1 + $0x744] sm:$0xf]  ;;  %v3348_v2 = vor.u32 %v4149_v58, %v3345_v60  ;;  %v3175_v42 = vld [vmem:[%s6513_s1 + $0x3e8] sm:$0xf] }
  0x75   :  { %1784 = vmatpush.bf16.msrb.mxu2 %v3508_v43  ;;  %v3601_v0 = vld [vmem:[%s6513_s1 + $0x750] sm:$0xf0]  ;;  %v3476_v3 = vor.u32 %v4181_v61, %v3473_v62  ;;  %v4113_v4 = vld [vmem:[%s6513_s1 + $0x424] sm:$0xf]  ;;  %v4108_v43 = vld [vmem:[%s6513_s1 + $0x3f4] sm:$0xf0] }
  0x76   :  { %1797 = vmatpush.bf16.msrb.mxu3 %v3636_v47  ;;  %v3201_v5 = vld [vmem:[%s6513_s1 + $0x430] sm:$0xf0]  ;;  %v4145_v6 = vld [vmem:[%s6513_s1 + $0x524] sm:$0xf]  ;;  %v3604_v7 = vor.u32 %v4213_v63, %v3601_v0  ;;  %v3048_v47 = vor.u32 %v4076_v39, %v3047_v37  ;;  %v3176_v51 = vor.u32 %v4108_v43, %v3175_v42  ;;  %v4040_v52 = vld [vmem:[%s6513_s1 + $0x1d4] sm:$0xf0] }
  0x77   :  { %1759 = vmatpush.bf16.msrb.mxu0 %v3236_v53  ;;  %v3329_v8 = vld [vmem:[%s6513_s1 + $0x530] sm:$0xf0]  ;;  %v4177_v9 = vld [vmem:[%s6513_s1 + $0x624] sm:$0xf]  ;;  %v3204_v13 = vor.u32 %v4113_v4, %v3201_v5  ;;  %v3031_v53 = vld [vmem:[%s6513_s1 + $0x2c8] sm:$0xf]  ;;  %v2904_v58 = vor.u32 %v4040_v52, %v2903_v50 }
  0x78   :  { %1772 = vmatpush.bf16.msrb.mxu1 %v3364_v54  ;;  %v3457_v10 = vld [vmem:[%s6513_s1 + $0x630] sm:$0xf0]  ;;  %v4209_v11 = vld [vmem:[%s6513_s1 + $0x724] sm:$0xf]  ;;  %v3332_v16 = vor.u32 %v4145_v6, %v3329_v8  ;;  %v4072_v54 = vld [vmem:[%s6513_s1 + $0x2d4] sm:$0xf0] }
  0x79   :  { %1785 = vmatpush.bf16.msrb.mxu2 %v3492_v55  ;;  %v3585_v12 = vld [vmem:[%s6513_s1 + $0x730] sm:$0xf0]  ;;  %v4109_v14 = vld [vmem:[%s6513_s1 + $0x404] sm:$0xf]  ;;  %v3460_v17 = vor.u32 %v4177_v9, %v3457_v10  ;;  %v3159_v55 = vld [vmem:[%s6513_s1 + $0x3c8] sm:$0xf] }
  0x7a   :  { %1798 = vmatpush.bf16.msrb.mxu3 %v3620_v59  ;;  %v3185_v15 = vld [vmem:[%s6513_s1 + $0x410] sm:$0xf0]  ;;  %v4141_v18 = vld [vmem:[%s6513_s1 + $0x504] sm:$0xf]  ;;  %v3588_v21 = vor.u32 %v4209_v11, %v3585_v12  ;;  %v4104_v56 = vld [vmem:[%s6513_s1 + $0x3d4] sm:$0xf0]  ;;  %v3032_v59 = vor.u32 %v4072_v54, %v3031_v53 }
  0x7b   :  { %1760 = vmatpush.bf16.msrb.mxu0 %v3220_v1  ;;  %v3313_v19 = vld [vmem:[%s6513_s1 + $0x510] sm:$0xf0]  ;;  %v4173_v20 = vld [vmem:[%s6513_s1 + $0x604] sm:$0xf]  ;;  %v3188_v35 = vor.u32 %v4109_v14, %v3185_v15  ;;  %v2759_v60 = vld [vmem:[%s6513_s1 + $0xa8] sm:$0xf]  ;;  %v3160_v63 = vor.u32 %v4104_v56, %v3159_v55 }
  0x7c   :  { %1773 = vmatpush.bf16.msrb.mxu1 %v3348_v2  ;;  %v3441_v22 = vld [vmem:[%s6513_s1 + $0x610] sm:$0xf0]  ;;  %v4205_v23 = vld [vmem:[%s6513_s1 + $0x704] sm:$0xf]  ;;  %v3316_v40 = vor.u32 %v4141_v18, %v3313_v19  ;;  %v4004_v61 = vld [vmem:[%s6513_s1 + $0xb4] sm:$0xf0] }
  0x7d   :  { %1786 = vmatpush.bf16.msrb.mxu2 %v3476_v3  ;;  %v3569_v24 = vld [vmem:[%s6513_s1 + $0x710] sm:$0xf0]  ;;  %v3444_v41 = vor.u32 %v4173_v20, %v3441_v22  ;;  %v2887_v62 = vld [vmem:[%s6513_s1 + $0x1a8] sm:$0xf]  ;;  %v4036_v0 = vld [vmem:[%s6513_s1 + $0x1b4] sm:$0xf0]  ;;  %v2760_v4 = vor.u32 %v4004_v61, %v2759_v60 }
  0x7e   :  { %1799 = vmatpush.bf16.msrb.mxu3 %v3604_v7  ;;  %v3572_v44 = vor.u32 %v4205_v23, %v3569_v24  ;;  %v3015_v1 = vld [vmem:[%s6513_s1 + $0x2a8] sm:$0xf]  ;;  %v4068_v2 = vld [vmem:[%s6513_s1 + $0x2b4] sm:$0xf0]  ;;  %v2888_v5 = vor.u32 %v4036_v0, %v2887_v62 }
  0x7f   :  { %1761 = vmatpush.bf16.msrb.mxu0 %v3204_v13  ;;  %v3143_v3 = vld [vmem:[%s6513_s1 + $0x3a8] sm:$0xf]  ;;  %v3016_v6 = vor.u32 %v4068_v2, %v3015_v1  ;;  %v4000_v8 = vld [vmem:[%s6513_s1 + $0x94] sm:$0xf0] }
  0x80   :  { %1774 = vmatpush.bf16.msrb.mxu1 %v3332_v16  ;;  %v2743_v7 = vld [vmem:[%s6513_s1 + $0x88] sm:$0xf]  ;;  %v4064_v10 = vld [vmem:[%s6513_s1 + $0x294] sm:$0xf0] }
  0x81   :  { %1787 = vmatpush.bf16.msrb.mxu2 %v3460_v17  ;;  %v2999_v9 = vld [vmem:[%s6513_s1 + $0x288] sm:$0xf]  ;;  %v4096_v12 = vld [vmem:[%s6513_s1 + $0x394] sm:$0xf0]  ;;  %v2744_v13 = vor.u32 %v4000_v8, %v2743_v7 }
  0x82   :  { %1800 = vmatpush.bf16.msrb.mxu3 %v3588_v21  ;;  %v3127_v11 = vld [vmem:[%s6513_s1 + $0x388] sm:$0xf]  ;;  %v3000_v15 = vor.u32 %v4064_v10, %v2999_v9  ;;  %v3996_v17 = vld [vmem:[%s6513_s1 + $0x74] sm:$0xf0] }
  0x83   :  { %1762 = vmatpush.bf16.msrb.mxu0 %v3188_v35  ;;  %v2727_v16 = vld [vmem:[%s6513_s1 + $0x68] sm:$0xf]  ;;  %v3128_v19 = vor.u32 %v4096_v12, %v3127_v11  ;;  %v4028_v20 = vld [vmem:[%s6513_s1 + $0x174] sm:$0xf0] }
  0x84   :  { %1775 = vmatpush.bf16.msrb.mxu1 %v3316_v40  ;;  %v2855_v18 = vld [vmem:[%s6513_s1 + $0x168] sm:$0xf]  ;;  %v4060_v22 = vld [vmem:[%s6513_s1 + $0x274] sm:$0xf0]  ;;  %v2728_v26 = vor.u32 %v3996_v17, %v2727_v16 }
  0x85   :  { %1788 = vmatpush.bf16.msrb.mxu2 %v3444_v41  ;;  %v2983_v21 = vld [vmem:[%s6513_s1 + $0x268] sm:$0xf]  ;;  %v4092_v24 = vld [vmem:[%s6513_s1 + $0x374] sm:$0xf0]  ;;  %v2856_v30 = vor.u32 %v4028_v20, %v2855_v18 }
  0x86   :  { %1801 = vmatpush.bf16.msrb.mxu3 %v3572_v44  ;;  %1763 = vmatmul.bf16.vlgmr.msrb.gmra.mxu0 %v4910_v31  ;;  %v2871_v31 = vld [vmem:[%s6513_s1 + $0x188] sm:$0xf]  ;;  %v2984_v33 = vor.u32 %v4060_v22, %v2983_v21  ;;  %v3992_v36 = vld [vmem:[%s6513_s1 + $0x54] sm:$0xf0] }
  0x87   :  { %1807 = vmatpush.bf16.msra.mxu0 %v2792_v45  ;;  %1776 = vmatmul.bf16.vlgmr.msrb.gmra.mxu1 %v4920_v38  ;;  %v4032_v38 = vld [vmem:[%s6513_s1 + $0x194] sm:$0xf0]  ;;  %v3111_v23 = vld [vmem:[%s6513_s1 + $0x368] sm:$0xf] }
  0x88   :  { %1820 = vmatpush.bf16.msra.mxu1 %v2920_v46  ;;  %1789 = vmatmul.bf16.vlgmr.msrb.gmra.mxu2 %v4905_v25  ;;  %v4100_v25 = vld [vmem:[%s6513_s1 + $0x3b4] sm:$0xf0]  ;;  %v2872_v14 = vor.u32 %v4032_v38, %v2871_v31  ;;  %v2711_v35 = vld [vmem:[%s6513_s1 + $0x48] sm:$0xf]  ;;  %v3112_v39 = vor.u32 %v4092_v24, %v3111_v23 }
  0x89   :  { %1833 = vmatpush.bf16.msra.mxu2 %v3048_v47  ;;  %1802 = vmatmul.bf16.vlgmr.msrb.gmra.mxu3 %v4912_v32  ;;  %v3144_v32 = vor.u32 %v4100_v25, %v3143_v3  ;;  %v2839_v37 = vld [vmem:[%s6513_s1 + $0x148] sm:$0xf]  ;;  %v4024_v40 = vld [vmem:[%s6513_s1 + $0x154] sm:$0xf0]  ;;  %v2712_v45 = vor.u32 %v3992_v36, %v2711_v35 }
  0x8a   :  { %1846 = vmatpush.bf16.msra.mxu3 %v3176_v51  ;;  %v2967_v41 = vld [vmem:[%s6513_s1 + $0x248] sm:$0xf]  ;;  %v4056_v42 = vld [vmem:[%s6513_s1 + $0x254] sm:$0xf0]  ;;  %v2840_v46 = vor.u32 %v4024_v40, %v2839_v37 }
  0x8b   :  { %1808 = vmatpush.bf16.msra.mxu0 %v2776_v57  ;;  %v3095_v43 = vld [vmem:[%s6513_s1 + $0x348] sm:$0xf]  ;;  %v4088_v44 = vld [vmem:[%s6513_s1 + $0x354] sm:$0xf0]  ;;  %v2968_v47 = vor.u32 %v4056_v42, %v2967_v41 }
  0x8c   :  { %1821 = vmatpush.bf16.msra.mxu1 %v2904_v58  ;;  %v2695_v48 = vld [vmem:[%s6513_s1 + $0x28] sm:$0xf]  ;;  %v3988_v49 = vld [vmem:[%s6513_s1 + $0x34] sm:$0xf0]  ;;  %v3096_v51 = vor.u32 %v4088_v44, %v3095_v43 }
  0x8d   :  { %1834 = vmatpush.bf16.msra.mxu2 %v3032_v59  ;;  %v2823_v50 = vld [vmem:[%s6513_s1 + $0x128] sm:$0xf]  ;;  %v4020_v52 = vld [vmem:[%s6513_s1 + $0x134] sm:$0xf0]  ;;  %v2696_v57 = vor.u32 %v3988_v49, %v2695_v48 }
  0x8e   :  { %1847 = vmatpush.bf16.msra.mxu3 %v3160_v63  ;;  %v2951_v53 = vld [vmem:[%s6513_s1 + $0x228] sm:$0xf]  ;;  %v4052_v54 = vld [vmem:[%s6513_s1 + $0x234] sm:$0xf0]  ;;  %v2824_v60 = vor.u32 %v4020_v52, %v2823_v50 }
  0x8f   :  { %1809 = vmatpush.bf16.msra.mxu0 %v2760_v4  ;;  %v3079_v55 = vld [vmem:[%s6513_s1 + $0x328] sm:$0xf]  ;;  %v4084_v56 = vld [vmem:[%s6513_s1 + $0x334] sm:$0xf0]  ;;  %v2952_v61 = vor.u32 %v4052_v54, %v2951_v53 }
  0x90   :  { %1822 = vmatpush.bf16.msra.mxu1 %v2888_v5  ;;  %v2679_v58 = vld [vmem:[%s6513_s1 + $0x8] sm:$0xf]  ;;  %v3984_v59 = vld [vmem:[%s6513_s1 + $0x14] sm:$0xf0]  ;;  %v3080_v1 = vor.u32 %v4084_v56, %v3079_v55 }
  0x91   :  { %1835 = vmatpush.bf16.msra.mxu2 %v3016_v6  ;;  %v2807_v62 = vld [vmem:[%s6513_s1 + $0x108] sm:$0xf]  ;;  %v4016_v63 = vld [vmem:[%s6513_s1 + $0x114] sm:$0xf0]  ;;  %v2680_v7 = vor.u32 %v3984_v59, %v2679_v58 }
  0x92   :  { %1848 = vmatpush.bf16.msra.mxu3 %v3144_v32  ;;  %v2935_v0 = vld [vmem:[%s6513_s1 + $0x208] sm:$0xf]  ;;  %v4048_v2 = vld [vmem:[%s6513_s1 + $0x214] sm:$0xf0]  ;;  %v2808_v38 = vor.u32 %v4016_v63, %v2807_v62 }
  0x93   :  { %1810 = vmatpush.bf16.msra.mxu0 %v2744_v13  ;;  %v3063_v3 = vld [vmem:[%s6513_s1 + $0x308] sm:$0xf]  ;;  %v4080_v25 = vld [vmem:[%s6513_s1 + $0x314] sm:$0xf0]  ;;  %v2936_v9 = vor.u32 %v4048_v2, %v2935_v0 }
  0x94   :  { %1823 = vmatpush.bf16.msra.mxu1 %v2872_v14  ;;  %v3303_v4 = vld [vmem:[%s6513_s1 + $0x4e8] sm:$0xf]  ;;  %v4140_v5 = vld [vmem:[%s6513_s1 + $0x4f4] sm:$0xf0]  ;;  %v3064_v12 = vor.u32 %v4080_v25, %v3063_v3 }
  0x95   :  { %1836 = vmatpush.bf16.msra.mxu2 %v3000_v15  ;;  %v3431_v6 = vld [vmem:[%s6513_s1 + $0x5e8] sm:$0xf]  ;;  %v4172_v8 = vld [vmem:[%s6513_s1 + $0x5f4] sm:$0xf0]  ;;  %v3304_v13 = vor.u32 %v4140_v5, %v3303_v4 }
  0x96   :  { %1849 = vmatpush.bf16.msra.mxu3 %v3128_v19  ;;  %v3559_v31 = vld [vmem:[%s6513_s1 + $0x6e8] sm:$0xf]  ;;  %v4204_v32 = vld [vmem:[%s6513_s1 + $0x6f4] sm:$0xf0]  ;;  %v3432_v14 = vor.u32 %v4172_v8, %v3431_v6 }
  0x97   :  { %1811 = vmatpush.bf16.msra.mxu0 %v2728_v26  ;;  %v3687_v10 = vld [vmem:[%s6513_s1 + $0x7e8] sm:$0xf]  ;;  %v4236_v11 = vld [vmem:[%s6513_s1 + $0x7f4] sm:$0xf0]  ;;  %v3560_v15 = vor.u32 %v4204_v32, %v3559_v31  ;;  %v5598_v32 = vld [vmem:[%s6514_s2] sm:$0xf] }
  0x98   :  { %1824 = vmatpush.bf16.msra.mxu1 %v2856_v30  ;;  %v3287_v16 = vld [vmem:[%s6513_s1 + $0x4c8] sm:$0xf]  ;;  %v4136_v17 = vld [vmem:[%s6513_s1 + $0x4d4] sm:$0xf0]  ;;  %v3688_v19 = vor.u32 %v4236_v11, %v3687_v10 }
  0x99   :  { %1837 = vmatpush.bf16.msra.mxu2 %v2984_v33  ;;  %v3415_v18 = vld [vmem:[%s6513_s1 + $0x5c8] sm:$0xf]  ;;  %v4168_v20 = vld [vmem:[%s6513_s1 + $0x5d4] sm:$0xf0]  ;;  %v3288_v26 = vor.u32 %v4136_v17, %v3287_v16  ;;  %v293_v16 = vperm.slane %v5598_v32, 0 }
  0x9a   :  { %1850 = vmatpush.bf16.msra.mxu3 %v3112_v39  ;;  %v3543_v21 = vld [vmem:[%s6513_s1 + $0x6c8] sm:$0xf]  ;;  %v4200_v22 = vld [vmem:[%s6513_s1 + $0x6d4] sm:$0xf0]  ;;  %v3416_v30 = vor.u32 %v4168_v20, %v3415_v18 }
  0x9b   :  { %1812 = vmatpush.bf16.msra.mxu0 %v2712_v45  ;;  %v3671_v23 = vld [vmem:[%s6513_s1 + $0x7c8] sm:$0xf]  ;;  %v4232_v24 = vld [vmem:[%s6513_s1 + $0x7d4] sm:$0xf0]  ;;  %v3544_v33 = vor.u32 %v4200_v22, %v3543_v21 }
  0x9c   :  { %1825 = vmatpush.bf16.msra.mxu1 %v2840_v46  ;;  %v3271_v35 = vld [vmem:[%s6513_s1 + $0x4a8] sm:$0xf]  ;;  %v4132_v36 = vld [vmem:[%s6513_s1 + $0x4b4] sm:$0xf0]  ;;  %v3672_v39 = vor.u32 %v4232_v24, %v3671_v23 }
  0x9d   :  { %1838 = vmatpush.bf16.msra.mxu2 %v2968_v47  ;;  %v3399_v37 = vld [vmem:[%s6513_s1 + $0x5a8] sm:$0xf]  ;;  %v4164_v40 = vld [vmem:[%s6513_s1 + $0x5b4] sm:$0xf0]  ;;  %v3272_v45 = vor.u32 %v4132_v36, %v3271_v35 }
  0x9e   :  { %1851 = vmatpush.bf16.msra.mxu3 %v3096_v51  ;;  %v3527_v41 = vld [vmem:[%s6513_s1 + $0x6a8] sm:$0xf]  ;;  %v4196_v42 = vld [vmem:[%s6513_s1 + $0x6b4] sm:$0xf0]  ;;  %v3400_v46 = vor.u32 %v4164_v40, %v3399_v37 }
  0x9f   :  { %1813 = vmatpush.bf16.msra.mxu0 %v2696_v57  ;;  %v3655_v43 = vld [vmem:[%s6513_s1 + $0x7a8] sm:$0xf]  ;;  %v4228_v44 = vld [vmem:[%s6513_s1 + $0x7b4] sm:$0xf0] }
  0xa0   :  { %1826 = vmatpush.bf16.msra.mxu1 %v2824_v60  ;;  %v3255_v47 = vld [vmem:[%s6513_s1 + $0x488] sm:$0xf]  ;;  %v4128_v48 = vld [vmem:[%s6513_s1 + $0x494] sm:$0xf0] }
  0xa1   :  { %1839 = vmatpush.bf16.msra.mxu2 %v2952_v61  ;;  %v3511_v49 = vld [vmem:[%s6513_s1 + $0x688] sm:$0xf]  ;;  %v4192_v50 = vld [vmem:[%s6513_s1 + $0x694] sm:$0xf0]  ;;  %v3256_v53 = vor.u32 %v4128_v48, %v3255_v47  ;;  %v4042_v47 = vld [vmem:[%s6513_s1 + $0x1ec] sm:$0xf] }
  0xa2   :  { %1852 = vmatpush.bf16.msra.mxu3 %v3080_v1  ;;  %v3639_v51 = vld [vmem:[%s6513_s1 + $0x788] sm:$0xf]  ;;  %v4224_v52 = vld [vmem:[%s6513_s1 + $0x794] sm:$0xf0]  ;;  %v3512_v55 = vor.u32 %v4192_v50, %v3511_v49  ;;  %v3049_v49 = vld [vmem:[%s6513_s1 + $0x2f8] sm:$0xf0] }
  0xa3   :  { %1814 = vmatpush.bf16.msra.mxu0 %v2680_v7  ;;  %v3239_v56 = vld [vmem:[%s6513_s1 + $0x468] sm:$0xf]  ;;  %v4124_v57 = vld [vmem:[%s6513_s1 + $0x474] sm:$0xf0]  ;;  %v3640_v59 = vor.u32 %v4224_v52, %v3639_v51  ;;  %v4106_v52 = vld [vmem:[%s6513_s1 + $0x3ec] sm:$0xf] }
  0xa4   :  { %1827 = vmatpush.bf16.msra.mxu1 %v2808_v38  ;;  %v3367_v58 = vld [vmem:[%s6513_s1 + $0x568] sm:$0xf]  ;;  %v4156_v60 = vld [vmem:[%s6513_s1 + $0x574] sm:$0xf0]  ;;  %v3240_v1 = vor.u32 %v4124_v57, %v3239_v56 }
  0xa5   :  { %1840 = vmatpush.bf16.msra.mxu2 %v2936_v9  ;;  %v3495_v61 = vld [vmem:[%s6513_s1 + $0x668] sm:$0xf]  ;;  %v4188_v62 = vld [vmem:[%s6513_s1 + $0x674] sm:$0xf0]  ;;  %v3368_v3 = vor.u32 %v4156_v60, %v3367_v58 }
  0xa6   :  { %1853 = vmatpush.bf16.msra.mxu3 %v3064_v12  ;;  %1815 = vmatmul.bf16.vlgmr.msra.gmra.mxu0 %v4778_v28  ;;  %v3383_v28 = vld [vmem:[%s6513_s1 + $0x588] sm:$0xf]  ;;  %v4220_v0 = vld [vmem:[%s6513_s1 + $0x774] sm:$0xf0]  ;;  %v3496_v25 = vor.u32 %v4188_v62, %v3495_v61  ;;  %v4006_v61 = vld [vmem:[%s6513_s1 + $0xcc] sm:$0xf] }
  0xa7   :  { %1859 = vmatpush.bf16.msrb.mxu0 %v3304_v13  ;;  %1828 = vmatmul.bf16.vlgmr.msra.gmra.mxu1 %v4788_v34  ;;  %v4160_v34 = vld [vmem:[%s6513_s1 + $0x594] sm:$0xf0]  ;;  %v3623_v63 = vld [vmem:[%s6513_s1 + $0x768] sm:$0xf]  ;;  %v2777_v62 = vld [vmem:[%s6513_s1 + $0xd8] sm:$0xf0] }
  0xa8   :  { %1872 = vmatpush.bf16.msrb.mxu1 %v3432_v14  ;;  %1841 = vmatmul.bf16.vlgmr.msra.gmra.mxu2 %v4776_v27  ;;  %v3528_v27 = vor.u32 %v4196_v42, %v3527_v41  ;;  %v3384_v54 = vor.u32 %v4160_v34, %v3383_v28  ;;  %v3223_v2 = vld [vmem:[%s6513_s1 + $0x448] sm:$0xf]  ;;  %v4120_v4 = vld [vmem:[%s6513_s1 + $0x454] sm:$0xf0]  ;;  %v3624_v7 = vor.u32 %v4220_v0, %v3623_v63  ;;  %v4074_v34 = vld [vmem:[%s6513_s1 + $0x2ec] sm:$0xf] }
  0xa9   :  { %1885 = vmatpush.bf16.msrb.mxu2 %v3560_v15  ;;  %1854 = vmatmul.bf16.vlgmr.msra.gmra.mxu3 %v4780_v29  ;;  %v3656_v29 = vor.u32 %v4228_v44, %v3655_v43  ;;  %v3351_v5 = vld [vmem:[%s6513_s1 + $0x548] sm:$0xf]  ;;  %v4152_v6 = vld [vmem:[%s6513_s1 + $0x554] sm:$0xf0]  ;;  %v3224_v10 = vor.u32 %v4120_v4, %v3223_v2  ;;  %v3052_v60 = vor.u32 %v4074_v34, %v3049_v49  ;;  %v4038_v63 = vld [vmem:[%s6513_s1 + $0x1cc] sm:$0xf] }
  0xaa   :  { %1898 = vmatpush.bf16.msrb.mxu3 %v3688_v19  ;;  %v3479_v8 = vld [vmem:[%s6513_s1 + $0x648] sm:$0xf]  ;;  %v4184_v31 = vld [vmem:[%s6513_s1 + $0x654] sm:$0xf0]  ;;  %v3352_v12 = vor.u32 %v4152_v6, %v3351_v5  ;;  %v4070_v2 = vld [vmem:[%s6513_s1 + $0x2cc] sm:$0xf] }
  0xab   :  { %1860 = vmatpush.bf16.msrb.mxu0 %v3288_v26  ;;  %v3607_v38 = vld [vmem:[%s6513_s1 + $0x748] sm:$0xf]  ;;  %v4216_v9 = vld [vmem:[%s6513_s1 + $0x754] sm:$0xf0]  ;;  %v3480_v13 = vor.u32 %v4184_v31, %v3479_v8  ;;  %v4102_v5 = vld [vmem:[%s6513_s1 + $0x3cc] sm:$0xf]  ;;  %v2780_v8 = vor.u32 %v4006_v61, %v2777_v62 }
  0xac   :  { %1873 = vmatpush.bf16.msrb.mxu1 %v3416_v30  ;;  %v3207_v11 = vld [vmem:[%s6513_s1 + $0x428] sm:$0xf]  ;;  %v4116_v14 = vld [vmem:[%s6513_s1 + $0x434] sm:$0xf0]  ;;  %v3608_v17 = vor.u32 %v4216_v9, %v3607_v38  ;;  %v3161_v6 = vld [vmem:[%s6513_s1 + $0x3d8] sm:$0xf0] }
  0xad   :  { %1886 = vmatpush.bf16.msrb.mxu2 %v3544_v33  ;;  %v3335_v15 = vld [vmem:[%s6513_s1 + $0x528] sm:$0xf]  ;;  %v4148_v18 = vld [vmem:[%s6513_s1 + $0x534] sm:$0xf0]  ;;  %v3208_v23 = vor.u32 %v4116_v14, %v3207_v11  ;;  %v4002_v9 = vld [vmem:[%s6513_s1 + $0xac] sm:$0xf] }
  0xae   :  { %1899 = vmatpush.bf16.msrb.mxu3 %v3672_v39  ;;  %v3463_v19 = vld [vmem:[%s6513_s1 + $0x628] sm:$0xf]  ;;  %v4180_v20 = vld [vmem:[%s6513_s1 + $0x634] sm:$0xf0]  ;;  %v3336_v33 = vor.u32 %v4148_v18, %v3335_v15  ;;  %v4034_v11 = vld [vmem:[%s6513_s1 + $0x1ac] sm:$0xf] }
  0xaf   :  { %1861 = vmatpush.bf16.msrb.mxu0 %v3272_v45  ;;  %v3591_v21 = vld [vmem:[%s6513_s1 + $0x728] sm:$0xf]  ;;  %v4212_v22 = vld [vmem:[%s6513_s1 + $0x734] sm:$0xf0]  ;;  %v3464_v35 = vor.u32 %v4180_v20, %v3463_v19  ;;  %v2889_v14 = vld [vmem:[%s6513_s1 + $0x1b8] sm:$0xf0] }
  0xb0   :  { %1874 = vmatpush.bf16.msrb.mxu1 %v3400_v46  ;;  %v3191_v24 = vld [vmem:[%s6513_s1 + $0x408] sm:$0xf]  ;;  %v4112_v26 = vld [vmem:[%s6513_s1 + $0x414] sm:$0xf0]  ;;  %v3592_v42 = vor.u32 %v4212_v22, %v3591_v21  ;;  %v4010_v46 = vld [vmem:[%s6513_s1 + $0xec] sm:$0xf] }
  0xb1   :  { %1887 = vmatpush.bf16.msrb.mxu2 %v3528_v27  ;;  %v3319_v36 = vld [vmem:[%s6513_s1 + $0x508] sm:$0xf]  ;;  %v4144_v37 = vld [vmem:[%s6513_s1 + $0x514] sm:$0xf0]  ;;  %v2793_v27 = vld [vmem:[%s6513_s1 + $0xf8] sm:$0xf0]  ;;  %v3192_v28 = vor.u32 %v4112_v26, %v3191_v24  ;;  %v2892_v26 = vor.u32 %v4034_v11, %v2889_v14 }
  0xb2   :  { %1900 = vmatpush.bf16.msrb.mxu3 %v3656_v29  ;;  %v3447_v39 = vld [vmem:[%s6513_s1 + $0x608] sm:$0xf]  ;;  %v4176_v43 = vld [vmem:[%s6513_s1 + $0x614] sm:$0xf0]  ;;  %v2921_v29 = vld [vmem:[%s6513_s1 + $0x1f8] sm:$0xf0]  ;;  %v3320_v50 = vor.u32 %v4144_v37, %v3319_v36  ;;  %v2796_v56 = vor.u32 %v4010_v46, %v2793_v27 }
  0xb3   :  { %1862 = vmatpush.bf16.msrb.mxu0 %v3256_v53  ;;  %v3575_v44 = vld [vmem:[%s6513_s1 + $0x708] sm:$0xf]  ;;  %v4208_v45 = vld [vmem:[%s6513_s1 + $0x714] sm:$0xf0]  ;;  %v3448_v51 = vor.u32 %v4176_v43, %v3447_v39  ;;  %v3177_v53 = vld [vmem:[%s6513_s1 + $0x3f8] sm:$0xf0] }
  0xb4   :  { %1875 = vmatpush.bf16.msrb.mxu1 %v3384_v54  ;;  %v1621_v41 = vpop.f32.mrf.mxu1  ;;  %v3180_v0 = vor.u32 %v4106_v52, %v3177_v53  ;;  %v4066_v15 = vld [vmem:[%s6513_s1 + $0x2ac] sm:$0xf]  ;;  %v5727_v18 = vld [vmem:[#allocation1 + $0x3f] sm:$0xff] }
  0xb5   :  { %1888 = vmatpush.bf16.msrb.mxu2 %v3512_v55  ;;  %v1608_v30 = vpop.f32.mrf.mxu0  ;;  %v3576_v55 = vor.u32 %v4208_v45, %v3575_v44  ;;  %v4098_v19 = vld [vmem:[%s6513_s1 + $0x3ac] sm:$0xf]  ;;  %v3145_v20 = vld [vmem:[%s6513_s1 + $0x3b8] sm:$0xf0] }
  0xb6   :  { %1901 = vmatpush.bf16.msrb.mxu3 %v3640_v59  ;;  %v1609_v40 = vadd.f32 %v1608_v30, %v293_v16  ;;  %v2924_v59 = vor.u32 %v4042_v47, %v2921_v29  ;;  %v3017_v16 = vld [vmem:[%s6513_s1 + $0x2b8] sm:$0xf0]  ;;  %v5736_v22 = vld [vmem:[#allocation1 + $0x2d] sm:$0xff]  ;;  %v3148_v37 = vor.u32 %v4098_v19, %v3145_v20 }
  0xb7   :  { %1863 = vmatpush.bf16.msrb.mxu0 %v3240_v1  ;;  %v2905_v1 = vld [vmem:[%s6513_s1 + $0x1d8] sm:$0xf0]  ;;  %v3020_v30 = vor.u32 %v4066_v15, %v3017_v16  ;;  %v4030_v36 = vld [vmem:[%s6513_s1 + $0x18c] sm:$0xf] }
  0xb8   :  { %1876 = vmatpush.bf16.msrb.mxu1 %v3368_v3  ;;  %v1622_v48 = vadd.f32 %v1621_v41, %v1609_v40  ;;  %v3033_v3 = vld [vmem:[%s6513_s1 + $0x2d8] sm:$0xf0]  ;;  %v2908_v31 = vor.u32 %v4038_v63, %v2905_v1  ;;  %v4062_v40 = vld [vmem:[%s6513_s1 + $0x28c] sm:$0xf] }
  0xb9   :  { %1889 = vmatpush.bf16.msrb.mxu2 %v3496_v25  ;;  %v3036_v38 = vor.u32 %v4070_v2, %v3033_v3  ;;  %v2873_v39 = vld [vmem:[%s6513_s1 + $0x198] sm:$0xf0]  ;;  %v3994_v47 = vld [vmem:[%s6513_s1 + $0x6c] sm:$0xf] }
  0xba   :  { %1902 = vmatpush.bf16.msrb.mxu3 %v3624_v7  ;;  %v1634_v54 = vpop.f32.mrf.mxu2  ;;  %v3001_v41 = vld [vmem:[%s6513_s1 + $0x298] sm:$0xf0]  ;;  %v2876_v46 = vor.u32 %v4030_v36, %v2873_v39  ;;  %v4090_v53 = vld [vmem:[%s6513_s1 + $0x36c] sm:$0xf] }
  0xbb   :  { %1864 = vmatpush.bf16.msrb.mxu0 %v3224_v10  ;;  %v1635_v57 = vadd.f32 %v1634_v54, %v1622_v48  ;;  %v2761_v10 = vld [vmem:[%s6513_s1 + $0xb8] sm:$0xf0]  ;;  %v3004_v27 = vor.u32 %v4062_v40, %v3001_v41  ;;  %v4022_v61 = vld [vmem:[%s6513_s1 + $0x14c] sm:$0xf] }
  0xbc   :  { %1877 = vmatpush.bf16.msrb.mxu1 %v3352_v12  ;;  %v1647_v58 = vpop.f32.mrf.mxu3  ;;  %v1623_v7 = vpop.f32.mrf.mxu1  ;;  %v5712_v12 = vld [vmem:[#allocation1 + $0x36] sm:$0xff]  ;;  %v4054_v1 = vld [vmem:[%s6513_s1 + $0x24c] sm:$0xf] }
  0xbd   :  { %1890 = vmatpush.bf16.msrb.mxu2 %v3480_v13  ;;  %v1648_v25 = vadd.f32 %v1647_v58, %v1635_v57  ;;  %v1610_v4 = vpop.f32.mrf.mxu0  ;;  %v3164_v13 = vor.u32 %v4102_v5, %v3161_v6  ;;  %v3129_v43 = vld [vmem:[%s6513_s1 + $0x398] sm:$0xf0]  ;;  %v4018_v11 = vld [vmem:[%s6513_s1 + $0x12c] sm:$0xf] }
  0xbe   :  { %1903 = vmatpush.bf16.msrb.mxu3 %v3608_v17  ;;  %v5724_v17 = vld [vmem:[#allocation1 + $0x24] sm:$0xff]  ;;  %v2729_v48 = vld [vmem:[%s6513_s1 + $0x78] sm:$0xf0]  ;;  %v4086_v4 = vld [vmem:[%s6513_s1 + $0x34c] sm:$0xf] }
  0xbf   :  { %1865 = vmatpush.bf16.msrb.mxu0 %v3208_v23  ;;  %v2764_v23 = vor.u32 %v4002_v9, %v2761_v10  ;;  %v2985_v52 = vld [vmem:[%s6513_s1 + $0x278] sm:$0xf0]  ;;  %v3986_v9 = vld [vmem:[%s6513_s1 + $0x2c] sm:$0xf] }
  0xc0   :  { %1878 = vmatpush.bf16.msrb.mxu1 %v3336_v33  ;;  %v3998_v33 = vld [vmem:[%s6513_s1 + $0x8c] sm:$0xf]  ;;  %v3113_v54 = vld [vmem:[%s6513_s1 + $0x378] sm:$0xf0] }
  0xc1   :  { %1891 = vmatpush.bf16.msrb.mxu2 %v3464_v35  ;;  %v2745_v35 = vld [vmem:[%s6513_s1 + $0x98] sm:$0xf0]  ;;  %v3116_v63 = vor.u32 %v4090_v53, %v3113_v54  ;;  %v4050_v16 = vld [vmem:[%s6513_s1 + $0x22c] sm:$0xf] }
  0xc2   :  { %1904 = vmatpush.bf16.msrb.mxu3 %v3592_v42  ;;  %v1636_v21 = vpop.f32.mrf.mxu2  ;;  %v4094_v42 = vld [vmem:[%s6513_s1 + $0x38c] sm:$0xf]  ;;  %v2748_v44 = vor.u32 %v3998_v33, %v2745_v35  ;;  %v2969_v2 = vld [vmem:[%s6513_s1 + $0x258] sm:$0xf0] }
  0xc3   :  { %1866 = vmatpush.bf16.msrb.mxu0 %v3192_v28  ;;  %v4026_v28 = vld [vmem:[%s6513_s1 + $0x16c] sm:$0xf]  ;;  %v3132_v49 = vor.u32 %v4094_v42, %v3129_v43  ;;  %v3097_v5 = vld [vmem:[%s6513_s1 + $0x358] sm:$0xf0] }
  0xc4   :  { %1879 = vmatpush.bf16.msrb.mxu1 %v3320_v50  ;;  %v1649_v24 = vpop.f32.mrf.mxu3  ;;  %v1673_v34 = vpop.f32.mrf.mxu1  ;;  %v2857_v50 = vld [vmem:[%s6513_s1 + $0x178] sm:$0xf0]  ;;  %v3100_v14 = vor.u32 %v4086_v4, %v3097_v5  ;;  %v4082_v20 = vld [vmem:[%s6513_s1 + $0x32c] sm:$0xf] }
  0xc5   :  { %1892 = vmatpush.bf16.msrb.mxu2 %v3448_v51  ;;  %v4058_v51 = vld [vmem:[%s6513_s1 + $0x26c] sm:$0xf]  ;;  %v2860_v57 = vor.u32 %v4026_v28, %v2857_v50  ;;  %v2697_v10 = vld [vmem:[%s6513_s1 + $0x38] sm:$0xf0] }
  0xc6   :  { %1905 = vmatpush.bf16.msrb.mxu3 %v3576_v55  ;;  %1867 = vmatmul.bf16.vlgmr.msrb.gmra.mxu0 %v5724_v17  ;;  %v1660_v45 = vpop.f32.mrf.mxu0  ;;  %v2988_v58 = vor.u32 %v4058_v51, %v2985_v52  ;;  %v2825_v15 = vld [vmem:[%s6513_s1 + $0x138] sm:$0xf0]  ;;  %v3982_v24 = vld [vmem:[%s6513_s1 + $0xc] sm:$0xf] }
  0xc7   :  { %1911 = vmatpush.bf16.msra.mxu0 %v2796_v56  ;;  %1880 = vmatmul.bf16.vlgmr.msrb.gmra.mxu1 %v5736_v22  ;;  %v1661_v29 = vadd.f32 %v1660_v45, %v1648_v25  ;;  %v2732_v56 = vor.u32 %v3994_v47, %v2729_v48  ;;  %v2953_v19 = vld [vmem:[%s6513_s1 + $0x238] sm:$0xf0]  ;;  %v4014_v35 = vld [vmem:[%s6513_s1 + $0x10c] sm:$0xf] }
  0xc8   :  { %1924 = vmatpush.bf16.msra.mxu1 %v2924_v59  ;;  %1893 = vmatmul.bf16.vlgmr.msrb.gmra.mxu2 %v5712_v12  ;;  %v3990_v59 = vld [vmem:[%s6513_s1 + $0x4c] sm:$0xf]  ;;  %v3081_v21 = vld [vmem:[%s6513_s1 + $0x338] sm:$0xf0]  ;;  %v2956_v33 = vor.u32 %v4050_v16, %v2953_v19 }
  0xc9   :  { %1937 = vmatpush.bf16.msra.mxu2 %v3052_v60  ;;  %1906 = vmatmul.bf16.vlgmr.msrb.gmra.mxu3 %v5727_v18  ;;  %v1674_v55 = vadd.f32 %v1673_v34, %v1661_v29  ;;  %v2713_v60 = vld [vmem:[%s6513_s1 + $0x58] sm:$0xf0]  ;;  %v3084_v40 = vor.u32 %v4082_v20, %v3081_v21  ;;  %v4078_v42 = vld [vmem:[%s6513_s1 + $0x30c] sm:$0xf] }
  0xca   :  { %1950 = vmatpush.bf16.msra.mxu3 %v3180_v0  ;;  %v2841_v0 = vld [vmem:[%s6513_s1 + $0x158] sm:$0xf0]  ;;  %v2716_v6 = vor.u32 %v3990_v59, %v2713_v60  ;;  %v4138_v45 = vld [vmem:[%s6513_s1 + $0x4ec] sm:$0xf] }
  0xcb   :  { %1912 = vmatpush.bf16.msra.mxu0 %v2780_v8  ;;  %v1686_v62 = vpop.f32.mrf.mxu2  ;;  %v2809_v36 = vld [vmem:[%s6513_s1 + $0x118] sm:$0xf0]  ;;  %v4202_v28 = vld [vmem:[%s6513_s1 + $0x6ec] sm:$0xf] }
  0xcc   :  { %1925 = vmatpush.bf16.msra.mxu1 %v2908_v31  ;;  %v1687_v3 = vadd.f32 %v1686_v62, %v1674_v55  ;;  %v2844_v31 = vor.u32 %v4022_v61, %v2841_v0  ;;  %v2937_v41 = vld [vmem:[%s6513_s1 + $0x218] sm:$0xf0]  ;;  %v2812_v34 = vor.u32 %v4014_v35, %v2809_v36  ;;  %v4234_v50 = vld [vmem:[%s6513_s1 + $0x7ec] sm:$0xf] }
  0xcd   :  { %1938 = vmatpush.bf16.msra.mxu2 %v3036_v38  ;;  %v2972_v38 = vor.u32 %v4054_v1, %v2969_v2  ;;  %v3065_v43 = vld [vmem:[%s6513_s1 + $0x318] sm:$0xf0]  ;;  %v4198_v61 = vld [vmem:[%s6513_s1 + $0x6cc] sm:$0xf] }
  0xce   :  { %1951 = vmatpush.bf16.msra.mxu3 %v3164_v13  ;;  %v1699_v25 = vpop.f32.mrf.mxu3  ;;  %v1662_v8 = vpop.f32.mrf.mxu0  ;;  %v3433_v48 = vld [vmem:[%s6513_s1 + $0x5f8] sm:$0xf0]  ;;  %v3068_v52 = vor.u32 %v4078_v42, %v3065_v43  ;;  %v4162_v5 = vld [vmem:[%s6513_s1 + $0x5ac] sm:$0xf] }
  0xcf   :  { %1913 = vmatpush.bf16.msra.mxu0 %v2764_v23  ;;  %v5811_v7 = vadd.f32 %v1699_v25, %v1687_v3  ;;  %v1675_v13 = vpop.f32.mrf.mxu1  ;;  %v2700_v23 = vor.u32 %v3986_v9, %v2697_v10  ;;  %v3561_v29 = vld [vmem:[%s6513_s1 + $0x6f8] sm:$0xf0]  ;;  %v4130_v25 = vld [vmem:[%s6513_s1 + $0x4ac] sm:$0xf]  ;;  %v4319_v8 = vld [vmem:[#allocation1 + $0x12] sm:$0xff] }
  0xd0   :  { %1926 = vmatpush.bf16.msra.mxu1 %v2892_v26  ;;  %v2681_v26 = vld [vmem:[%s6513_s1 + $0x18] sm:$0xf0]  ;;  %v3564_v55 = vor.u32 %v4202_v28, %v3561_v29  ;;  %v4226_v10 = vld [vmem:[%s6513_s1 + $0x7ac] sm:$0xf]  ;;  %v4320_v13 = vld [vmem:[#allocation1] sm:$0xff] }
  0xd1   :  { %1939 = vmatpush.bf16.msra.mxu2 %v3020_v30  ;;  %v2828_v30 = vor.u32 %v4018_v11, %v2825_v15  ;;  %v2684_v47 = vor.u32 %v3982_v24, %v2681_v26  ;;  %v3689_v51 = vld [vmem:[%s6513_s1 + $0x7f8] sm:$0xf0]  ;;  %v4322_v16 = vld [vmem:[#allocation1 + $0x9] sm:$0xff] }
  0xd2   :  { %1952 = vmatpush.bf16.msra.mxu3 %v3148_v37  ;;  %v4046_v37 = vld [vmem:[%s6513_s1 + $0x20c] sm:$0xf]  ;;  %v3692_v59 = vor.u32 %v4234_v50, %v3689_v51  ;;  %v3417_v60 = vld [vmem:[%s6513_s1 + $0x5d8] sm:$0xf0] }
  0xd3   :  { %1914 = vmatpush.bf16.msra.mxu0 %v2748_v44  ;;  %v1688_v39 = vpop.f32.mrf.mxu2  ;;  %v3545_v62 = vld [vmem:[%s6513_s1 + $0x6d8] sm:$0xf0]  ;;  %v4126_v21 = vld [vmem:[%s6513_s1 + $0x48c] sm:$0xf] }
  0xd4   :  { %1927 = vmatpush.bf16.msra.mxu1 %v2876_v46  ;;  %v3305_v46 = vld [vmem:[%s6513_s1 + $0x4f8] sm:$0xf0]  ;;  %v3548_v3 = vor.u32 %v4198_v61, %v3545_v62  ;;  %v4158_v24 = vld [vmem:[%s6513_s1 + $0x58c] sm:$0xf] }
  0xd5   :  { %1940 = vmatpush.bf16.msra.mxu2 %v3004_v27  ;;  %v4170_v27 = vld [vmem:[%s6513_s1 + $0x5ec] sm:$0xf]  ;;  %v3308_v53 = vor.u32 %v4138_v45, %v3305_v46  ;;  %v3673_v0 = vld [vmem:[%s6513_s1 + $0x7d8] sm:$0xf0] }
  0xd6   :  { %1953 = vmatpush.bf16.msra.mxu3 %v3132_v49  ;;  %v1701_v44 = vpop.f32.mrf.mxu3  ;;  %v2940_v49 = vor.u32 %v4046_v37, %v2937_v41  ;;  %v3436_v54 = vor.u32 %v4170_v27, %v3433_v48  ;;  %v3273_v4 = vld [vmem:[%s6513_s1 + $0x4b8] sm:$0xf0]  ;;  %v4222_v36 = vld [vmem:[%s6513_s1 + $0x78c] sm:$0xf] }
  0xd7   :  { %1915 = vmatpush.bf16.msra.mxu0 %v2732_v56  ;;  %v4134_v56 = vld [vmem:[%s6513_s1 + $0x4cc] sm:$0xf]  ;;  %v3529_v9 = vld [vmem:[%s6513_s1 + $0x6b8] sm:$0xf0]  ;;  %v3276_v15 = vor.u32 %v4130_v25, %v3273_v4 }
  0xd8   :  { %1928 = vmatpush.bf16.msra.mxu1 %v2860_v57  ;;  %v3289_v57 = vld [vmem:[%s6513_s1 + $0x4d8] sm:$0xf0]  ;;  %v4122_v43 = vld [vmem:[%s6513_s1 + $0x46c] sm:$0xf] }
  0xd9   :  { %1941 = vmatpush.bf16.msra.mxu2 %v2988_v58  ;;  %v4166_v58 = vld [vmem:[%s6513_s1 + $0x5cc] sm:$0xf]  ;;  %v3292_v1 = vor.u32 %v4134_v56, %v3289_v57  ;;  %v3657_v11 = vld [vmem:[%s6513_s1 + $0x7b8] sm:$0xf0] }
  0xda   :  { %1954 = vmatpush.bf16.msra.mxu3 %v3116_v63  ;;  %v4230_v63 = vld [vmem:[%s6513_s1 + $0x7cc] sm:$0xf]  ;;  %v3420_v2 = vor.u32 %v4166_v58, %v3417_v60  ;;  %v3660_v26 = vor.u32 %v4226_v10, %v3657_v11  ;;  %v3513_v35 = vld [vmem:[%s6513_s1 + $0x698] sm:$0xf0]  ;;  %v294_v11 = vperm.slane %v5598_v32, 1 }
  0xdb   :  { %1916 = vmatpush.bf16.msra.mxu0 %v2716_v6  ;;  %v3676_v6 = vor.u32 %v4230_v63, %v3673_v0  ;;  %v3641_v37 = vld [vmem:[%s6513_s1 + $0x798] sm:$0xf0]  ;;  %v4154_v45 = vld [vmem:[%s6513_s1 + $0x56c] sm:$0xf] }
  0xdc   :  { %1929 = vmatpush.bf16.msra.mxu1 %v2844_v31  ;;  %v3401_v31 = vld [vmem:[%s6513_s1 + $0x5b8] sm:$0xf0]  ;;  %v3644_v27 = vor.u32 %v4222_v36, %v3641_v37  ;;  %v4186_v48 = vld [vmem:[%s6513_s1 + $0x66c] sm:$0xf]  ;;  %v3751_v36 = vld [vmem:[%s6515_s3 + $0x70] sm:$0xf] }
  0xdd   :  { %1942 = vmatpush.bf16.msra.mxu2 %v2972_v38  ;;  %v4194_v38 = vld [vmem:[%s6513_s1 + $0x6ac] sm:$0xf]  ;;  %v3404_v19 = vor.u32 %v4162_v5, %v3401_v31  ;;  %v3241_v44 = vld [vmem:[%s6513_s1 + $0x478] sm:$0xf0]  ;;  %v4252_v37 = vld [vmem:[%s6515_s3 + $0x74] sm:$0xf0] }
  0xde   :  { %1955 = vmatpush.bf16.msra.mxu3 %v3100_v14  ;;  %v4321_v14 = vld [vmem:[#allocation1 + $0x1b] sm:$0xff]  ;;  %v3532_v20 = vor.u32 %v4194_v38, %v3529_v9  ;;  %v4218_v29 = vld [vmem:[%s6513_s1 + $0x76c] sm:$0xf] }
  0xdf   :  { %1917 = vmatpush.bf16.msra.mxu0 %v2700_v23  ;;  %v3257_v23 = vld [vmem:[%s6513_s1 + $0x498] sm:$0xf0]  ;;  %v4182_v58 = vld [vmem:[%s6513_s1 + $0x64c] sm:$0xf] }
  0xe0   :  { %1930 = vmatpush.bf16.msra.mxu1 %v2828_v30  ;;  %v3385_v30 = vld [vmem:[%s6513_s1 + $0x598] sm:$0xf0]  ;;  %v3260_v39 = vor.u32 %v4126_v21, %v3257_v23  ;;  %v4214_v61 = vld [vmem:[%s6513_s1 + $0x74c] sm:$0xf] }
  0xe1   :  { %1943 = vmatpush.bf16.msra.mxu2 %v2956_v33  ;;  %v4190_v33 = vld [vmem:[%s6513_s1 + $0x68c] sm:$0xf]  ;;  %v3388_v41 = vor.u32 %v4158_v24, %v3385_v30  ;;  %v3497_v28 = vld [vmem:[%s6513_s1 + $0x678] sm:$0xf0] }
  0xe2   :  { %1956 = vmatpush.bf16.msra.mxu3 %v3084_v40  ;;  %v3516_v42 = vor.u32 %v4190_v33, %v3513_v35  ;;  %v3500_v51 = vor.u32 %v4186_v48, %v3497_v28  ;;  %v3353_v57 = vld [vmem:[%s6513_s1 + $0x558] sm:$0xf0]  ;;  %v4146_v4 = vld [vmem:[%s6513_s1 + $0x52c] sm:$0xf]  ;;  %v3743_v28 = vld [vmem:[%s6515_s3 + $0x60] sm:$0xf] }
  0xe3   :  { %1918 = vmatpush.bf16.msra.mxu0 %v2684_v47  ;;  %v5957_v40 = vpop.f32.mrf.mxu0  ;;  %v3369_v47 = vld [vmem:[%s6513_s1 + $0x578] sm:$0xf0]  ;;  %v4178_v31 = vld [vmem:[%s6513_s1 + $0x62c] sm:$0xf] }
  0xe4   :  { %1931 = vmatpush.bf16.msra.mxu1 %v2812_v34  ;;  %v5968_v46 = vpop.f32.mrf.mxu1  ;;  %v3625_v34 = vld [vmem:[%s6513_s1 + $0x778] sm:$0xf0]  ;;  %v3372_v50 = vor.u32 %v4154_v45, %v3369_v47  ;;  %v4210_v9 = vld [vmem:[%s6513_s1 + $0x72c] sm:$0xf]  ;;  %v3752_v47 = vor.u32 %v4252_v37, %v3751_v36  ;;  %v3703_v36 = vld [vmem:[%s6515_s3 + $0x10] sm:$0xf] }
  0xe5   :  { %1944 = vmatpush.bf16.msra.mxu2 %v2940_v49  ;;  %v3244_v49 = vor.u32 %v4122_v43, %v3241_v44  ;;  %v3628_v56 = vor.u32 %v4218_v29, %v3625_v34  ;;  %v3609_v62 = vld [vmem:[%s6513_s1 + $0x758] sm:$0xf0]  ;;  %v4174_v24 = vld [vmem:[%s6513_s1 + $0x60c] sm:$0xf]  ;;  %v4268_v43 = vld [vmem:[%s6515_s3 + $0xf4] sm:$0xf0] }
  0xe6   :  { %1957 = vmatpush.bf16.msra.mxu3 %v3068_v52  ;;  %1919 = vmatmul.bf16.vlgmr.msra.gmra.mxu0 %v4320_v13  ;;  %v4118_v52 = vld [vmem:[%s6513_s1 + $0x44c] sm:$0xf]  ;;  %v3209_v25 = vld [vmem:[%s6513_s1 + $0x438] sm:$0xf0]  ;;  %v4250_v29 = vld [vmem:[%s6515_s3 + $0x64] sm:$0xf0] }
  0xe7   :  { %1963 = vmatpush.bf16.msrb.mxu0 %v3308_v53  ;;  %1932 = vmatmul.bf16.vlgmr.msra.gmra.mxu1 %v4322_v16  ;;  %v3225_v53 = vld [vmem:[%s6513_s1 + $0x458] sm:$0xf0]  ;;  %v4206_v30 = vld [vmem:[%s6513_s1 + $0x70c] sm:$0xf]  ;;  %v3807_v34 = vld [vmem:[%s6515_s3 + $0xe0] sm:$0xf] }
  0xe8   :  { %1976 = vmatpush.bf16.msrb.mxu1 %v3436_v54  ;;  %1945 = vmatmul.bf16.vlgmr.msra.gmra.mxu2 %v4319_v8  ;;  %v4150_v54 = vld [vmem:[%s6513_s1 + $0x54c] sm:$0xf]  ;;  %v3228_v63 = vor.u32 %v4118_v52, %v3225_v53  ;;  %v3337_v8 = vld [vmem:[%s6513_s1 + $0x538] sm:$0xf0]  ;;  %v3735_v52 = vld [vmem:[%s6515_s3 + $0x50] sm:$0xf] }
  0xe9   :  { %1989 = vmatpush.bf16.msrb.mxu2 %v3564_v55  ;;  %1958 = vmatmul.bf16.vlgmr.msra.gmra.mxu3 %v4321_v14  ;;  %v3465_v38 = vld [vmem:[%s6513_s1 + $0x638] sm:$0xf0]  ;;  %v4110_v14 = vld [vmem:[%s6513_s1 + $0x40c] sm:$0xf]  ;;  %v4248_v53 = vld [vmem:[%s6515_s3 + $0x54] sm:$0xf0] }
  0xea   :  { %2002 = vmatpush.bf16.msrb.mxu3 %v3692_v59  ;;  %v3481_v59 = vld [vmem:[%s6513_s1 + $0x658] sm:$0xf0]  ;;  %v3468_v16 = vor.u32 %v4178_v31, %v3465_v38  ;;  %v4260_v31 = vld [vmem:[%s6515_s3 + $0xb4] sm:$0xf0] }
  0xeb   :  { %1964 = vmatpush.bf16.msrb.mxu0 %v3292_v1  ;;  %v5994_v55 = vpop.f32.mrf.mxu2  ;;  %v1714_v0 = vpop.f32.mrf.mxu0  ;;  %v3356_v1 = vor.u32 %v4150_v54, %v3353_v57  ;;  %v3593_v10 = vld [vmem:[%s6513_s1 + $0x738] sm:$0xf0]  ;;  %v3799_v54 = vld [vmem:[%s6515_s3 + $0xd0] sm:$0xf]  ;;  %v4240_v37 = vld [vmem:[%s6515_s3 + $0x14] sm:$0xf0] }
  0xec   :  { %1977 = vmatpush.bf16.msrb.mxu1 %v3420_v2  ;;  %v6005_v60 = vpop.f32.mrf.mxu3  ;;  %v3484_v2 = vor.u32 %v4182_v58, %v3481_v59  ;;  %v1727_v5 = vpop.f32.mrf.mxu1  ;;  %v3321_v32 = vld [vmem:[%s6513_s1 + $0x518] sm:$0xf0]  ;;  %v3596_v23 = vor.u32 %v4210_v9, %v3593_v10  ;;  %v3727_v58 = vld [vmem:[%s6515_s3 + $0x40] sm:$0xf]  ;;  %v3863_v10 = vld [vmem:[%s6515_s3 + $0x150] sm:$0xf] }
  0xed   :  { %1990 = vmatpush.bf16.msrb.mxu2 %v3548_v3  ;;  %v4114_v3 = vld [vmem:[%s6513_s1 + $0x42c] sm:$0xf]  ;;  %v3577_v35 = vld [vmem:[%s6513_s1 + $0x718] sm:$0xf0]  ;;  %v3871_v0 = vld [vmem:[%s6515_s3 + $0x160] sm:$0xf] }
  0xee   :  { %2003 = vmatpush.bf16.msrb.mxu3 %v3676_v6  ;;  %v3612_v6 = vor.u32 %v4214_v61, %v3609_v62  ;;  %v3212_v13 = vor.u32 %v4114_v3, %v3209_v25  ;;  %v3791_v61 = vld [vmem:[%s6515_s3 + $0xc0] sm:$0xf]  ;;  %v4262_v62 = vld [vmem:[%s6515_s3 + $0xc4] sm:$0xf0]  ;;  %v3719_v3 = vld [vmem:[%s6515_s3 + $0x30] sm:$0xf] }
  0xef   :  { %1965 = vmatpush.bf16.msrb.mxu0 %v3276_v15  ;;  %v3340_v15 = vor.u32 %v4146_v4, %v3337_v8  ;;  %v4244_v25 = vld [vmem:[%s6515_s3 + $0x34] sm:$0xf0]  ;;  %v3783_v8 = vld [vmem:[%s6515_s3 + $0xb0] sm:$0xf] }
  0xf0   :  { %1978 = vmatpush.bf16.msrb.mxu1 %v3404_v19  ;;  %v3193_v19 = vld [vmem:[%s6513_s1 + $0x418] sm:$0xf0]  ;;  %v3720_v38 = vor.u32 %v4244_v25, %v3719_v3 }
  0xf1   :  { %1991 = vmatpush.bf16.msrb.mxu2 %v3532_v20  ;;  %v4142_v20 = vld [vmem:[%s6513_s1 + $0x50c] sm:$0xf] }
  0xf2   :  { %2004 = vmatpush.bf16.msrb.mxu3 %v3660_v26  ;;  %v3449_v26 = vld [vmem:[%s6513_s1 + $0x618] sm:$0xf0]  ;;  %v3324_v44 = vor.u32 %v4142_v20, %v3321_v32  ;;  %v3775_v20 = vld [vmem:[%s6515_s3 + $0xa0] sm:$0xf]  ;;  %v4258_v32 = vld [vmem:[%s6515_s3 + $0xa4] sm:$0xf0] }
  0xf3   :  { %1966 = vmatpush.bf16.msrb.mxu0 %v3260_v39  ;;  %v1740_v21 = vpop.f32.mrf.mxu2  ;;  %v1713_v39 = vadd.f32 %v5957_v40, %v294_v11  ;;  %v3452_v45 = vor.u32 %v4174_v24, %v3449_v26  ;;  %v4280_v11 = vld [vmem:[%s6515_s3 + $0x154] sm:$0xf0]  ;;  %s2640_s1 = sshll.u32 %s6521_s9, 4  ;;  %s2649_s9 = sshll.u32 %s4402_s14, 4  ;;  %s2641_s1 = int_to_ptr.hbm [resolvable:$true] %s2640_s1  ;;  %s2650_s9 = int_to_ptr.vmem [resolvable:$true] %s2649_s9 }
  0xf4   :  { %1979 = vmatpush.bf16.msrb.mxu1 %v3388_v41  ;;  %v1753_v33 = vpop.f32.mrf.mxu3  ;;  %v3196_v41 = vor.u32 %v4110_v14, %v3193_v19  ;;  %v3711_v14 = vld [vmem:[%s6515_s3 + $0x20] sm:$0xf]  ;;  %v3864_v19 = vor.u32 %v4280_v11, %v3863_v10  ;;  %v4263_v10 = vld [vmem:[%s6515_s3 + $0xd4] sm:$0xf]  ;;  %v3801_v11 = vld [vmem:[%s6515_s3 + $0xd8] sm:$0xf0] }
  0xf5   :  { %1992 = vmatpush.bf16.msrb.mxu2 %v3516_v42  ;;  %v3815_v42 = vld [vmem:[%s6515_s3 + $0xf0] sm:$0xf]  ;;  %v1726_v40 = vadd.f32 %v5968_v46, %v1713_v39  ;;  %v3744_v46 = vor.u32 %v4250_v29, %v3743_v28  ;;  %v4278_v33 = vld [vmem:[%s6515_s3 + $0x144] sm:$0xf0]  ;;  %v3759_v29 = vld [vmem:[%s6515_s3 + $0x80] sm:$0xf] }
  0xf6   :  { %2005 = vmatpush.bf16.msrb.mxu3 %v3644_v27  ;;  %v3580_v27 = vor.u32 %v4206_v30, %v3577_v35  ;;  %v3816_v48 = vor.u32 %v4268_v43, %v3815_v42  ;;  %v3855_v30 = vld [vmem:[%s6515_s3 + $0x140] sm:$0xf]  ;;  %v3776_v35 = vor.u32 %v4258_v32, %v3775_v20  ;;  %v3767_v42 = vld [vmem:[%s6515_s3 + $0x90] sm:$0xf]  ;;  %v4256_v43 = vld [vmem:[%s6515_s3 + $0x94] sm:$0xf0] }
  0xf7   :  { %1967 = vmatpush.bf16.msrb.mxu0 %v3244_v49  ;;  %v4266_v49 = vld [vmem:[%s6515_s3 + $0xe4] sm:$0xf0]  ;;  %v3729_v20 = vld [vmem:[%s6515_s3 + $0x48] sm:$0xf0]  ;;  %v4261_v32 = vld [vmem:[%s6515_s3 + $0xc4] sm:$0xf] }
  0xf8   :  { %1980 = vmatpush.bf16.msrb.mxu1 %v3372_v50  ;;  %v3808_v50 = vor.u32 %v4266_v49, %v3807_v34  ;;  %v4238_v28 = vld [vmem:[%s6515_s3 + $0x4] sm:$0xf0] }
  0xf9   :  { %1993 = vmatpush.bf16.msrb.mxu2 %v3500_v51  ;;  %v1739_v51 = vadd.f32 %v5994_v55, %v1726_v40  ;;  %v3736_v55 = vor.u32 %v4248_v53, %v3735_v52  ;;  %v3695_v40 = vld [vmem:[%s6515_s3] sm:$0xf]  ;;  %v4267_v53 = vld [vmem:[%s6515_s3 + $0xf4] sm:$0xf] }
  0xfa   :  { %2006 = vmatpush.bf16.msrb.mxu3 %v3628_v56  ;;  %v3879_v56 = vld [vmem:[%s6515_s3 + $0x170] sm:$0xf] }
  0xfb   :  { %1968 = vmatpush.bf16.msrb.mxu0 %v3228_v63 }
  0xfc   :  { %1981 = vmatpush.bf16.msrb.mxu1 %v3356_v1  ;;  %v4282_v1 = vld [vmem:[%s6515_s3 + $0x164] sm:$0xf0] }
  0xfd   :  { %1994 = vmatpush.bf16.msrb.mxu2 %v3484_v2  ;;  %v3792_v2 = vor.u32 %v4262_v62, %v3791_v61  ;;  %v4249_v61 = vld [vmem:[%s6515_s3 + $0x64] sm:$0xf]  ;;  %v3745_v62 = vld [vmem:[%s6515_s3 + $0x68] sm:$0xf0] }
  0xfe   :  { %2007 = vmatpush.bf16.msrb.mxu3 %v3612_v6  ;;  %v3872_v6 = vor.u32 %v4282_v1, %v3871_v0  ;;  %v3831_v0 = vld [vmem:[%s6515_s3 + $0x110] sm:$0xf]  ;;  %v4272_v1 = vld [vmem:[%s6515_s3 + $0x114] sm:$0xf0]  ;;  %v3748_v3 = vor.u32 %v4249_v61, %v3745_v62 }
  0xff   :  { %1969 = vmatpush.bf16.msrb.mxu0 %v3212_v13  ;;  %v3784_v13 = vor.u32 %v4260_v31, %v3783_v8  ;;  %v3832_v25 = vor.u32 %v4272_v1, %v3831_v0  ;;  %v4247_v31 = vld [vmem:[%s6515_s3 + $0x54] sm:$0xf]  ;;  %v4237_v1 = vld [vmem:[%s6515_s3 + $0x4] sm:$0xf] }
 0x100   :  { %1982 = vmatpush.bf16.msrb.mxu1 %v3340_v15  ;;  %v4242_v15 = vld [vmem:[%s6515_s3 + $0x24] sm:$0xf0] }
 0x101   :  { %1995 = vmatpush.bf16.msrb.mxu2 %v3468_v16 }
 0x102   :  { %2008 = vmatpush.bf16.msrb.mxu3 %v3596_v23  ;;  %v3712_v23 = vor.u32 %v4242_v15, %v3711_v14 }
 0x103   :  { %1970 = vmatpush.bf16.msrb.mxu0 %v3196_v41  ;;  %v1764_v63 = vpop.f32.mrf.mxu0  ;;  %v3856_v41 = vor.u32 %v4278_v33, %v3855_v30  ;;  %v4243_v33 = vld [vmem:[%s6515_s3 + $0x34] sm:$0xf] }
 0x104   :  { %1983 = vmatpush.bf16.msrb.mxu1 %v3324_v44  ;;  %v1777_v5 = vpop.f32.mrf.mxu1 }
 0x105   :  { %1996 = vmatpush.bf16.msrb.mxu2 %v3452_v45  ;;  %v3704_v45 = vor.u32 %v4240_v37, %v3703_v36 }
 0x106   :  { %2009 = vmatpush.bf16.msrb.mxu3 %v3580_v27  ;;  %1971 = vmatmul.bf16.vlgmr.msrb.gmra.mxu0 %v5724_v17  ;;  %v4264_v17 = vld [vmem:[%s6515_s3 + $0xd4] sm:$0xf0]  ;;  %v3847_v27 = vld [vmem:[%s6515_s3 + $0x130] sm:$0xf] }
 0x107   :  { %2426 = vmatpush.bf16.msra.mxu0 %v3752_v47  ;;  %1984 = vmatmul.bf16.vlgmr.msrb.gmra.mxu1 %v5736_v22  ;;  %v1752_v22 = vadd.f32 %v6005_v60, %v1739_v51  ;;  %v3800_v57 = vor.u32 %v4264_v17, %v3799_v54  ;;  %v4276_v47 = vld [vmem:[%s6515_s3 + $0x134] sm:$0xf0]  ;;  %v3753_v51 = vld [vmem:[%s6515_s3 + $0x78] sm:$0xf0] }
 0x108   :  { %2439 = vmatpush.bf16.msra.mxu1 %v3816_v48  ;;  %1997 = vmatmul.bf16.vlgmr.msrb.gmra.mxu2 %v5712_v12  ;;  %v4284_v12 = vld [vmem:[%s6515_s3 + $0x174] sm:$0xf0]  ;;  %v3768_v48 = vor.u32 %v4256_v43, %v3767_v42  ;;  %v3848_v49 = vor.u32 %v4276_v47, %v3847_v27  ;;  %v3817_v54 = vld [vmem:[%s6515_s3 + $0xf8] sm:$0xf0]  ;;  %v4241_v47 = vld [vmem:[%s6515_s3 + $0x24] sm:$0xf] }
 0x109   :  { %2010 = vmatmul.bf16.vlgmr.msrb.gmra.mxu3 %v5727_v18  ;;  %v4246_v18 = vld [vmem:[%s6515_s3 + $0x44] sm:$0xf0]  ;;  %v3880_v59 = vor.u32 %v4284_v12, %v3879_v56  ;;  %v1765_v4 = vadd.f32 %v1764_v63, %v1752_v22  ;;  %v3839_v56 = vld [vmem:[%s6515_s3 + $0x120] sm:$0xf]  ;;  %v2024_v22 = vmax.f32 %v5811_v7, 0.0 }
 0x10a   :  { %v3728_v60 = vor.u32 %v4246_v18, %v3727_v58  ;;  %v4274_v12 = vld [vmem:[%s6515_s3 + $0x124] sm:$0xf0]  ;;  %v3809_v7 = vld [vmem:[%s6515_s3 + $0xe8] sm:$0xf0] }
 0x10b   :  { %2427 = vmatpush.bf16.msra.mxu0 %v3744_v46  ;;  %2452 = vmatpush.bf16.msra.mxu2 %v3880_v59  ;;  %v1778_v9 = vadd.f32 %v1777_v5, %v1765_v4  ;;  %v1790_v16 = vpop.f32.mrf.mxu2  ;;  %v1766_v26 = vpop.f32.mrf.mxu0  ;;  %v4254_v46 = vld [vmem:[%s6515_s3 + $0x84] sm:$0xf0]  ;;  %v3840_v18 = vor.u32 %v4274_v12, %v3839_v56  ;;  %v3820_v59 = vor.u32 %v4267_v53, %v3817_v54  ;;  %v3823_v4 = vld [vmem:[%s6515_s3 + $0x100] sm:$0xf]  ;;  %v4239_v53 = vld [vmem:[%s6515_s3 + $0x14] sm:$0xf] }
 0x10c   :  { %2440 = vmatpush.bf16.msra.mxu1 %v3808_v50  ;;  %v1803_v21 = vpop.f32.mrf.mxu3  ;;  %v1779_v39 = vpop.f32.mrf.mxu1  ;;  %v4251_v50 = vld [vmem:[%s6515_s3 + $0x74] sm:$0xf]  ;;  %v4270_v5 = vld [vmem:[%s6515_s3 + $0x104] sm:$0xf0]  ;;  %v3873_v26 = vld [vmem:[%s6515_s3 + $0x168] sm:$0xf0] }
 0x10d   :  { %v1791_v24 = vadd.f32 %v1790_v16, %v1778_v9  ;;  %v3756_v58 = vor.u32 %v4251_v50, %v3753_v51  ;;  %v3881_v9 = vld [vmem:[%s6515_s3 + $0x178] sm:$0xf0]  ;;  %v3804_v16 = vor.u32 %v4263_v10, %v3801_v11  ;;  %v4259_v39 = vld [vmem:[%s6515_s3 + $0xb4] sm:$0xf]  ;;  %v4277_v50 = vld [vmem:[%s6515_s3 + $0x144] sm:$0xf] }
 0x10e   :  { %v3857_v51 = vld [vmem:[%s6515_s3 + $0x148] sm:$0xf0]  ;;  %v3705_v54 = vld [vmem:[%s6515_s3 + $0x18] sm:$0xf0]  ;;  %v4255_v56 = vld [vmem:[%s6515_s3 + $0x94] sm:$0xf] }
 0x10f   :  { %2428 = vmatpush.bf16.msra.mxu0 %v3736_v55  ;;  %2453 = vmatpush.bf16.msra.mxu2 %v3872_v6  ;;  %v1804_v44 = vadd.f32 %v1803_v21, %v1791_v24  ;;  %v3696_v55 = vor.u32 %v4238_v28, %v3695_v40  ;;  %v4283_v6 = vld [vmem:[%s6515_s3 + $0x174] sm:$0xf]  ;;  %v3793_v21 = vld [vmem:[%s6515_s3 + $0xc8] sm:$0xf0]  ;;  %v4281_v24 = vld [vmem:[%s6515_s3 + $0x164] sm:$0xf] }
 0x110   :  { %2441 = vmatpush.bf16.msra.mxu1 %v3800_v57  ;;  %v3760_v57 = vor.u32 %v4254_v46, %v3759_v29  ;;  %v3884_v14 = vor.u32 %v4283_v6, %v3881_v9  ;;  %v3796_v30 = vor.u32 %v4261_v32, %v3793_v21  ;;  %v3876_v37 = vor.u32 %v4281_v24, %v3873_v26  ;;  %v4257_v28 = vld [vmem:[%s6515_s3 + $0xa4] sm:$0xf]  ;;  %v3777_v29 = vld [vmem:[%s6515_s3 + $0xa8] sm:$0xf0]  ;;  %v3769_v12 = vld [vmem:[%s6515_s3 + $0x98] sm:$0xf0] }
 0x111   :  { %v2025_v17 = vmax.f32 %v1804_v44, 0.0  ;;  %v4279_v44 = vld [vmem:[%s6515_s3 + $0x154] sm:$0xf]  ;;  %v3772_v0 = vor.u32 %v4255_v56, %v3769_v12  ;;  %v3825_v32 = vld [vmem:[%s6515_s3 + $0x108] sm:$0xf0] }
 0x112   :  { %v3935_v24 = vld [vmem:[%s6515_s3 + $0x1e0] sm:$0xf]  ;;  %v4298_v26 = vld [vmem:[%s6515_s3 + $0x1e4] sm:$0xf0] }
 0x113   :  { %2429 = vmatpush.bf16.msra.mxu0 %v3728_v60  ;;  %2454 = vmatpush.bf16.msra.mxu2 %v3864_v19  ;;  %v1792_v34 = vpop.f32.mrf.mxu2  ;;  %v4265_v60 = vld [vmem:[%s6515_s3 + $0xe4] sm:$0xf]  ;;  %v6227_v63 = vpack.c.bf16 %v2025_v17, %v2025_v17  ;;  %v3887_v12 = vld [vmem:[%s6515_s3 + $0x180] sm:$0xf] }
 0x114   :  { %2442 = vmatpush.bf16.msra.mxu1 %v3792_v2  ;;  %v1805_v52 = vpop.f32.mrf.mxu3  ;;  %v6235_v2 = vpack.c.bf16 %v2024_v22, %v2024_v22  ;;  %v3812_v8 = vor.u32 %v4265_v60, %v3809_v7  ;;  %v4245_v19 = vld [vmem:[%s6515_s3 + $0x44] sm:$0xf]  ;;  %v3841_v7 = vld [vmem:[%s6515_s3 + $0x128] sm:$0xf0] }
 0x115   :  { %v3780_v52 = vor.u32 %v4257_v28, %v3777_v29  ;;  %v4273_v60 = vld [vmem:[%s6515_s3 + $0x124] sm:$0xf] }
 0x117   :  { %2430 = vmatpush.bf16.msra.mxu0 %v3720_v38  ;;  %2455 = vmatpush.bf16.msra.mxu2 %v3856_v41  ;;  %v3737_v38 = vld [vmem:[%s6515_s3 + $0x58] sm:$0xf0] }
 0x118   :  { %2443 = vmatpush.bf16.msra.mxu1 %v3784_v13  ;;  %v3824_v13 = vor.u32 %v4270_v5, %v3823_v4  ;;  %v3740_v15 = vor.u32 %v4247_v31, %v3737_v38  ;;  %v3785_v41 = vld [vmem:[%s6515_s3 + $0xb8] sm:$0xf0]  ;;  %v4253_v4 = vld [vmem:[%s6515_s3 + $0x84] sm:$0xf]  ;;  %v3761_v5 = vld [vmem:[%s6515_s3 + $0x88] sm:$0xf0]  ;;  %v3844_v38 = vor.u32 %v4273_v60, %v3841_v7 }
 0x119   :  { %v3788_v27 = vor.u32 %v4259_v39, %v3785_v41  ;;  %v3919_v41 = vld [vmem:[%s6515_s3 + $0x1c0] sm:$0xf]  ;;  %v3937_v60 = vld [vmem:[%s6515_s3 + $0x1e8] sm:$0xf0] }
 0x11b   :  { %2431 = vmatpush.bf16.msra.mxu0 %v3712_v23  ;;  %2456 = vmatpush.bf16.msra.mxu2 %v3848_v49  ;;  %v3732_v23 = vor.u32 %v4245_v19, %v3729_v20  ;;  %v4269_v20 = vld [vmem:[%s6515_s3 + $0x104] sm:$0xf] }
 0x11c   :  { %2444 = vmatpush.bf16.msra.mxu1 %v3776_v35  ;;  %v3721_v35 = vld [vmem:[%s6515_s3 + $0x38] sm:$0xf0]  ;;  %v3828_v21 = vor.u32 %v4269_v20, %v3825_v32 }
 0x11d   :  { %v3724_v43 = vor.u32 %v4243_v33, %v3721_v35  ;;  %v4296_v35 = vld [vmem:[%s6515_s3 + $0x1d4] sm:$0xf0] }
 0x11f   :  { %2432 = vmatpush.bf16.msra.mxu0 %v3704_v45  ;;  %2457 = vmatpush.bf16.msra.mxu2 %v3840_v18  ;;  %v3865_v45 = vld [vmem:[%s6515_s3 + $0x158] sm:$0xf0]  ;;  %v3708_v18 = vor.u32 %v4239_v53, %v3705_v54  ;;  %v3895_v53 = vld [vmem:[%s6515_s3 + $0x190] sm:$0xf]  ;;  %v4288_v54 = vld [vmem:[%s6515_s3 + $0x194] sm:$0xf0] }
 0x120   :  { %2445 = vmatpush.bf16.msra.mxu1 %v3768_v48  ;;  %v3713_v48 = vld [vmem:[%s6515_s3 + $0x28] sm:$0xf0]  ;;  %v3868_v40 = vor.u32 %v4279_v44, %v3865_v45  ;;  %v3896_v56 = vor.u32 %v4288_v54, %v3895_v53 }
 0x121   :  { %v3716_v46 = vor.u32 %v4241_v47, %v3713_v48  ;;  %v3911_v48 = vld [vmem:[%s6515_s3 + $0x1b0] sm:$0xf] }
 0x123   :  { %2433 = vmatpush.bf16.msra.mxu0 %v3696_v55  ;;  %2458 = vmatpush.bf16.msra.mxu2 %v3832_v25  ;;  %v1816_v36 = vpop.f32.mrf.mxu0  ;;  %v3860_v55 = vor.u32 %v4277_v50, %v3857_v51  ;;  %v3943_v25 = vld [vmem:[%s6515_s3 + $0x1f0] sm:$0xf] }
 0x124   :  { %2446 = vmatpush.bf16.msra.mxu1 %v3760_v57  ;;  %v1829_v42 = vpop.f32.mrf.mxu1  ;;  %v4275_v57 = vld [vmem:[%s6515_s3 + $0x134] sm:$0xf] }
 0x126   :  { %2434 = vmatmul.bf16.vlgmr.msra.gmra.mxu0 %v6235_v2 }
 0x127   :  { %2478 = vmatpush.bf16.msrb.mxu0 %v3756_v58  ;;  %2447 = vmatmul.bf16.vlgmr.msra.gmra.mxu1 %v6227_v63  ;;  %v3849_v58 = vld [vmem:[%s6515_s3 + $0x138] sm:$0xf0] }
 0x128   :  { %2491 = vmatpush.bf16.msrb.mxu1 %v3820_v59  ;;  %2459 = vmatpush.bf16.msra.mxu2 %v3824_v13  ;;  %v6338_v59 = vld [vmem:[%s6514_s2] sm:$0xf]  ;;  %v3852_v62 = vor.u32 %v4275_v57, %v3849_v58  ;;  %v4271_v13 = vld [vmem:[%s6515_s3 + $0x114] sm:$0xf]  ;;  %v3945_v58 = vld [vmem:[%s6515_s3 + $0x1f8] sm:$0xf0] }
 0x129   :  { %v295_v61 = vperm.slane %v6338_v59, 2  ;;  %v4299_v57 = vld [vmem:[%s6515_s3 + $0x1f4] sm:$0xf] }
 0x12b   :  { %2479 = vmatpush.bf16.msrb.mxu0 %v3748_v3  ;;  %v1842_v34 = vpop.f32.mrf.mxu2  ;;  %v1818_v17 = vpop.f32.mrf.mxu0  ;;  %v3697_v3 = vld [vmem:[%s6515_s3 + $0x8] sm:$0xf0]  ;;  %v1817_v10 = vadd.f32 %v1816_v36, %v295_v61  ;;  %v3948_v61 = vor.u32 %v4299_v57, %v3945_v58 }
 0x12c   :  { %2492 = vmatpush.bf16.msrb.mxu1 %v3812_v8  ;;  %2504 = vmatpush.bf16.msrb.mxu2 %v3884_v14  ;;  %v1855_v49 = vpop.f32.mrf.mxu3  ;;  %v1831_v22 = vpop.f32.mrf.mxu1  ;;  %v4300_v8 = vld [vmem:[%s6515_s3 + $0x1f4] sm:$0xf0]  ;;  %v3700_v11 = vor.u32 %v4237_v1, %v3697_v3  ;;  %v3833_v14 = vld [vmem:[%s6515_s3 + $0x118] sm:$0xf0]  ;;  %v4295_v3 = vld [vmem:[%s6515_s3 + $0x1d4] sm:$0xf] }
 0x12d   :  { %v3944_v9 = vor.u32 %v4300_v8, %v3943_v25  ;;  %v1830_v19 = vadd.f32 %v1829_v42, %v1817_v10  ;;  %v4294_v42 = vld [vmem:[%s6515_s3 + $0x1c4] sm:$0xf0]  ;;  %v3929_v25 = vld [vmem:[%s6515_s3 + $0x1d8] sm:$0xf0]  ;;  %v3921_v8 = vld [vmem:[%s6515_s3 + $0x1c8] sm:$0xf0] }
 0x12e   :  { %v3920_v44 = vor.u32 %v4294_v42, %v3919_v41  ;;  %v4286_v22 = vld [vmem:[%s6515_s3 + $0x184] sm:$0xf0] }
 0x12f   :  { %2480 = vmatpush.bf16.msrb.mxu0 %v3740_v15  ;;  %v3764_v15 = vor.u32 %v4253_v4, %v3761_v5  ;;  %2465 = vmatpush.bf16.msra.mxu3 %v3944_v9  ;;  %v3932_v4 = vor.u32 %v4295_v3, %v3929_v25  ;;  %v4305_v3 = vld [vmem:[%s6517_s5 + $0x20] sm:$0xff]  ;;  %v4304_v25 = vld [vmem:[%s6517_s5 + $0x18] sm:$0xff] }
 0x130   :  { %2493 = vmatpush.bf16.msrb.mxu1 %v3804_v16  ;;  %2505 = vmatpush.bf16.msrb.mxu2 %v3876_v37  ;;  %v3836_v16 = vor.u32 %v4271_v13, %v3833_v14  ;;  %v3913_v13 = vld [vmem:[%s6515_s3 + $0x1b8] sm:$0xf0] }
 0x133   :  { %2481 = vmatpush.bf16.msrb.mxu0 %v3732_v23  ;;  %v1844_v6 = vpop.f32.mrf.mxu2  ;;  %v1843_v23 = vadd.f32 %v1842_v34, %v1830_v19  ;;  %v3905_v19 = vld [vmem:[%s6515_s3 + $0x1a8] sm:$0xf0] }
 0x134   :  { %2494 = vmatpush.bf16.msrb.mxu1 %v3796_v30  ;;  %2506 = vmatpush.bf16.msrb.mxu2 %v3868_v40  ;;  %v1857_v31 = vpop.f32.mrf.mxu3  ;;  %v3927_v30 = vld [vmem:[%s6515_s3 + $0x1d0] sm:$0xf]  ;;  %v4292_v40 = vld [vmem:[%s6515_s3 + $0x1b4] sm:$0xf0]  ;;  %v4293_v6 = vld [vmem:[%s6515_s3 + $0x1c4] sm:$0xf] }
 0x135   :  { %v1856_v33 = vadd.f32 %v1855_v49, %v1843_v23  ;;  %v3912_v28 = vor.u32 %v4292_v40, %v3911_v48  ;;  %v3903_v49 = vld [vmem:[%s6515_s3 + $0x1a0] sm:$0xf]  ;;  %v3897_v23 = vld [vmem:[%s6515_s3 + $0x198] sm:$0xf0] }
 0x137   :  { %2482 = vmatpush.bf16.msrb.mxu0 %v3724_v43 }
 0x138   :  { %2495 = vmatpush.bf16.msrb.mxu1 %v3788_v27  ;;  %2507 = vmatpush.bf16.msrb.mxu2 %v3860_v55 }
 0x13b   :  { %2483 = vmatpush.bf16.msrb.mxu0 %v3716_v46  ;;  %v4290_v46 = vld [vmem:[%s6515_s3 + $0x1a4] sm:$0xf0] }
 0x13c   :  { %2496 = vmatpush.bf16.msrb.mxu1 %v3780_v52  ;;  %2508 = vmatpush.bf16.msrb.mxu2 %v3852_v62  ;;  %v3904_v52 = vor.u32 %v4290_v46, %v3903_v49  ;;  %v4297_v62 = vld [vmem:[%s6515_s3 + $0x1e4] sm:$0xf] }
 0x13d   :  { %v3940_v7 = vor.u32 %v4297_v62, %v3937_v60 }
 0x13f   :  { %2484 = vmatpush.bf16.msrb.mxu0 %v3708_v18  ;;  %v3888_v18 = vor.u32 %v4286_v22, %v3887_v12 }
 0x140   :  { %2497 = vmatpush.bf16.msrb.mxu1 %v3772_v0  ;;  %2509 = vmatpush.bf16.msrb.mxu2 %v3844_v38  ;;  %v3924_v38 = vor.u32 %v4293_v6, %v3921_v8 }
 0x143   :  { %2485 = vmatpush.bf16.msrb.mxu0 %v3700_v11  ;;  %v1868_v36 = vpop.f32.mrf.mxu0  ;;  %v4291_v11 = vld [vmem:[%s6515_s3 + $0x1b4] sm:$0xf] }
 0x144   :  { %2498 = vmatpush.bf16.msrb.mxu1 %v3764_v15  ;;  %2510 = vmatpush.bf16.msrb.mxu2 %v3836_v16  ;;  %v1869_v37 = vadd.f32 %v1868_v36, %v1856_v33  ;;  %v1881_v39 = vpop.f32.mrf.mxu1  ;;  %v3916_v14 = vor.u32 %v4291_v11, %v3913_v13  ;;  %v296_v15 = vperm.slane %v6338_v59, 3  ;;  %v4289_v16 = vld [vmem:[%s6515_s3 + $0x1a4] sm:$0xf]  ;;  %v3889_v33 = vld [vmem:[%s6515_s3 + $0x188] sm:$0xf0] }
 0x145   :  { %v3908_v32 = vor.u32 %v4289_v16, %v3905_v19 }
 0x146   :  { %2486 = vmatmul.bf16.vlgmr.msrb.gmra.mxu0 %v6235_v2  ;;  %v3936_v2 = vor.u32 %v4298_v26, %v3935_v24  ;;  %v1882_v43 = vadd.f32 %v1881_v39, %v1869_v37 }
 0x147   :  { %2499 = vmatmul.bf16.vlgmr.msrb.gmra.mxu1 %v6227_v63  ;;  %v3928_v63 = vor.u32 %v4296_v35, %v3927_v30  ;;  %v4285_v30 = vld [vmem:[%s6515_s3 + $0x184] sm:$0xf] }
 0x148   :  { %2511 = vmatpush.bf16.msrb.mxu2 %v3828_v21  ;;  %2466 = vmatpush.bf16.msra.mxu3 %v3936_v2  ;;  %v4287_v21 = vld [vmem:[%s6515_s3 + $0x194] sm:$0xf]  ;;  %v3892_v35 = vor.u32 %v4285_v30, %v3889_v33 }
 0x149   :  { %v3900_v26 = vor.u32 %v4287_v21, %v3897_v23 }
 0x14b   :  { %v1894_v45 = vpop.f32.mrf.mxu2  ;;  %v1870_v34 = vpop.f32.mrf.mxu0 }
 0x14c   :  { %2467 = vmatpush.bf16.msra.mxu3 %v3928_v63  ;;  %v1895_v27 = vadd.f32 %v1894_v45, %v1882_v43  ;;  %v1907_v47 = vpop.f32.mrf.mxu3  ;;  %v1883_v50 = vpop.f32.mrf.mxu1  ;;  %v2100_v34 = vld [vmem:[%s6516_s4] sm:$0x3] }
 0x14d   :  { %v2102_v49 = vperm.slane %v2100_v34, 0 }
 0x14e   :  { %v1908_v29 = vadd.f32 %v1907_v47, %v1895_v27 }
 0x150   :  { %2468 = vmatpush.bf16.msra.mxu3 %v3920_v44  ;;  %v2034_v51 = vpack.c.bf16 %v1908_v29, %v1908_v29 }
 0x152   :  { %2460 = vmatmul.bf16.vlgmr.msra.gmra.mxu2 %v2034_v51 }
 0x153   :  { %v1896_v17 = vpop.f32.mrf.mxu2 }
 0x154   :  { %2469 = vmatpush.bf16.msra.mxu3 %v3912_v28  ;;  %v1909_v55 = vpop.f32.mrf.mxu3  ;;  %v2103_v17 = vperm.slane %v2100_v34, 1 }
 0x158   :  { %2470 = vmatpush.bf16.msra.mxu3 %v3904_v52 }
 0x15c   :  { %2471 = vmatpush.bf16.msra.mxu3 %v3896_v56 }
 0x160   :  { %2472 = vmatpush.bf16.msra.mxu3 %v3888_v18 }
 0x162   :  { %2512 = vmatmul.bf16.vlgmr.msrb.gmra.mxu2 %v2034_v51 }
 0x163   :  { %v1920_v0 = vpop.f32.mrf.mxu0 }
 0x164   :  { %2517 = vmatpush.bf16.msrb.mxu3 %v3948_v61  ;;  %v1933_v1 = vpop.f32.mrf.mxu1  ;;  %v1921_v24 = vadd.f32 %v1920_v0, %v296_v15  ;;  %v4307_v0 = vld [vmem:[%s6517_s5 + $0x30] sm:$0xff] }
 0x166   :  { %v1934_v2 = vadd.f32 %v1933_v1, %v1921_v24  ;;  %v4306_v1 = vld [vmem:[%s6517_s5 + $0x28] sm:$0xff]  ;;  %v4312_v24 = vld [vmem:[%s6518_s6] ss:$0 sm:$0xff] }
 0x168   :  { %2518 = vmatpush.bf16.msrb.mxu3 %v3940_v7  ;;  %v4308_v7 = vld [vmem:[%s6517_s5 + $0x38] sm:$0xff] }
 0x169   :  { %2606 = vmatpush.bf16.msra.mxu0 %v4308_v7 }
 0x16b   :  { %v1946_v5 = vpop.f32.mrf.mxu2  ;;  %v1922_v9 = vpop.f32.mrf.mxu0 }
 0x16c   :  { %2519 = vmatpush.bf16.msrb.mxu3 %v3932_v4  ;;  %v1959_v31 = vpop.f32.mrf.mxu3  ;;  %v1935_v10 = vpop.f32.mrf.mxu1  ;;  %v1947_v63 = vadd.f32 %v1946_v5, %v1934_v2  ;;  %v4303_v4 = vld [vmem:[%s6517_s5 + $0x10] sm:$0xff]  ;;  %v4302_v5 = vld [vmem:[%s6517_s5 + $0x8] sm:$0xff] }
 0x16d   :  { %2607 = vmatpush.bf16.msra.mxu0 %v4307_v0 }
 0x16e   :  { %v1960_v36 = vadd.f32 %v1959_v31, %v1947_v63  ;;  %v4301_v31 = vld [vmem:[%s6517_s5] sm:$0xff] }
 0x170   :  { %2520 = vmatpush.bf16.msrb.mxu3 %v3924_v38 }
 0x171   :  { %2608 = vmatpush.bf16.msra.mxu0 %v4306_v1 }
 0x173   :  { %v1948_v20 = vpop.f32.mrf.mxu2 }
 0x174   :  { %2521 = vmatpush.bf16.msrb.mxu3 %v3916_v14  ;;  %v1961_v59 = vpop.f32.mrf.mxu3  ;;  %v2534_v20 = vld [vmem:[%s6519_s7] sm:$0x3]  ;;  %s4401_s7 = smov [#allocation2]  }
 0x175   :  { %2609 = vmatpush.bf16.msra.mxu0 %v4305_v3  ;;  %s2627_s4 = sshll.u32 %s4401_s7, 4  ;;  %s2628_s4 = int_to_ptr.vmem [resolvable:$true] %s2627_s4 }
 0x178   :  { %2522 = vmatpush.bf16.msrb.mxu3 %v3908_v32 }
 0x179   :  { %2610 = vmatpush.bf16.msra.mxu0 %v4304_v25 }
 0x17c   :  { %2523 = vmatpush.bf16.msrb.mxu3 %v3900_v26 }
 0x17d   :  { %2611 = vmatpush.bf16.msra.mxu0 %v4303_v4 }
 0x180   :  { %2524 = vmatpush.bf16.msrb.mxu3 %v3892_v35 }
 0x181   :  { %2612 = vmatpush.bf16.msra.mxu0 %v4302_v5 }
 0x183   :  { %v1972_v37 = vpop.f32.mrf.mxu0 }
 0x184   :  { %v1985_v39 = vpop.f32.mrf.mxu1  ;;  %v1973_v41 = vadd.f32 %v1972_v37, %v1960_v36 }
 0x185   :  { %2613 = vmatpush.bf16.msra.mxu0 %v4301_v31 }
 0x186   :  { %v1986_v42 = vadd.f32 %v1985_v39, %v1973_v41 }
 0x18b   :  { %v1998_v43 = vpop.f32.mrf.mxu2  ;;  %v1974_v27 = vpop.f32.mrf.mxu0 }
 0x18c   :  { %v1999_v44 = vadd.f32 %v1998_v43, %v1986_v42  ;;  %v2011_v45 = vpop.f32.mrf.mxu3  ;;  %v1987_v47 = vpop.f32.mrf.mxu1 }
 0x18e   :  { %v2012_v48 = vadd.f32 %v2011_v45, %v1999_v44 }
 0x190   :  { %v2035_v40 = vpack.c.bf16 %v2012_v48, %v2012_v48 }
 0x192   :  { %2473 = vmatmul.bf16.vlgmr.msra.gmra.mxu3 %v2035_v40 }
 0x193   :  { %v2000_v28 = vpop.f32.mrf.mxu2 }
 0x194   :  { %v2013_v29 = vpop.f32.mrf.mxu3 }
 0x1a2   :  { %2525 = vmatmul.bf16.vlgmr.msrb.gmra.mxu3 %v2035_v40 }
 0x1a3   :  { %v2435_v46 = vpop.f32.mrf.mxu0 }
 0x1a4   :  { %v2436_v50 = vadd.f32 %v2435_v46, %v2102_v49  ;;  %v2448_v51 = vpop.f32.mrf.mxu1 }
 0x1a6   :  { %v2449_v52 = vadd.f32 %v2448_v51, %v2436_v50 }
 0x1ab   :  { %v2437_v53 = vpop.f32.mrf.mxu0 }
 0x1ac   :  { %v2450_v54 = vpop.f32.mrf.mxu1 }
 0x1c3   :  { %v2487_v55 = vpop.f32.mrf.mxu0 }
 0x1c4   :  { %v2488_v56 = vadd.f32 %v2487_v55, %v2103_v17  ;;  %v2500_v12 = vpop.f32.mrf.mxu1 }
 0x1c6   :  { %v2501_v22 = vadd.f32 %v2500_v12, %v2488_v56 }
 0x1cb   :  { %v2489_v57 = vpop.f32.mrf.mxu0 }
 0x1cc   :  { %v2502_v58 = vpop.f32.mrf.mxu1 }
 0x1d5   :  { %v2461_v18 = vpop.f32.mrf.mxu2 }
 0x1d6   :  { %v2462_v6 = vadd.f32 %v2461_v18, %v2449_v52 }
 0x1dd   :  { %v2463_v61 = vpop.f32.mrf.mxu2 }
 0x1e5   :  { %v2513_v62 = vpop.f32.mrf.mxu2 }
 0x1e6   :  { %v2514_v10 = vadd.f32 %v2513_v62, %v2501_v22 }
 0x1ed   :  { %v2515_v60 = vpop.f32.mrf.mxu2 }
 0x215   :  { %v2474_v8 = vpop.f32.mrf.mxu3 }
 0x216   :  { %v2475_v38 = vadd.f32 %v2474_v8, %v2462_v6 }
 0x218   :  { %2619 = vst [vmem:[#allocation2] sm:$0x3] %v2475_v38 }
 0x219   :  { %2632 = dma.vmem_to_hbm [thread:$0]  %s2628_s4, 32, %s2630_s11, [#allocation3]  }
 0x21d   :  { %v2476_v9 = vpop.f32.mrf.mxu3 }
 0x225   :  { %v2526_v11 = vpop.f32.mrf.mxu3 }
 0x226   :  { %v2527_v13 = vadd.f32 %v2526_v11, %v2514_v10 }
 0x228   :  { %v2530_v14 = vmax.f32 %v2527_v13, 0.0 }
 0x22a   :  { %v2531_v15 = vmul.f32 0.5, %v2530_v14 }
 0x22c   :  { %v2532_v16 = vmul.f32 1.442695, %v2531_v15 }
 0x22d   :  { %v2528_v19 = vpop.f32.mrf.mxu3 }
 0x22e   :  { %4313 = vpow2.f32 %v2532_v16 }
 0x234   :  { %v4314_v32 = vpop.eup %4313 }
 0x235   :  { %v2535_v21 = vmul.f32 %v4314_v32, %v2534_v20  ;;  %2620 = vst [vmem:[#allocation4] sm:$0x3] %v4314_v32 }
 0x236   :  { %2643 = dma.vmem_to_hbm [thread:$0]  %s2639_s29, 32, %s2641_s1, [#allocation5]  }
 0x237   :  { %v2536_v23 = vadd.f32 %v2535_v21, %v2475_v38 }
 0x239   :  { %v2537_v59 = vpack.c.bf16 %v2536_v23, %v2536_v23 }
 0x23b   :  { %2614 = vmatmul.bf16.vlgmr.msra.gmra.mxu0 %v2537_v59 }
 0x2b8   :  { %v2615_v26 = vpop.f32.mrf.mxu0 }
 0x2b9   :  { %v2616_v30 = vadd.f32 %v4312_v24, %v2615_v26 }
 0x2bb   :  { %2621 = vst [vmem:[#allocation6] sm:$0x3] %v2616_v30 }
 0x2bc   :  { %2654 = dma.vmem_to_hbm [thread:$0]  %s2650_s9, 32, %s2652_s17, [#allocation5]  }
 0x2c0   :  { %v2617_v33 = vpop.f32.mrf.mxu0 }
 0x2c1   :  { %4396 = dma.done.wait [#allocation3], 32  }
 0x2c2   :  { %4397 = vsyncadd [#allocation3], 4294967264 }
 0x2c3   :  { %4398 = dma.done.wait [#allocation5], 64  }
 0x2c4   :  { %4399 = vsyncadd [#allocation5], 4294967232 }
 0x2c5   :  { %2667 = vsyncpa [#allocation3], 1 }
 0x2c6   :  { %2668 = vsyncpa [#allocation5], 1 }

</bundles_post_ra>
